<compile_context>
chip_gen: v7x
topology: tpu7x:2x2x1
jax: 0.10.0
libtpu: 0.0.40
codegen_flags: <defaults>
</compile_context>

<pallas_src>
import functools

import jax
import jax.numpy as jnp
import numpy as np
from jax.experimental import pallas as pl
from jax.experimental.pallas import tpu as pltpu

LEAKY_SLOPE = 0.2
BN_EPS = 1e-5
# bf16 MXU inputs, f32 accumulation. Set to jnp.float32 for bit-tight BN stats
# (then the test tolerance below can drop to ~2e-4).
MXU_INPUT_DTYPE = jnp.bfloat16


# ------------------------------ Pallas kernel ------------------------------ #

def _fused_generator_block_kernel(x_ref, prev_ref, mask_ref, *refs,
                                  num_layers, K, H, W, pad, layer_cfg):
    """Whole GeneratorBlock in one grid-less Pallas invocation.

    x_ref    : (N, Cin0, H*W)    NCHW-flattened input
    prev_ref : (N, Cout, H*W)    residual input
    mask_ref : (K*K, 1, N*H*W)   per-tap 0/1 boundary masks (zero padding)
    refs     : w_0..w_{L-1}      (K*K, Cout_l, Cin_l) per-tap transposed weights
               b_0..b_{L-1}      (Cout_l, 1) conv biases
               o_ref             (N, Cout, H*W) output
    """
    w_refs = refs[:num_layers]
    b_refs = refs[num_layers:2 * num_layers]
    o_ref = refs[2 * num_layers]

    N = x_ref.shape[0]
    HW = H * W
    rows = N * HW

    # Channel-major head input (Cin0, rows). Each per-image piece lands at a
    # 128-aligned lane offset (HW is a multiple of 128), so this is cheap.
    if N == 1:
        cur = x_ref[0]
    else:
        cur = jnp.concatenate([x_ref[n] for n in range(N)], axis=1)

    for li in range(num_layers):
        use_bn, act = layer_cfg[li]
        cout = w_refs[li].shape[1]

        acc = jnp.zeros((cout, rows), jnp.float32)
        for tap in range(K * K):
            dy, dx = tap // K - pad, tap % K - pad
            delta = dy * W + dx
            # shifted[:, idx] = cur[:, idx + delta]  (lane rotate on the XLU)
            shifted = cur if delta == 0 else pltpu.roll(
                cur, shift=(-delta) % rows, axis=1)
            if dy != 0 or dx != 0:
                # zero the pixels whose (y+dy, x+dx) falls outside the image
                shifted = shifted * mask_ref[tap]
            acc = acc + jnp.dot(
                w_refs[li][tap].astype(MXU_INPUT_DTYPE),
                shifted.astype(MXU_INPUT_DTYPE),
                preferred_element_type=jnp.float32)
        acc = acc + b_refs[li][...]

        if use_bn:
            # Freshly-initialized nn.BatchNorm2d in train mode: biased batch
            # stats over (N, H, W) == the lane axis, gamma=1, beta=0.
            mean = jnp.mean(acc, axis=1, keepdims=True)
            cen = acc - mean
            var = jnp.mean(cen * cen, axis=1, keepdims=True)
            acc = cen * jax.lax.rsqrt(var + BN_EPS)

        if act == "leaky_relu":
            acc = jnp.where(acc >= 0, acc, LEAKY_SLOPE * acc)
        elif act == "tanh":
            acc = jnp.tanh(acc)

        if li < num_layers - 1:
            cur = acc
        else:
            # Tail + residual: lane slices are HW-aligned (multiple of 128),
            # so the HBM stores are unmasked and lane-dense.
            for n in range(N):
                o_ref[n] = (acc[:, n * HW:(n + 1) * HW]
                            + prev_ref[n].astype(jnp.float32)
                            ).astype(o_ref.dtype)


# ------------------------------ JAX wrapper -------------------------------- #

def _full_spec(shape):
    ndim = len(shape)
    return pl.BlockSpec(shape, lambda *_: (0,) * ndim)


def _make_tap_masks(N, H, W, K, pad):
    """Static 0/1 masks: mask[tap, 0, idx] = 1 iff (y+dy, x+dx) is in-bounds."""
    rows = N * H * W
    idx = np.arange(rows)
    xcol = idx % W
    yrow = (idx // W) % H
    masks = np.zeros((K * K, 1, rows), np.float32)
    for tap in range(K * K):
        dy, dx = tap // K - pad, tap % K - pad
        valid = np.ones(rows, bool)
        if dx > 0:
            valid &= xcol < W - dx
        elif dx < 0:
            valid &= xcol >= -dx
        if dy > 0:
            valid &= yrow < H - dy
        elif dy < 0:
            valid &= yrow >= -dy
        masks[tap, 0] = valid.astype(np.float32)
    return jnp.asarray(masks)


def generator_block_forward(params, x_nchw, prev_nchw, *, kernel_size, padding):
    """Matches GeneratorBlock.forward (allow_no_residual=False, stride=1)."""
    N, cin0, H, W = x_nchw.shape
    K = kernel_size
    assert padding == (K - 1) // 2, "fused kernel assumes 'same' spatial size"
    num_layers = len(params)
    cout_final = params[-1]["w"].shape[-1]
    assert prev_nchw.shape == (N, cout_final, H, W)
    # Channel-chaining sanity check: layer l's Cin must equal layer l-1's Cout.
    assert params[0]["w"].shape[2] == cin0
    for l in range(1, num_layers):
        assert params[l]["w"].shape[2] == params[l - 1]["w"].shape[3], \
            "layer channel chaining broken"

    HW = H * W
    x_flat = x_nchw.reshape(N, cin0, HW)               # free reshape
    prev_flat = prev_nchw.reshape(N, cout_final, HW)   # free reshape
    masks = _make_tap_masks(N, H, W, K, padding)

    # Per-tap, transposed weights: (K*K, Cout, Cin), so the in-kernel GEMM
    # directly emits channel-major (Cout, rows) activations.
    w_taps = [jnp.transpose(l["w"].reshape(K * K, l["w"].shape[2],
                                           l["w"].shape[3]), (0, 2, 1))
              for l in params]
    biases = [l["b"].reshape(-1, 1) for l in params]
    layer_cfg = tuple((bool(l["use_bn"]), l["act"]) for l in params)

    kern = functools.partial(
        _fused_generator_block_kernel, num_layers=num_layers, K=K, H=H, W=W,
        pad=padding, layer_cfg=layer_cfg)

    in_specs = ([_full_spec(x_flat.shape), _full_spec(prev_flat.shape),
                 _full_spec(masks.shape)]
                + [_full_spec(tuple(w.shape)) for w in w_taps]
                + [_full_spec(tuple(b.shape)) for b in biases])

    out_flat = pl.pallas_call(
        kern,
        out_shape=jax.ShapeDtypeStruct((N, cout_final, HW), jnp.float32),
        in_specs=in_specs,
        out_specs=_full_spec((N, cout_final, HW)),
        compiler_params=pltpu.CompilerParams(vmem_limit_bytes=64 * 1024 * 1024),
    )(x_flat, prev_flat, masks, *w_taps, *biases)

    return out_flat.reshape(N, cout_final, H, W)       # free reshape (NCHW)


# --------------------------- GeneratorBlock params -------------------------- #

def make_generator_block_params(key, in_channels, out_channels, kernel_size,
                                num_layers, base_channels, min_feat_channels):
    """normal_init(conv, 0, 0.02): weight ~ N(0, 0.02), bias = 0.  BN: gamma=1, beta=0."""
    params = []
    cin = in_channels
    cout = base_channels
    # head
    key, k = jax.random.split(key)
    params.append(dict(
        w=0.02 * jax.random.normal(k, (kernel_size, kernel_size, cin, cout), jnp.float32),
        b=jnp.zeros((cout,), jnp.float32), use_bn=True, act="leaky_relu"))
    # body
    feat_channels_ = base_channels
    for i in range(num_layers - 2):
        feat_channels_ = int(base_channels / pow(2, i + 1))
        cin = max(2 * feat_channels_, min_feat_channels)
        cout = max(feat_channels_, min_feat_channels)
        key, k = jax.random.split(key)
        params.append(dict(
            w=0.02 * jax.random.normal(k, (kernel_size, kernel_size, cin, cout), jnp.float32),
            b=jnp.zeros((cout,), jnp.float32), use_bn=True, act="leaky_relu"))
    # tail (no norm, Tanh)
    cin = max(feat_channels_, min_feat_channels)
    key, k = jax.random.split(key)
    params.append(dict(
        w=0.02 * jax.random.normal(k, (kernel_size, kernel_size, cin, out_channels), jnp.float32),
        b=jnp.zeros((out_channels,), jnp.float32), use_bn=False, act="tanh"))
    return params


# ------------------------------- pure-JAX ref -------------------------------- #

def _ref_forward(params, x_nchw, prev_nchw, *, padding):
    x = jnp.transpose(x_nchw, (0, 2, 3, 1))
    prev = jnp.transpose(prev_nchw, (0, 2, 3, 1))
    for layer in params:
        y = jax.lax.conv_general_dilated(
            x, layer["w"], window_strides=(1, 1),
            padding=[(padding, padding), (padding, padding)],
            dimension_numbers=("NHWC", "HWIO", "NHWC"),
            precision=jax.lax.Precision.HIGHEST) + layer["b"]
        if layer["use_bn"]:
            mean = jnp.mean(y, axis=(0, 1, 2), keepdims=True)
            var = jnp.mean((y - mean) ** 2, axis=(0, 1, 2), keepdims=True)
            y = (y - mean) / jnp.sqrt(var + BN_EPS)
        if layer["act"] == "leaky_relu":
            y = jnp.where(y >= 0, y, LEAKY_SLOPE * y)
        else:
            y = jnp.tanh(y)
        x = y
    x = x + prev
    return jnp.transpose(x, (0, 3, 1, 2))


# ----------------------------------- main ------------------------------------ #

if __name__ == "__main__":
    # SinGAN-default block config, but padding=1 so spatial size is preserved
    # and the residual add against `prev` is well defined at small shapes.
    in_channels, out_channels = 3, 3
    kernel_size, padding = 3, 1
    num_layers, base_channels, min_feat_channels = 5, 32, 32
    N, H, W = 2, 16, 16

    key = jax.random.PRNGKey(0)
    kp, kx, kprev = jax.random.split(key, 3)
    params = make_generator_block_params(kp, in_channels, out_channels,
                                         kernel_size, num_layers,
                                         base_channels, min_feat_channels)

    x = jax.random.normal(kx, (N, in_channels, H, W), jnp.float32)
    prev = jax.random.normal(kprev, (N, out_channels, H, W), jnp.float32)

    out = generator_block_forward(params, x, prev,
                                  kernel_size=kernel_size, padding=padding)
    out = jax.block_until_ready(out)

    ref = jax.block_until_ready(_ref_forward(params, x, prev, padding=padding))
    # bf16 MXU inputs (f32 accumulation) slightly perturb the BatchNorm batch
    # statistics, so the tolerance is looser than a pure-f32 run would need.
    np.testing.assert_allclose(np.asarray(out), np.asarray(ref),
                               rtol=2e-2, atol=5e-2)

    assert out.shape == (N, out_channels, H, W)
    print("KERNEL_OK")
</pallas_src>

<mosaic_0001>
module attributes {stable_mosaic.version = 11 : i64} {
  func.func @_fused_generator_block_kernel(%arg0: memref<2x3x256xf32, #tpu.memory_space<vmem>>, %arg1: memref<2x3x256xf32, #tpu.memory_space<vmem>>, %arg2: memref<9x1x512xf32, #tpu.memory_space<vmem>>, %arg3: memref<9x32x3xf32, #tpu.memory_space<vmem>>, %arg4: memref<9x32x32xf32, #tpu.memory_space<vmem>>, %arg5: memref<9x32x32xf32, #tpu.memory_space<vmem>>, %arg6: memref<9x32x32xf32, #tpu.memory_space<vmem>>, %arg7: memref<9x3x32xf32, #tpu.memory_space<vmem>>, %arg8: memref<32x1xf32, #tpu.memory_space<vmem>>, %arg9: memref<32x1xf32, #tpu.memory_space<vmem>>, %arg10: memref<32x1xf32, #tpu.memory_space<vmem>>, %arg11: memref<32x1xf32, #tpu.memory_space<vmem>>, %arg12: memref<3x1xf32, #tpu.memory_space<vmem>>, %arg13: memref<2x3x256xf32, #tpu.memory_space<vmem>>) attributes {dimension_semantics = [], scalar_prefetch = 0 : i64, scratch_operands = 0 : i64, tpu.core_type = #tpu.core_type<tc>} {
    %c0 = arith.constant 0 : index
    %c0_0 = arith.constant 0 : index
    %c0_1 = arith.constant 0 : index
    %0 = vector.load %arg0[%c0, %c0_0, %c0_1] : memref<2x3x256xf32, #tpu.memory_space<vmem>>, vector<1x3x256xf32>
    %1 = vector.shape_cast %0 : vector<1x3x256xf32> to vector<3x256xf32>
    %c1 = arith.constant 1 : index
    %c0_2 = arith.constant 0 : index
    %c0_3 = arith.constant 0 : index
    %2 = vector.load %arg0[%c1, %c0_2, %c0_3] : memref<2x3x256xf32, #tpu.memory_space<vmem>>, vector<1x3x256xf32>
    %3 = vector.shape_cast %2 : vector<1x3x256xf32> to vector<3x256xf32>
    %4 = tpu.concatenate %1, %3 in 1 : vector<3x256xf32>, vector<3x256xf32> -> vector<3x512xf32>
    %cst = arith.constant 0.000000e+00 : f32
    %5 = vector.broadcast %cst : f32 to vector<32x512xf32>
    %c17_i32 = arith.constant 17 : i32
    %6 = tpu.dynamic_rotate %4 by %c17_i32 dim 1 : vector<3x512xf32>, i32 -> vector<3x512xf32>
    %c0_4 = arith.constant 0 : index
    %c0_5 = arith.constant 0 : index
    %c0_6 = arith.constant 0 : index
    %7 = vector.load %arg2[%c0_4, %c0_5, %c0_6] : memref<9x1x512xf32, #tpu.memory_space<vmem>>, vector<1x1x512xf32>
    %8 = vector.shape_cast %7 : vector<1x1x512xf32> to vector<1x512xf32>
    %9 = vector.broadcast %8 : vector<1x512xf32> to vector<3x512xf32>
    %10 = arith.mulf %6, %9 : vector<3x512xf32>
    %c0_7 = arith.constant 0 : index
    %c0_8 = arith.constant 0 : index
    %c0_9 = arith.constant 0 : index
    %11 = vector.load %arg3[%c0_7, %c0_8, %c0_9] : memref<9x32x3xf32, #tpu.memory_space<vmem>>, vector<1x32x3xf32>
    %12 = vector.shape_cast %11 : vector<1x32x3xf32> to vector<32x3xf32>
    %13 = arith.truncf %12 : vector<32x3xf32> to vector<32x3xbf16>
    %14 = arith.truncf %10 : vector<3x512xf32> to vector<3x512xbf16>
    %cst_10 = arith.constant dense<0.000000e+00> : vector<32x512xf32>
    %15 = tpu.matmul %13, %14, %cst_10 {dimension_numbers = #tpu.dot_dimension_numbers<[1], [0], [0], [1], [0, 0, 1, 1], [], []>} : vector<32x3xbf16>, vector<3x512xbf16>, vector<32x512xf32> -> vector<32x512xf32>
    %16 = arith.addf %5, %15 : vector<32x512xf32>
    %c16_i32 = arith.constant 16 : i32
    %17 = tpu.dynamic_rotate %4 by %c16_i32 dim 1 : vector<3x512xf32>, i32 -> vector<3x512xf32>
    %c1_11 = arith.constant 1 : index
    %c0_12 = arith.constant 0 : index
    %c0_13 = arith.constant 0 : index
    %18 = vector.load %arg2[%c1_11, %c0_12, %c0_13] : memref<9x1x512xf32, #tpu.memory_space<vmem>>, vector<1x1x512xf32>
    %19 = vector.shape_cast %18 : vector<1x1x512xf32> to vector<1x512xf32>
    %20 = vector.broadcast %19 : vector<1x512xf32> to vector<3x512xf32>
    %21 = arith.mulf %17, %20 : vector<3x512xf32>
    %c1_14 = arith.constant 1 : index
    %c0_15 = arith.constant 0 : index
    %c0_16 = arith.constant 0 : index
    %22 = vector.load %arg3[%c1_14, %c0_15, %c0_16] : memref<9x32x3xf32, #tpu.memory_space<vmem>>, vector<1x32x3xf32>
    %23 = vector.shape_cast %22 : vector<1x32x3xf32> to vector<32x3xf32>
    %24 = arith.truncf %23 : vector<32x3xf32> to vector<32x3xbf16>
    %25 = arith.truncf %21 : vector<3x512xf32> to vector<3x512xbf16>
    %cst_17 = arith.constant dense<0.000000e+00> : vector<32x512xf32>
    %26 = tpu.matmul %24, %25, %cst_17 {dimension_numbers = #tpu.dot_dimension_numbers<[1], [0], [0], [1], [0, 0, 1, 1], [], []>} : vector<32x3xbf16>, vector<3x512xbf16>, vector<32x512xf32> -> vector<32x512xf32>
    %27 = arith.addf %16, %26 : vector<32x512xf32>
    %c15_i32 = arith.constant 15 : i32
    %28 = tpu.dynamic_rotate %4 by %c15_i32 dim 1 : vector<3x512xf32>, i32 -> vector<3x512xf32>
    %c2 = arith.constant 2 : index
    %c0_18 = arith.constant 0 : index
    %c0_19 = arith.constant 0 : index
    %29 = vector.load %arg2[%c2, %c0_18, %c0_19] : memref<9x1x512xf32, #tpu.memory_space<vmem>>, vector<1x1x512xf32>
    %30 = vector.shape_cast %29 : vector<1x1x512xf32> to vector<1x512xf32>
    %31 = vector.broadcast %30 : vector<1x512xf32> to vector<3x512xf32>
    %32 = arith.mulf %28, %31 : vector<3x512xf32>
    %c2_20 = arith.constant 2 : index
    %c0_21 = arith.constant 0 : index
    %c0_22 = arith.constant 0 : index
    %33 = vector.load %arg3[%c2_20, %c0_21, %c0_22] : memref<9x32x3xf32, #tpu.memory_space<vmem>>, vector<1x32x3xf32>
    %34 = vector.shape_cast %33 : vector<1x32x3xf32> to vector<32x3xf32>
    %35 = arith.truncf %34 : vector<32x3xf32> to vector<32x3xbf16>
    %36 = arith.truncf %32 : vector<3x512xf32> to vector<3x512xbf16>
    %cst_23 = arith.constant dense<0.000000e+00> : vector<32x512xf32>
    %37 = tpu.matmul %35, %36, %cst_23 {dimension_numbers = #tpu.dot_dimension_numbers<[1], [0], [0], [1], [0, 0, 1, 1], [], []>} : vector<32x3xbf16>, vector<3x512xbf16>, vector<32x512xf32> -> vector<32x512xf32>
    %38 = arith.addf %27, %37 : vector<32x512xf32>
    %c1_i32 = arith.constant 1 : i32
    %39 = tpu.dynamic_rotate %4 by %c1_i32 dim 1 : vector<3x512xf32>, i32 -> vector<3x512xf32>
    %c3 = arith.constant 3 : index
    %c0_24 = arith.constant 0 : index
    %c0_25 = arith.constant 0 : index
    %40 = vector.load %arg2[%c3, %c0_24, %c0_25] : memref<9x1x512xf32, #tpu.memory_space<vmem>>, vector<1x1x512xf32>
    %41 = vector.shape_cast %40 : vector<1x1x512xf32> to vector<1x512xf32>
    %42 = vector.broadcast %41 : vector<1x512xf32> to vector<3x512xf32>
    %43 = arith.mulf %39, %42 : vector<3x512xf32>
    %c3_26 = arith.constant 3 : index
    %c0_27 = arith.constant 0 : index
    %c0_28 = arith.constant 0 : index
    %44 = vector.load %arg3[%c3_26, %c0_27, %c0_28] : memref<9x32x3xf32, #tpu.memory_space<vmem>>, vector<1x32x3xf32>
    %45 = vector.shape_cast %44 : vector<1x32x3xf32> to vector<32x3xf32>
    %46 = arith.truncf %45 : vector<32x3xf32> to vector<32x3xbf16>
    %47 = arith.truncf %43 : vector<3x512xf32> to vector<3x512xbf16>
    %cst_29 = arith.constant dense<0.000000e+00> : vector<32x512xf32>
    %48 = tpu.matmul %46, %47, %cst_29 {dimension_numbers = #tpu.dot_dimension_numbers<[1], [0], [0], [1], [0, 0, 1, 1], [], []>} : vector<32x3xbf16>, vector<3x512xbf16>, vector<32x512xf32> -> vector<32x512xf32>
    %49 = arith.addf %38, %48 : vector<32x512xf32>
    %c4 = arith.constant 4 : index
    %c0_30 = arith.constant 0 : index
    %c0_31 = arith.constant 0 : index
    %50 = vector.load %arg3[%c4, %c0_30, %c0_31] : memref<9x32x3xf32, #tpu.memory_space<vmem>>, vector<1x32x3xf32>
    %51 = vector.shape_cast %50 : vector<1x32x3xf32> to vector<32x3xf32>
    %52 = arith.truncf %51 : vector<32x3xf32> to vector<32x3xbf16>
    %53 = arith.truncf %4 : vector<3x512xf32> to vector<3x512xbf16>
    %cst_32 = arith.constant dense<0.000000e+00> : vector<32x512xf32>
    %54 = tpu.matmul %52, %53, %cst_32 {dimension_numbers = #tpu.dot_dimension_numbers<[1], [0], [0], [1], [0, 0, 1, 1], [], []>} : vector<32x3xbf16>, vector<3x512xbf16>, vector<32x512xf32> -> vector<32x512xf32>
    %55 = arith.addf %49, %54 : vector<32x512xf32>
    %c511_i32 = arith.constant 511 : i32
    %56 = tpu.dynamic_rotate %4 by %c511_i32 dim 1 : vector<3x512xf32>, i32 -> vector<3x512xf32>
    %c5 = arith.constant 5 : index
    %c0_33 = arith.constant 0 : index
    %c0_34 = arith.constant 0 : index
    %57 = vector.load %arg2[%c5, %c0_33, %c0_34] : memref<9x1x512xf32, #tpu.memory_space<vmem>>, vector<1x1x512xf32>
    %58 = vector.shape_cast %57 : vector<1x1x512xf32> to vector<1x512xf32>
    %59 = vector.broadcast %58 : vector<1x512xf32> to vector<3x512xf32>
    %60 = arith.mulf %56, %59 : vector<3x512xf32>
    %c5_35 = arith.constant 5 : index
    %c0_36 = arith.constant 0 : index
    %c0_37 = arith.constant 0 : index
    %61 = vector.load %arg3[%c5_35, %c0_36, %c0_37] : memref<9x32x3xf32, #tpu.memory_space<vmem>>, vector<1x32x3xf32>
    %62 = vector.shape_cast %61 : vector<1x32x3xf32> to vector<32x3xf32>
    %63 = arith.truncf %62 : vector<32x3xf32> to vector<32x3xbf16>
    %64 = arith.truncf %60 : vector<3x512xf32> to vector<3x512xbf16>
    %cst_38 = arith.constant dense<0.000000e+00> : vector<32x512xf32>
    %65 = tpu.matmul %63, %64, %cst_38 {dimension_numbers = #tpu.dot_dimension_numbers<[1], [0], [0], [1], [0, 0, 1, 1], [], []>} : vector<32x3xbf16>, vector<3x512xbf16>, vector<32x512xf32> -> vector<32x512xf32>
    %66 = arith.addf %55, %65 : vector<32x512xf32>
    %c497_i32 = arith.constant 497 : i32
    %67 = tpu.dynamic_rotate %4 by %c497_i32 dim 1 : vector<3x512xf32>, i32 -> vector<3x512xf32>
    %c6 = arith.constant 6 : index
    %c0_39 = arith.constant 0 : index
    %c0_40 = arith.constant 0 : index
    %68 = vector.load %arg2[%c6, %c0_39, %c0_40] : memref<9x1x512xf32, #tpu.memory_space<vmem>>, vector<1x1x512xf32>
    %69 = vector.shape_cast %68 : vector<1x1x512xf32> to vector<1x512xf32>
    %70 = vector.broadcast %69 : vector<1x512xf32> to vector<3x512xf32>
    %71 = arith.mulf %67, %70 : vector<3x512xf32>
    %c6_41 = arith.constant 6 : index
    %c0_42 = arith.constant 0 : index
    %c0_43 = arith.constant 0 : index
    %72 = vector.load %arg3[%c6_41, %c0_42, %c0_43] : memref<9x32x3xf32, #tpu.memory_space<vmem>>, vector<1x32x3xf32>
    %73 = vector.shape_cast %72 : vector<1x32x3xf32> to vector<32x3xf32>
    %74 = arith.truncf %73 : vector<32x3xf32> to vector<32x3xbf16>
    %75 = arith.truncf %71 : vector<3x512xf32> to vector<3x512xbf16>
    %cst_44 = arith.constant dense<0.000000e+00> : vector<32x512xf32>
    %76 = tpu.matmul %74, %75, %cst_44 {dimension_numbers = #tpu.dot_dimension_numbers<[1], [0], [0], [1], [0, 0, 1, 1], [], []>} : vector<32x3xbf16>, vector<3x512xbf16>, vector<32x512xf32> -> vector<32x512xf32>
    %77 = arith.addf %66, %76 : vector<32x512xf32>
    %c496_i32 = arith.constant 496 : i32
    %78 = tpu.dynamic_rotate %4 by %c496_i32 dim 1 : vector<3x512xf32>, i32 -> vector<3x512xf32>
    %c7 = arith.constant 7 : index
    %c0_45 = arith.constant 0 : index
    %c0_46 = arith.constant 0 : index
    %79 = vector.load %arg2[%c7, %c0_45, %c0_46] : memref<9x1x512xf32, #tpu.memory_space<vmem>>, vector<1x1x512xf32>
    %80 = vector.shape_cast %79 : vector<1x1x512xf32> to vector<1x512xf32>
    %81 = vector.broadcast %80 : vector<1x512xf32> to vector<3x512xf32>
    %82 = arith.mulf %78, %81 : vector<3x512xf32>
    %c7_47 = arith.constant 7 : index
    %c0_48 = arith.constant 0 : index
    %c0_49 = arith.constant 0 : index
    %83 = vector.load %arg3[%c7_47, %c0_48, %c0_49] : memref<9x32x3xf32, #tpu.memory_space<vmem>>, vector<1x32x3xf32>
    %84 = vector.shape_cast %83 : vector<1x32x3xf32> to vector<32x3xf32>
    %85 = arith.truncf %84 : vector<32x3xf32> to vector<32x3xbf16>
    %86 = arith.truncf %82 : vector<3x512xf32> to vector<3x512xbf16>
    %cst_50 = arith.constant dense<0.000000e+00> : vector<32x512xf32>
    %87 = tpu.matmul %85, %86, %cst_50 {dimension_numbers = #tpu.dot_dimension_numbers<[1], [0], [0], [1], [0, 0, 1, 1], [], []>} : vector<32x3xbf16>, vector<3x512xbf16>, vector<32x512xf32> -> vector<32x512xf32>
    %88 = arith.addf %77, %87 : vector<32x512xf32>
    %c495_i32 = arith.constant 495 : i32
    %89 = tpu.dynamic_rotate %4 by %c495_i32 dim 1 : vector<3x512xf32>, i32 -> vector<3x512xf32>
    %c8 = arith.constant 8 : index
    %c0_51 = arith.constant 0 : index
    %c0_52 = arith.constant 0 : index
    %90 = vector.load %arg2[%c8, %c0_51, %c0_52] : memref<9x1x512xf32, #tpu.memory_space<vmem>>, vector<1x1x512xf32>
    %91 = vector.shape_cast %90 : vector<1x1x512xf32> to vector<1x512xf32>
    %92 = vector.broadcast %91 : vector<1x512xf32> to vector<3x512xf32>
    %93 = arith.mulf %89, %92 : vector<3x512xf32>
    %c8_53 = arith.constant 8 : index
    %c0_54 = arith.constant 0 : index
    %c0_55 = arith.constant 0 : index
    %94 = vector.load %arg3[%c8_53, %c0_54, %c0_55] : memref<9x32x3xf32, #tpu.memory_space<vmem>>, vector<1x32x3xf32>
    %95 = vector.shape_cast %94 : vector<1x32x3xf32> to vector<32x3xf32>
    %96 = arith.truncf %95 : vector<32x3xf32> to vector<32x3xbf16>
    %97 = arith.truncf %93 : vector<3x512xf32> to vector<3x512xbf16>
    %cst_56 = arith.constant dense<0.000000e+00> : vector<32x512xf32>
    %98 = tpu.matmul %96, %97, %cst_56 {dimension_numbers = #tpu.dot_dimension_numbers<[1], [0], [0], [1], [0, 0, 1, 1], [], []>} : vector<32x3xbf16>, vector<3x512xbf16>, vector<32x512xf32> -> vector<32x512xf32>
    %99 = arith.addf %88, %98 : vector<32x512xf32>
    %c0_57 = arith.constant 0 : index
    %c0_58 = arith.constant 0 : index
    %100 = vector.load %arg8[%c0_57, %c0_58] : memref<32x1xf32, #tpu.memory_space<vmem>>, vector<32x1xf32>
    %101 = vector.broadcast %100 : vector<32x1xf32> to vector<32x512xf32>
    %102 = arith.addf %99, %101 : vector<32x512xf32>
    %cst_59 = arith.constant dense<0.000000e+00> : vector<32xf32>
    %103 = vector.multi_reduction <add>, %102, %cst_59 [1] : vector<32x512xf32> to vector<32xf32>
    %104 = vector.shape_cast %103 : vector<32xf32> to vector<32x1xf32>
    %cst_60 = arith.constant 5.120000e+02 : f32
    %105 = vector.broadcast %cst_60 : f32 to vector<32x1xf32>
    %106 = arith.divf %104, %105 : vector<32x1xf32>
    %107 = vector.broadcast %106 : vector<32x1xf32> to vector<32x512xf32>
    %108 = arith.subf %102, %107 : vector<32x512xf32>
    %109 = arith.mulf %108, %108 : vector<32x512xf32>
    %cst_61 = arith.constant dense<0.000000e+00> : vector<32xf32>
    %110 = vector.multi_reduction <add>, %109, %cst_61 [1] : vector<32x512xf32> to vector<32xf32>
    %111 = vector.shape_cast %110 : vector<32xf32> to vector<32x1xf32>
    %cst_62 = arith.constant 5.120000e+02 : f32
    %112 = vector.broadcast %cst_62 : f32 to vector<32x1xf32>
    %113 = arith.divf %111, %112 : vector<32x1xf32>
    %cst_63 = arith.constant 9.99999974E-6 : f32
    %114 = vector.broadcast %cst_63 : f32 to vector<32x1xf32>
    %115 = arith.addf %113, %114 : vector<32x1xf32>
    %116 = math.rsqrt %115 : vector<32x1xf32>
    %117 = vector.broadcast %116 : vector<32x1xf32> to vector<32x512xf32>
    %118 = arith.mulf %108, %117 : vector<32x512xf32>
    %cst_64 = arith.constant 0.000000e+00 : f32
    %119 = vector.broadcast %cst_64 : f32 to vector<32x512xf32>
    %120 = arith.cmpf oge, %118, %119 : vector<32x512xf32>
    %cst_65 = arith.constant 2.000000e-01 : f32
    %121 = vector.broadcast %cst_65 : f32 to vector<32x512xf32>
    %122 = arith.mulf %121, %118 : vector<32x512xf32>
    %123 = arith.select %120, %118, %122 : vector<32x512xi1>, vector<32x512xf32>
    %cst_66 = arith.constant 0.000000e+00 : f32
    %124 = vector.broadcast %cst_66 : f32 to vector<32x512xf32>
    %c17_i32_67 = arith.constant 17 : i32
    %125 = tpu.dynamic_rotate %123 by %c17_i32_67 dim 1 : vector<32x512xf32>, i32 -> vector<32x512xf32>
    %c0_68 = arith.constant 0 : index
    %c0_69 = arith.constant 0 : index
    %c0_70 = arith.constant 0 : index
    %126 = vector.load %arg2[%c0_68, %c0_69, %c0_70] : memref<9x1x512xf32, #tpu.memory_space<vmem>>, vector<1x1x512xf32>
    %127 = vector.shape_cast %126 : vector<1x1x512xf32> to vector<1x512xf32>
    %128 = vector.broadcast %127 : vector<1x512xf32> to vector<32x512xf32>
    %129 = arith.mulf %125, %128 : vector<32x512xf32>
    %c0_71 = arith.constant 0 : index
    %c0_72 = arith.constant 0 : index
    %c0_73 = arith.constant 0 : index
    %130 = vector.load %arg4[%c0_71, %c0_72, %c0_73] : memref<9x32x32xf32, #tpu.memory_space<vmem>>, vector<1x32x32xf32>
    %131 = vector.shape_cast %130 : vector<1x32x32xf32> to vector<32x32xf32>
    %132 = arith.truncf %131 : vector<32x32xf32> to vector<32x32xbf16>
    %133 = arith.truncf %129 : vector<32x512xf32> to vector<32x512xbf16>
    %cst_74 = arith.constant dense<0.000000e+00> : vector<32x512xf32>
    %134 = tpu.matmul %132, %133, %cst_74 {dimension_numbers = #tpu.dot_dimension_numbers<[1], [0], [0], [1], [0, 0, 1, 1], [], []>} : vector<32x32xbf16>, vector<32x512xbf16>, vector<32x512xf32> -> vector<32x512xf32>
    %135 = arith.addf %124, %134 : vector<32x512xf32>
    %c16_i32_75 = arith.constant 16 : i32
    %136 = tpu.dynamic_rotate %123 by %c16_i32_75 dim 1 : vector<32x512xf32>, i32 -> vector<32x512xf32>
    %c1_76 = arith.constant 1 : index
    %c0_77 = arith.constant 0 : index
    %c0_78 = arith.constant 0 : index
    %137 = vector.load %arg2[%c1_76, %c0_77, %c0_78] : memref<9x1x512xf32, #tpu.memory_space<vmem>>, vector<1x1x512xf32>
    %138 = vector.shape_cast %137 : vector<1x1x512xf32> to vector<1x512xf32>
    %139 = vector.broadcast %138 : vector<1x512xf32> to vector<32x512xf32>
    %140 = arith.mulf %136, %139 : vector<32x512xf32>
    %c1_79 = arith.constant 1 : index
    %c0_80 = arith.constant 0 : index
    %c0_81 = arith.constant 0 : index
    %141 = vector.load %arg4[%c1_79, %c0_80, %c0_81] : memref<9x32x32xf32, #tpu.memory_space<vmem>>, vector<1x32x32xf32>
    %142 = vector.shape_cast %141 : vector<1x32x32xf32> to vector<32x32xf32>
    %143 = arith.truncf %142 : vector<32x32xf32> to vector<32x32xbf16>
    %144 = arith.truncf %140 : vector<32x512xf32> to vector<32x512xbf16>
    %cst_82 = arith.constant dense<0.000000e+00> : vector<32x512xf32>
    %145 = tpu.matmul %143, %144, %cst_82 {dimension_numbers = #tpu.dot_dimension_numbers<[1], [0], [0], [1], [0, 0, 1, 1], [], []>} : vector<32x32xbf16>, vector<32x512xbf16>, vector<32x512xf32> -> vector<32x512xf32>
    %146 = arith.addf %135, %145 : vector<32x512xf32>
    %c15_i32_83 = arith.constant 15 : i32
    %147 = tpu.dynamic_rotate %123 by %c15_i32_83 dim 1 : vector<32x512xf32>, i32 -> vector<32x512xf32>
    %c2_84 = arith.constant 2 : index
    %c0_85 = arith.constant 0 : index
    %c0_86 = arith.constant 0 : index
    %148 = vector.load %arg2[%c2_84, %c0_85, %c0_86] : memref<9x1x512xf32, #tpu.memory_space<vmem>>, vector<1x1x512xf32>
    %149 = vector.shape_cast %148 : vector<1x1x512xf32> to vector<1x512xf32>
    %150 = vector.broadcast %149 : vector<1x512xf32> to vector<32x512xf32>
    %151 = arith.mulf %147, %150 : vector<32x512xf32>
    %c2_87 = arith.constant 2 : index
    %c0_88 = arith.constant 0 : index
    %c0_89 = arith.constant 0 : index
    %152 = vector.load %arg4[%c2_87, %c0_88, %c0_89] : memref<9x32x32xf32, #tpu.memory_space<vmem>>, vector<1x32x32xf32>
    %153 = vector.shape_cast %152 : vector<1x32x32xf32> to vector<32x32xf32>
    %154 = arith.truncf %153 : vector<32x32xf32> to vector<32x32xbf16>
    %155 = arith.truncf %151 : vector<32x512xf32> to vector<32x512xbf16>
    %cst_90 = arith.constant dense<0.000000e+00> : vector<32x512xf32>
    %156 = tpu.matmul %154, %155, %cst_90 {dimension_numbers = #tpu.dot_dimension_numbers<[1], [0], [0], [1], [0, 0, 1, 1], [], []>} : vector<32x32xbf16>, vector<32x512xbf16>, vector<32x512xf32> -> vector<32x512xf32>
    %157 = arith.addf %146, %156 : vector<32x512xf32>
    %c1_i32_91 = arith.constant 1 : i32
    %158 = tpu.dynamic_rotate %123 by %c1_i32_91 dim 1 : vector<32x512xf32>, i32 -> vector<32x512xf32>
    %c3_92 = arith.constant 3 : index
    %c0_93 = arith.constant 0 : index
    %c0_94 = arith.constant 0 : index
    %159 = vector.load %arg2[%c3_92, %c0_93, %c0_94] : memref<9x1x512xf32, #tpu.memory_space<vmem>>, vector<1x1x512xf32>
    %160 = vector.shape_cast %159 : vector<1x1x512xf32> to vector<1x512xf32>
    %161 = vector.broadcast %160 : vector<1x512xf32> to vector<32x512xf32>
    %162 = arith.mulf %158, %161 : vector<32x512xf32>
    %c3_95 = arith.constant 3 : index
    %c0_96 = arith.constant 0 : index
    %c0_97 = arith.constant 0 : index
    %163 = vector.load %arg4[%c3_95, %c0_96, %c0_97] : memref<9x32x32xf32, #tpu.memory_space<vmem>>, vector<1x32x32xf32>
    %164 = vector.shape_cast %163 : vector<1x32x32xf32> to vector<32x32xf32>
    %165 = arith.truncf %164 : vector<32x32xf32> to vector<32x32xbf16>
    %166 = arith.truncf %162 : vector<32x512xf32> to vector<32x512xbf16>
    %cst_98 = arith.constant dense<0.000000e+00> : vector<32x512xf32>
    %167 = tpu.matmul %165, %166, %cst_98 {dimension_numbers = #tpu.dot_dimension_numbers<[1], [0], [0], [1], [0, 0, 1, 1], [], []>} : vector<32x32xbf16>, vector<32x512xbf16>, vector<32x512xf32> -> vector<32x512xf32>
    %168 = arith.addf %157, %167 : vector<32x512xf32>
    %c4_99 = arith.constant 4 : index
    %c0_100 = arith.constant 0 : index
    %c0_101 = arith.constant 0 : index
    %169 = vector.load %arg4[%c4_99, %c0_100, %c0_101] : memref<9x32x32xf32, #tpu.memory_space<vmem>>, vector<1x32x32xf32>
    %170 = vector.shape_cast %169 : vector<1x32x32xf32> to vector<32x32xf32>
    %171 = arith.truncf %170 : vector<32x32xf32> to vector<32x32xbf16>
    %172 = arith.truncf %123 : vector<32x512xf32> to vector<32x512xbf16>
    %cst_102 = arith.constant dense<0.000000e+00> : vector<32x512xf32>
    %173 = tpu.matmul %171, %172, %cst_102 {dimension_numbers = #tpu.dot_dimension_numbers<[1], [0], [0], [1], [0, 0, 1, 1], [], []>} : vector<32x32xbf16>, vector<32x512xbf16>, vector<32x512xf32> -> vector<32x512xf32>
    %174 = arith.addf %168, %173 : vector<32x512xf32>
    %c511_i32_103 = arith.constant 511 : i32
    %175 = tpu.dynamic_rotate %123 by %c511_i32_103 dim 1 : vector<32x512xf32>, i32 -> vector<32x512xf32>
    %c5_104 = arith.constant 5 : index
    %c0_105 = arith.constant 0 : index
    %c0_106 = arith.constant 0 : index
    %176 = vector.load %arg2[%c5_104, %c0_105, %c0_106] : memref<9x1x512xf32, #tpu.memory_space<vmem>>, vector<1x1x512xf32>
    %177 = vector.shape_cast %176 : vector<1x1x512xf32> to vector<1x512xf32>
    %178 = vector.broadcast %177 : vector<1x512xf32> to vector<32x512xf32>
    %179 = arith.mulf %175, %178 : vector<32x512xf32>
    %c5_107 = arith.constant 5 : index
    %c0_108 = arith.constant 0 : index
    %c0_109 = arith.constant 0 : index
    %180 = vector.load %arg4[%c5_107, %c0_108, %c0_109] : memref<9x32x32xf32, #tpu.memory_space<vmem>>, vector<1x32x32xf32>
    %181 = vector.shape_cast %180 : vector<1x32x32xf32> to vector<32x32xf32>
    %182 = arith.truncf %181 : vector<32x32xf32> to vector<32x32xbf16>
    %183 = arith.truncf %179 : vector<32x512xf32> to vector<32x512xbf16>
    %cst_110 = arith.constant dense<0.000000e+00> : vector<32x512xf32>
    %184 = tpu.matmul %182, %183, %cst_110 {dimension_numbers = #tpu.dot_dimension_numbers<[1], [0], [0], [1], [0, 0, 1, 1], [], []>} : vector<32x32xbf16>, vector<32x512xbf16>, vector<32x512xf32> -> vector<32x512xf32>
    %185 = arith.addf %174, %184 : vector<32x512xf32>
    %c497_i32_111 = arith.constant 497 : i32
    %186 = tpu.dynamic_rotate %123 by %c497_i32_111 dim 1 : vector<32x512xf32>, i32 -> vector<32x512xf32>
    %c6_112 = arith.constant 6 : index
    %c0_113 = arith.constant 0 : index
    %c0_114 = arith.constant 0 : index
    %187 = vector.load %arg2[%c6_112, %c0_113, %c0_114] : memref<9x1x512xf32, #tpu.memory_space<vmem>>, vector<1x1x512xf32>
    %188 = vector.shape_cast %187 : vector<1x1x512xf32> to vector<1x512xf32>
    %189 = vector.broadcast %188 : vector<1x512xf32> to vector<32x512xf32>
    %190 = arith.mulf %186, %189 : vector<32x512xf32>
    %c6_115 = arith.constant 6 : index
    %c0_116 = arith.constant 0 : index
    %c0_117 = arith.constant 0 : index
    %191 = vector.load %arg4[%c6_115, %c0_116, %c0_117] : memref<9x32x32xf32, #tpu.memory_space<vmem>>, vector<1x32x32xf32>
    %192 = vector.shape_cast %191 : vector<1x32x32xf32> to vector<32x32xf32>
    %193 = arith.truncf %192 : vector<32x32xf32> to vector<32x32xbf16>
    %194 = arith.truncf %190 : vector<32x512xf32> to vector<32x512xbf16>
    %cst_118 = arith.constant dense<0.000000e+00> : vector<32x512xf32>
    %195 = tpu.matmul %193, %194, %cst_118 {dimension_numbers = #tpu.dot_dimension_numbers<[1], [0], [0], [1], [0, 0, 1, 1], [], []>} : vector<32x32xbf16>, vector<32x512xbf16>, vector<32x512xf32> -> vector<32x512xf32>
    %196 = arith.addf %185, %195 : vector<32x512xf32>
    %c496_i32_119 = arith.constant 496 : i32
    %197 = tpu.dynamic_rotate %123 by %c496_i32_119 dim 1 : vector<32x512xf32>, i32 -> vector<32x512xf32>
    %c7_120 = arith.constant 7 : index
    %c0_121 = arith.constant 0 : index
    %c0_122 = arith.constant 0 : index
    %198 = vector.load %arg2[%c7_120, %c0_121, %c0_122] : memref<9x1x512xf32, #tpu.memory_space<vmem>>, vector<1x1x512xf32>
    %199 = vector.shape_cast %198 : vector<1x1x512xf32> to vector<1x512xf32>
    %200 = vector.broadcast %199 : vector<1x512xf32> to vector<32x512xf32>
    %201 = arith.mulf %197, %200 : vector<32x512xf32>
    %c7_123 = arith.constant 7 : index
    %c0_124 = arith.constant 0 : index
    %c0_125 = arith.constant 0 : index
    %202 = vector.load %arg4[%c7_123, %c0_124, %c0_125] : memref<9x32x32xf32, #tpu.memory_space<vmem>>, vector<1x32x32xf32>
    %203 = vector.shape_cast %202 : vector<1x32x32xf32> to vector<32x32xf32>
    %204 = arith.truncf %203 : vector<32x32xf32> to vector<32x32xbf16>
    %205 = arith.truncf %201 : vector<32x512xf32> to vector<32x512xbf16>
    %cst_126 = arith.constant dense<0.000000e+00> : vector<32x512xf32>
    %206 = tpu.matmul %204, %205, %cst_126 {dimension_numbers = #tpu.dot_dimension_numbers<[1], [0], [0], [1], [0, 0, 1, 1], [], []>} : vector<32x32xbf16>, vector<32x512xbf16>, vector<32x512xf32> -> vector<32x512xf32>
    %207 = arith.addf %196, %206 : vector<32x512xf32>
    %c495_i32_127 = arith.constant 495 : i32
    %208 = tpu.dynamic_rotate %123 by %c495_i32_127 dim 1 : vector<32x512xf32>, i32 -> vector<32x512xf32>
    %c8_128 = arith.constant 8 : index
    %c0_129 = arith.constant 0 : index
    %c0_130 = arith.constant 0 : index
    %209 = vector.load %arg2[%c8_128, %c0_129, %c0_130] : memref<9x1x512xf32, #tpu.memory_space<vmem>>, vector<1x1x512xf32>
    %210 = vector.shape_cast %209 : vector<1x1x512xf32> to vector<1x512xf32>
    %211 = vector.broadcast %210 : vector<1x512xf32> to vector<32x512xf32>
    %212 = arith.mulf %208, %211 : vector<32x512xf32>
    %c8_131 = arith.constant 8 : index
    %c0_132 = arith.constant 0 : index
    %c0_133 = arith.constant 0 : index
    %213 = vector.load %arg4[%c8_131, %c0_132, %c0_133] : memref<9x32x32xf32, #tpu.memory_space<vmem>>, vector<1x32x32xf32>
    %214 = vector.shape_cast %213 : vector<1x32x32xf32> to vector<32x32xf32>
    %215 = arith.truncf %214 : vector<32x32xf32> to vector<32x32xbf16>
    %216 = arith.truncf %212 : vector<32x512xf32> to vector<32x512xbf16>
    %cst_134 = arith.constant dense<0.000000e+00> : vector<32x512xf32>
    %217 = tpu.matmul %215, %216, %cst_134 {dimension_numbers = #tpu.dot_dimension_numbers<[1], [0], [0], [1], [0, 0, 1, 1], [], []>} : vector<32x32xbf16>, vector<32x512xbf16>, vector<32x512xf32> -> vector<32x512xf32>
    %218 = arith.addf %207, %217 : vector<32x512xf32>
    %c0_135 = arith.constant 0 : index
    %c0_136 = arith.constant 0 : index
    %219 = vector.load %arg9[%c0_135, %c0_136] : memref<32x1xf32, #tpu.memory_space<vmem>>, vector<32x1xf32>
    %220 = vector.broadcast %219 : vector<32x1xf32> to vector<32x512xf32>
    %221 = arith.addf %218, %220 : vector<32x512xf32>
    %cst_137 = arith.constant dense<0.000000e+00> : vector<32xf32>
    %222 = vector.multi_reduction <add>, %221, %cst_137 [1] : vector<32x512xf32> to vector<32xf32>
    %223 = vector.shape_cast %222 : vector<32xf32> to vector<32x1xf32>
    %cst_138 = arith.constant 5.120000e+02 : f32
    %224 = vector.broadcast %cst_138 : f32 to vector<32x1xf32>
    %225 = arith.divf %223, %224 : vector<32x1xf32>
    %226 = vector.broadcast %225 : vector<32x1xf32> to vector<32x512xf32>
    %227 = arith.subf %221, %226 : vector<32x512xf32>
    %228 = arith.mulf %227, %227 : vector<32x512xf32>
    %cst_139 = arith.constant dense<0.000000e+00> : vector<32xf32>
    %229 = vector.multi_reduction <add>, %228, %cst_139 [1] : vector<32x512xf32> to vector<32xf32>
    %230 = vector.shape_cast %229 : vector<32xf32> to vector<32x1xf32>
    %cst_140 = arith.constant 5.120000e+02 : f32
    %231 = vector.broadcast %cst_140 : f32 to vector<32x1xf32>
    %232 = arith.divf %230, %231 : vector<32x1xf32>
    %cst_141 = arith.constant 9.99999974E-6 : f32
    %233 = vector.broadcast %cst_141 : f32 to vector<32x1xf32>
    %234 = arith.addf %232, %233 : vector<32x1xf32>
    %235 = math.rsqrt %234 : vector<32x1xf32>
    %236 = vector.broadcast %235 : vector<32x1xf32> to vector<32x512xf32>
    %237 = arith.mulf %227, %236 : vector<32x512xf32>
    %cst_142 = arith.constant 0.000000e+00 : f32
    %238 = vector.broadcast %cst_142 : f32 to vector<32x512xf32>
    %239 = arith.cmpf oge, %237, %238 : vector<32x512xf32>
    %cst_143 = arith.constant 2.000000e-01 : f32
    %240 = vector.broadcast %cst_143 : f32 to vector<32x512xf32>
    %241 = arith.mulf %240, %237 : vector<32x512xf32>
    %242 = arith.select %239, %237, %241 : vector<32x512xi1>, vector<32x512xf32>
    %cst_144 = arith.constant 0.000000e+00 : f32
    %243 = vector.broadcast %cst_144 : f32 to vector<32x512xf32>
    %c17_i32_145 = arith.constant 17 : i32
    %244 = tpu.dynamic_rotate %242 by %c17_i32_145 dim 1 : vector<32x512xf32>, i32 -> vector<32x512xf32>
    %c0_146 = arith.constant 0 : index
    %c0_147 = arith.constant 0 : index
    %c0_148 = arith.constant 0 : index
    %245 = vector.load %arg2[%c0_146, %c0_147, %c0_148] : memref<9x1x512xf32, #tpu.memory_space<vmem>>, vector<1x1x512xf32>
    %246 = vector.shape_cast %245 : vector<1x1x512xf32> to vector<1x512xf32>
    %247 = vector.broadcast %246 : vector<1x512xf32> to vector<32x512xf32>
    %248 = arith.mulf %244, %247 : vector<32x512xf32>
    %c0_149 = arith.constant 0 : index
    %c0_150 = arith.constant 0 : index
    %c0_151 = arith.constant 0 : index
    %249 = vector.load %arg5[%c0_149, %c0_150, %c0_151] : memref<9x32x32xf32, #tpu.memory_space<vmem>>, vector<1x32x32xf32>
    %250 = vector.shape_cast %249 : vector<1x32x32xf32> to vector<32x32xf32>
    %251 = arith.truncf %250 : vector<32x32xf32> to vector<32x32xbf16>
    %252 = arith.truncf %248 : vector<32x512xf32> to vector<32x512xbf16>
    %cst_152 = arith.constant dense<0.000000e+00> : vector<32x512xf32>
    %253 = tpu.matmul %251, %252, %cst_152 {dimension_numbers = #tpu.dot_dimension_numbers<[1], [0], [0], [1], [0, 0, 1, 1], [], []>} : vector<32x32xbf16>, vector<32x512xbf16>, vector<32x512xf32> -> vector<32x512xf32>
    %254 = arith.addf %243, %253 : vector<32x512xf32>
    %c16_i32_153 = arith.constant 16 : i32
    %255 = tpu.dynamic_rotate %242 by %c16_i32_153 dim 1 : vector<32x512xf32>, i32 -> vector<32x512xf32>
    %c1_154 = arith.constant 1 : index
    %c0_155 = arith.constant 0 : index
    %c0_156 = arith.constant 0 : index
    %256 = vector.load %arg2[%c1_154, %c0_155, %c0_156] : memref<9x1x512xf32, #tpu.memory_space<vmem>>, vector<1x1x512xf32>
    %257 = vector.shape_cast %256 : vector<1x1x512xf32> to vector<1x512xf32>
    %258 = vector.broadcast %257 : vector<1x512xf32> to vector<32x512xf32>
    %259 = arith.mulf %255, %258 : vector<32x512xf32>
    %c1_157 = arith.constant 1 : index
    %c0_158 = arith.constant 0 : index
    %c0_159 = arith.constant 0 : index
    %260 = vector.load %arg5[%c1_157, %c0_158, %c0_159] : memref<9x32x32xf32, #tpu.memory_space<vmem>>, vector<1x32x32xf32>
    %261 = vector.shape_cast %260 : vector<1x32x32xf32> to vector<32x32xf32>
    %262 = arith.truncf %261 : vector<32x32xf32> to vector<32x32xbf16>
    %263 = arith.truncf %259 : vector<32x512xf32> to vector<32x512xbf16>
    %cst_160 = arith.constant dense<0.000000e+00> : vector<32x512xf32>
    %264 = tpu.matmul %262, %263, %cst_160 {dimension_numbers = #tpu.dot_dimension_numbers<[1], [0], [0], [1], [0, 0, 1, 1], [], []>} : vector<32x32xbf16>, vector<32x512xbf16>, vector<32x512xf32> -> vector<32x512xf32>
    %265 = arith.addf %254, %264 : vector<32x512xf32>
    %c15_i32_161 = arith.constant 15 : i32
    %266 = tpu.dynamic_rotate %242 by %c15_i32_161 dim 1 : vector<32x512xf32>, i32 -> vector<32x512xf32>
    %c2_162 = arith.constant 2 : index
    %c0_163 = arith.constant 0 : index
    %c0_164 = arith.constant 0 : index
    %267 = vector.load %arg2[%c2_162, %c0_163, %c0_164] : memref<9x1x512xf32, #tpu.memory_space<vmem>>, vector<1x1x512xf32>
    %268 = vector.shape_cast %267 : vector<1x1x512xf32> to vector<1x512xf32>
    %269 = vector.broadcast %268 : vector<1x512xf32> to vector<32x512xf32>
    %270 = arith.mulf %266, %269 : vector<32x512xf32>
    %c2_165 = arith.constant 2 : index
    %c0_166 = arith.constant 0 : index
    %c0_167 = arith.constant 0 : index
    %271 = vector.load %arg5[%c2_165, %c0_166, %c0_167] : memref<9x32x32xf32, #tpu.memory_space<vmem>>, vector<1x32x32xf32>
    %272 = vector.shape_cast %271 : vector<1x32x32xf32> to vector<32x32xf32>
    %273 = arith.truncf %272 : vector<32x32xf32> to vector<32x32xbf16>
    %274 = arith.truncf %270 : vector<32x512xf32> to vector<32x512xbf16>
    %cst_168 = arith.constant dense<0.000000e+00> : vector<32x512xf32>
    %275 = tpu.matmul %273, %274, %cst_168 {dimension_numbers = #tpu.dot_dimension_numbers<[1], [0], [0], [1], [0, 0, 1, 1], [], []>} : vector<32x32xbf16>, vector<32x512xbf16>, vector<32x512xf32> -> vector<32x512xf32>
    %276 = arith.addf %265, %275 : vector<32x512xf32>
    %c1_i32_169 = arith.constant 1 : i32
    %277 = tpu.dynamic_rotate %242 by %c1_i32_169 dim 1 : vector<32x512xf32>, i32 -> vector<32x512xf32>
    %c3_170 = arith.constant 3 : index
    %c0_171 = arith.constant 0 : index
    %c0_172 = arith.constant 0 : index
    %278 = vector.load %arg2[%c3_170, %c0_171, %c0_172] : memref<9x1x512xf32, #tpu.memory_space<vmem>>, vector<1x1x512xf32>
    %279 = vector.shape_cast %278 : vector<1x1x512xf32> to vector<1x512xf32>
    %280 = vector.broadcast %279 : vector<1x512xf32> to vector<32x512xf32>
    %281 = arith.mulf %277, %280 : vector<32x512xf32>
    %c3_173 = arith.constant 3 : index
    %c0_174 = arith.constant 0 : index
    %c0_175 = arith.constant 0 : index
    %282 = vector.load %arg5[%c3_173, %c0_174, %c0_175] : memref<9x32x32xf32, #tpu.memory_space<vmem>>, vector<1x32x32xf32>
    %283 = vector.shape_cast %282 : vector<1x32x32xf32> to vector<32x32xf32>
    %284 = arith.truncf %283 : vector<32x32xf32> to vector<32x32xbf16>
    %285 = arith.truncf %281 : vector<32x512xf32> to vector<32x512xbf16>
    %cst_176 = arith.constant dense<0.000000e+00> : vector<32x512xf32>
    %286 = tpu.matmul %284, %285, %cst_176 {dimension_numbers = #tpu.dot_dimension_numbers<[1], [0], [0], [1], [0, 0, 1, 1], [], []>} : vector<32x32xbf16>, vector<32x512xbf16>, vector<32x512xf32> -> vector<32x512xf32>
    %287 = arith.addf %276, %286 : vector<32x512xf32>
    %c4_177 = arith.constant 4 : index
    %c0_178 = arith.constant 0 : index
    %c0_179 = arith.constant 0 : index
    %288 = vector.load %arg5[%c4_177, %c0_178, %c0_179] : memref<9x32x32xf32, #tpu.memory_space<vmem>>, vector<1x32x32xf32>
    %289 = vector.shape_cast %288 : vector<1x32x32xf32> to vector<32x32xf32>
    %290 = arith.truncf %289 : vector<32x32xf32> to vector<32x32xbf16>
    %291 = arith.truncf %242 : vector<32x512xf32> to vector<32x512xbf16>
    %cst_180 = arith.constant dense<0.000000e+00> : vector<32x512xf32>
    %292 = tpu.matmul %290, %291, %cst_180 {dimension_numbers = #tpu.dot_dimension_numbers<[1], [0], [0], [1], [0, 0, 1, 1], [], []>} : vector<32x32xbf16>, vector<32x512xbf16>, vector<32x512xf32> -> vector<32x512xf32>
    %293 = arith.addf %287, %292 : vector<32x512xf32>
    %c511_i32_181 = arith.constant 511 : i32
    %294 = tpu.dynamic_rotate %242 by %c511_i32_181 dim 1 : vector<32x512xf32>, i32 -> vector<32x512xf32>
    %c5_182 = arith.constant 5 : index
    %c0_183 = arith.constant 0 : index
    %c0_184 = arith.constant 0 : index
    %295 = vector.load %arg2[%c5_182, %c0_183, %c0_184] : memref<9x1x512xf32, #tpu.memory_space<vmem>>, vector<1x1x512xf32>
    %296 = vector.shape_cast %295 : vector<1x1x512xf32> to vector<1x512xf32>
    %297 = vector.broadcast %296 : vector<1x512xf32> to vector<32x512xf32>
    %298 = arith.mulf %294, %297 : vector<32x512xf32>
    %c5_185 = arith.constant 5 : index
    %c0_186 = arith.constant 0 : index
    %c0_187 = arith.constant 0 : index
    %299 = vector.load %arg5[%c5_185, %c0_186, %c0_187] : memref<9x32x32xf32, #tpu.memory_space<vmem>>, vector<1x32x32xf32>
    %300 = vector.shape_cast %299 : vector<1x32x32xf32> to vector<32x32xf32>
    %301 = arith.truncf %300 : vector<32x32xf32> to vector<32x32xbf16>
    %302 = arith.truncf %298 : vector<32x512xf32> to vector<32x512xbf16>
    %cst_188 = arith.constant dense<0.000000e+00> : vector<32x512xf32>
    %303 = tpu.matmul %301, %302, %cst_188 {dimension_numbers = #tpu.dot_dimension_numbers<[1], [0], [0], [1], [0, 0, 1, 1], [], []>} : vector<32x32xbf16>, vector<32x512xbf16>, vector<32x512xf32> -> vector<32x512xf32>
    %304 = arith.addf %293, %303 : vector<32x512xf32>
    %c497_i32_189 = arith.constant 497 : i32
    %305 = tpu.dynamic_rotate %242 by %c497_i32_189 dim 1 : vector<32x512xf32>, i32 -> vector<32x512xf32>
    %c6_190 = arith.constant 6 : index
    %c0_191 = arith.constant 0 : index
    %c0_192 = arith.constant 0 : index
    %306 = vector.load %arg2[%c6_190, %c0_191, %c0_192] : memref<9x1x512xf32, #tpu.memory_space<vmem>>, vector<1x1x512xf32>
    %307 = vector.shape_cast %306 : vector<1x1x512xf32> to vector<1x512xf32>
    %308 = vector.broadcast %307 : vector<1x512xf32> to vector<32x512xf32>
    %309 = arith.mulf %305, %308 : vector<32x512xf32>
    %c6_193 = arith.constant 6 : index
    %c0_194 = arith.constant 0 : index
    %c0_195 = arith.constant 0 : index
    %310 = vector.load %arg5[%c6_193, %c0_194, %c0_195] : memref<9x32x32xf32, #tpu.memory_space<vmem>>, vector<1x32x32xf32>
    %311 = vector.shape_cast %310 : vector<1x32x32xf32> to vector<32x32xf32>
    %312 = arith.truncf %311 : vector<32x32xf32> to vector<32x32xbf16>
    %313 = arith.truncf %309 : vector<32x512xf32> to vector<32x512xbf16>
    %cst_196 = arith.constant dense<0.000000e+00> : vector<32x512xf32>
    %314 = tpu.matmul %312, %313, %cst_196 {dimension_numbers = #tpu.dot_dimension_numbers<[1], [0], [0], [1], [0, 0, 1, 1], [], []>} : vector<32x32xbf16>, vector<32x512xbf16>, vector<32x512xf32> -> vector<32x512xf32>
    %315 = arith.addf %304, %314 : vector<32x512xf32>
    %c496_i32_197 = arith.constant 496 : i32
    %316 = tpu.dynamic_rotate %242 by %c496_i32_197 dim 1 : vector<32x512xf32>, i32 -> vector<32x512xf32>
    %c7_198 = arith.constant 7 : index
    %c0_199 = arith.constant 0 : index
    %c0_200 = arith.constant 0 : index
    %317 = vector.load %arg2[%c7_198, %c0_199, %c0_200] : memref<9x1x512xf32, #tpu.memory_space<vmem>>, vector<1x1x512xf32>
    %318 = vector.shape_cast %317 : vector<1x1x512xf32> to vector<1x512xf32>
    %319 = vector.broadcast %318 : vector<1x512xf32> to vector<32x512xf32>
    %320 = arith.mulf %316, %319 : vector<32x512xf32>
    %c7_201 = arith.constant 7 : index
    %c0_202 = arith.constant 0 : index
    %c0_203 = arith.constant 0 : index
    %321 = vector.load %arg5[%c7_201, %c0_202, %c0_203] : memref<9x32x32xf32, #tpu.memory_space<vmem>>, vector<1x32x32xf32>
    %322 = vector.shape_cast %321 : vector<1x32x32xf32> to vector<32x32xf32>
    %323 = arith.truncf %322 : vector<32x32xf32> to vector<32x32xbf16>
    %324 = arith.truncf %320 : vector<32x512xf32> to vector<32x512xbf16>
    %cst_204 = arith.constant dense<0.000000e+00> : vector<32x512xf32>
    %325 = tpu.matmul %323, %324, %cst_204 {dimension_numbers = #tpu.dot_dimension_numbers<[1], [0], [0], [1], [0, 0, 1, 1], [], []>} : vector<32x32xbf16>, vector<32x512xbf16>, vector<32x512xf32> -> vector<32x512xf32>
    %326 = arith.addf %315, %325 : vector<32x512xf32>
    %c495_i32_205 = arith.constant 495 : i32
    %327 = tpu.dynamic_rotate %242 by %c495_i32_205 dim 1 : vector<32x512xf32>, i32 -> vector<32x512xf32>
    %c8_206 = arith.constant 8 : index
    %c0_207 = arith.constant 0 : index
    %c0_208 = arith.constant 0 : index
    %328 = vector.load %arg2[%c8_206, %c0_207, %c0_208] : memref<9x1x512xf32, #tpu.memory_space<vmem>>, vector<1x1x512xf32>
    %329 = vector.shape_cast %328 : vector<1x1x512xf32> to vector<1x512xf32>
    %330 = vector.broadcast %329 : vector<1x512xf32> to vector<32x512xf32>
    %331 = arith.mulf %327, %330 : vector<32x512xf32>
    %c8_209 = arith.constant 8 : index
    %c0_210 = arith.constant 0 : index
    %c0_211 = arith.constant 0 : index
    %332 = vector.load %arg5[%c8_209, %c0_210, %c0_211] : memref<9x32x32xf32, #tpu.memory_space<vmem>>, vector<1x32x32xf32>
    %333 = vector.shape_cast %332 : vector<1x32x32xf32> to vector<32x32xf32>
    %334 = arith.truncf %333 : vector<32x32xf32> to vector<32x32xbf16>
    %335 = arith.truncf %331 : vector<32x512xf32> to vector<32x512xbf16>
    %cst_212 = arith.constant dense<0.000000e+00> : vector<32x512xf32>
    %336 = tpu.matmul %334, %335, %cst_212 {dimension_numbers = #tpu.dot_dimension_numbers<[1], [0], [0], [1], [0, 0, 1, 1], [], []>} : vector<32x32xbf16>, vector<32x512xbf16>, vector<32x512xf32> -> vector<32x512xf32>
    %337 = arith.addf %326, %336 : vector<32x512xf32>
    %c0_213 = arith.constant 0 : index
    %c0_214 = arith.constant 0 : index
    %338 = vector.load %arg10[%c0_213, %c0_214] : memref<32x1xf32, #tpu.memory_space<vmem>>, vector<32x1xf32>
    %339 = vector.broadcast %338 : vector<32x1xf32> to vector<32x512xf32>
    %340 = arith.addf %337, %339 : vector<32x512xf32>
    %cst_215 = arith.constant dense<0.000000e+00> : vector<32xf32>
    %341 = vector.multi_reduction <add>, %340, %cst_215 [1] : vector<32x512xf32> to vector<32xf32>
    %342 = vector.shape_cast %341 : vector<32xf32> to vector<32x1xf32>
    %cst_216 = arith.constant 5.120000e+02 : f32
    %343 = vector.broadcast %cst_216 : f32 to vector<32x1xf32>
    %344 = arith.divf %342, %343 : vector<32x1xf32>
    %345 = vector.broadcast %344 : vector<32x1xf32> to vector<32x512xf32>
    %346 = arith.subf %340, %345 : vector<32x512xf32>
    %347 = arith.mulf %346, %346 : vector<32x512xf32>
    %cst_217 = arith.constant dense<0.000000e+00> : vector<32xf32>
    %348 = vector.multi_reduction <add>, %347, %cst_217 [1] : vector<32x512xf32> to vector<32xf32>
    %349 = vector.shape_cast %348 : vector<32xf32> to vector<32x1xf32>
    %cst_218 = arith.constant 5.120000e+02 : f32
    %350 = vector.broadcast %cst_218 : f32 to vector<32x1xf32>
    %351 = arith.divf %349, %350 : vector<32x1xf32>
    %cst_219 = arith.constant 9.99999974E-6 : f32
    %352 = vector.broadcast %cst_219 : f32 to vector<32x1xf32>
    %353 = arith.addf %351, %352 : vector<32x1xf32>
    %354 = math.rsqrt %353 : vector<32x1xf32>
    %355 = vector.broadcast %354 : vector<32x1xf32> to vector<32x512xf32>
    %356 = arith.mulf %346, %355 : vector<32x512xf32>
    %cst_220 = arith.constant 0.000000e+00 : f32
    %357 = vector.broadcast %cst_220 : f32 to vector<32x512xf32>
    %358 = arith.cmpf oge, %356, %357 : vector<32x512xf32>
    %cst_221 = arith.constant 2.000000e-01 : f32
    %359 = vector.broadcast %cst_221 : f32 to vector<32x512xf32>
    %360 = arith.mulf %359, %356 : vector<32x512xf32>
    %361 = arith.select %358, %356, %360 : vector<32x512xi1>, vector<32x512xf32>
    %cst_222 = arith.constant 0.000000e+00 : f32
    %362 = vector.broadcast %cst_222 : f32 to vector<32x512xf32>
    %c17_i32_223 = arith.constant 17 : i32
    %363 = tpu.dynamic_rotate %361 by %c17_i32_223 dim 1 : vector<32x512xf32>, i32 -> vector<32x512xf32>
    %c0_224 = arith.constant 0 : index
    %c0_225 = arith.constant 0 : index
    %c0_226 = arith.constant 0 : index
    %364 = vector.load %arg2[%c0_224, %c0_225, %c0_226] : memref<9x1x512xf32, #tpu.memory_space<vmem>>, vector<1x1x512xf32>
    %365 = vector.shape_cast %364 : vector<1x1x512xf32> to vector<1x512xf32>
    %366 = vector.broadcast %365 : vector<1x512xf32> to vector<32x512xf32>
    %367 = arith.mulf %363, %366 : vector<32x512xf32>
    %c0_227 = arith.constant 0 : index
    %c0_228 = arith.constant 0 : index
    %c0_229 = arith.constant 0 : index
    %368 = vector.load %arg6[%c0_227, %c0_228, %c0_229] : memref<9x32x32xf32, #tpu.memory_space<vmem>>, vector<1x32x32xf32>
    %369 = vector.shape_cast %368 : vector<1x32x32xf32> to vector<32x32xf32>
    %370 = arith.truncf %369 : vector<32x32xf32> to vector<32x32xbf16>
    %371 = arith.truncf %367 : vector<32x512xf32> to vector<32x512xbf16>
    %cst_230 = arith.constant dense<0.000000e+00> : vector<32x512xf32>
    %372 = tpu.matmul %370, %371, %cst_230 {dimension_numbers = #tpu.dot_dimension_numbers<[1], [0], [0], [1], [0, 0, 1, 1], [], []>} : vector<32x32xbf16>, vector<32x512xbf16>, vector<32x512xf32> -> vector<32x512xf32>
    %373 = arith.addf %362, %372 : vector<32x512xf32>
    %c16_i32_231 = arith.constant 16 : i32
    %374 = tpu.dynamic_rotate %361 by %c16_i32_231 dim 1 : vector<32x512xf32>, i32 -> vector<32x512xf32>
    %c1_232 = arith.constant 1 : index
    %c0_233 = arith.constant 0 : index
    %c0_234 = arith.constant 0 : index
    %375 = vector.load %arg2[%c1_232, %c0_233, %c0_234] : memref<9x1x512xf32, #tpu.memory_space<vmem>>, vector<1x1x512xf32>
    %376 = vector.shape_cast %375 : vector<1x1x512xf32> to vector<1x512xf32>
    %377 = vector.broadcast %376 : vector<1x512xf32> to vector<32x512xf32>
    %378 = arith.mulf %374, %377 : vector<32x512xf32>
    %c1_235 = arith.constant 1 : index
    %c0_236 = arith.constant 0 : index
    %c0_237 = arith.constant 0 : index
    %379 = vector.load %arg6[%c1_235, %c0_236, %c0_237] : memref<9x32x32xf32, #tpu.memory_space<vmem>>, vector<1x32x32xf32>
    %380 = vector.shape_cast %379 : vector<1x32x32xf32> to vector<32x32xf32>
    %381 = arith.truncf %380 : vector<32x32xf32> to vector<32x32xbf16>
    %382 = arith.truncf %378 : vector<32x512xf32> to vector<32x512xbf16>
    %cst_238 = arith.constant dense<0.000000e+00> : vector<32x512xf32>
    %383 = tpu.matmul %381, %382, %cst_238 {dimension_numbers = #tpu.dot_dimension_numbers<[1], [0], [0], [1], [0, 0, 1, 1], [], []>} : vector<32x32xbf16>, vector<32x512xbf16>, vector<32x512xf32> -> vector<32x512xf32>
    %384 = arith.addf %373, %383 : vector<32x512xf32>
    %c15_i32_239 = arith.constant 15 : i32
    %385 = tpu.dynamic_rotate %361 by %c15_i32_239 dim 1 : vector<32x512xf32>, i32 -> vector<32x512xf32>
    %c2_240 = arith.constant 2 : index
    %c0_241 = arith.constant 0 : index
    %c0_242 = arith.constant 0 : index
    %386 = vector.load %arg2[%c2_240, %c0_241, %c0_242] : memref<9x1x512xf32, #tpu.memory_space<vmem>>, vector<1x1x512xf32>
    %387 = vector.shape_cast %386 : vector<1x1x512xf32> to vector<1x512xf32>
    %388 = vector.broadcast %387 : vector<1x512xf32> to vector<32x512xf32>
    %389 = arith.mulf %385, %388 : vector<32x512xf32>
    %c2_243 = arith.constant 2 : index
    %c0_244 = arith.constant 0 : index
    %c0_245 = arith.constant 0 : index
    %390 = vector.load %arg6[%c2_243, %c0_244, %c0_245] : memref<9x32x32xf32, #tpu.memory_space<vmem>>, vector<1x32x32xf32>
    %391 = vector.shape_cast %390 : vector<1x32x32xf32> to vector<32x32xf32>
    %392 = arith.truncf %391 : vector<32x32xf32> to vector<32x32xbf16>
    %393 = arith.truncf %389 : vector<32x512xf32> to vector<32x512xbf16>
    %cst_246 = arith.constant dense<0.000000e+00> : vector<32x512xf32>
    %394 = tpu.matmul %392, %393, %cst_246 {dimension_numbers = #tpu.dot_dimension_numbers<[1], [0], [0], [1], [0, 0, 1, 1], [], []>} : vector<32x32xbf16>, vector<32x512xbf16>, vector<32x512xf32> -> vector<32x512xf32>
    %395 = arith.addf %384, %394 : vector<32x512xf32>
    %c1_i32_247 = arith.constant 1 : i32
    %396 = tpu.dynamic_rotate %361 by %c1_i32_247 dim 1 : vector<32x512xf32>, i32 -> vector<32x512xf32>
    %c3_248 = arith.constant 3 : index
    %c0_249 = arith.constant 0 : index
    %c0_250 = arith.constant 0 : index
    %397 = vector.load %arg2[%c3_248, %c0_249, %c0_250] : memref<9x1x512xf32, #tpu.memory_space<vmem>>, vector<1x1x512xf32>
    %398 = vector.shape_cast %397 : vector<1x1x512xf32> to vector<1x512xf32>
    %399 = vector.broadcast %398 : vector<1x512xf32> to vector<32x512xf32>
    %400 = arith.mulf %396, %399 : vector<32x512xf32>
    %c3_251 = arith.constant 3 : index
    %c0_252 = arith.constant 0 : index
    %c0_253 = arith.constant 0 : index
    %401 = vector.load %arg6[%c3_251, %c0_252, %c0_253] : memref<9x32x32xf32, #tpu.memory_space<vmem>>, vector<1x32x32xf32>
    %402 = vector.shape_cast %401 : vector<1x32x32xf32> to vector<32x32xf32>
    %403 = arith.truncf %402 : vector<32x32xf32> to vector<32x32xbf16>
    %404 = arith.truncf %400 : vector<32x512xf32> to vector<32x512xbf16>
    %cst_254 = arith.constant dense<0.000000e+00> : vector<32x512xf32>
    %405 = tpu.matmul %403, %404, %cst_254 {dimension_numbers = #tpu.dot_dimension_numbers<[1], [0], [0], [1], [0, 0, 1, 1], [], []>} : vector<32x32xbf16>, vector<32x512xbf16>, vector<32x512xf32> -> vector<32x512xf32>
    %406 = arith.addf %395, %405 : vector<32x512xf32>
    %c4_255 = arith.constant 4 : index
    %c0_256 = arith.constant 0 : index
    %c0_257 = arith.constant 0 : index
    %407 = vector.load %arg6[%c4_255, %c0_256, %c0_257] : memref<9x32x32xf32, #tpu.memory_space<vmem>>, vector<1x32x32xf32>
    %408 = vector.shape_cast %407 : vector<1x32x32xf32> to vector<32x32xf32>
    %409 = arith.truncf %408 : vector<32x32xf32> to vector<32x32xbf16>
    %410 = arith.truncf %361 : vector<32x512xf32> to vector<32x512xbf16>
    %cst_258 = arith.constant dense<0.000000e+00> : vector<32x512xf32>
    %411 = tpu.matmul %409, %410, %cst_258 {dimension_numbers = #tpu.dot_dimension_numbers<[1], [0], [0], [1], [0, 0, 1, 1], [], []>} : vector<32x32xbf16>, vector<32x512xbf16>, vector<32x512xf32> -> vector<32x512xf32>
    %412 = arith.addf %406, %411 : vector<32x512xf32>
    %c511_i32_259 = arith.constant 511 : i32
    %413 = tpu.dynamic_rotate %361 by %c511_i32_259 dim 1 : vector<32x512xf32>, i32 -> vector<32x512xf32>
    %c5_260 = arith.constant 5 : index
    %c0_261 = arith.constant 0 : index
    %c0_262 = arith.constant 0 : index
    %414 = vector.load %arg2[%c5_260, %c0_261, %c0_262] : memref<9x1x512xf32, #tpu.memory_space<vmem>>, vector<1x1x512xf32>
    %415 = vector.shape_cast %414 : vector<1x1x512xf32> to vector<1x512xf32>
    %416 = vector.broadcast %415 : vector<1x512xf32> to vector<32x512xf32>
    %417 = arith.mulf %413, %416 : vector<32x512xf32>
    %c5_263 = arith.constant 5 : index
    %c0_264 = arith.constant 0 : index
    %c0_265 = arith.constant 0 : index
    %418 = vector.load %arg6[%c5_263, %c0_264, %c0_265] : memref<9x32x32xf32, #tpu.memory_space<vmem>>, vector<1x32x32xf32>
    %419 = vector.shape_cast %418 : vector<1x32x32xf32> to vector<32x32xf32>
    %420 = arith.truncf %419 : vector<32x32xf32> to vector<32x32xbf16>
    %421 = arith.truncf %417 : vector<32x512xf32> to vector<32x512xbf16>
    %cst_266 = arith.constant dense<0.000000e+00> : vector<32x512xf32>
    %422 = tpu.matmul %420, %421, %cst_266 {dimension_numbers = #tpu.dot_dimension_numbers<[1], [0], [0], [1], [0, 0, 1, 1], [], []>} : vector<32x32xbf16>, vector<32x512xbf16>, vector<32x512xf32> -> vector<32x512xf32>
    %423 = arith.addf %412, %422 : vector<32x512xf32>
    %c497_i32_267 = arith.constant 497 : i32
    %424 = tpu.dynamic_rotate %361 by %c497_i32_267 dim 1 : vector<32x512xf32>, i32 -> vector<32x512xf32>
    %c6_268 = arith.constant 6 : index
    %c0_269 = arith.constant 0 : index
    %c0_270 = arith.constant 0 : index
    %425 = vector.load %arg2[%c6_268, %c0_269, %c0_270] : memref<9x1x512xf32, #tpu.memory_space<vmem>>, vector<1x1x512xf32>
    %426 = vector.shape_cast %425 : vector<1x1x512xf32> to vector<1x512xf32>
    %427 = vector.broadcast %426 : vector<1x512xf32> to vector<32x512xf32>
    %428 = arith.mulf %424, %427 : vector<32x512xf32>
    %c6_271 = arith.constant 6 : index
    %c0_272 = arith.constant 0 : index
    %c0_273 = arith.constant 0 : index
    %429 = vector.load %arg6[%c6_271, %c0_272, %c0_273] : memref<9x32x32xf32, #tpu.memory_space<vmem>>, vector<1x32x32xf32>
    %430 = vector.shape_cast %429 : vector<1x32x32xf32> to vector<32x32xf32>
    %431 = arith.truncf %430 : vector<32x32xf32> to vector<32x32xbf16>
    %432 = arith.truncf %428 : vector<32x512xf32> to vector<32x512xbf16>
    %cst_274 = arith.constant dense<0.000000e+00> : vector<32x512xf32>
    %433 = tpu.matmul %431, %432, %cst_274 {dimension_numbers = #tpu.dot_dimension_numbers<[1], [0], [0], [1], [0, 0, 1, 1], [], []>} : vector<32x32xbf16>, vector<32x512xbf16>, vector<32x512xf32> -> vector<32x512xf32>
    %434 = arith.addf %423, %433 : vector<32x512xf32>
    %c496_i32_275 = arith.constant 496 : i32
    %435 = tpu.dynamic_rotate %361 by %c496_i32_275 dim 1 : vector<32x512xf32>, i32 -> vector<32x512xf32>
    %c7_276 = arith.constant 7 : index
    %c0_277 = arith.constant 0 : index
    %c0_278 = arith.constant 0 : index
    %436 = vector.load %arg2[%c7_276, %c0_277, %c0_278] : memref<9x1x512xf32, #tpu.memory_space<vmem>>, vector<1x1x512xf32>
    %437 = vector.shape_cast %436 : vector<1x1x512xf32> to vector<1x512xf32>
    %438 = vector.broadcast %437 : vector<1x512xf32> to vector<32x512xf32>
    %439 = arith.mulf %435, %438 : vector<32x512xf32>
    %c7_279 = arith.constant 7 : index
    %c0_280 = arith.constant 0 : index
    %c0_281 = arith.constant 0 : index
    %440 = vector.load %arg6[%c7_279, %c0_280, %c0_281] : memref<9x32x32xf32, #tpu.memory_space<vmem>>, vector<1x32x32xf32>
    %441 = vector.shape_cast %440 : vector<1x32x32xf32> to vector<32x32xf32>
    %442 = arith.truncf %441 : vector<32x32xf32> to vector<32x32xbf16>
    %443 = arith.truncf %439 : vector<32x512xf32> to vector<32x512xbf16>
    %cst_282 = arith.constant dense<0.000000e+00> : vector<32x512xf32>
    %444 = tpu.matmul %442, %443, %cst_282 {dimension_numbers = #tpu.dot_dimension_numbers<[1], [0], [0], [1], [0, 0, 1, 1], [], []>} : vector<32x32xbf16>, vector<32x512xbf16>, vector<32x512xf32> -> vector<32x512xf32>
    %445 = arith.addf %434, %444 : vector<32x512xf32>
    %c495_i32_283 = arith.constant 495 : i32
    %446 = tpu.dynamic_rotate %361 by %c495_i32_283 dim 1 : vector<32x512xf32>, i32 -> vector<32x512xf32>
    %c8_284 = arith.constant 8 : index
    %c0_285 = arith.constant 0 : index
    %c0_286 = arith.constant 0 : index
    %447 = vector.load %arg2[%c8_284, %c0_285, %c0_286] : memref<9x1x512xf32, #tpu.memory_space<vmem>>, vector<1x1x512xf32>
    %448 = vector.shape_cast %447 : vector<1x1x512xf32> to vector<1x512xf32>
    %449 = vector.broadcast %448 : vector<1x512xf32> to vector<32x512xf32>
    %450 = arith.mulf %446, %449 : vector<32x512xf32>
    %c8_287 = arith.constant 8 : index
    %c0_288 = arith.constant 0 : index
    %c0_289 = arith.constant 0 : index
    %451 = vector.load %arg6[%c8_287, %c0_288, %c0_289] : memref<9x32x32xf32, #tpu.memory_space<vmem>>, vector<1x32x32xf32>
    %452 = vector.shape_cast %451 : vector<1x32x32xf32> to vector<32x32xf32>
    %453 = arith.truncf %452 : vector<32x32xf32> to vector<32x32xbf16>
    %454 = arith.truncf %450 : vector<32x512xf32> to vector<32x512xbf16>
    %cst_290 = arith.constant dense<0.000000e+00> : vector<32x512xf32>
    %455 = tpu.matmul %453, %454, %cst_290 {dimension_numbers = #tpu.dot_dimension_numbers<[1], [0], [0], [1], [0, 0, 1, 1], [], []>} : vector<32x32xbf16>, vector<32x512xbf16>, vector<32x512xf32> -> vector<32x512xf32>
    %456 = arith.addf %445, %455 : vector<32x512xf32>
    %c0_291 = arith.constant 0 : index
    %c0_292 = arith.constant 0 : index
    %457 = vector.load %arg11[%c0_291, %c0_292] : memref<32x1xf32, #tpu.memory_space<vmem>>, vector<32x1xf32>
    %458 = vector.broadcast %457 : vector<32x1xf32> to vector<32x512xf32>
    %459 = arith.addf %456, %458 : vector<32x512xf32>
    %cst_293 = arith.constant dense<0.000000e+00> : vector<32xf32>
    %460 = vector.multi_reduction <add>, %459, %cst_293 [1] : vector<32x512xf32> to vector<32xf32>
    %461 = vector.shape_cast %460 : vector<32xf32> to vector<32x1xf32>
    %cst_294 = arith.constant 5.120000e+02 : f32
    %462 = vector.broadcast %cst_294 : f32 to vector<32x1xf32>
    %463 = arith.divf %461, %462 : vector<32x1xf32>
    %464 = vector.broadcast %463 : vector<32x1xf32> to vector<32x512xf32>
    %465 = arith.subf %459, %464 : vector<32x512xf32>
    %466 = arith.mulf %465, %465 : vector<32x512xf32>
    %cst_295 = arith.constant dense<0.000000e+00> : vector<32xf32>
    %467 = vector.multi_reduction <add>, %466, %cst_295 [1] : vector<32x512xf32> to vector<32xf32>
    %468 = vector.shape_cast %467 : vector<32xf32> to vector<32x1xf32>
    %cst_296 = arith.constant 5.120000e+02 : f32
    %469 = vector.broadcast %cst_296 : f32 to vector<32x1xf32>
    %470 = arith.divf %468, %469 : vector<32x1xf32>
    %cst_297 = arith.constant 9.99999974E-6 : f32
    %471 = vector.broadcast %cst_297 : f32 to vector<32x1xf32>
    %472 = arith.addf %470, %471 : vector<32x1xf32>
    %473 = math.rsqrt %472 : vector<32x1xf32>
    %474 = vector.broadcast %473 : vector<32x1xf32> to vector<32x512xf32>
    %475 = arith.mulf %465, %474 : vector<32x512xf32>
    %cst_298 = arith.constant 0.000000e+00 : f32
    %476 = vector.broadcast %cst_298 : f32 to vector<32x512xf32>
    %477 = arith.cmpf oge, %475, %476 : vector<32x512xf32>
    %cst_299 = arith.constant 2.000000e-01 : f32
    %478 = vector.broadcast %cst_299 : f32 to vector<32x512xf32>
    %479 = arith.mulf %478, %475 : vector<32x512xf32>
    %480 = arith.select %477, %475, %479 : vector<32x512xi1>, vector<32x512xf32>
    %cst_300 = arith.constant 0.000000e+00 : f32
    %481 = vector.broadcast %cst_300 : f32 to vector<3x512xf32>
    %c17_i32_301 = arith.constant 17 : i32
    %482 = tpu.dynamic_rotate %480 by %c17_i32_301 dim 1 : vector<32x512xf32>, i32 -> vector<32x512xf32>
    %c0_302 = arith.constant 0 : index
    %c0_303 = arith.constant 0 : index
    %c0_304 = arith.constant 0 : index
    %483 = vector.load %arg2[%c0_302, %c0_303, %c0_304] : memref<9x1x512xf32, #tpu.memory_space<vmem>>, vector<1x1x512xf32>
    %484 = vector.shape_cast %483 : vector<1x1x512xf32> to vector<1x512xf32>
    %485 = vector.broadcast %484 : vector<1x512xf32> to vector<32x512xf32>
    %486 = arith.mulf %482, %485 : vector<32x512xf32>
    %c0_305 = arith.constant 0 : index
    %c0_306 = arith.constant 0 : index
    %c0_307 = arith.constant 0 : index
    %487 = vector.load %arg7[%c0_305, %c0_306, %c0_307] : memref<9x3x32xf32, #tpu.memory_space<vmem>>, vector<1x3x32xf32>
    %488 = vector.shape_cast %487 : vector<1x3x32xf32> to vector<3x32xf32>
    %489 = arith.truncf %488 : vector<3x32xf32> to vector<3x32xbf16>
    %490 = arith.truncf %486 : vector<32x512xf32> to vector<32x512xbf16>
    %cst_308 = arith.constant dense<0.000000e+00> : vector<3x512xf32>
    %491 = tpu.matmul %489, %490, %cst_308 {dimension_numbers = #tpu.dot_dimension_numbers<[1], [0], [0], [1], [0, 0, 1, 1], [], []>} : vector<3x32xbf16>, vector<32x512xbf16>, vector<3x512xf32> -> vector<3x512xf32>
    %492 = arith.addf %481, %491 : vector<3x512xf32>
    %c16_i32_309 = arith.constant 16 : i32
    %493 = tpu.dynamic_rotate %480 by %c16_i32_309 dim 1 : vector<32x512xf32>, i32 -> vector<32x512xf32>
    %c1_310 = arith.constant 1 : index
    %c0_311 = arith.constant 0 : index
    %c0_312 = arith.constant 0 : index
    %494 = vector.load %arg2[%c1_310, %c0_311, %c0_312] : memref<9x1x512xf32, #tpu.memory_space<vmem>>, vector<1x1x512xf32>
    %495 = vector.shape_cast %494 : vector<1x1x512xf32> to vector<1x512xf32>
    %496 = vector.broadcast %495 : vector<1x512xf32> to vector<32x512xf32>
    %497 = arith.mulf %493, %496 : vector<32x512xf32>
    %c1_313 = arith.constant 1 : index
    %c0_314 = arith.constant 0 : index
    %c0_315 = arith.constant 0 : index
    %498 = vector.load %arg7[%c1_313, %c0_314, %c0_315] : memref<9x3x32xf32, #tpu.memory_space<vmem>>, vector<1x3x32xf32>
    %499 = vector.shape_cast %498 : vector<1x3x32xf32> to vector<3x32xf32>
    %500 = arith.truncf %499 : vector<3x32xf32> to vector<3x32xbf16>
    %501 = arith.truncf %497 : vector<32x512xf32> to vector<32x512xbf16>
    %cst_316 = arith.constant dense<0.000000e+00> : vector<3x512xf32>
    %502 = tpu.matmul %500, %501, %cst_316 {dimension_numbers = #tpu.dot_dimension_numbers<[1], [0], [0], [1], [0, 0, 1, 1], [], []>} : vector<3x32xbf16>, vector<32x512xbf16>, vector<3x512xf32> -> vector<3x512xf32>
    %503 = arith.addf %492, %502 : vector<3x512xf32>
    %c15_i32_317 = arith.constant 15 : i32
    %504 = tpu.dynamic_rotate %480 by %c15_i32_317 dim 1 : vector<32x512xf32>, i32 -> vector<32x512xf32>
    %c2_318 = arith.constant 2 : index
    %c0_319 = arith.constant 0 : index
    %c0_320 = arith.constant 0 : index
    %505 = vector.load %arg2[%c2_318, %c0_319, %c0_320] : memref<9x1x512xf32, #tpu.memory_space<vmem>>, vector<1x1x512xf32>
    %506 = vector.shape_cast %505 : vector<1x1x512xf32> to vector<1x512xf32>
    %507 = vector.broadcast %506 : vector<1x512xf32> to vector<32x512xf32>
    %508 = arith.mulf %504, %507 : vector<32x512xf32>
    %c2_321 = arith.constant 2 : index
    %c0_322 = arith.constant 0 : index
    %c0_323 = arith.constant 0 : index
    %509 = vector.load %arg7[%c2_321, %c0_322, %c0_323] : memref<9x3x32xf32, #tpu.memory_space<vmem>>, vector<1x3x32xf32>
    %510 = vector.shape_cast %509 : vector<1x3x32xf32> to vector<3x32xf32>
    %511 = arith.truncf %510 : vector<3x32xf32> to vector<3x32xbf16>
    %512 = arith.truncf %508 : vector<32x512xf32> to vector<32x512xbf16>
    %cst_324 = arith.constant dense<0.000000e+00> : vector<3x512xf32>
    %513 = tpu.matmul %511, %512, %cst_324 {dimension_numbers = #tpu.dot_dimension_numbers<[1], [0], [0], [1], [0, 0, 1, 1], [], []>} : vector<3x32xbf16>, vector<32x512xbf16>, vector<3x512xf32> -> vector<3x512xf32>
    %514 = arith.addf %503, %513 : vector<3x512xf32>
    %c1_i32_325 = arith.constant 1 : i32
    %515 = tpu.dynamic_rotate %480 by %c1_i32_325 dim 1 : vector<32x512xf32>, i32 -> vector<32x512xf32>
    %c3_326 = arith.constant 3 : index
    %c0_327 = arith.constant 0 : index
    %c0_328 = arith.constant 0 : index
    %516 = vector.load %arg2[%c3_326, %c0_327, %c0_328] : memref<9x1x512xf32, #tpu.memory_space<vmem>>, vector<1x1x512xf32>
    %517 = vector.shape_cast %516 : vector<1x1x512xf32> to vector<1x512xf32>
    %518 = vector.broadcast %517 : vector<1x512xf32> to vector<32x512xf32>
    %519 = arith.mulf %515, %518 : vector<32x512xf32>
    %c3_329 = arith.constant 3 : index
    %c0_330 = arith.constant 0 : index
    %c0_331 = arith.constant 0 : index
    %520 = vector.load %arg7[%c3_329, %c0_330, %c0_331] : memref<9x3x32xf32, #tpu.memory_space<vmem>>, vector<1x3x32xf32>
    %521 = vector.shape_cast %520 : vector<1x3x32xf32> to vector<3x32xf32>
    %522 = arith.truncf %521 : vector<3x32xf32> to vector<3x32xbf16>
    %523 = arith.truncf %519 : vector<32x512xf32> to vector<32x512xbf16>
    %cst_332 = arith.constant dense<0.000000e+00> : vector<3x512xf32>
    %524 = tpu.matmul %522, %523, %cst_332 {dimension_numbers = #tpu.dot_dimension_numbers<[1], [0], [0], [1], [0, 0, 1, 1], [], []>} : vector<3x32xbf16>, vector<32x512xbf16>, vector<3x512xf32> -> vector<3x512xf32>
    %525 = arith.addf %514, %524 : vector<3x512xf32>
    %c4_333 = arith.constant 4 : index
    %c0_334 = arith.constant 0 : index
    %c0_335 = arith.constant 0 : index
    %526 = vector.load %arg7[%c4_333, %c0_334, %c0_335] : memref<9x3x32xf32, #tpu.memory_space<vmem>>, vector<1x3x32xf32>
    %527 = vector.shape_cast %526 : vector<1x3x32xf32> to vector<3x32xf32>
    %528 = arith.truncf %527 : vector<3x32xf32> to vector<3x32xbf16>
    %529 = arith.truncf %480 : vector<32x512xf32> to vector<32x512xbf16>
    %cst_336 = arith.constant dense<0.000000e+00> : vector<3x512xf32>
    %530 = tpu.matmul %528, %529, %cst_336 {dimension_numbers = #tpu.dot_dimension_numbers<[1], [0], [0], [1], [0, 0, 1, 1], [], []>} : vector<3x32xbf16>, vector<32x512xbf16>, vector<3x512xf32> -> vector<3x512xf32>
    %531 = arith.addf %525, %530 : vector<3x512xf32>
    %c511_i32_337 = arith.constant 511 : i32
    %532 = tpu.dynamic_rotate %480 by %c511_i32_337 dim 1 : vector<32x512xf32>, i32 -> vector<32x512xf32>
    %c5_338 = arith.constant 5 : index
    %c0_339 = arith.constant 0 : index
    %c0_340 = arith.constant 0 : index
    %533 = vector.load %arg2[%c5_338, %c0_339, %c0_340] : memref<9x1x512xf32, #tpu.memory_space<vmem>>, vector<1x1x512xf32>
    %534 = vector.shape_cast %533 : vector<1x1x512xf32> to vector<1x512xf32>
    %535 = vector.broadcast %534 : vector<1x512xf32> to vector<32x512xf32>
    %536 = arith.mulf %532, %535 : vector<32x512xf32>
    %c5_341 = arith.constant 5 : index
    %c0_342 = arith.constant 0 : index
    %c0_343 = arith.constant 0 : index
    %537 = vector.load %arg7[%c5_341, %c0_342, %c0_343] : memref<9x3x32xf32, #tpu.memory_space<vmem>>, vector<1x3x32xf32>
    %538 = vector.shape_cast %537 : vector<1x3x32xf32> to vector<3x32xf32>
    %539 = arith.truncf %538 : vector<3x32xf32> to vector<3x32xbf16>
    %540 = arith.truncf %536 : vector<32x512xf32> to vector<32x512xbf16>
    %cst_344 = arith.constant dense<0.000000e+00> : vector<3x512xf32>
    %541 = tpu.matmul %539, %540, %cst_344 {dimension_numbers = #tpu.dot_dimension_numbers<[1], [0], [0], [1], [0, 0, 1, 1], [], []>} : vector<3x32xbf16>, vector<32x512xbf16>, vector<3x512xf32> -> vector<3x512xf32>
    %542 = arith.addf %531, %541 : vector<3x512xf32>
    %c497_i32_345 = arith.constant 497 : i32
    %543 = tpu.dynamic_rotate %480 by %c497_i32_345 dim 1 : vector<32x512xf32>, i32 -> vector<32x512xf32>
    %c6_346 = arith.constant 6 : index
    %c0_347 = arith.constant 0 : index
    %c0_348 = arith.constant 0 : index
    %544 = vector.load %arg2[%c6_346, %c0_347, %c0_348] : memref<9x1x512xf32, #tpu.memory_space<vmem>>, vector<1x1x512xf32>
    %545 = vector.shape_cast %544 : vector<1x1x512xf32> to vector<1x512xf32>
    %546 = vector.broadcast %545 : vector<1x512xf32> to vector<32x512xf32>
    %547 = arith.mulf %543, %546 : vector<32x512xf32>
    %c6_349 = arith.constant 6 : index
    %c0_350 = arith.constant 0 : index
    %c0_351 = arith.constant 0 : index
    %548 = vector.load %arg7[%c6_349, %c0_350, %c0_351] : memref<9x3x32xf32, #tpu.memory_space<vmem>>, vector<1x3x32xf32>
    %549 = vector.shape_cast %548 : vector<1x3x32xf32> to vector<3x32xf32>
    %550 = arith.truncf %549 : vector<3x32xf32> to vector<3x32xbf16>
    %551 = arith.truncf %547 : vector<32x512xf32> to vector<32x512xbf16>
    %cst_352 = arith.constant dense<0.000000e+00> : vector<3x512xf32>
    %552 = tpu.matmul %550, %551, %cst_352 {dimension_numbers = #tpu.dot_dimension_numbers<[1], [0], [0], [1], [0, 0, 1, 1], [], []>} : vector<3x32xbf16>, vector<32x512xbf16>, vector<3x512xf32> -> vector<3x512xf32>
    %553 = arith.addf %542, %552 : vector<3x512xf32>
    %c496_i32_353 = arith.constant 496 : i32
    %554 = tpu.dynamic_rotate %480 by %c496_i32_353 dim 1 : vector<32x512xf32>, i32 -> vector<32x512xf32>
    %c7_354 = arith.constant 7 : index
    %c0_355 = arith.constant 0 : index
    %c0_356 = arith.constant 0 : index
    %555 = vector.load %arg2[%c7_354, %c0_355, %c0_356] : memref<9x1x512xf32, #tpu.memory_space<vmem>>, vector<1x1x512xf32>
    %556 = vector.shape_cast %555 : vector<1x1x512xf32> to vector<1x512xf32>
    %557 = vector.broadcast %556 : vector<1x512xf32> to vector<32x512xf32>
    %558 = arith.mulf %554, %557 : vector<32x512xf32>
    %c7_357 = arith.constant 7 : index
    %c0_358 = arith.constant 0 : index
    %c0_359 = arith.constant 0 : index
    %559 = vector.load %arg7[%c7_357, %c0_358, %c0_359] : memref<9x3x32xf32, #tpu.memory_space<vmem>>, vector<1x3x32xf32>
    %560 = vector.shape_cast %559 : vector<1x3x32xf32> to vector<3x32xf32>
    %561 = arith.truncf %560 : vector<3x32xf32> to vector<3x32xbf16>
    %562 = arith.truncf %558 : vector<32x512xf32> to vector<32x512xbf16>
    %cst_360 = arith.constant dense<0.000000e+00> : vector<3x512xf32>
    %563 = tpu.matmul %561, %562, %cst_360 {dimension_numbers = #tpu.dot_dimension_numbers<[1], [0], [0], [1], [0, 0, 1, 1], [], []>} : vector<3x32xbf16>, vector<32x512xbf16>, vector<3x512xf32> -> vector<3x512xf32>
    %564 = arith.addf %553, %563 : vector<3x512xf32>
    %c495_i32_361 = arith.constant 495 : i32
    %565 = tpu.dynamic_rotate %480 by %c495_i32_361 dim 1 : vector<32x512xf32>, i32 -> vector<32x512xf32>
    %c8_362 = arith.constant 8 : index
    %c0_363 = arith.constant 0 : index
    %c0_364 = arith.constant 0 : index
    %566 = vector.load %arg2[%c8_362, %c0_363, %c0_364] : memref<9x1x512xf32, #tpu.memory_space<vmem>>, vector<1x1x512xf32>
    %567 = vector.shape_cast %566 : vector<1x1x512xf32> to vector<1x512xf32>
    %568 = vector.broadcast %567 : vector<1x512xf32> to vector<32x512xf32>
    %569 = arith.mulf %565, %568 : vector<32x512xf32>
    %c8_365 = arith.constant 8 : index
    %c0_366 = arith.constant 0 : index
    %c0_367 = arith.constant 0 : index
    %570 = vector.load %arg7[%c8_365, %c0_366, %c0_367] : memref<9x3x32xf32, #tpu.memory_space<vmem>>, vector<1x3x32xf32>
    %571 = vector.shape_cast %570 : vector<1x3x32xf32> to vector<3x32xf32>
    %572 = arith.truncf %571 : vector<3x32xf32> to vector<3x32xbf16>
    %573 = arith.truncf %569 : vector<32x512xf32> to vector<32x512xbf16>
    %cst_368 = arith.constant dense<0.000000e+00> : vector<3x512xf32>
    %574 = tpu.matmul %572, %573, %cst_368 {dimension_numbers = #tpu.dot_dimension_numbers<[1], [0], [0], [1], [0, 0, 1, 1], [], []>} : vector<3x32xbf16>, vector<32x512xbf16>, vector<3x512xf32> -> vector<3x512xf32>
    %575 = arith.addf %564, %574 : vector<3x512xf32>
    %c0_369 = arith.constant 0 : index
    %c0_370 = arith.constant 0 : index
    %576 = vector.load %arg12[%c0_369, %c0_370] : memref<3x1xf32, #tpu.memory_space<vmem>>, vector<3x1xf32>
    %577 = vector.broadcast %576 : vector<3x1xf32> to vector<3x512xf32>
    %578 = arith.addf %575, %577 : vector<3x512xf32>
    %579 = math.tanh %578 : vector<3x512xf32>
    %580 = vector.extract_strided_slice %579 {offsets = [0, 0], sizes = [3, 256], strides = [1, 1]} : vector<3x512xf32> to vector<3x256xf32>
    %c0_371 = arith.constant 0 : index
    %c0_372 = arith.constant 0 : index
    %c0_373 = arith.constant 0 : index
    %581 = vector.load %arg1[%c0_371, %c0_372, %c0_373] : memref<2x3x256xf32, #tpu.memory_space<vmem>>, vector<1x3x256xf32>
    %582 = vector.shape_cast %581 : vector<1x3x256xf32> to vector<3x256xf32>
    %583 = arith.addf %580, %582 : vector<3x256xf32>
    %c0_374 = arith.constant 0 : index
    %c0_375 = arith.constant 0 : index
    %c0_376 = arith.constant 0 : index
    %584 = vector.load %arg13[%c0_374, %c0_375, %c0_376] : memref<2x3x256xf32, #tpu.memory_space<vmem>>, vector<1x3x256xf32>
    %585 = vector.shape_cast %584 : vector<1x3x256xf32> to vector<3x256xf32>
    %586 = vector.shape_cast %583 : vector<3x256xf32> to vector<1x3x256xf32>
    tpu.vector_store %arg13[%c0_374, %c0_375, %c0_376], %586 {strides = array<i32>} : memref<2x3x256xf32, #tpu.memory_space<vmem>>, vector<1x3x256xf32>,
    %587 = vector.extract_strided_slice %579 {offsets = [0, 256], sizes = [3, 256], strides = [1, 1]} : vector<3x512xf32> to vector<3x256xf32>
    %c1_377 = arith.constant 1 : index
    %c0_378 = arith.constant 0 : index
    %c0_379 = arith.constant 0 : index
    %588 = vector.load %arg1[%c1_377, %c0_378, %c0_379] : memref<2x3x256xf32, #tpu.memory_space<vmem>>, vector<1x3x256xf32>
    %589 = vector.shape_cast %588 : vector<1x3x256xf32> to vector<3x256xf32>
    %590 = arith.addf %587, %589 : vector<3x256xf32>
    %c1_380 = arith.constant 1 : index
    %c0_381 = arith.constant 0 : index
    %c0_382 = arith.constant 0 : index
    %591 = vector.load %arg13[%c1_380, %c0_381, %c0_382] : memref<2x3x256xf32, #tpu.memory_space<vmem>>, vector<1x3x256xf32>
    %592 = vector.shape_cast %591 : vector<1x3x256xf32> to vector<3x256xf32>
    %593 = vector.shape_cast %590 : vector<3x256xf32> to vector<1x3x256xf32>
    tpu.vector_store %arg13[%c1_380, %c0_381, %c0_382], %593 {strides = array<i32>} : memref<2x3x256xf32, #tpu.memory_space<vmem>>, vector<1x3x256xf32>,
    return
  }
}

</mosaic_0001>

<bundles_post_ra>
// kernel: tpu_custom_call.1
= control target key start
LH: loop header
LB: loop body
LE: loop exit
PB: predicated region body
PF: predicated region fallthrough
CT: control target
= control target key end

     0   :  { %18 = vsyncpa [#allocation3], 0  ;;  %s15489_s0 = inlined_call_operand.hbm [shape: f32[2,3,256], index: 0, kind: input, shape index: {}]   ;;  %s15490_s1 = inlined_call_operand.hbm [shape: f32[2,3,256], index: 1, kind: input, shape index: {}]   ;;  %s15491_s2 = inlined_call_operand.hbm [shape: f32[9,1,512], index: 2, kind: input, shape index: {}]   ;;  %s15492_s3 = inlined_call_operand.hbm [shape: f32[9,32,3], index: 3, kind: input, shape index: {}]   ;;  %s15493_s4 = inlined_call_operand.hbm [shape: f32[9,32,32], index: 4, kind: input, shape index: {}]   ;;  %s15494_s5 = inlined_call_operand.hbm [shape: f32[9,32,32], index: 5, kind: input, shape index: {}]   ;;  %s15495_s6 = inlined_call_operand.hbm [shape: f32[9,32,32], index: 6, kind: input, shape index: {}]   ;;  %s15496_s7 = inlined_call_operand.hbm [shape: f32[9,3,32], index: 7, kind: input, shape index: {}]   ;;  %s15497_s8 = inlined_call_operand.hbm [shape: f32[32,1], index: 8, kind: input, shape index: {}]   ;;  %s15498_s9 = inlined_call_operand.hbm [shape: f32[32,1], index: 9, kind: input, shape index: {}]   ;;  %s15499_s10 = inlined_call_operand.hbm [shape: f32[32,1], index: 10, kind: input, shape index: {}]   ;;  %s15500_s11 = inlined_call_operand.hbm [shape: f32[32,1], index: 11, kind: input, shape index: {}]   ;;  %s15501_s12 = inlined_call_operand.hbm [shape: f32[3,1], index: 12, kind: input, shape index: {}]   ;;  %s15502_s13 = inlined_call_operand.hbm [shape: f32[2,3,256], index: 13, kind: output, shape index: {}]  }
   0x1   :  { %19 = vsyncpa [#allocation6], 0 }
   0x2   :  { %20 = vsyncpa [#allocation9], 0 }
   0x3   :  { %21 = vsyncpa [#allocation12], 0 }
   0x4   :  { %22 = vsyncpa [#allocation15], 0 }
   0x5   :  { %23 = vsyncpa [#allocation18], 0 }
   0x6   :  { %24 = vsyncpa [#allocation21], 0 }
   0x7   :  { %25 = vsyncpa [#allocation4], 0  ;;  %s10485_s25 = smov [#allocation5]   ;;  %s10486_s27 = smov [#allocation8]  }
   0x8   :  { %s43_s26 = sshll.u32 %s10485_s25, 4  ;;  %s67_s28 = sshll.u32 %s10486_s27, 4  ;;  %s44_s26 = int_to_ptr.vmem [resolvable:$true] %s43_s26  ;;  %s10583_s28 = int_to_ptr.vmem [resolvable:$true] %s67_s28 }
   0x9   :  { %s10161_s14 = scalar_lea.hbm %s15490_s1, 256 }
   0xa   :  { %p10162_p0 = scmp.ne.s32.totalorder %s15490_s1, %s10161_s14  ;;  %p10165_p1 = scmp.lt.u32.totalorder %s10161_s14, %s15490_s1 }
   0xc   :  { %p10167_p2 = pnand %p10165_p1, %p10162_p0 }
   0xe   :  { %10170 = shalt.err (!%p10167_p2)
}
   0xf   :  { %s10171_s19 = scalar_lea.vmem %s44_s26, 256  ;;  %p10176_p4 = scmp.lt.s32.totalorder %s44_s26, %s44_s26 }
  0x10   :  { %p10172_p3 = scmp.ne.s32.totalorder %s44_s26, %s10171_s19  ;;  %p10177_p5 = scmp.lt.s32.totalorder %s10171_s19, %s10171_s19 }
  0x12   :  { %p10178_p6 = por %p10177_p5, %p10176_p4 }
  0x14   :  { %p10179_p7 = pnand %p10178_p6, %p10172_p3 }
  0x16   :  { %10182 = shalt.err (!%p10179_p7)
}
  0x17   :  { %s10487_s20 = smov 128   ;;  %s10488_s21 = smov 8  }
  0x18   :  { %49 = dma.hbm_to_vmem [thread:$0]  %s15490_s1, 256, %s44_s26, [#allocation6], %s10487_s20, %s10487_s20, %s10488_s21  }
  0x19   :  { %s10183_s27 = scalar_lea.hbm %s15492_s3, 4608 }
  0x1a   :  { %p10184_p8 = scmp.ne.s32.totalorder %s15492_s3, %s10183_s27  ;;  %p10187_p9 = scmp.lt.u32.totalorder %s10183_s27, %s15492_s3 }
  0x1c   :  { %p10189_p10 = pnand %p10187_p9, %p10184_p8 }
  0x1e   :  { %10192 = shalt.err (!%p10189_p10)
}
  0x1f   :  { %s10193_s16 = scalar_lea.vmem %s10583_s28, 4608  ;;  %p10198_p12 = scmp.lt.s32.totalorder %s10583_s28, %s10583_s28 }
  0x20   :  { %p10194_p11 = scmp.ne.s32.totalorder %s10583_s28, %s10193_s16  ;;  %p10199_p13 = scmp.lt.s32.totalorder %s10193_s16, %s10193_s16 }
  0x22   :  { %p10200_p0 = por %p10199_p13, %p10198_p12 }
  0x24   :  { %p10201_p1 = pnand %p10200_p0, %p10194_p11 }
  0x26   :  { %10204 = shalt.err (!%p10201_p1)
}
  0x27   :  { %73 = dma.hbm_to_vmem [thread:$0]  %s15492_s3, 4608, %s10583_s28, [#allocation9], %s10487_s20, %s10487_s20, %s10488_s21  }
  0x28   :  { %s10489_s17 = smov [#allocation11]   ;;  %s10205_s23 = scalar_lea.hbm %s15494_s5, 4608 }
  0x29   :  { %s91_s18 = sshll.u32 %s10489_s17, 4  ;;  %p10206_p2 = scmp.ne.s32.totalorder %s15494_s5, %s10205_s23  ;;  %s92_s18 = int_to_ptr.vmem [resolvable:$true] %s91_s18 }
  0x2a   :  { %p10209_p3 = scmp.lt.u32.totalorder %s10205_s23, %s15494_s5 }
  0x2c   :  { %p10211_p4 = pnand %p10209_p3, %p10206_p2 }
  0x2e   :  { %10214 = shalt.err (!%p10211_p4)
}
  0x2f   :  { %s10215_s30 = scalar_lea.vmem %s92_s18, 4608  ;;  %p10220_p6 = scmp.lt.s32.totalorder %s92_s18, %s92_s18 }
  0x30   :  { %p10216_p5 = scmp.ne.s32.totalorder %s92_s18, %s10215_s30  ;;  %p10221_p7 = scmp.lt.s32.totalorder %s10215_s30, %s10215_s30 }
  0x32   :  { %p10222_p8 = por %p10221_p7, %p10220_p6 }
  0x34   :  { %p10223_p9 = pnand %p10222_p8, %p10216_p5 }
  0x36   :  { %10226 = shalt.err (!%p10223_p9)
}
  0x37   :  { %97 = dma.hbm_to_vmem [thread:$0]  %s15494_s5, 4608, %s92_s18, [#allocation12], %s10487_s20, %s10487_s20, %s10488_s21  }
  0x38   :  { %s10490_s14 = smov [#allocation14]   ;;  %s10491_s16 = smov [#allocation17]  }
  0x39   :  { %s115_s15 = sshll.u32 %s10490_s14, 4  ;;  %s139_s1 = sshll.u32 %s10491_s16, 4  ;;  %s116_s15 = int_to_ptr.vmem [resolvable:$true] %s115_s15  ;;  %s140_s1 = int_to_ptr.vmem [resolvable:$true] %s139_s1 }
  0x3a   :  { %s10227_s19 = scalar_lea.hbm %s15496_s7, 576 }
  0x3b   :  { %p10228_p10 = scmp.ne.s32.totalorder %s15496_s7, %s10227_s19  ;;  %p10231_p11 = scmp.lt.u32.totalorder %s10227_s19, %s15496_s7 }
  0x3d   :  { %p10233_p12 = pnand %p10231_p11, %p10228_p10 }
  0x3f   :  { %10236 = shalt.err (!%p10233_p12)
}
  0x40   :  { %s10237_s5 = scalar_lea.vmem %s116_s15, 576  ;;  %p10242_p0 = scmp.lt.s32.totalorder %s116_s15, %s116_s15 }
  0x41   :  { %p10238_p13 = scmp.ne.s32.totalorder %s116_s15, %s10237_s5  ;;  %p10243_p1 = scmp.lt.s32.totalorder %s10237_s5, %s10237_s5 }
  0x43   :  { %p10244_p2 = por %p10243_p1, %p10242_p0 }
  0x45   :  { %p10245_p3 = pnand %p10244_p2, %p10238_p13 }
  0x47   :  { %10248 = shalt.err (!%p10245_p3)
}
  0x48   :  { %s10492_s18 = smov 64   ;;  %s10493_s27 = smov 4  }
  0x49   :  { %121 = dma.hbm_to_vmem [thread:$0]  %s15496_s7, 576, %s116_s15, [#allocation15], %s10492_s18, %s10492_s18, %s10493_s27  }
  0x4a   :  { %s10249_s14 = scalar_lea.hbm %s15498_s9, 512 }
  0x4b   :  { %p10250_p4 = scmp.ne.s32.totalorder %s15498_s9, %s10249_s14  ;;  %p10253_p5 = scmp.lt.u32.totalorder %s10249_s14, %s15498_s9 }
  0x4d   :  { %p10255_p6 = pnand %p10253_p5, %p10250_p4 }
  0x4f   :  { %10258 = shalt.err (!%p10255_p6)
}
  0x50   :  { %s10259_s22 = scalar_lea.vmem %s140_s1, 512  ;;  %p10264_p8 = scmp.lt.s32.totalorder %s140_s1, %s140_s1 }
  0x51   :  { %p10260_p7 = scmp.ne.s32.totalorder %s140_s1, %s10259_s22  ;;  %p10265_p9 = scmp.lt.s32.totalorder %s10259_s22, %s10259_s22 }
  0x53   :  { %p10266_p10 = por %p10265_p9, %p10264_p8 }
  0x55   :  { %p10267_p11 = pnand %p10266_p10, %p10260_p7 }
  0x57   :  { %10270 = shalt.err (!%p10267_p11)
}
  0x58   :  { %145 = dma.hbm_to_vmem [thread:$0]  %s15498_s9, 512, %s140_s1, [#allocation18], %s10487_s20, %s10487_s20, %s10488_s21  }
  0x59   :  { %s10494_s23 = smov [#allocation20]   ;;  %s10495_s25 = smov [#allocation2]  }
  0x5a   :  { %s163_s24 = sshll.u32 %s10494_s23, 4  ;;  %s31_s5 = sshll.u32 %s10495_s25, 4  ;;  %s164_s24 = int_to_ptr.vmem [resolvable:$true] %s163_s24  ;;  %s32_s5 = int_to_ptr.vmem [resolvable:$true] %s31_s5 }
  0x5b   :  { %s10271_s3 = scalar_lea.hbm %s15500_s11, 512 }
  0x5c   :  { %p10272_p12 = scmp.ne.s32.totalorder %s15500_s11, %s10271_s3  ;;  %p10275_p13 = scmp.lt.u32.totalorder %s10271_s3, %s15500_s11 }
  0x5e   :  { %p10277_p0 = pnand %p10275_p13, %p10272_p12 }
  0x60   :  { %10280 = shalt.err (!%p10277_p0)
}
  0x61   :  { %s10281_s9 = scalar_lea.vmem %s164_s24, 512  ;;  %p10286_p2 = scmp.lt.s32.totalorder %s164_s24, %s164_s24 }
  0x62   :  { %p10282_p1 = scmp.ne.s32.totalorder %s164_s24, %s10281_s9  ;;  %p10287_p3 = scmp.lt.s32.totalorder %s10281_s9, %s10281_s9 }
  0x64   :  { %p10288_p4 = por %p10287_p3, %p10286_p2 }
  0x66   :  { %p10289_p5 = pnand %p10288_p4, %p10282_p1 }
  0x68   :  { %10292 = shalt.err (!%p10289_p5)
}
  0x69   :  { %169 = dma.hbm_to_vmem [thread:$0]  %s15500_s11, 512, %s164_s24, [#allocation21], %s10487_s20, %s10487_s20, %s10488_s21  }
  0x6a   :  { %s10293_s7 = scalar_lea.hbm %s15489_s0, 256 }
  0x6b   :  { %p10294_p6 = scmp.ne.s32.totalorder %s15489_s0, %s10293_s7  ;;  %p10297_p7 = scmp.lt.u32.totalorder %s10293_s7, %s15489_s0 }
  0x6d   :  { %p10299_p8 = pnand %p10297_p7, %p10294_p6 }
  0x6f   :  { %10302 = shalt.err (!%p10299_p8)
}
  0x70   :  { %s10303_s30 = scalar_lea.vmem %s32_s5, 256  ;;  %p10308_p10 = scmp.lt.s32.totalorder %s32_s5, %s32_s5 }
  0x71   :  { %p10304_p9 = scmp.ne.s32.totalorder %s32_s5, %s10303_s30  ;;  %p10309_p11 = scmp.lt.s32.totalorder %s10303_s30, %s10303_s30 }
  0x73   :  { %p10310_p12 = por %p10309_p11, %p10308_p10 }
  0x75   :  { %p10311_p13 = pnand %p10310_p12, %p10304_p9 }
  0x77   :  { %10314 = shalt.err (!%p10311_p13)
}
  0x78   :  { %37 = dma.hbm_to_vmem [thread:$0]  %s15489_s0, 256, %s32_s5, [#allocation3], %s10487_s20, %s10487_s20, %s10488_s21  }
  0x79   :  { %s10496_s3 = smov [#allocation7]   ;;  %s10497_s14 = smov [#allocation10]  }
  0x7a   :  { %s55_s28 = sshll.u32 %s10496_s3, 4  ;;  %s79_s16 = sshll.u32 %s10497_s14, 4  ;;  %s56_s28 = int_to_ptr.vmem [resolvable:$true] %s55_s28  ;;  %s80_s16 = int_to_ptr.vmem [resolvable:$true] %s79_s16 }
  0x7b   :  { %s10315_s1 = scalar_lea.hbm %s15491_s2, 576 }
  0x7c   :  { %p10316_p0 = scmp.ne.s32.totalorder %s15491_s2, %s10315_s1  ;;  %p10319_p1 = scmp.lt.u32.totalorder %s10315_s1, %s15491_s2 }
  0x7e   :  { %p10321_p2 = pnand %p10319_p1, %p10316_p0 }
  0x80   :  { %10324 = shalt.err (!%p10321_p2)
}
  0x81   :  { %s10325_s0 = scalar_lea.vmem %s56_s28, 576  ;;  %p10330_p4 = scmp.lt.s32.totalorder %s56_s28, %s56_s28 }
  0x82   :  { %p10326_p3 = scmp.ne.s32.totalorder %s56_s28, %s10325_s0  ;;  %p10331_p5 = scmp.lt.s32.totalorder %s10325_s0, %s10325_s0 }
  0x84   :  { %p10332_p6 = por %p10331_p5, %p10330_p4 }
  0x86   :  { %p10333_p7 = pnand %p10332_p6, %p10326_p3 }
  0x88   :  { %10336 = shalt.err (!%p10333_p7)
}
  0x89   :  { %61 = dma.hbm_to_vmem [thread:$0]  %s15491_s2, 576, %s56_s28, [#allocation6], %s10492_s18, %s10492_s18, %s10493_s27  }
  0x8a   :  { %s10337_s29 = scalar_lea.hbm %s15493_s4, 4608 }
  0x8b   :  { %p10338_p8 = scmp.ne.s32.totalorder %s15493_s4, %s10337_s29  ;;  %p10341_p9 = scmp.lt.u32.totalorder %s10337_s29, %s15493_s4 }
  0x8d   :  { %p10343_p10 = pnand %p10341_p9, %p10338_p8 }
  0x8f   :  { %10346 = shalt.err (!%p10343_p10)
}
  0x90   :  { %s10347_s14 = scalar_lea.vmem %s80_s16, 4608  ;;  %p10352_p12 = scmp.lt.s32.totalorder %s80_s16, %s80_s16 }
  0x91   :  { %p10348_p11 = scmp.ne.s32.totalorder %s80_s16, %s10347_s14  ;;  %p10353_p13 = scmp.lt.s32.totalorder %s10347_s14, %s10347_s14 }
  0x93   :  { %p10354_p0 = por %p10353_p13, %p10352_p12 }
  0x95   :  { %p10355_p1 = pnand %p10354_p0, %p10348_p11 }
  0x97   :  { %10358 = shalt.err (!%p10355_p1)
}
  0x98   :  { %85 = dma.hbm_to_vmem [thread:$0]  %s15493_s4, 4608, %s80_s16, [#allocation9], %s10487_s20, %s10487_s20, %s10488_s21  }
  0x99   :  { %s10498_s27 = smov [#allocation13]   ;;  %s10499_s26 = smov [#allocation16]  }
  0x9a   :  { %s103_s28 = sshll.u32 %s10498_s27, 4  ;;  %s127_s9 = sshll.u32 %s10499_s26, 4  ;;  %s104_s28 = int_to_ptr.vmem [resolvable:$true] %s103_s28  ;;  %s128_s9 = int_to_ptr.vmem [resolvable:$true] %s127_s9 }
  0x9b   :  { %s10359_s19 = scalar_lea.hbm %s15495_s6, 4608 }
  0x9c   :  { %p10360_p2 = scmp.ne.s32.totalorder %s15495_s6, %s10359_s19  ;;  %p10363_p3 = scmp.lt.u32.totalorder %s10359_s19, %s15495_s6 }
  0x9e   :  { %p10365_p4 = pnand %p10363_p3, %p10360_p2 }
  0xa0   :  { %10368 = shalt.err (!%p10365_p4)
}
  0xa1   :  { %s10369_s4 = scalar_lea.vmem %s104_s28, 4608  ;;  %p10374_p6 = scmp.lt.s32.totalorder %s104_s28, %s104_s28 }
  0xa2   :  { %p10370_p5 = scmp.ne.s32.totalorder %s104_s28, %s10369_s4  ;;  %p10375_p7 = scmp.lt.s32.totalorder %s10369_s4, %s10369_s4 }
  0xa4   :  { %p10376_p8 = por %p10375_p7, %p10374_p6 }
  0xa6   :  { %p10377_p9 = pnand %p10376_p8, %p10370_p5 }
  0xa8   :  { %10380 = shalt.err (!%p10377_p9)
}
  0xa9   :  { %109 = dma.hbm_to_vmem [thread:$0]  %s15495_s6, 4608, %s104_s28, [#allocation12], %s10487_s20, %s10487_s20, %s10488_s21  }
  0xaa   :  { %s10381_s29 = scalar_lea.hbm %s15497_s8, 512 }
  0xab   :  { %p10382_p10 = scmp.ne.s32.totalorder %s15497_s8, %s10381_s29  ;;  %p10385_p11 = scmp.lt.u32.totalorder %s10381_s29, %s15497_s8 }
  0xad   :  { %p10387_p12 = pnand %p10385_p11, %p10382_p10 }
  0xaf   :  { %10390 = shalt.err (!%p10387_p12)
}
  0xb0   :  { %s10391_s14 = scalar_lea.vmem %s128_s9, 512  ;;  %p10396_p0 = scmp.lt.s32.totalorder %s128_s9, %s128_s9 }
  0xb1   :  { %p10392_p13 = scmp.ne.s32.totalorder %s128_s9, %s10391_s14  ;;  %p10397_p1 = scmp.lt.s32.totalorder %s10391_s14, %s10391_s14 }
  0xb3   :  { %p10398_p2 = por %p10397_p1, %p10396_p0 }
  0xb5   :  { %p10399_p3 = pnand %p10398_p2, %p10392_p13 }
  0xb7   :  { %10402 = shalt.err (!%p10399_p3)
}
  0xb8   :  { %133 = dma.hbm_to_vmem [thread:$0]  %s15497_s8, 512, %s128_s9, [#allocation15], %s10487_s20, %s10487_s20, %s10488_s21  }
  0xb9   :  { %s10500_s18 = smov [#allocation19]   ;;  %s10501_s28 = smov [#allocation22]  }
  0xba   :  { %s151_s27 = sshll.u32 %s10500_s18, 4  ;;  %s176_s26 = sshll.u32 %s10501_s28, 4  ;;  %s152_s27 = int_to_ptr.vmem [resolvable:$true] %s151_s27  ;;  %s177_s26 = int_to_ptr.vmem [resolvable:$true] %s176_s26 }
  0xbb   :  { %s10403_s19 = scalar_lea.hbm %s15499_s10, 512 }
  0xbc   :  { %p10404_p4 = scmp.ne.s32.totalorder %s15499_s10, %s10403_s19  ;;  %p10407_p5 = scmp.lt.u32.totalorder %s10403_s19, %s15499_s10 }
  0xbe   :  { %p10409_p6 = pnand %p10407_p5, %p10404_p4 }
  0xc0   :  { %10412 = shalt.err (!%p10409_p6)
}
  0xc1   :  { %s10413_s8 = scalar_lea.vmem %s152_s27, 512  ;;  %p10418_p8 = scmp.lt.s32.totalorder %s152_s27, %s152_s27 }
  0xc2   :  { %p10414_p7 = scmp.ne.s32.totalorder %s152_s27, %s10413_s8  ;;  %p10419_p9 = scmp.lt.s32.totalorder %s10413_s8, %s10413_s8 }
  0xc4   :  { %p10420_p10 = por %p10419_p9, %p10418_p8 }
  0xc6   :  { %p10421_p11 = pnand %p10420_p10, %p10414_p7 }
  0xc8   :  { %10424 = shalt.err (!%p10421_p11)
}
  0xc9   :  { %157 = dma.hbm_to_vmem [thread:$0]  %s15499_s10, 512, %s152_s27, [#allocation18], %s10487_s20, %s10487_s20, %s10488_s21  }
  0xca   :  { %s10425_s23 = scalar_lea.hbm %s15501_s12, 64 }
  0xcb   :  { %p10426_p12 = scmp.ne.s32.totalorder %s15501_s12, %s10425_s23  ;;  %p10429_p13 = scmp.lt.u32.totalorder %s10425_s23, %s15501_s12 }
  0xcd   :  { %p10431_p0 = pnand %p10429_p13, %p10426_p12 }
  0xcf   :  { %10434 = shalt.err (!%p10431_p0)
}
  0xd0   :  { %s10435_s24 = scalar_lea.vmem %s177_s26, 64  ;;  %p10440_p2 = scmp.lt.s32.totalorder %s177_s26, %s177_s26 }
  0xd1   :  { %p10436_p1 = scmp.ne.s32.totalorder %s177_s26, %s10435_s24  ;;  %p10441_p3 = scmp.lt.s32.totalorder %s10435_s24, %s10435_s24 }
  0xd3   :  { %p10442_p4 = por %p10441_p3, %p10440_p2 }
  0xd5   :  { %p10443_p5 = pnand %p10442_p4, %p10436_p1 }
  0xd7   :  { %10446 = shalt.err (!%p10443_p5)
}
  0xd8   :  { %179 = dma.hbm_to_vmem [thread:$0]  %s15501_s12, 64, %s177_s26, [#allocation21]  }
  0xd9   :  { %10469 = dma.done.wait [#allocation3], 256  }
  0xda   :  { %10470 = vsyncadd [#allocation3], 4294967040 }
  0xdb   :  { %10471 = dma.done.wait [#allocation6], 832  }
  0xdc   :  { %10472 = vsyncadd [#allocation6], 4294966464 }
  0xdd   :  { %10473 = dma.done.wait [#allocation9], 9216  }
  0xde   :  { %10474 = vsyncadd [#allocation9], 4294958080 }
  0xdf   :  { %10475 = dma.done.wait [#allocation12], 9216  }
  0xe0   :  { %10476 = vsyncadd [#allocation12], 4294958080 }
  0xe1   :  { %10477 = dma.done.wait [#allocation15], 1088  }
  0xe2   :  { %10478 = vsyncadd [#allocation15], 4294966208 }
  0xe3   :  { %10479 = dma.done.wait [#allocation18], 1024  }
  0xe4   :  { %10480 = vsyncadd [#allocation18], 4294966272 }
  0xe5   :  { %10481 = dma.done.wait [#allocation21], 576  }
  0xe6   :  { %10482 = vsyncadd [#allocation21], 4294966720  ;;  %v10782_v0 = vld [vmem:[#allocation2] sm:$0x77]  ;;  %v10784_v1 = vld [vmem:[#allocation2 + $0x8] sm:$0x77]  ;;  %v237_v5 = vlaneseq }
  0xe7   :  { %s10502_s14 = smov 16   ;;  %v10790_v2 = vcombine.high %v10784_v1, %v10784_v1  ;;  %v10794_v3 = vcombine.high %v10782_v0, %v10782_v0  ;;  %v15503_v4 = vmov 0   ;;  %s10504_s12 = smov 17   ;;  %v294_v9 = vld [vmem:[#allocation7 + $0x4] sm:$0xf]  ;;  %vm338_vm0 = vcmask 1040384  }
  0xe8   :  { %280 = vrot.lane.b32.xlu0 %v10782_v0, %s10502_s14  ;;  %386 = vmatprep.mubr.bf16.mxu0 %v15503_v4  ;;  %s10505_s6 = smov 15   ;;  %s10506_s2 = smov 1   ;;  %v247_v6 = vshrl.u32 %v237_v5, 7  ;;  %v10862_v7 = vand.u32 127, %v237_v5  ;;  %vm339_vm2 = vcmask 1041408   ;;  %v10511_v18 = vmov 65535  }
  0xe9   :  { %286 = vrot.lane.b32.xlu1 %v10790_v2, %s10502_s14  ;;  %439 = vmatprep.mubr.bf16.mxu1 %v15503_v4  ;;  %s10507_s18 = smov 127   ;;  %s10508_s27 = smov 113   ;;  %v340_v19 = vsel %vm338_vm0, 4294967295, %v10511_v18  ;;  %v244_v24 = vld [vmem:[#allocation7] sm:$0xf]  ;;  %v321_v37 = vld [vmem:[#allocation8 + $0x20] sm:$0xff] }
  0xea   :  { %10115 = vset.pattern.permute.xlu0 %v15503_v4  ;;  %10116 = vset.pattern.permute.xlu1 %v15503_v4  ;;  %s10509_s28 = smov 112   ;;  %s10510_s26 = smov 111   ;;  %v10864_v8 = vsub.s32 0, %v247_v6  ;;  %v10866_v10 = vsub.s32 1, %v247_v6  ;;  %vm288_vm1 = vcmp.lt.s32.totalorder %v10862_v7, 16  ;;  %v10872_v13 = vsub.s32 3, %v247_v6 }
  0xeb   :  { %v10874_v14 = vsub.s32 2, %v247_v6  ;;  %v10891_v28 = vsel %vm339_vm2, %v340_v19, 0  ;;  %vm239_vm3 = vcmp.lt.s32.totalorder %v10862_v7, 17  ;;  %v322_v38 = vld [vmem:[#allocation8 + $0x28] sm:$0xff]  ;;  %v598_v53 = vld [vmem:[#allocation7 + $0x8] sm:$0xf] }
  0xec   :  { %282 = vrot.lane.b32.xlu0 %v10794_v3, %s10502_s14  ;;  %v10870_v12 = vrot.slane %v294_v9, %v10864_v8  ;;  %v10877_v16 = vrot.slane %v294_v9, %v10866_v10  ;;  %v10883_v22 = vrot.slane %v294_v9, %v10872_v13  ;;  %v10899_v33 = vrot.slane %v244_v24, %v10866_v10  ;;  %s10512_s1 = smov [#allocation23]  }
  0xed   :  { %284 = vrot.lane.b32.xlu1 %v10784_v1, %s10502_s14  ;;  %v10886_v23 = vrot.slane %v294_v9, %v10874_v14  ;;  %v10905_v41 = vrot.slane %v244_v24, %v10864_v8  ;;  %v10911_v46 = vrot.slane %v244_v24, %v10874_v14  ;;  %v325_v47 = vpack.c.bf16 %v322_v38, %v321_v37  ;;  %v323_v9 = vld [vmem:[#allocation8 + $0x30] sm:$0xff]  ;;  %s9395_s17 = sshll.u32 %s10512_s1, 4  ;;  %s9396_s17 = int_to_ptr.vmem [resolvable:$true] %s9395_s17 }
  0xee   :  { %15748 = vst [vmem:[#allocation32_spill] sm:$0xff] %v10877_v16  ;;  %v10916_v51 = vrot.slane %v244_v24, %v10872_v13  ;;  %vm331_vm4 = vcmask 23552   ;;  %vm592_vm5 = vcmp.lt.s32.totalorder %v10862_v7, 15  ;;  %v10928_v60 = vrot.slane %v598_v53, %v10866_v10  ;;  %s10447_s19 = scalar_lea.vmem %s9396_s17, 256  ;;  %p10452_p7 = scmp.lt.s32.totalorder %s9396_s17, %s9396_s17 }
  0xef   :  { %vm783_vm6 = vcmp.lt.s32.totalorder %v10862_v7, 1  ;;  %vm1125_vm7 = vcmp.lt.s32.totalorder %v10862_v7, 127  ;;  %vm1316_vm8 = vcmp.lt.s32.totalorder %v10862_v7, 113  ;;  %vm1507_vm9 = vcmp.lt.s32.totalorder %v10862_v7, 112  ;;  %p10448_p6 = scmp.ne.s32.totalorder %s9396_s17, %s10447_s19  ;;  %p10453_p8 = scmp.lt.s32.totalorder %s10447_s19, %s10447_s19 }
  0xf0   :  { %229 = vrot.lane.b32.xlu0 %v10782_v0, %s10504_s12  ;;  %15749 = vst [vmem:[#allocation33_spill] sm:$0xff] %v10928_v60  ;;  %vm1698_vm10 = vcmp.lt.s32.totalorder %v10862_v7, 111 }
  0xf1   :  { %231 = vrot.lane.b32.xlu1 %v10794_v3, %s10504_s12  ;;  %p10454_p9 = por %p10453_p8, %p10452_p7 }
  0xf3   :  { %p10455_p10 = pnand %p10454_p9, %p10448_p6 }
  0xf4   :  { %235 = vrot.lane.b32.xlu0 %v10790_v2, %s10504_s12 }
  0xf5   :  { %233 = vrot.lane.b32.xlu1 %v10784_v1, %s10504_s12 }
  0xf8   :  { %584 = vrot.lane.b32.xlu0 %v10782_v0, %s10505_s6 }
  0xf9   :  { %586 = vrot.lane.b32.xlu1 %v10794_v3, %s10505_s6 }
  0xfc   :  { %590 = vrot.lane.b32.xlu0 %v10790_v2, %s10505_s6 }
  0xfd   :  { %588 = vrot.lane.b32.xlu1 %v10784_v1, %s10505_s6 }
 0x100   :  { %775 = vrot.lane.b32.xlu0 %v10782_v0, %s10506_s2 }
 0x101   :  { %777 = vrot.lane.b32.xlu1 %v10794_v3, %s10506_s2 }
 0x104   :  { %781 = vrot.lane.b32.xlu0 %v10790_v2, %s10506_s2 }
 0x105   :  { %779 = vrot.lane.b32.xlu1 %v10784_v1, %s10506_s2 }
 0x108   :  { %1119 = vrot.lane.b32.xlu0 %v10794_v3, %s10507_s18 }
 0x109   :  { %1121 = vrot.lane.b32.xlu1 %v10784_v1, %s10507_s18 }
 0x10c   :  { %1117 = vrot.lane.b32.xlu0 %v10782_v0, %s10507_s18 }
 0x10d   :  { %1123 = vrot.lane.b32.xlu1 %v10790_v2, %s10507_s18 }
 0x110   :  { %1310 = vrot.lane.b32.xlu0 %v10794_v3, %s10508_s27 }
 0x111   :  { %1312 = vrot.lane.b32.xlu1 %v10784_v1, %s10508_s27 }
 0x114   :  { %1308 = vrot.lane.b32.xlu0 %v10782_v0, %s10508_s27 }
 0x115   :  { %1314 = vrot.lane.b32.xlu1 %v10790_v2, %s10508_s27 }
 0x118   :  { %1501 = vrot.lane.b32.xlu0 %v10794_v3, %s10509_s28 }
 0x119   :  { %1503 = vrot.lane.b32.xlu1 %v10784_v1, %s10509_s28 }
 0x11c   :  { %1499 = vrot.lane.b32.xlu0 %v10782_v0, %s10509_s28 }
 0x11d   :  { %1505 = vrot.lane.b32.xlu1 %v10790_v2, %s10509_s28 }
 0x120   :  { %1692 = vrot.lane.b32.xlu0 %v10794_v3, %s10510_s26 }
 0x121   :  { %1694 = vrot.lane.b32.xlu1 %v10784_v1, %s10510_s26 }
 0x124   :  { %1690 = vrot.lane.b32.xlu0 %v10782_v0, %s10510_s26 }
 0x125   :  { %1696 = vrot.lane.b32.xlu1 %v10790_v2, %s10510_s26 }
 0x15a   :  { %v281_v11 = vpop.permute.xlu0 %280 }
 0x15b   :  { %v287_v15 = vpop.permute.xlu1 %286 }
 0x15c   :  { %v292_v17 = vsel %vm288_vm1, %v287_v15, %v281_v11 }
 0x15d   :  { %v316_v21 = vmul.f32 %v10870_v12, %v292_v17 }
 0x15e   :  { %v283_v20 = vpop.permute.xlu0 %282 }
 0x15f   :  { %v291_v25 = vsel %vm288_vm1, %v281_v11, %v283_v20  ;;  %v285_v26 = vpop.permute.xlu1 %284  ;;  %v327_v30 = vpack.c.bf16 %v316_v21, %v316_v21  ;;  %v324_v11 = vld [vmem:[#allocation8 + $0x38] sm:$0xff] }
 0x160   :  { %v317_v27 = vmul.f32 %v10877_v16, %v291_v25  ;;  %v290_v29 = vsel %vm288_vm1, %v283_v20, %v285_v26  ;;  %v289_v31 = vsel %vm288_vm1, %v285_v26, %v287_v15  ;;  %v10936_v15 = vrot.slane %v598_v53, %v10864_v8 }
 0x161   :  { %v319_v35 = vmul.f32 %v10883_v22, %v289_v31  ;;  %v318_v36 = vmul.f32 %v10886_v23, %v290_v29  ;;  %v343_v45 = vand.u32 %v10891_v28, %v327_v30  ;;  %v326_v24 = vpack.c.bf16 %v324_v11, %v323_v9 }
 0x162   :  { %v230_v32 = vpop.permute.xlu0 %229  ;;  %v328_v34 = vpack.c.bf16 %v317_v27, %v317_v27  ;;  %15750 = vst [vmem:[#allocation34_spill] sm:$0xff] %v10936_v15  ;;  %v10944_v25 = vrot.slane %v598_v53, %v10874_v14  ;;  %v10950_v31 = vrot.slane %v598_v53, %v10872_v13  ;;  %v1881_v53 = vld [vmem:[#allocation16] sm:$0xff] }
 0x163   :  { %v232_v39 = vpop.permute.xlu1 %231  ;;  %v330_v42 = vpack.c.bf16 %v319_v35, %v319_v35  ;;  %v329_v43 = vpack.c.bf16 %v318_v36, %v318_v36  ;;  %1887 = vperm.xlu0 %10115, %v1881_v53  }
 0x164   :  { %v346_v40 = vand.u32 %v10891_v28, %v328_v34  ;;  %v242_v44 = vsel %vm239_vm3, %v230_v32, %v232_v39  ;;  %15751 = vst [vmem:[#allocation35_spill] sm:$0xff] %v10944_v25  ;;  %15752 = vst [vmem:[#allocation36_spill] sm:$0xff] %v10950_v31  ;;  %v789_v34 = vld [vmem:[#allocation7 + $0xc] sm:$0xf] }
 0x165   :  { %v267_v48 = vmul.f32 %v10899_v33, %v242_v44  ;;  %v352_v50 = vand.u32 %v10891_v28, %v330_v42  ;;  %v349_v52 = vand.u32 %v10891_v28, %v329_v43 }
 0x166   :  { %354 = vmatprep.subr.bf16.mxu0 %v346_v40  ;;  %v236_v49 = vpop.permute.xlu0 %235 }
 0x167   :  { %v243_v54 = vsel %vm239_vm3, %v236_v49, %v230_v32  ;;  %355 = vmatpush1.bf16.msra.mxu0 %v343_v45  ;;  %v277_v55 = vpack.c.bf16 %v267_v48, %v267_v48  ;;  %407 = vmatprep.subr.bf16.mxu1 %v352_v50  ;;  %v234_v57 = vpop.permute.xlu1 %233  ;;  %v10965_v45 = vrot.slane %v789_v34, %v10866_v10  ;;  %v270_v48 = vld [vmem:[#allocation8] sm:$0xff] }
 0x168   :  { %v266_v56 = vmul.f32 %v10905_v41, %v243_v54  ;;  %v240_v58 = vsel %vm239_vm3, %v234_v57, %v236_v49  ;;  %v241_v59 = vsel %vm239_vm3, %v232_v39, %v234_v57  ;;  %408 = vmatpush1.bf16.msra.mxu1 %v349_v52  ;;  %v271_v49 = vld [vmem:[#allocation8 + $0x8] sm:$0xff] }
 0x169   :  { %v268_v62 = vmul.f32 %v10911_v46, %v241_v59  ;;  %v269_v63 = vmul.f32 %v10916_v51, %v240_v58  ;;  %v470_v5 = vand.u32 %v10891_v28, %v277_v55  ;;  %15753 = vst [vmem:[#allocation37_spill] sm:$0xff] %v10965_v45  ;;  %v1882_v54 = vld [vmem:[#allocation16 + $0x8] sm:$0xff]  ;;  %v274_v57 = vpack.c.bf16 %v271_v49, %v270_v48 }
 0x16a   :  { %v276_v61 = vpack.c.bf16 %v266_v56, %v266_v56  ;;  %9413 = vmatmul.mubr.msk.bf16.vlgmr.msra.gmra.mrb[0].mxu0 %vm331_vm4, %v325_v47  ;;  %v585_v6 = vpop.permute.xlu0 %584  ;;  %1892 = vperm.xlu1 %10116, %v1882_v54   ;;  %v976_v49 = vpack.c.bf16 %v10790_v2, %v10790_v2  ;;  %v1131_v54 = vld [vmem:[#allocation7 + $0x14] sm:$0xf] }
 0x16b   :  { %396 = vmatprep.mubr.bf16.mxu0 %v15503_v4  ;;  %v278_v18 = vpack.c.bf16 %v268_v62, %v268_v62  ;;  %v279_v19 = vpack.c.bf16 %v269_v63, %v269_v63  ;;  %9415 = vmatmul.mubr.msk.bf16.vlgmr.msra.gmra.mrb[0].mxu1 %vm331_vm4, %v325_v47  ;;  %v587_v20 = vpop.permute.xlu1 %586  ;;  %v10975_v62 = vrot.slane %v789_v34, %v10872_v13  ;;  %v1884_v63 = vld [vmem:[#allocation16 + $0x18] sm:$0xff] }
 0x16c   :  { %v467_v17 = vand.u32 %v10891_v28, %v276_v61  ;;  %478 = vmatprep.subr.bf16.mxu0 %v470_v5  ;;  %v595_v21 = vsel %vm592_vm5, %v585_v6, %v587_v20  ;;  %449 = vmatprep.mubr.bf16.mxu1 %v15503_v4  ;;  %v11019_v2 = vrot.slane %v1131_v54, %v10866_v10 }
 0x16d   :  { %v473_v26 = vand.u32 %v10891_v28, %v278_v18  ;;  %v621_v27 = vmul.f32 %v10928_v60, %v595_v21  ;;  %v476_v29 = vand.u32 %v10891_v28, %v279_v19  ;;  %15754 = vst [vmem:[#allocation38_spill] sm:$0xff] %v10975_v62  ;;  %1902 = vperm.xlu0 %10115, %v1884_v63   ;;  %v273_v21 = vld [vmem:[#allocation8 + $0x18] sm:$0xff] }
 0x16e   :  { %479 = vmatpush1.bf16.msra.mxu0 %v467_v17  ;;  %v591_v30 = vpop.permute.xlu0 %590  ;;  %15757 = vst [vmem:[#allocation41_spill] sm:$0xff] %v11019_v2  ;;  %v11026_v63 = vrot.slane %v1131_v54, %v10872_v13 }
 0x16f   :  { %v596_v32 = vsel %vm592_vm5, %v591_v30, %v585_v6  ;;  %v632_v35 = vpack.c.bf16 %v621_v27, %v621_v27  ;;  %531 = vmatprep.subr.bf16.mxu1 %v476_v29  ;;  %v589_v37 = vpop.permute.xlu1 %588 }
 0x170   :  { %v620_v36 = vmul.f32 %v10936_v15, %v596_v32  ;;  %532 = vmatpush1.bf16.msra.mxu1 %v473_v26  ;;  %v593_v38 = vsel %vm592_vm5, %v589_v37, %v591_v30  ;;  %v594_v39 = vsel %vm592_vm5, %v587_v20, %v589_v37  ;;  %v272_v20 = vld [vmem:[#allocation8 + $0x10] sm:$0xff]  ;;  %v10993_v30 = vrot.slane %v789_v34, %v10874_v14 }
 0x171   :  { %v622_v40 = vmul.f32 %v10944_v25, %v594_v39  ;;  %v623_v42 = vmul.f32 %v10950_v31, %v593_v38  ;;  %v645_v43 = vand.u32 %v632_v35, %v10891_v28  ;;  %v1883_v26 = vld [vmem:[#allocation16 + $0x10] sm:$0xff]  ;;  %v275_v32 = vpack.c.bf16 %v273_v21, %v272_v20  ;;  %15758 = vst [vmem:[#allocation42_spill] sm:$0xff] %v11026_v63 }
 0x172   :  { %9414 = vmatmul.mubr.msk.bf16.gmra.mrb[4].mxu0 %vm331_vm4, %v326_v24  ;;  %v776_v44 = vpop.permute.xlu0 %775  ;;  %v631_v47 = vpack.c.bf16 %v620_v36, %v620_v36  ;;  %15756 = vst [vmem:[#allocation40_spill] sm:$0xff] %v10993_v30  ;;  %1897 = vperm.xlu1 %10116, %v1883_v26   ;;  %v975_v20 = vpack.c.bf16 %v10784_v1, %v10784_v1  ;;  %v818_v1 = vld [vmem:[#allocation8 + $0x70] sm:$0xff] }
 0x173   :  { %510 = vmatprep.mubr.bf16.mxu0 %v15503_v4  ;;  %v634_v50 = vpack.c.bf16 %v623_v42, %v623_v42  ;;  %9416 = vmatmul.mubr.msk.bf16.gmra.mrb[4].mxu1 %vm331_vm4, %v326_v24  ;;  %v778_v52 = vpop.permute.xlu1 %777  ;;  %v633_v55 = vpack.c.bf16 %v622_v40, %v622_v40  ;;  %v10986_v24 = vrot.slane %v789_v34, %v10864_v8  ;;  %v625_v40 = vld [vmem:[#allocation8 + $0x40] sm:$0xff]  ;;  %v626_v34 = vld [vmem:[#allocation8 + $0x48] sm:$0xff] }
 0x174   :  { %653 = vmatprep.subr.bf16.mxu0 %v645_v43  ;;  %563 = vmatprep.mubr.bf16.mxu1 %v15503_v4  ;;  %v786_v56 = vsel %vm783_vm6, %v776_v44, %v778_v52  ;;  %v642_v5 = vand.u32 %v631_v47, %v10891_v28  ;;  %v974_v42 = vpack.c.bf16 %v10794_v3, %v10794_v3 }
 0x175   :  { %v651_v58 = vand.u32 %v634_v50, %v10891_v28  ;;  %v812_v59 = vmul.f32 %v10965_v45, %v786_v56  ;;  %v648_v11 = vand.u32 %v633_v55, %v10891_v28  ;;  %15755 = vst [vmem:[#allocation39_spill] sm:$0xff] %v10986_v24  ;;  %v993_v3 = vand.u32 %v976_v49, %v10891_v28  ;;  %v627_v55 = vld [vmem:[#allocation8 + $0x50] sm:$0xff]  ;;  %v628_v56 = vld [vmem:[#allocation8 + $0x58] sm:$0xff] }
 0x176   :  { %v782_v61 = vpop.permute.xlu0 %781 }
 0x177   :  { %706 = vmatprep.subr.bf16.mxu1 %v651_v58  ;;  %v823_v6 = vpack.c.bf16 %v812_v59, %v812_v59  ;;  %v780_v9 = vpop.permute.xlu1 %779  ;;  %v787_v27 = vsel %vm783_vm6, %v782_v61, %v776_v44  ;;  %v629_v44 = vpack.c.bf16 %v626_v34, %v625_v40 }
 0x178   :  { %v784_v17 = vsel %vm783_vm6, %v780_v9, %v782_v61  ;;  %v785_v35 = vsel %vm783_vm6, %v778_v52, %v780_v9  ;;  %v811_v37 = vmul.f32 %v10986_v24, %v787_v27  ;;  %v987_v52 = vand.u32 %v974_v42, %v10891_v28 }
 0x179   :  { %v814_v18 = vmul.f32 %v10975_v62, %v784_v17  ;;  %v836_v19 = vand.u32 %v823_v6, %v10891_v28  ;;  %v813_v38 = vmul.f32 %v10993_v30, %v785_v35  ;;  %v630_v61 = vpack.c.bf16 %v628_v56, %v627_v55  ;;  %v817_v17 = vld [vmem:[#allocation8 + $0x68] sm:$0xff] }
 0x17a   :  { %9417 = vmatmul.mubr.msk.bf16.vlgmr.msra.gmra.mrb[0].mxu0 %vm331_vm4, %v274_v57  ;;  %v822_v39 = vpack.c.bf16 %v811_v37, %v811_v37  ;;  %v1120_v47 = vpop.permute.xlu0 %1119 }
 0x17b   :  { %654 = vmatpush1.bf16.msra.mxu0 %v642_v5  ;;  %520 = vmatprep.mubr.bf16.mxu0 %v15503_v4  ;;  %v825_v29 = vpack.c.bf16 %v814_v18, %v814_v18  ;;  %v824_v43 = vpack.c.bf16 %v813_v38, %v813_v38  ;;  %v11006_v48 = vpop.permute.xlu1 %1121  ;;  %v973_v18 = vpack.c.bf16 %v10782_v0, %v10782_v0  ;;  %v1322_v0 = vld [vmem:[#allocation7 + $0x18] sm:$0xf]  ;;  %v819_v38 = vld [vmem:[#allocation8 + $0x78] sm:$0xff] }
 0x17c   :  { %9419 = vmatmul.mubr.msk.bf16.vlgmr.msra.gmra.mrb[0].mxu1 %vm331_vm4, %v274_v57  ;;  %844 = vmatprep.subr.bf16.mxu0 %v836_v19  ;;  %v833_v50 = vand.u32 %v822_v39, %v10891_v28  ;;  %v1127_v59 = vsel %vm1125_vm7, %v1120_v47, %v11006_v48  ;;  %v11050_v39 = vrot.slane %v1131_v54, %v10864_v8 }
 0x17d   :  { %707 = vmatpush1.bf16.msra.mxu1 %v648_v11  ;;  %573 = vmatprep.mubr.bf16.mxu1 %v15503_v4  ;;  %v842_v36 = vand.u32 %v825_v29, %v10891_v28  ;;  %v839_v53 = vand.u32 %v824_v43, %v10891_v28  ;;  %v1154_v6 = vmul.f32 %v11019_v2, %v1127_v59  ;;  %v816_v11 = vld [vmem:[#allocation8 + $0x60] sm:$0xff] }
 0x17e   :  { %v1118_v57 = vpop.permute.xlu0 %1117  ;;  %v820_v21 = vpack.c.bf16 %v817_v17, %v816_v11  ;;  %15759 = vst [vmem:[#allocation43_spill] sm:$0xff] %v11050_v39  ;;  %v11056_v34 = vrot.slane %v1322_v0, %v10866_v10 }
 0x17f   :  { %897 = vmatprep.subr.bf16.mxu1 %v842_v36  ;;  %v1124_v58 = vpop.permute.xlu1 %1123  ;;  %v1165_v19 = vpack.c.bf16 %v1154_v6, %v1154_v6  ;;  %v990_v36 = vand.u32 %v975_v20, %v10891_v28  ;;  %v1128_v40 = vsel %vm1125_vm7, %v1118_v57, %v1120_v47  ;;  %v1513_v20 = vld [vmem:[#allocation7 + $0x1c] sm:$0xf] }
 0x180   :  { %v1129_v5 = vsel %vm1125_vm7, %v1124_v58, %v1118_v57  ;;  %15760 = vst [vmem:[#allocation44_spill] sm:$0xff] %v11056_v34  ;;  %v1126_v47 = vsel %vm1125_vm7, %v11006_v48, %v1124_v58  ;;  %v967_v48 = vld [vmem:[#allocation8 + $0x80] sm:$0xff]  ;;  %v968_v58 = vld [vmem:[#allocation8 + $0x88] sm:$0xff] }
 0x181   :  { %v1156_v9 = vmul.f32 %v11026_v63, %v1129_v5  ;;  %v1178_v35 = vand.u32 %v1165_v19, %v10891_v28  ;;  %v971_v5 = vpack.c.bf16 %v968_v58, %v967_v48 }
 0x182   :  { %9418 = vmatmul.mubr.msk.bf16.gmra.mrb[4].mxu0 %vm331_vm4, %v275_v32  ;;  %v1311_v27 = vpop.permute.xlu0 %1310 }
 0x183   :  { %685 = vmatprep.mubr.bf16.mxu0 %v15503_v4  ;;  %v1167_v26 = vpack.c.bf16 %v1156_v9, %v1156_v9  ;;  %v11040_v29 = vpop.permute.xlu1 %1312 }
 0x184   :  { %9420 = vmatmul.mubr.msk.bf16.gmra.mrb[4].mxu1 %vm331_vm4, %v275_v32  ;;  %v984_v32 = vand.u32 %v973_v18, %v10891_v28  ;;  %v1318_v49 = vsel %vm1316_vm8, %v1311_v27, %v11040_v29 }
 0x185   :  { %738 = vmatprep.mubr.bf16.mxu1 %v15503_v4  ;;  %v1184_v37 = vand.u32 %v1167_v26, %v10891_v28  ;;  %v969_v26 = vld [vmem:[#allocation8 + $0x90] sm:$0xff] }
 0x186   :  { %v1309_v42 = vpop.permute.xlu0 %1308 }
 0x187   :  { %v1315_v43 = vpop.permute.xlu1 %1314 }
 0x18a   :  { %9421 = vmatmul.mubr.msk.bf16.vlgmr.msra.gmra.mrb[0].mxu0 %vm331_vm4, %v629_v44  ;;  %v1502_v9 = vpop.permute.xlu0 %1501 }
 0x18b   :  { %845 = vmatpush1.bf16.msra.mxu0 %v833_v50  ;;  %695 = vmatprep.mubr.bf16.mxu0 %v15503_v4  ;;  %v821_v50 = vpack.c.bf16 %v819_v38, %v818_v1  ;;  %v11081_v11 = vpop.permute.xlu1 %1503 }
 0x18c   :  { %9423 = vmatmul.mubr.msk.bf16.vlgmr.msra.gmra.mrb[0].mxu1 %vm331_vm4, %v629_v44  ;;  %995 = vmatprep.subr.bf16.mxu0 %v987_v52  ;;  %v11060_v44 = vrot.slane %v1131_v54, %v10874_v14  ;;  %v11069_v52 = vrot.slane %v1322_v0, %v10872_v13  ;;  %v1345_v54 = vmul.f32 %v11056_v34, %v1318_v49 }
 0x18d   :  { %898 = vmatpush1.bf16.msra.mxu1 %v839_v53  ;;  %748 = vmatprep.mubr.bf16.mxu1 %v15503_v4  ;;  %v1153_v53 = vmul.f32 %v11050_v39, %v1128_v40  ;;  %v11101_v40 = vrot.slane %v1322_v0, %v10874_v14  ;;  %v1509_v49 = vsel %vm1507_vm9, %v1502_v9, %v11081_v11 }
 0x18e   :  { %1048 = vmatprep.subr.bf16.mxu1 %v993_v3  ;;  %15761 = vst [vmem:[#allocation45_spill] sm:$0xff] %v11060_v44  ;;  %15762 = vst [vmem:[#allocation46_spill] sm:$0xff] %v11069_v52  ;;  %v1320_v3 = vsel %vm1316_vm8, %v1315_v43, %v1309_v42  ;;  %v1155_v55 = vmul.f32 %v11060_v44, %v1126_v47  ;;  %v1356_v59 = vpack.c.bf16 %v1345_v54, %v1345_v54  ;;  %v1500_v1 = vpop.permute.xlu0 %1499 }
 0x18f   :  { %v1347_v56 = vmul.f32 %v11069_v52, %v1320_v3  ;;  %v1164_v57 = vpack.c.bf16 %v1153_v53, %v1153_v53  ;;  %v1506_v38 = vpop.permute.xlu1 %1505  ;;  %15765 = vst [vmem:[#allocation49_spill] sm:$0xff] %v11101_v40 }
 0x190   :  { %v1369_v18 = vand.u32 %v1356_v59, %v10891_v28  ;;  %v1511_v53 = vsel %vm1507_vm9, %v1506_v38, %v1500_v1 }
 0x191   :  { %v1358_v6 = vpack.c.bf16 %v1347_v56, %v1347_v56  ;;  %v1175_v17 = vand.u32 %v1164_v57, %v10891_v28 }
 0x192   :  { %9422 = vmatmul.mubr.msk.bf16.gmra.mrb[4].mxu0 %vm331_vm4, %v630_v61  ;;  %v1693_v59 = vpop.permute.xlu0 %1692 }
 0x193   :  { %876 = vmatprep.mubr.bf16.mxu0 %v15503_v4 }
 0x194   :  { %9424 = vmatmul.mubr.msk.bf16.gmra.mrb[4].mxu1 %vm331_vm4, %v630_v61  ;;  %v1166_v61 = vpack.c.bf16 %v1155_v55, %v1155_v55 }
 0x195   :  { %929 = vmatprep.mubr.bf16.mxu1 %v15503_v4 }
 0x196   :  { %v1181_v19 = vand.u32 %v1166_v61, %v10891_v28  ;;  %v1695_v61 = vpop.permute.xlu1 %1694 }
 0x19a   :  { %9425 = vmatmul.mubr.msk.bf16.vlgmr.msra.gmra.mrb[0].mxu0 %vm331_vm4, %v820_v21 }
 0x19b   :  { %996 = vmatpush1.bf16.msra.mxu0 %v984_v32  ;;  %886 = vmatprep.mubr.bf16.mxu0 %v15503_v4  ;;  %v970_v32 = vld [vmem:[#allocation8 + $0x98] sm:$0xff] }
 0x19c   :  { %9427 = vmatmul.mubr.msk.bf16.vlgmr.msra.gmra.mrb[0].mxu1 %vm331_vm4, %v820_v21  ;;  %1186 = vmatprep.subr.bf16.mxu0 %v1178_v35  ;;  %v1375_v21 = vand.u32 %v1358_v6, %v10891_v28  ;;  %v11091_v35 = vrot.slane %v1322_v0, %v10864_v8 }
 0x19d   :  { %1049 = vmatpush1.bf16.msra.mxu1 %v990_v36  ;;  %939 = vmatprep.mubr.bf16.mxu1 %v15503_v4  ;;  %v1319_v36 = vsel %vm1316_vm8, %v1309_v42, %v1311_v27  ;;  %v1317_v27 = vsel %vm1316_vm8, %v11040_v29, %v1315_v43  ;;  %v11110_v42 = vrot.slane %v1513_v20, %v10872_v13  ;;  %v1158_v29 = vld [vmem:[#allocation8 + $0xa0] sm:$0xff]  ;;  %v1159_v43 = vld [vmem:[#allocation8 + $0xa8] sm:$0xff] }
 0x19e   :  { %1239 = vmatprep.subr.bf16.mxu1 %v1184_v37  ;;  %15763 = vst [vmem:[#allocation47_spill] sm:$0xff] %v11091_v35  ;;  %v11097_v37 = vrot.slane %v1513_v20, %v10866_v10  ;;  %v1344_v47 = vmul.f32 %v11091_v35, %v1319_v36  ;;  %v1346_v3 = vmul.f32 %v11101_v40, %v1317_v27  ;;  %v1697_v27 = vpop.permute.xlu1 %1696 }
 0x19f   :  { %15766 = vst [vmem:[#allocation50_spill] sm:$0xff] %v11110_v42  ;;  %v1538_v54 = vmul.f32 %v11110_v42, %v1511_v53  ;;  %v1162_v48 = vpack.c.bf16 %v1159_v43, %v1158_v29  ;;  %v1510_v36 = vsel %vm1507_vm9, %v1500_v1, %v1502_v9  ;;  %v1700_v53 = vsel %vm1698_vm10, %v1693_v59, %v1695_v61 }
 0x1a0   :  { %15764 = vst [vmem:[#allocation48_spill] sm:$0xff] %v11097_v37  ;;  %v1536_v0 = vmul.f32 %v11097_v37, %v1509_v49  ;;  %v1355_v55 = vpack.c.bf16 %v1344_v47, %v1344_v47  ;;  %v1357_v57 = vpack.c.bf16 %v1346_v3, %v1346_v3  ;;  %v11140_v47 = vrot.slane %v1513_v20, %v10874_v14 }
 0x1a1   :  { %v1549_v58 = vpack.c.bf16 %v1538_v54, %v1538_v54  ;;  %v1508_v9 = vsel %vm1507_vm9, %v11081_v11, %v1506_v38  ;;  %v1349_v11 = vld [vmem:[#allocation8 + $0xc0] sm:$0xff]  ;;  %v1350_v38 = vld [vmem:[#allocation8 + $0xc8] sm:$0xff] }
 0x1a2   :  { %9426 = vmatmul.mubr.msk.bf16.gmra.mrb[4].mxu0 %vm331_vm4, %v821_v50  ;;  %v1547_v56 = vpack.c.bf16 %v1536_v0, %v1536_v0  ;;  %15769 = vst [vmem:[#allocation53_spill] sm:$0xff] %v11140_v47  ;;  %v1537_v54 = vmul.f32 %v11140_v47, %v1508_v9 }
 0x1a3   :  { %1027 = vmatprep.mubr.bf16.mxu0 %v15503_v4 }
 0x1a4   :  { %9428 = vmatmul.mubr.msk.bf16.gmra.mrb[4].mxu1 %vm331_vm4, %v821_v50  ;;  %v972_v50 = vpack.c.bf16 %v970_v32, %v969_v26  ;;  %v1560_v6 = vand.u32 %v1547_v56, %v10891_v28  ;;  %v1161_v26 = vld [vmem:[#allocation8 + $0xb8] sm:$0xff]  ;;  %v11130_v32 = vrot.slane %v1513_v20, %v10864_v8  ;;  %v1548_v43 = vpack.c.bf16 %v1537_v54, %v1537_v54 }
 0x1a5   :  { %1080 = vmatprep.mubr.bf16.mxu1 %v15503_v4  ;;  %v1353_v56 = vpack.c.bf16 %v1350_v38, %v1349_v11  ;;  %v1733_v11 = vld [vmem:[#allocation8 + $0x110] sm:$0xff]  ;;  %v1734_v38 = vld [vmem:[#allocation8 + $0x118] sm:$0xff] }
 0x1a6   :  { %15767 = vst [vmem:[#allocation51_spill] sm:$0xff] %v11130_v32  ;;  %v1535_v1 = vmul.f32 %v11130_v32, %v1510_v36 }
 0x1a8   :  { %v1546_v29 = vpack.c.bf16 %v1535_v1, %v1535_v1 }
 0x1aa   :  { %9429 = vmatmul.mubr.msk.bf16.vlgmr.msra.gmra.mrb[0].mxu0 %vm331_vm4, %v971_v5 }
 0x1ab   :  { %1187 = vmatpush1.bf16.msra.mxu0 %v1175_v17  ;;  %1037 = vmatprep.mubr.bf16.mxu0 %v15503_v4  ;;  %v1372_v17 = vand.u32 %v1357_v57, %v10891_v28 }
 0x1ac   :  { %9431 = vmatmul.mubr.msk.bf16.vlgmr.msra.gmra.mrb[0].mxu1 %vm331_vm4, %v971_v5  ;;  %1377 = vmatprep.subr.bf16.mxu0 %v1369_v18  ;;  %v1366_v5 = vand.u32 %v1355_v55, %v10891_v28  ;;  %v1704_v18 = vld [vmem:[#allocation7 + $0x20] sm:$0xf] }
 0x1ad   :  { %1240 = vmatpush1.bf16.msra.mxu1 %v1181_v19  ;;  %1090 = vmatprep.mubr.bf16.mxu1 %v15503_v4  ;;  %v1566_v19 = vand.u32 %v1549_v58, %v10891_v28  ;;  %v11136_v49 = vrot.slane %v1704_v18, %v10866_v10  ;;  %v11148_v10 = vrot.slane %v1704_v18, %v10872_v13 }
 0x1ae   :  { %1430 = vmatprep.subr.bf16.mxu1 %v1375_v21  ;;  %v1160_v21 = vld [vmem:[#allocation8 + $0xb0] sm:$0xff]  ;;  %v11174_v36 = vrot.slane %v1704_v18, %v10874_v14 }
 0x1af   :  { %15768 = vst [vmem:[#allocation52_spill] sm:$0xff] %v11136_v49  ;;  %v1163_v0 = vpack.c.bf16 %v1161_v26, %v1160_v21  ;;  %15770 = vst [vmem:[#allocation54_spill] sm:$0xff] %v11148_v10  ;;  %v1727_v20 = vmul.f32 %v11136_v49, %v1700_v53  ;;  %v11167_v21 = vrot.slane %v1704_v18, %v10864_v8 }
 0x1b0   :  { %15772 = vst [vmem:[#allocation56_spill] sm:$0xff] %v11174_v36 }
 0x1b1   :  { %v1738_v13 = vpack.c.bf16 %v1727_v20, %v1727_v20  ;;  %15771 = vst [vmem:[#allocation55_spill] sm:$0xff] %v11167_v21  ;;  %v1543_v20 = vld [vmem:[#allocation8 + $0xf8] sm:$0xff] }
 0x1b2   :  { %9430 = vmatmul.mubr.msk.bf16.gmra.mrb[4].mxu0 %vm331_vm4, %v972_v50 }
 0x1b3   :  { %1218 = vmatprep.mubr.bf16.mxu0 %v15503_v4  ;;  %v1751_v58 = vand.u32 %v1738_v13, %v10891_v28  ;;  %v1736_v13 = vpack.c.bf16 %v1734_v38, %v1733_v11 }
 0x1b4   :  { %9432 = vmatmul.mubr.msk.bf16.gmra.mrb[4].mxu1 %vm331_vm4, %v972_v50  ;;  %v1691_v50 = vpop.permute.xlu0 %1690 }
 0x1b5   :  { %1271 = vmatprep.mubr.bf16.mxu1 %v15503_v4  ;;  %v1702_v3 = vsel %vm1698_vm10, %v1697_v27, %v1691_v50  ;;  %v1701_v26 = vsel %vm1698_vm10, %v1691_v50, %v1693_v59  ;;  %v1540_v59 = vld [vmem:[#allocation8 + $0xe0] sm:$0xff]  ;;  %v1541_v50 = vld [vmem:[#allocation8 + $0xe8] sm:$0xff] }
 0x1b6   :  { %v1729_v55 = vmul.f32 %v11148_v10, %v1702_v3  ;;  %v1726_v8 = vmul.f32 %v11167_v21, %v1701_v26  ;;  %v1544_v18 = vpack.c.bf16 %v1541_v50, %v1540_v59  ;;  %v1542_v3 = vld [vmem:[#allocation8 + $0xf0] sm:$0xff] }
 0x1b7   :  { %v1545_v54 = vpack.c.bf16 %v1543_v20, %v1542_v3 }
 0x1b8   :  { %v1740_v57 = vpack.c.bf16 %v1729_v55, %v1729_v55  ;;  %v1737_v1 = vpack.c.bf16 %v1726_v8, %v1726_v8  ;;  %v1731_v55 = vld [vmem:[#allocation8 + $0x100] sm:$0xff] }
 0x1ba   :  { %9433 = vmatmul.mubr.msk.bf16.vlgmr.msra.gmra.mrb[0].mxu0 %vm331_vm4, %v1162_v48 }
 0x1bb   :  { %1378 = vmatpush1.bf16.msra.mxu0 %v1366_v5  ;;  %1228 = vmatprep.mubr.bf16.mxu0 %v15503_v4  ;;  %v1563_v5 = vand.u32 %v1548_v43, %v10891_v28 }
 0x1bc   :  { %9435 = vmatmul.mubr.msk.bf16.vlgmr.msra.gmra.mrb[0].mxu1 %vm331_vm4, %v1162_v48  ;;  %1568 = vmatprep.subr.bf16.mxu0 %v1560_v6  ;;  %v1557_v48 = vand.u32 %v1546_v29, %v10891_v28  ;;  %v1757_v6 = vand.u32 %v1740_v57, %v10891_v28  ;;  %v1732_v29 = vld [vmem:[#allocation8 + $0x108] sm:$0xff] }
 0x1bd   :  { %1431 = vmatpush1.bf16.msra.mxu1 %v1372_v17  ;;  %1281 = vmatprep.mubr.bf16.mxu1 %v15503_v4  ;;  %v1351_v17 = vld [vmem:[#allocation8 + $0xd0] sm:$0xff] }
 0x1be   :  { %1621 = vmatprep.subr.bf16.mxu1 %v1566_v19  ;;  %v1352_v19 = vld [vmem:[#allocation8 + $0xd8] sm:$0xff] }
 0x1bf   :  { %v1354_v53 = vpack.c.bf16 %v1352_v19, %v1351_v17 }
 0x1c2   :  { %9434 = vmatmul.mubr.msk.bf16.gmra.mrb[4].mxu0 %vm331_vm4, %v1163_v0 }
 0x1c3   :  { %1409 = vmatprep.mubr.bf16.mxu0 %v15503_v4 }
 0x1c4   :  { %9436 = vmatmul.mubr.msk.bf16.gmra.mrb[4].mxu1 %vm331_vm4, %v1163_v0  ;;  %v1699_v0 = vsel %vm1698_vm10, %v1695_v61, %v1697_v27  ;;  %v1748_v61 = vand.u32 %v1737_v1, %v10891_v28 }
 0x1c5   :  { %1462 = vmatprep.mubr.bf16.mxu1 %v15503_v4  ;;  %v1728_v9 = vmul.f32 %v11174_v36, %v1699_v0 }
 0x1c7   :  { %v1739_v14 = vpack.c.bf16 %v1728_v9, %v1728_v9 }
 0x1c9   :  { %v1754_v27 = vand.u32 %v1739_v14, %v10891_v28  ;;  %v1735_v28 = vpack.c.bf16 %v1732_v29, %v1731_v55 }
 0x1ca   :  { %9437 = vmatmul.mubr.msk.bf16.vlgmr.msra.gmra.mrb[0].mxu0 %vm331_vm4, %v1353_v56 }
 0x1cb   :  { %1569 = vmatpush1.bf16.msra.mxu0 %v1557_v48  ;;  %1419 = vmatprep.mubr.bf16.mxu0 %v15503_v4 }
 0x1cc   :  { %9439 = vmatmul.mubr.msk.bf16.vlgmr.msra.gmra.mrb[0].mxu1 %vm331_vm4, %v1353_v56  ;;  %1759 = vmatprep.subr.bf16.mxu0 %v1751_v58 }
 0x1cd   :  { %1622 = vmatpush1.bf16.msra.mxu1 %v1563_v5  ;;  %1472 = vmatprep.mubr.bf16.mxu1 %v15503_v4 }
 0x1ce   :  { %1812 = vmatprep.subr.bf16.mxu1 %v1757_v6 }
 0x1d2   :  { %9438 = vmatmul.mubr.msk.bf16.gmra.mrb[4].mxu0 %vm331_vm4, %v1354_v53 }
 0x1d3   :  { %1600 = vmatprep.mubr.bf16.mxu0 %v15503_v4 }
 0x1d4   :  { %9440 = vmatmul.mubr.msk.bf16.gmra.mrb[4].mxu1 %vm331_vm4, %v1354_v53 }
 0x1d5   :  { %1653 = vmatprep.mubr.bf16.mxu1 %v15503_v4 }
 0x1da   :  { %9441 = vmatmul.mubr.msk.bf16.vlgmr.msra.gmra.mrb[0].mxu0 %vm331_vm4, %v1544_v18 }
 0x1db   :  { %1760 = vmatpush1.bf16.msra.mxu0 %v1748_v61  ;;  %1610 = vmatprep.mubr.bf16.mxu0 %v15503_v4 }
 0x1dc   :  { %9443 = vmatmul.mubr.msk.bf16.vlgmr.msra.gmra.mrb[0].mxu1 %vm331_vm4, %v1544_v18 }
 0x1dd   :  { %1813 = vmatpush1.bf16.msra.mxu1 %v1754_v27  ;;  %1663 = vmatprep.mubr.bf16.mxu1 %v15503_v4 }
 0x1e2   :  { %9442 = vmatmul.mubr.msk.bf16.gmra.mrb[4].mxu0 %vm331_vm4, %v1545_v54  ;;  %v1888_v43 = vpop.permute.xlu0 %1887 }
 0x1e3   :  { %1791 = vmatprep.mubr.bf16.mxu0 %v15503_v4 }
 0x1e4   :  { %9444 = vmatmul.mubr.msk.bf16.gmra.mrb[4].mxu1 %vm331_vm4, %v1545_v54 }
 0x1e5   :  { %1844 = vmatprep.mubr.bf16.mxu1 %v15503_v4 }
 0x1e9   :  { %v1893_v57 = vpop.permute.xlu1 %1892 }
 0x1ea   :  { %9445 = vmatmul.mubr.msk.bf16.vlgmr.msra.gmra.mrb[0].mxu0 %vm331_vm4, %v1735_v28 }
 0x1eb   :  { %1801 = vmatprep.mubr.bf16.mxu0 %v15503_v4 }
 0x1ec   :  { %9447 = vmatmul.mubr.msk.bf16.vlgmr.msra.gmra.mrb[0].mxu1 %vm331_vm4, %v1735_v28  ;;  %v1903_v29 = vpop.permute.xlu0 %1902 }
 0x1ed   :  { %1854 = vmatprep.mubr.bf16.mxu1 %v15503_v4 }
 0x1f1   :  { %v1898_v3 = vpop.permute.xlu1 %1897 }
 0x1f2   :  { %9446 = vmatmul.mubr.msk.bf16.gmra.mrb[4].mxu0 %vm331_vm4, %v1736_v13 }
 0x1f3   :  { %2270 = vmatprep.mubr.bf16.mxu0 %v15503_v4 }
 0x1f4   :  { %9448 = vmatmul.mubr.msk.bf16.gmra.mrb[4].mxu1 %vm331_vm4, %v1736_v13 }
 0x1f5   :  { %2323 = vmatprep.mubr.bf16.mxu1 %v15503_v4 }
 0x2bd   :  { %v1793_v56 = vpop.f32.mrb[0].mxu0 }
 0x2be   :  { %v1905_v48 = vadd.f32 %v1888_v43, %v1793_v56  ;;  %v1795_v58 = vpop.f32.mrb[1].mxu0 }
 0x2bf   :  { %v1906_v5 = vadd.f32 %v1888_v43, %v1795_v58  ;;  %v1797_v6 = vpop.f32.mrb[2].mxu0  ;;  %v1846_v17 = vpop.f32.mrb[0].mxu1 }
 0x2c0   :  { %v1909_v19 = vadd.f32 %v1893_v57, %v1797_v6  ;;  %v1907_v26 = vadd.f32 %v1888_v43, %v1846_v17  ;;  %v1799_v53 = vpop.f32.mrb[3].mxu0  ;;  %v1848_v0 = vpop.f32.mrb[1].mxu1 }
 0x2c1   :  { %v1921_v8 = vadd.f32 %v1906_v5, %v1905_v48  ;;  %v1910_v9 = vadd.f32 %v1893_v57, %v1799_v53  ;;  %v1850_v1 = vpop.f32.mrb[2].mxu1  ;;  %v1908_v61 = vadd.f32 %v1888_v43, %v1848_v0 }
 0x2c2   :  { %v1911_v59 = vadd.f32 %v1893_v57, %v1850_v1  ;;  %v1852_v50 = vpop.f32.mrb[3].mxu1 }
 0x2c3   :  { %v1922_v14 = vadd.f32 %v1921_v8, %v1907_v26  ;;  %v1926_v18 = vadd.f32 %v1910_v9, %v1909_v19  ;;  %v1912_v20 = vadd.f32 %v1893_v57, %v1852_v50 }
 0x2c5   :  { %v1927_v27 = vadd.f32 %v1926_v18, %v1911_v59  ;;  %v1803_v54 = vpop.f32.mrb[4].mxu0  ;;  %v1923_v55 = vadd.f32 %v1922_v14, %v1908_v61 }
 0x2c6   :  { %v1913_v28 = vadd.f32 %v1898_v3, %v1803_v54  ;;  %v1805_v11 = vpop.f32.mrb[5].mxu0 }
 0x2c7   :  { %v1914_v38 = vadd.f32 %v1898_v3, %v1805_v11  ;;  %v1856_v13 = vpop.f32.mrb[4].mxu1  ;;  %1924 = vadd.xlane.f32.xlu1 %v1923_v55  ;;  %v1807_v56 = vpop.f32.mrb[6].mxu0  ;;  %v1928_v58 = vadd.f32 %v1927_v27, %v1912_v20 }
 0x2c8   :  { %v1915_v6 = vadd.f32 %v1898_v3, %v1856_v13  ;;  %v1917_v17 = vadd.f32 %v1903_v29, %v1807_v56  ;;  %v1809_v53 = vpop.f32.mrb[7].mxu0  ;;  %v1858_v1 = vpop.f32.mrb[5].mxu1 }
 0x2c9   :  { %v1931_v8 = vadd.f32 %v1914_v38, %v1913_v28  ;;  %v1918_v4 = vadd.f32 %v1903_v29, %v1809_v53  ;;  %v1860_v43 = vpop.f32.mrb[6].mxu1  ;;  %1929 = vadd.xlane.f32.xlu0 %v1928_v58  ;;  %v1916_v18 = vadd.f32 %v1898_v3, %v1858_v1 }
 0x2ca   :  { %v1919_v0 = vadd.f32 %v1903_v29, %v1860_v43  ;;  %v1862_v57 = vpop.f32.mrb[7].mxu1 }
 0x2cb   :  { %v1932_v50 = vadd.f32 %v1931_v8, %v1915_v6  ;;  %v1936_v14 = vadd.f32 %v1918_v4, %v1917_v17  ;;  %v1920_v36 = vadd.f32 %v1903_v29, %v1862_v57 }
 0x2cd   :  { %v1937_v54 = vadd.f32 %v1936_v14, %v1919_v0  ;;  %v1933_v11 = vadd.f32 %v1932_v50, %v1916_v18 }
 0x2cf   :  { %1934 = vadd.xlane.f32.xlu0 %v1933_v11  ;;  %v1938_v55 = vadd.f32 %v1937_v54, %v1920_v36 }
 0x2d1   :  { %1939 = vadd.xlane.f32.xlu1 %v1938_v55 }
 0x354   :  { %v1925_v27 = vpop.xlane.xlu1 %1924 }
 0x355   :  { %v1942_v13 = vmul.f32 0.001953125, %v1925_v27 }
 0x356   :  { %v1930_v56 = vpop.xlane.xlu0 %1929 }
 0x357   :  { %v1943_v10 = vmul.f32 0.001953125, %v1930_v56  ;;  %v1946_v21 = vsub.f32 %v1905_v48, %v1942_v13  ;;  %v1947_v49 = vsub.f32 %v1906_v5, %v1942_v13  ;;  %v11202_v53 = vsub.f32 %v1907_v26, %v1942_v13 }
 0x358   :  { %v1949_v58 = vsub.f32 %v1908_v61, %v1942_v13 }
 0x359   :  { %v1962_v43 = vmul.f32 %v1946_v21, %v1946_v21  ;;  %v1963_v47 = vmul.f32 %v1947_v49, %v1947_v49  ;;  %v11204_v8 = vsub.f32 %v1909_v19, %v1943_v10  ;;  %v1951_v3 = vsub.f32 %v1910_v9, %v1943_v10 }
 0x35a   :  { %v11206_v1 = vsub.f32 %v1911_v59, %v1943_v10  ;;  %v1964_v29 = vmul.f32 %v11202_v53, %v11202_v53  ;;  %v1953_v48 = vsub.f32 %v1912_v20, %v1943_v10  ;;  %v1965_v54 = vmul.f32 %v1949_v58, %v1949_v58 }
 0x35b   :  { %v1978_v57 = vadd.f32 %v1963_v47, %v1962_v43  ;;  %v1966_v50 = vmul.f32 %v11204_v8, %v11204_v8  ;;  %v1967_v5 = vmul.f32 %v1951_v3, %v1951_v3 }
 0x35c   :  { %v1935_v14 = vpop.xlane.xlu0 %1934  ;;  %v1968_v19 = vmul.f32 %v11206_v1, %v11206_v1  ;;  %v1969_v47 = vmul.f32 %v1953_v48, %v1953_v48 }
 0x35d   :  { %v1944_v26 = vmul.f32 0.001953125, %v1935_v14  ;;  %v1979_v61 = vadd.f32 %v1978_v57, %v1964_v29  ;;  %v1983_v9 = vadd.f32 %v1967_v5, %v1966_v50 }
 0x35e   :  { %v1940_v11 = vpop.xlane.xlu1 %1939 }
 0x35f   :  { %v1945_v59 = vmul.f32 0.001953125, %v1940_v11  ;;  %v1980_v55 = vadd.f32 %v1979_v61, %v1965_v54  ;;  %v11214_v27 = vsub.f32 %v1913_v28, %v1944_v26  ;;  %v11216_v13 = vsub.f32 %v1914_v38, %v1944_v26 }
 0x360   :  { %v1984_v56 = vadd.f32 %v1983_v9, %v1968_v19  ;;  %v11218_v43 = vsub.f32 %v1915_v6, %v1944_v26  ;;  %v11220_v10 = vsub.f32 %v1916_v18, %v1944_v26 }
 0x361   :  { %1981 = vadd.xlane.f32.xlu0 %v1980_v55  ;;  %v1970_v20 = vmul.f32 %v11214_v27, %v11214_v27  ;;  %v1971_v29 = vmul.f32 %v11216_v13, %v11216_v13  ;;  %v11226_v57 = vsub.f32 %v1917_v17, %v1945_v59  ;;  %v11228_v50 = vsub.f32 %v1918_v4, %v1945_v59 }
 0x362   :  { %v1985_v28 = vadd.f32 %v1984_v56, %v1969_v47  ;;  %v1972_v38 = vmul.f32 %v11218_v43, %v11218_v43  ;;  %v11232_v14 = vsub.f32 %v1919_v0, %v1945_v59  ;;  %v11234_v18 = vsub.f32 %v1920_v36, %v1945_v59 }
 0x363   :  { %v1988_v6 = vadd.f32 %v1971_v29, %v1970_v20  ;;  %v1974_v5 = vmul.f32 %v11226_v57, %v11226_v57  ;;  %v1975_v26 = vmul.f32 %v11228_v50, %v11228_v50  ;;  %v1973_v4 = vmul.f32 %v11220_v10, %v11220_v10 }
 0x364   :  { %1986 = vadd.xlane.f32.xlu1 %v1985_v28  ;;  %v1976_v54 = vmul.f32 %v11232_v14, %v11232_v14  ;;  %v1977_v36 = vmul.f32 %v11234_v18, %v11234_v18 }
 0x365   :  { %v1989_v17 = vadd.f32 %v1988_v6, %v1972_v38  ;;  %v1993_v61 = vadd.f32 %v1975_v26, %v1974_v5 }
 0x367   :  { %v1990_v0 = vadd.f32 %v1989_v17, %v1973_v4  ;;  %v1994_v11 = vadd.f32 %v1993_v61, %v1976_v54 }
 0x369   :  { %1991 = vadd.xlane.f32.xlu0 %v1990_v0  ;;  %v1995_v19 = vadd.f32 %v1994_v11, %v1977_v36 }
 0x36b   :  { %1996 = vadd.xlane.f32.xlu1 %v1995_v19 }
 0x3ee   :  { %v1982_v9 = vpop.xlane.xlu0 %1981 }
 0x3ef   :  { %v1998_v59 = vmul.f32 0.001953125, %v1982_v9 }
 0x3f1   :  { %v2002_v55 = vadd.f32 1e-05, %v1998_v59  ;;  %v1987_v47 = vpop.xlane.xlu1 %1986 }
 0x3f2   :  { %v1999_v56 = vmul.f32 0.001953125, %v1987_v47 }
 0x3f3   :  { %10121 = vrsqrt.f32 %v2002_v55 }
 0x3f4   :  { %v2003_v20 = vadd.f32 1e-05, %v1999_v56 }
 0x3f6   :  { %10123 = vrsqrt.f32 %v2003_v20 }
 0x3f8   :  { %v1997_v20 = vpop.xlane.xlu1 %1996 }
 0x3fd   :  { %v10122_v29 = vpop.eup %10121 }
 0x3fe   :  { %v2010_v28 = vmul.f32 %v10122_v29, %v1946_v21  ;;  %v2011_v38 = vmul.f32 %v10122_v29, %v1947_v49  ;;  %v2013_v6 = vmul.f32 %v10122_v29, %v1949_v58  ;;  %v2012_v54 = vmul.f32 %v10122_v29, %v11202_v53 }
 0x400   :  { %v10124_v5 = vpop.eup %10123  ;;  %vm2026_vm11 = vcmp.ge.f32.partialorder %v2010_v28, 0.0  ;;  %v2042_v26 = vmul.f32 0.2, %v2010_v28  ;;  %vm2027_vm12 = vcmp.ge.f32.partialorder %v2011_v38, 0.0  ;;  %v2043_v4 = vmul.f32 0.2, %v2011_v38 }
 0x401   :  { %v2015_v17 = vmul.f32 %v10124_v5, %v1951_v3  ;;  %v2045_v36 = vmul.f32 0.2, %v2013_v6  ;;  %v2017_v11 = vmul.f32 %v10124_v5, %v1953_v48  ;;  %vm2029_vm13 = vcmp.ge.f32.partialorder %v2013_v6, 0.0 }
 0x402   :  { %v11247_v61 = vsel %vm2026_vm11, %v2010_v28, %v2042_v26  ;;  %v11249_v0 = vsel %vm2027_vm12, %v2011_v38, %v2043_v4  ;;  %v2044_v21 = vmul.f32 0.2, %v2012_v54  ;;  %v2016_v19 = vmul.f32 %v10124_v5, %v11206_v1 }
 0x403   :  { %15773 = vst [vmem:[#allocation57_spill] sm:$0xff] %v11247_v61  ;;  %15774 = vst [vmem:[#allocation58_spill] sm:$0xff] %v11249_v0  ;;  %2152 = vrot.lane.b32.xlu0 %v11247_v61, %s10502_s14  ;;  %2160 = vrot.lane.b32.xlu1 %v11249_v0, %s10502_s14  ;;  %vm2031_vm14 = vcmp.ge.f32.partialorder %v2015_v17, 0.0  ;;  %v2047_v49 = vmul.f32 0.2, %v2015_v17  ;;  %v11255_v58 = vsel %vm2029_vm13, %v2013_v6, %v2045_v36  ;;  %vm2028_vm15 = vcmp.ge.f32.partialorder %v2012_v54, 0.0 }
 0x404   :  { %v2049_v53 = vmul.f32 0.2, %v2017_v11  ;;  %vm2033_vm0 = vcmp.ge.f32.partialorder %v2017_v11, 0.0  ;;  %v11264_v48 = vsel %vm2028_vm15, %v2012_v54, %v2044_v21  ;;  %v2048_v59 = vmul.f32 0.2, %v2016_v19 }
 0x405   :  { %v11257_v3 = vsel %vm2031_vm14, %v2015_v17, %v2047_v49  ;;  %15776 = vst [vmem:[#allocation60_spill] sm:$0xff] %v11264_v48  ;;  %v2014_v55 = vmul.f32 %v10124_v5, %v11204_v8  ;;  %vm2032_vm2 = vcmp.ge.f32.partialorder %v2016_v19, 0.0  ;;  %v1992_v8 = vpop.xlane.xlu0 %1991  ;;  %v2001_v28 = vmul.f32 0.001953125, %v1997_v20 }
 0x406   :  { %15775 = vst [vmem:[#allocation59_spill] sm:$0xff] %v11257_v3  ;;  %v11266_v9 = vsel %vm2033_vm0, %v2017_v11, %v2049_v53  ;;  %v11273_v1 = vsel %vm2032_vm2, %v2016_v19, %v2048_v59  ;;  %v2000_v29 = vmul.f32 0.001953125, %v1992_v8 }
 0x407   :  { %2176 = vrot.lane.b32.xlu1 %v11255_v58, %s10502_s14  ;;  %2162 = vrot.lane.b32.xlu0 %v11257_v3, %s10502_s14  ;;  %15777 = vst [vmem:[#allocation61_spill] sm:$0xff] %v11266_v9  ;;  %15778 = vst [vmem:[#allocation62_spill] sm:$0xff] %v11273_v1  ;;  %v2046_v47 = vmul.f32 0.2, %v2014_v55  ;;  %vm2030_vm4 = vcmp.ge.f32.partialorder %v2014_v55, 0.0 }
 0x408   :  { %v2004_v38 = vadd.f32 1e-05, %v2000_v29  ;;  %v2005_v6 = vadd.f32 1e-05, %v2001_v28 }
 0x409   :  { %v11279_v56 = vsel %vm2030_vm4, %v2014_v55, %v2046_v47 }
 0x40a   :  { %15779 = vst [vmem:[#allocation63_spill] sm:$0xff] %v11279_v56  ;;  %10125 = vrsqrt.f32 %v2004_v38 }
 0x40b   :  { %2168 = vrot.lane.b32.xlu1 %v11264_v48, %s10502_s14  ;;  %2178 = vrot.lane.b32.xlu0 %v11266_v9, %s10502_s14  ;;  %10127 = vrsqrt.f32 %v2005_v6 }
 0x40f   :  { %2074 = vrot.lane.b32.xlu1 %v11247_v61, %s10504_s12  ;;  %2170 = vrot.lane.b32.xlu0 %v11273_v1, %s10502_s14 }
 0x413   :  { %2082 = vrot.lane.b32.xlu1 %v11249_v0, %s10504_s12  ;;  %2076 = vrot.lane.b32.xlu0 %v11279_v56, %s10504_s12 }
 0x414   :  { %v10126_v5 = vpop.eup %10125 }
 0x415   :  { %v10128_v26 = vpop.eup %10127  ;;  %v2018_v4 = vmul.f32 %v10126_v5, %v11214_v27  ;;  %v2019_v54 = vmul.f32 %v10126_v5, %v11216_v13  ;;  %v2020_v20 = vmul.f32 %v10126_v5, %v11218_v43 }
 0x416   :  { %v2022_v17 = vmul.f32 %v10128_v26, %v11226_v57  ;;  %v2023_v49 = vmul.f32 %v10128_v26, %v11228_v50  ;;  %v2021_v57 = vmul.f32 %v10126_v5, %v11220_v10  ;;  %v2025_v19 = vmul.f32 %v10128_v26, %v11234_v18 }
 0x417   :  { %2098 = vrot.lane.b32.xlu1 %v11255_v58, %s10504_s12  ;;  %2084 = vrot.lane.b32.xlu0 %v11257_v3, %s10504_s12  ;;  %v2050_v36 = vmul.f32 0.2, %v2018_v4  ;;  %vm2034_vm11 = vcmp.ge.f32.partialorder %v2018_v4, 0.0  ;;  %vm2035_vm13 = vcmp.ge.f32.partialorder %v2019_v54, 0.0  ;;  %v2051_v27 = vmul.f32 0.2, %v2019_v54 }
 0x418   :  { %v2054_v11 = vmul.f32 0.2, %v2022_v17  ;;  %vm2038_vm12 = vcmp.ge.f32.partialorder %v2022_v17, 0.0  ;;  %v2055_v13 = vmul.f32 0.2, %v2023_v49  ;;  %vm2039_vm14 = vcmp.ge.f32.partialorder %v2023_v49, 0.0 }
 0x419   :  { %v11382_v21 = vsel %vm2034_vm11, %v2018_v4, %v2050_v36  ;;  %v11395_v55 = vsel %vm2035_vm13, %v2019_v54, %v2051_v27  ;;  %v2053_v10 = vmul.f32 0.2, %v2021_v57  ;;  %v2057_v8 = vmul.f32 0.2, %v2025_v19 }
 0x41a   :  { %v11384_v53 = vsel %vm2038_vm12, %v2022_v17, %v2054_v11  ;;  %v11397_v47 = vsel %vm2039_vm14, %v2023_v49, %v2055_v13  ;;  %v2024_v18 = vmul.f32 %v10128_v26, %v11232_v14  ;;  %vm2037_vm15 = vcmp.ge.f32.partialorder %v2021_v57, 0.0 }
 0x41b   :  { %2090 = vrot.lane.b32.xlu1 %v11264_v48, %s10504_s12  ;;  %2100 = vrot.lane.b32.xlu0 %v11266_v9, %s10504_s12  ;;  %vm2041_vm0 = vcmp.ge.f32.partialorder %v2025_v19, 0.0  ;;  %v11409_v38 = vsel %vm2037_vm15, %v2021_v57, %v2053_v10  ;;  %v2052_v4 = vmul.f32 0.2, %v2020_v20  ;;  %vm2036_vm2 = vcmp.ge.f32.partialorder %v2020_v20, 0.0 }
 0x41c   :  { %v11411_v6 = vsel %vm2041_vm0, %v2025_v19, %v2057_v8  ;;  %v2056_v43 = vmul.f32 0.2, %v2024_v18  ;;  %vm2040_vm4 = vcmp.ge.f32.partialorder %v2024_v18, 0.0  ;;  %vm2231_vm11 = vcmask 261120  }
 0x41d   :  { %v11419_v26 = vsel %vm2036_vm2, %v2020_v20, %v2052_v4 }
 0x41e   :  { %v11421_v17 = vsel %vm2040_vm4, %v2024_v18, %v2056_v43 }
 0x41f   :  { %2456 = vrot.lane.b32.xlu1 %v11247_v61, %s10505_s6  ;;  %2092 = vrot.lane.b32.xlu0 %v11273_v1, %s10504_s12 }
 0x423   :  { %2464 = vrot.lane.b32.xlu1 %v11249_v0, %s10505_s6  ;;  %2458 = vrot.lane.b32.xlu0 %v11279_v56, %s10505_s6 }
 0x427   :  { %2480 = vrot.lane.b32.xlu1 %v11255_v58, %s10505_s6  ;;  %2466 = vrot.lane.b32.xlu0 %v11257_v3, %s10505_s6 }
 0x42b   :  { %2472 = vrot.lane.b32.xlu1 %v11264_v48, %s10505_s6  ;;  %2482 = vrot.lane.b32.xlu0 %v11266_v9, %s10505_s6 }
 0x42f   :  { %2663 = vrot.lane.b32.xlu1 %v11247_v61, %s10506_s2  ;;  %2474 = vrot.lane.b32.xlu0 %v11273_v1, %s10505_s6 }
 0x433   :  { %2671 = vrot.lane.b32.xlu1 %v11249_v0, %s10506_s2  ;;  %2665 = vrot.lane.b32.xlu0 %v11279_v56, %s10506_s2 }
 0x437   :  { %2687 = vrot.lane.b32.xlu1 %v11255_v58, %s10506_s2  ;;  %2673 = vrot.lane.b32.xlu0 %v11257_v3, %s10506_s2 }
 0x43b   :  { %2679 = vrot.lane.b32.xlu1 %v11264_v48, %s10506_s2  ;;  %2689 = vrot.lane.b32.xlu0 %v11266_v9, %s10506_s2 }
 0x43f   :  { %3021 = vrot.lane.b32.xlu1 %v11249_v0, %s10507_s18  ;;  %2681 = vrot.lane.b32.xlu0 %v11273_v1, %s10506_s2 }
 0x443   :  { %3029 = vrot.lane.b32.xlu1 %v11264_v48, %s10507_s18  ;;  %3023 = vrot.lane.b32.xlu0 %v11257_v3, %s10507_s18 }
 0x447   :  { %3013 = vrot.lane.b32.xlu1 %v11247_v61, %s10507_s18  ;;  %3031 = vrot.lane.b32.xlu0 %v11273_v1, %s10507_s18 }
 0x44b   :  { %3037 = vrot.lane.b32.xlu1 %v11255_v58, %s10507_s18  ;;  %3015 = vrot.lane.b32.xlu0 %v11279_v56, %s10507_s18 }
 0x44f   :  { %3228 = vrot.lane.b32.xlu1 %v11249_v0, %s10508_s27  ;;  %3039 = vrot.lane.b32.xlu0 %v11266_v9, %s10507_s18 }
 0x453   :  { %3236 = vrot.lane.b32.xlu1 %v11264_v48, %s10508_s27  ;;  %3230 = vrot.lane.b32.xlu0 %v11257_v3, %s10508_s27 }
 0x457   :  { %3220 = vrot.lane.b32.xlu1 %v11247_v61, %s10508_s27  ;;  %3238 = vrot.lane.b32.xlu0 %v11273_v1, %s10508_s27 }
 0x45b   :  { %3244 = vrot.lane.b32.xlu1 %v11255_v58, %s10508_s27  ;;  %3222 = vrot.lane.b32.xlu0 %v11279_v56, %s10508_s27 }
 0x45f   :  { %3435 = vrot.lane.b32.xlu1 %v11249_v0, %s10509_s28  ;;  %3246 = vrot.lane.b32.xlu0 %v11266_v9, %s10508_s27 }
 0x463   :  { %3443 = vrot.lane.b32.xlu1 %v11264_v48, %s10509_s28  ;;  %3437 = vrot.lane.b32.xlu0 %v11257_v3, %s10509_s28 }
 0x467   :  { %3427 = vrot.lane.b32.xlu1 %v11247_v61, %s10509_s28  ;;  %3445 = vrot.lane.b32.xlu0 %v11273_v1, %s10509_s28 }
 0x46b   :  { %3451 = vrot.lane.b32.xlu1 %v11255_v58, %s10509_s28  ;;  %3429 = vrot.lane.b32.xlu0 %v11279_v56, %s10509_s28 }
 0x46f   :  { %3453 = vrot.lane.b32.xlu0 %v11266_v9, %s10509_s28  ;;  %2154 = vrot.lane.b32.xlu1 %v11279_v56, %s10502_s14 }
 0x473   :  { %2156 = vrot.lane.b32.xlu1 %v11382_v21, %s10502_s14  ;;  %2158 = vrot.lane.b32.xlu0 %v11384_v53, %s10502_s14 }
 0x475   :  { %v11391_v50 = vpop.permute.xlu0 %2152  ;;  %v11393_v59 = vpop.permute.xlu1 %2160 }
 0x477   :  { %2164 = vrot.lane.b32.xlu1 %v11395_v55, %s10502_s14  ;;  %2166 = vrot.lane.b32.xlu0 %v11397_v47, %s10502_s14 }
 0x479   :  { %v11405_v29 = vpop.permute.xlu0 %2162  ;;  %v11407_v28 = vpop.permute.xlu1 %2176 }
 0x47b   :  { %2180 = vrot.lane.b32.xlu1 %v11409_v38, %s10502_s14  ;;  %2182 = vrot.lane.b32.xlu0 %v11411_v6, %s10502_s14 }
 0x47d   :  { %v11417_v14 = vpop.permute.xlu0 %2178  ;;  %v2169_v5 = vpop.permute.xlu1 %2168 }
 0x47e   :  { %v2188_v54 = vsel %vm288_vm1, %v11393_v59, %v2169_v5  ;;  %v2184_v36 = vsel %vm288_vm1, %v2169_v5, %v11407_v28 }
 0x47f   :  { %2172 = vrot.lane.b32.xlu1 %v11419_v26, %s10502_s14  ;;  %2174 = vrot.lane.b32.xlu0 %v11421_v17, %s10502_s14  ;;  %v2202_v27 = vmul.f32 %v2188_v54, %v10886_v23  ;;  %v2203_v19 = vmul.f32 %v2184_v36, %v10883_v22 }
 0x481   :  { %v2171_v11 = vpop.permute.xlu0 %2170  ;;  %v11433_v49 = vpop.permute.xlu1 %2074 }
 0x482   :  { %v2185_v57 = vsel %vm288_vm1, %v2171_v11, %v11417_v14  ;;  %v2189_v13 = vsel %vm288_vm1, %v11405_v29, %v2171_v11 }
 0x483   :  { %v2206_v10 = vmul.f32 %v2189_v13, %v10886_v23  ;;  %v2207_v8 = vmul.f32 %v2185_v57, %v10883_v22  ;;  %2078 = vrot.lane.b32.xlu1 %v11382_v21, %s10504_s12  ;;  %2080 = vrot.lane.b32.xlu0 %v11384_v53, %s10504_s12 }
 0x485   :  { %v2225_v20 = vpack.c.bf16 %v2206_v10, %v2202_v27  ;;  %v11449_v18 = vpop.permute.xlu0 %2076  ;;  %v11451_v4 = vpop.permute.xlu1 %2082  ;;  %v2226_v43 = vpack.c.bf16 %v2207_v8, %v2203_v19 }
 0x487   :  { %2086 = vrot.lane.b32.xlu1 %v11395_v55, %s10504_s12  ;;  %2088 = vrot.lane.b32.xlu0 %v11397_v47, %s10504_s12 }
 0x488   :  { %2291 = vmatprep.subr.bf16.mxu1 %v2226_v43 }
 0x489   :  { %2292 = vmatpush1.bf16.msra.mxu1 %v2225_v20  ;;  %v11457_v5 = vpop.permute.xlu0 %2084  ;;  %v11459_v54 = vpop.permute.xlu1 %2098 }
 0x48b   :  { %2102 = vrot.lane.b32.xlu1 %v11409_v38, %s10504_s12  ;;  %2104 = vrot.lane.b32.xlu0 %v11411_v6, %s10504_s12 }
 0x48d   :  { %v11465_v36 = vpop.permute.xlu0 %2100  ;;  %v11467_v11 = vpop.permute.xlu1 %2090 }
 0x48f   :  { %2094 = vrot.lane.b32.xlu1 %v11419_v26, %s10504_s12  ;;  %2096 = vrot.lane.b32.xlu0 %v11421_v17, %s10504_s12 }
 0x491   :  { %v11473_v27 = vpop.permute.xlu0 %2092  ;;  %v11475_v57 = vpop.permute.xlu1 %2456 }
 0x493   :  { %2460 = vrot.lane.b32.xlu1 %v11382_v21, %s10505_s6  ;;  %2462 = vrot.lane.b32.xlu0 %v11384_v53, %s10505_s6 }
 0x495   :  { %v11481_v13 = vpop.permute.xlu0 %2458  ;;  %v11483_v19 = vpop.permute.xlu1 %2464 }
 0x497   :  { %2468 = vrot.lane.b32.xlu1 %v11395_v55, %s10505_s6  ;;  %2470 = vrot.lane.b32.xlu0 %v11397_v47, %s10505_s6 }
 0x499   :  { %v11489_v10 = vpop.permute.xlu0 %2466  ;;  %v11491_v8 = vpop.permute.xlu1 %2480 }
 0x49b   :  { %2484 = vrot.lane.b32.xlu1 %v11409_v38, %s10505_s6  ;;  %2486 = vrot.lane.b32.xlu0 %v11411_v6, %s10505_s6 }
 0x49d   :  { %v11497_v20 = vpop.permute.xlu0 %2482  ;;  %v11499_v43 = vpop.permute.xlu1 %2472 }
 0x49f   :  { %2476 = vrot.lane.b32.xlu1 %v11419_v26, %s10505_s6  ;;  %2478 = vrot.lane.b32.xlu0 %v11421_v17, %s10505_s6 }
 0x4a1   :  { %v11505_v42 = vpop.permute.xlu0 %2474  ;;  %v11507_v32 = vpop.permute.xlu1 %2663 }
 0x4a3   :  { %2667 = vrot.lane.b32.xlu1 %v11382_v21, %s10506_s2  ;;  %2669 = vrot.lane.b32.xlu0 %v11384_v53, %s10506_s2 }
 0x4a5   :  { %v11513_v37 = vpop.permute.xlu0 %2665  ;;  %v11515_v40 = vpop.permute.xlu1 %2671 }
 0x4a7   :  { %2675 = vrot.lane.b32.xlu1 %v11395_v55, %s10506_s2  ;;  %2677 = vrot.lane.b32.xlu0 %v11397_v47, %s10506_s2 }
 0x4a9   :  { %v11521_v52 = vpop.permute.xlu0 %2673  ;;  %v11523_v35 = vpop.permute.xlu1 %2687 }
 0x4ab   :  { %2691 = vrot.lane.b32.xlu1 %v11409_v38, %s10506_s2  ;;  %2693 = vrot.lane.b32.xlu0 %v11411_v6, %s10506_s2 }
 0x4ad   :  { %v11529_v34 = vpop.permute.xlu0 %2689  ;;  %v11531_v44 = vpop.permute.xlu1 %2679 }
 0x4ae   :  { %15780 = vst [vmem:[#allocation64_spill] sm:$0xff] %v11531_v44 }
 0x4af   :  { %2683 = vrot.lane.b32.xlu1 %v11419_v26, %s10506_s2  ;;  %2685 = vrot.lane.b32.xlu0 %v11421_v17, %s10506_s2 }
 0x4b1   :  { %v11537_v39 = vpop.permute.xlu0 %2681  ;;  %v11539_v63 = vpop.permute.xlu1 %3021 }
 0x4b2   :  { %15781 = vst [vmem:[#allocation65_spill] sm:$0xff] %v11539_v63 }
 0x4b3   :  { %3642 = vrot.lane.b32.xlu1 %v11249_v0, %s10510_s26  ;;  %3644 = vrot.lane.b32.xlu0 %v11257_v3, %s10510_s26  ;;  %v2218_v0 = vld [vmem:[#allocation10 + $0x28] sm:$0xff] }
 0x4b5   :  { %v11545_v2 = vpop.permute.xlu0 %3023  ;;  %v11547_v30 = vpop.permute.xlu1 %3029 }
 0x4b6   :  { %15782 = vst [vmem:[#allocation66_spill] sm:$0xff] %v11545_v2  ;;  %15783 = vst [vmem:[#allocation67_spill] sm:$0xff] %v11547_v30 }
 0x4b7   :  { %3025 = vrot.lane.b32.xlu1 %v11395_v55, %s10507_s18  ;;  %3652 = vrot.lane.b32.xlu0 %v11273_v1, %s10510_s26 }
 0x4b9   :  { %v11553_v62 = vpop.permute.xlu0 %3031  ;;  %v11555_v44 = vpop.permute.xlu1 %3013 }
 0x4ba   :  { %15784 = vst [vmem:[#allocation68_spill] sm:$0xff] %v11553_v62  ;;  %15785 = vst [vmem:[#allocation69_spill] sm:$0xff] %v11555_v44 }
 0x4bb   :  { %3033 = vrot.lane.b32.xlu1 %v11419_v26, %s10507_s18  ;;  %3636 = vrot.lane.b32.xlu0 %v11279_v56, %s10510_s26 }
 0x4bd   :  { %v11561_v63 = vpop.permute.xlu0 %3015  ;;  %v11563_v2 = vpop.permute.xlu1 %3037 }
 0x4be   :  { %15786 = vst [vmem:[#allocation70_spill] sm:$0xff] %v11561_v63  ;;  %15787 = vst [vmem:[#allocation71_spill] sm:$0xff] %v11563_v2 }
 0x4bf   :  { %3017 = vrot.lane.b32.xlu1 %v11382_v21, %s10507_s18  ;;  %3660 = vrot.lane.b32.xlu0 %v11266_v9, %s10510_s26 }
 0x4c1   :  { %v11569_v1 = vpop.permute.xlu0 %3039  ;;  %v11571_v30 = vpop.permute.xlu1 %3228 }
 0x4c2   :  { %15788 = vst [vmem:[#allocation72_spill] sm:$0xff] %v11569_v1  ;;  %15789 = vst [vmem:[#allocation73_spill] sm:$0xff] %v11571_v30 }
 0x4c3   :  { %3027 = vrot.lane.b32.xlu0 %v11397_v47, %s10507_s18  ;;  %3041 = vrot.lane.b32.xlu1 %v11409_v38, %s10507_s18 }
 0x4c5   :  { %v11577_v44 = vpop.permute.xlu0 %3230  ;;  %v11579_v63 = vpop.permute.xlu1 %3236 }
 0x4c6   :  { %15790 = vst [vmem:[#allocation74_spill] sm:$0xff] %v11577_v44  ;;  %15791 = vst [vmem:[#allocation75_spill] sm:$0xff] %v11579_v63 }
 0x4c7   :  { %3035 = vrot.lane.b32.xlu0 %v11421_v17, %s10507_s18  ;;  %3232 = vrot.lane.b32.xlu1 %v11395_v55, %s10508_s27 }
 0x4c9   :  { %v11585_v2 = vpop.permute.xlu0 %3238  ;;  %v11587_v1 = vpop.permute.xlu1 %3220 }
 0x4ca   :  { %15792 = vst [vmem:[#allocation76_spill] sm:$0xff] %v11585_v2  ;;  %15793 = vst [vmem:[#allocation77_spill] sm:$0xff] %v11587_v1 }
 0x4cb   :  { %3019 = vrot.lane.b32.xlu0 %v11384_v53, %s10507_s18  ;;  %3240 = vrot.lane.b32.xlu1 %v11419_v26, %s10508_s27 }
 0x4cd   :  { %v11593_v30 = vpop.permute.xlu0 %3222  ;;  %v11595_v44 = vpop.permute.xlu1 %3244 }
 0x4ce   :  { %15794 = vst [vmem:[#allocation78_spill] sm:$0xff] %v11593_v30  ;;  %15795 = vst [vmem:[#allocation79_spill] sm:$0xff] %v11595_v44 }
 0x4cf   :  { %3043 = vrot.lane.b32.xlu0 %v11411_v6, %s10507_s18  ;;  %3224 = vrot.lane.b32.xlu1 %v11382_v21, %s10508_s27 }
 0x4d1   :  { %v11601_v63 = vpop.permute.xlu0 %3246  ;;  %v11603_v2 = vpop.permute.xlu1 %3435 }
 0x4d2   :  { %15796 = vst [vmem:[#allocation80_spill] sm:$0xff] %v11601_v63  ;;  %15797 = vst [vmem:[#allocation81_spill] sm:$0xff] %v11603_v2 }
 0x4d3   :  { %3234 = vrot.lane.b32.xlu0 %v11397_v47, %s10508_s27  ;;  %3248 = vrot.lane.b32.xlu1 %v11409_v38, %s10508_s27 }
 0x4d5   :  { %v11609_v1 = vpop.permute.xlu0 %3437  ;;  %v11611_v30 = vpop.permute.xlu1 %3443 }
 0x4d6   :  { %15798 = vst [vmem:[#allocation82_spill] sm:$0xff] %v11609_v1  ;;  %15799 = vst [vmem:[#allocation83_spill] sm:$0xff] %v11611_v30  ;;  %v2196_v30 = vsel %vm288_vm1, %v11407_v28, %v11391_v50 }
 0x4d7   :  { %3242 = vrot.lane.b32.xlu0 %v11421_v17, %s10508_s27  ;;  %3439 = vrot.lane.b32.xlu1 %v11395_v55, %s10509_s28 }
 0x4d9   :  { %v11617_v44 = vpop.permute.xlu0 %3445  ;;  %v11619_v63 = vpop.permute.xlu1 %3427 }
 0x4da   :  { %15800 = vst [vmem:[#allocation84_spill] sm:$0xff] %v11617_v44  ;;  %15801 = vst [vmem:[#allocation85_spill] sm:$0xff] %v11619_v63  ;;  %v2192_v63 = vsel %vm288_vm1, %v11391_v50, %v11393_v59  ;;  %v2200_v59 = vmul.f32 %v2196_v30, %v10870_v12  ;;  %v2115_v30 = vsel %vm239_vm3, %v11449_v18, %v11457_v5 }
 0x4db   :  { %3226 = vrot.lane.b32.xlu0 %v11384_v53, %s10508_s27  ;;  %3447 = vrot.lane.b32.xlu1 %v11419_v26, %s10509_s28  ;;  %v2201_v56 = vmul.f32 %v2192_v63, %v10877_v16 }
 0x4dd   :  { %v11625_v2 = vpop.permute.xlu0 %3429  ;;  %v11627_v1 = vpop.permute.xlu1 %3451 }
 0x4de   :  { %15802 = vst [vmem:[#allocation86_spill] sm:$0xff] %v11625_v2  ;;  %15803 = vst [vmem:[#allocation87_spill] sm:$0xff] %v11627_v1 }
 0x4df   :  { %3250 = vrot.lane.b32.xlu0 %v11411_v6, %s10508_s27  ;;  %3431 = vrot.lane.b32.xlu1 %v11382_v21, %s10509_s28 }
 0x4e1   :  { %v11641_v44 = vpop.permute.xlu0 %3453  ;;  %v2155_v2 = vpop.permute.xlu1 %2154 }
 0x4e2   :  { %15804 = vst [vmem:[#allocation88_spill] sm:$0xff] %v11641_v44  ;;  %v2193_v1 = vsel %vm288_vm1, %v2155_v2, %v11405_v29  ;;  %v2197_v9 = vsel %vm288_vm1, %v11417_v14, %v2155_v2 }
 0x4e3   :  { %v2204_v62 = vmul.f32 %v2197_v9, %v10870_v12  ;;  %v2205_v3 = vmul.f32 %v2193_v1, %v10877_v16  ;;  %3441 = vrot.lane.b32.xlu0 %v11397_v47, %s10509_s28  ;;  %3455 = vrot.lane.b32.xlu1 %v11409_v38, %s10509_s28 }
 0x4e5   :  { %v2223_v50 = vpack.c.bf16 %v2204_v62, %v2200_v59  ;;  %v2159_v29 = vpop.permute.xlu0 %2158  ;;  %v2157_v28 = vpop.permute.xlu1 %2156  ;;  %v2224_v44 = vpack.c.bf16 %v2205_v3, %v2201_v56  ;;  %v2127_v56 = vmul.f32 %v2115_v30, %v10899_v33 }
 0x4e7   :  { %3449 = vrot.lane.b32.xlu0 %v11421_v17, %s10509_s28  ;;  %2238 = vmatprep.subr.bf16.mxu0 %v2224_v44  ;;  %v2114_v44 = vsel %vm239_vm3, %v11433_v49, %v11451_v4 }
 0x4e8   :  { %3650 = vrot.lane.b32.xlu1 %v11264_v48, %s10510_s26  ;;  %2239 = vmatpush1.bf16.msra.mxu0 %v2223_v50  ;;  %v2217_v48 = vld [vmem:[#allocation10 + $0x20] sm:$0xff]  ;;  %v2123_v24 = vmul.f32 %v2114_v44, %v10899_v33  ;;  %v2118_v44 = vsel %vm239_vm3, %v11459_v54, %v11433_v49 }
 0x4e9   :  { %v2167_v2 = vpop.permute.xlu0 %2166  ;;  %v2165_v63 = vpop.permute.xlu1 %2164 }
 0x4ea   :  { %v2195_v62 = vsel %vm288_vm1, %v2159_v29, %v2167_v2  ;;  %v2194_v3 = vsel %vm288_vm1, %v2157_v28, %v2165_v63 }
 0x4eb   :  { %v2213_v9 = vmul.f32 %v2195_v62, %v10877_v16  ;;  %v2209_v1 = vmul.f32 %v2194_v3, %v10877_v16  ;;  %3433 = vrot.lane.b32.xlu0 %v11384_v53, %s10509_s28  ;;  %v2119_v62 = vsel %vm239_vm3, %v11465_v36, %v11449_v18  ;;  %v2145_v18 = vpack.c.bf16 %v2127_v56, %v2123_v24 }
 0x4ec   :  { %3634 = vrot.lane.b32.xlu1 %v11247_v61, %s10510_s26 }
 0x4ed   :  { %v2183_v14 = vpop.permute.xlu0 %2182  ;;  %v2181_v59 = vpop.permute.xlu1 %2180  ;;  %v2228_v50 = vpack.c.bf16 %v2213_v9, %v2209_v1  ;;  %v2106_v9 = vsel %vm239_vm3, %v11467_v11, %v11459_v54  ;;  %v2107_v1 = vsel %vm239_vm3, %v11473_v27, %v11465_v36  ;;  %v2111_v36 = vsel %vm239_vm3, %v11457_v5, %v11473_v27 }
 0x4ee   :  { %v2199_v3 = vsel %vm288_vm1, %v2183_v14, %v2159_v29  ;;  %v2198_v30 = vsel %vm288_vm1, %v2181_v59, %v2157_v28  ;;  %v2221_v29 = vpack.c.bf16 %v2218_v0, %v2217_v48  ;;  %v2126_v28 = vmul.f32 %v2119_v62, %v10905_v41 }
 0x4ef   :  { %v2212_v16 = vmul.f32 %v2199_v3, %v10870_v12  ;;  %v2208_v61 = vmul.f32 %v2198_v30, %v10870_v12  ;;  %3457 = vrot.lane.b32.xlu0 %v11411_v6, %s10509_s28  ;;  %2240 = vmatprep.subr.bf16.mxu0 %v2228_v50  ;;  %v2125_v5 = vmul.f32 %v2106_v9, %v10916_v51 }
 0x4f0   :  { %3658 = vrot.lane.b32.xlu1 %v11255_v58, %s10510_s26 }
 0x4f1   :  { %v2227_v50 = vpack.c.bf16 %v2212_v16, %v2208_v61  ;;  %v2175_v3 = vpop.permute.xlu0 %2174  ;;  %v2173_v49 = vpop.permute.xlu1 %2172 }
 0x4f2   :  { %v2187_v30 = vsel %vm288_vm1, %v2175_v3, %v2183_v14  ;;  %v2191_v24 = vsel %vm288_vm1, %v2167_v2, %v2175_v3  ;;  %v2186_v0 = vsel %vm288_vm1, %v2173_v49, %v2181_v59  ;;  %v2190_v48 = vsel %vm288_vm1, %v2165_v63, %v2173_v49 }
 0x4f3   :  { %v2214_v54 = vmul.f32 %v2191_v24, %v10886_v23  ;;  %v2215_v56 = vmul.f32 %v2187_v30, %v10883_v22  ;;  %v2210_v16 = vmul.f32 %v2190_v48, %v10886_v23  ;;  %v2211_v61 = vmul.f32 %v2186_v0, %v10883_v22  ;;  %3648 = vrot.lane.b32.xlu0 %v11397_v47, %s10510_s26 }
 0x4f4   :  { %v2129_v2 = vmul.f32 %v2107_v1, %v10916_v51  ;;  %3646 = vrot.lane.b32.xlu1 %v11395_v55, %s10510_s26  ;;  %2241 = vmatpush1.bf16.msra.mxu0 %v2227_v50  ;;  %v2122_v63 = vmul.f32 %v2118_v44, %v10905_v41  ;;  %v2110_v49 = vsel %vm239_vm3, %v11451_v4, %v11467_v11  ;;  %v2220_v50 = vld [vmem:[#allocation10 + $0x38] sm:$0xff]  ;;  %v15805_v24 = vmov 0  }
 0x4f5   :  { %v2229_v14 = vpack.c.bf16 %v2214_v54, %v2210_v16  ;;  %2350 = vmatprep.subr.bf16.mxu0 %v2145_v18  ;;  %v2081_v59 = vpop.permute.xlu0 %2080  ;;  %v2079_v62 = vpop.permute.xlu1 %2078  ;;  %v2230_v3 = vpack.c.bf16 %v2215_v56, %v2211_v61  ;;  %v2128_v1 = vmul.f32 %v2111_v36, %v10911_v46  ;;  %v2219_v18 = vld [vmem:[#allocation10 + $0x30] sm:$0xff]  ;;  %v2124_v30 = vmul.f32 %v2110_v49, %v10911_v46  ;;  %v2138_v16 = vld [vmem:[#allocation10] sm:$0xff]  ;;  %v2139_v61 = vld [vmem:[#allocation10 + $0x8] sm:$0xff] }
 0x4f6   :  { %v2144_v27 = vpack.c.bf16 %v2126_v28, %v2122_v63  ;;  %v2147_v44 = vpack.c.bf16 %v2129_v2, %v2125_v5  ;;  %v2222_v56 = vpack.c.bf16 %v2220_v50, %v2219_v18  ;;  %v2496_v36 = vsel %vm592_vm5, %v11475_v57, %v11483_v19 }
 0x4f7   :  { %9449 = vmatmul.mubr.msk.bf16.vlgmr.msra.gmra.mrb[8].mxu0 %vm2231_vm11, %v2221_v29  ;;  %3656 = vrot.lane.b32.xlu0 %v11421_v17, %s10510_s26  ;;  %v2146_v0 = vpack.c.bf16 %v2128_v1, %v2124_v30  ;;  %v2497_v2 = vsel %vm592_vm5, %v11481_v13, %v11489_v10  ;;  %v2505_v18 = vmul.f32 %v2496_v36, %v10928_v60 }
 0x4f8   :  { %3654 = vrot.lane.b32.xlu1 %v11419_v26, %s10510_s26  ;;  %2293 = vmatprep.subr.bf16.mxu1 %v2230_v3  ;;  %v2488_v30 = vsel %vm592_vm5, %v11499_v43, %v11491_v8 }
 0x4f9   :  { %2351 = vmatpush1.bf16.msra.mxu0 %v2144_v27  ;;  %2294 = vmatpush1.bf16.msra.mxu1 %v2229_v14  ;;  %v2089_v4 = vpop.permute.xlu0 %2088  ;;  %v2087_v11 = vpop.permute.xlu1 %2086 }
 0x4fa   :  { %v2117_v28 = vsel %vm239_vm3, %v2081_v59, %v2089_v4  ;;  %2403 = vmatprep.subr.bf16.mxu1 %v2147_v44  ;;  %v2116_v9 = vsel %vm239_vm3, %v2079_v62, %v2087_v11  ;;  %2280 = vmatprep.mubr.bf16.mxu0 %v15805_v24  ;;  %v11776_v44 = vpack.c.bf16 %v2139_v61, %v2138_v16 }
 0x4fb   :  { %v2135_v48 = vmul.f32 %v2117_v28, %v10899_v33  ;;  %v2131_v54 = vmul.f32 %v2116_v9, %v10899_v33  ;;  %3640 = vrot.lane.b32.xlu0 %v11384_v53, %s10510_s26  ;;  %v2489_v28 = vsel %vm592_vm5, %v11505_v42, %v11497_v20 }
 0x4fc   :  { %3638 = vrot.lane.b32.xlu1 %v11382_v21, %s10510_s26  ;;  %9451 = vmatmul.mubr.msk.bf16.vlgmr.msra.gmra.mrb[8].mxu1 %vm2231_vm11, %v2221_v29  ;;  %v2501_v29 = vsel %vm592_vm5, %v11497_v20, %v11481_v13  ;;  %v2509_v13 = vmul.f32 %v2497_v2, %v10928_v60 }
 0x4fd   :  { %2404 = vmatpush1.bf16.msra.mxu1 %v2146_v0  ;;  %v2105_v63 = vpop.permute.xlu0 %2104  ;;  %v2103_v14 = vpop.permute.xlu1 %2102  ;;  %v2149_v3 = vpack.c.bf16 %v2135_v48, %v2131_v54  ;;  %2333 = vmatprep.mubr.bf16.mxu1 %v15805_v24  ;;  %v2508_v50 = vmul.f32 %v2501_v29, %v10936_v15  ;;  %v3841_v48 = vld [vmem:[#allocation17] sm:$0xff] }
 0x4fe   :  { %v2121_v49 = vsel %vm239_vm3, %v2105_v63, %v2081_v59  ;;  %v2120_v5 = vsel %vm239_vm3, %v2103_v14, %v2079_v62  ;;  %v2500_v59 = vsel %vm592_vm5, %v11491_v8, %v11475_v57  ;;  %v3842_v62 = vld [vmem:[#allocation17 + $0x8] sm:$0xff] }
 0x4ff   :  { %v2134_v27 = vmul.f32 %v2121_v49, %v10905_v41  ;;  %v2130_v1 = vmul.f32 %v2120_v5, %v10905_v41  ;;  %9450 = vmatmul.mubr.msk.bf16.gmra.mrb[12].mxu0 %vm2231_vm11, %v2222_v56  ;;  %3664 = vrot.lane.b32.xlu0 %v11411_v6, %s10510_s26  ;;  %v2504_v29 = vmul.f32 %v2500_v59, %v10936_v15 }
 0x500   :  { %3662 = vrot.lane.b32.xlu1 %v11409_v38, %s10510_s26  ;;  %2352 = vmatprep.subr.bf16.mxu0 %v2149_v3 }
 0x501   :  { %v2148_v9 = vpack.c.bf16 %v2134_v27, %v2130_v1  ;;  %v2097_v0 = vpop.permute.xlu0 %2096  ;;  %v2095_v57 = vpop.permute.xlu1 %2094  ;;  %2382 = vmatprep.mubr.bf16.mxu0 %v15805_v24  ;;  %v3843_v1 = vld [vmem:[#allocation17 + $0x10] sm:$0xff] }
 0x502   :  { %v2109_v54 = vsel %vm239_vm3, %v2097_v0, %v2105_v63  ;;  %v2113_v16 = vsel %vm239_vm3, %v2089_v4, %v2097_v0  ;;  %v2108_v8 = vsel %vm239_vm3, %v2095_v57, %v2103_v14  ;;  %v2112_v61 = vsel %vm239_vm3, %v2087_v11, %v2095_v57  ;;  %v3844_v14 = vld [vmem:[#allocation17 + $0x18] sm:$0xff] }
 0x503   :  { %v2136_v20 = vmul.f32 %v2113_v16, %v10911_v46  ;;  %v2137_v36 = vmul.f32 %v2109_v54, %v10916_v51  ;;  %v2132_v2 = vmul.f32 %v2112_v61, %v10911_v46  ;;  %v2133_v3 = vmul.f32 %v2108_v8, %v10916_v51  ;;  %3852 = vperm.xlu0 %10115, %v3842_v62  }
 0x504   :  { %v2493_v4 = vsel %vm592_vm5, %v11489_v10, %v11505_v42  ;;  %v2511_v63 = vmul.f32 %v2489_v28, %v10950_v31  ;;  %3847 = vperm.xlu1 %10116, %v3841_v48   ;;  %9452 = vmatmul.mubr.msk.bf16.gmra.mrb[12].mxu1 %vm2231_vm11, %v2222_v56  ;;  %v2528_v11 = vpack.c.bf16 %v2509_v13, %v2505_v18  ;;  %v2141_v28 = vld [vmem:[#allocation10 + $0x18] sm:$0xff] }
 0x505   :  { %v2150_v49 = vpack.c.bf16 %v2136_v20, %v2132_v2  ;;  %2353 = vmatpush1.bf16.msra.mxu0 %v2148_v9  ;;  %v2463_v5 = vpop.permute.xlu0 %2462  ;;  %v2461_v27 = vpop.permute.xlu1 %2460  ;;  %v2151_v62 = vpack.c.bf16 %v2137_v36, %v2133_v3  ;;  %2435 = vmatprep.mubr.bf16.mxu1 %v15805_v24  ;;  %v2492_v42 = vsel %vm592_vm5, %v11483_v19, %v11499_v43 }
 0x506   :  { %v2507_v10 = vmul.f32 %v2488_v30, %v10950_v31  ;;  %2541 = vmatprep.subr.bf16.mxu0 %v2528_v11  ;;  %v2527_v56 = vpack.c.bf16 %v2508_v50, %v2504_v29  ;;  %v2510_v18 = vmul.f32 %v2493_v4, %v10944_v25  ;;  %v2506_v59 = vmul.f32 %v2492_v42, %v10944_v25  ;;  %v2140_v30 = vld [vmem:[#allocation10 + $0x10] sm:$0xff] }
 0x507   :  { %3862 = vperm.xlu0 %10115, %v3844_v14   ;;  %2405 = vmatprep.subr.bf16.mxu1 %v2151_v62  ;;  %v2704_v19 = vsel %vm783_vm6, %v11513_v37, %v11521_v52  ;;  %v2703_v9 = vsel %vm783_vm6, %v11507_v32, %v11515_v40  ;;  %v2143_v61 = vpack.c.bf16 %v2141_v28, %v2140_v30  ;;  %v15808_v62 = vld [vmem:[#allocation38_spill] sm:$0xff] }
 0x508   :  { %9453 = vmatmul.mubr.msk.bf16.vlgmr.msra.gmra.mrb[8].mxu0 %vm2231_vm11, %v11776_v44  ;;  %3857 = vperm.xlu1 %10116, %v3843_v1   ;;  %v2530_v13 = vpack.c.bf16 %v2511_v63, %v2507_v10  ;;  %v2529_v48 = vpack.c.bf16 %v2510_v18, %v2506_v59  ;;  %v2716_v8 = vmul.f32 %v2704_v19, %v10965_v45  ;;  %v2522_v59 = vld [vmem:[#allocation10 + $0x48] sm:$0xff] }
 0x509   :  { %2542 = vmatpush1.bf16.msra.mxu0 %v2527_v56  ;;  %2406 = vmatpush1.bf16.msra.mxu1 %v2150_v49  ;;  %v2471_v43 = vpop.permute.xlu0 %2470  ;;  %v2469_v50 = vpop.permute.xlu1 %2468  ;;  %v2712_v20 = vmul.f32 %v2703_v9, %v10965_v45  ;;  %v2708_v4 = vsel %vm783_vm6, %v11529_v34, %v11513_v37  ;;  %v2696_v63 = vsel %vm783_vm6, %v11537_v39, %v11529_v34  ;;  %v15806_v34 = vld [vmem:[#allocation39_spill] sm:$0xff] }
 0x50a   :  { %v2499_v0 = vsel %vm592_vm5, %v2463_v5, %v2471_v43  ;;  %2594 = vmatprep.subr.bf16.mxu1 %v2530_v13  ;;  %v2498_v57 = vsel %vm592_vm5, %v2461_v27, %v2469_v50  ;;  %2392 = vmatprep.mubr.bf16.mxu0 %v15805_v24  ;;  %v2707_v37 = vsel %vm783_vm6, %v11523_v35, %v11507_v32  ;;  %v2521_v13 = vld [vmem:[#allocation10 + $0x40] sm:$0xff] }
 0x50b   :  { %v2517_v54 = vmul.f32 %v2499_v0, %v10928_v60  ;;  %v2513_v16 = vmul.f32 %v2498_v57, %v10928_v60  ;;  %v2735_v49 = vpack.c.bf16 %v2716_v8, %v2712_v20  ;;  %v2715_v1 = vmul.f32 %v2708_v4, %v15806_v34 }
 0x50c   :  { %9455 = vmatmul.mubr.msk.bf16.vlgmr.msra.gmra.mrb[8].mxu1 %vm2231_vm11, %v11776_v44  ;;  %v2718_v42 = vmul.f32 %v2696_v63, %v15808_v62 }
 0x50d   :  { %2595 = vmatpush1.bf16.msra.mxu1 %v2529_v48  ;;  %v2487_v36 = vpop.permute.xlu0 %2486  ;;  %v2485_v2 = vpop.permute.xlu1 %2484  ;;  %v2532_v3 = vpack.c.bf16 %v2517_v54, %v2513_v16  ;;  %2445 = vmatprep.mubr.bf16.mxu1 %v15805_v24  ;;  %v2525_v48 = vpack.c.bf16 %v2522_v59, %v2521_v13 }
 0x50e   :  { %v2503_v44 = vsel %vm592_vm5, %v2487_v36, %v2463_v5  ;;  %v2502_v11 = vsel %vm592_vm5, %v2485_v2, %v2461_v27  ;;  %v15807_v5 = vld [vmem:[#allocation64_spill] sm:$0xff] }
 0x50f   :  { %v2516_v14 = vmul.f32 %v2503_v44, %v10936_v15  ;;  %v2512_v29 = vmul.f32 %v2502_v11, %v10936_v15  ;;  %2543 = vmatprep.subr.bf16.mxu0 %v2532_v3  ;;  %v2695_v27 = vsel %vm783_vm6, %v15807_v5, %v11523_v35  ;;  %v2523_v11 = vld [vmem:[#allocation10 + $0x50] sm:$0xff] }
 0x510   :  { %9454 = vmatmul.mubr.msk.bf16.gmra.mrb[12].mxu0 %vm2231_vm11, %v2143_v61  ;;  %v2714_v54 = vmul.f32 %v2695_v27, %v15808_v62 }
 0x511   :  { %v2531_v10 = vpack.c.bf16 %v2516_v14, %v2512_v29  ;;  %v2479_v56 = vpop.permute.xlu0 %2478  ;;  %v2477_v18 = vpop.permute.xlu1 %2476  ;;  %2573 = vmatprep.mubr.bf16.mxu0 %v15805_v24  ;;  %v2524_v14 = vld [vmem:[#allocation10 + $0x58] sm:$0xff] }
 0x512   :  { %v2491_v32 = vsel %vm592_vm5, %v2479_v56, %v2487_v36  ;;  %v2495_v19 = vsel %vm592_vm5, %v2471_v43, %v2479_v56  ;;  %v2490_v30 = vsel %vm592_vm5, %v2477_v18, %v2485_v2  ;;  %v2494_v35 = vsel %vm592_vm5, %v2469_v50, %v2477_v18 }
 0x513   :  { %v2518_v28 = vmul.f32 %v2495_v19, %v10944_v25  ;;  %v2519_v9 = vmul.f32 %v2491_v32, %v10950_v31  ;;  %v2514_v0 = vmul.f32 %v2494_v35, %v10944_v25  ;;  %v2515_v57 = vmul.f32 %v2490_v30, %v10950_v31  ;;  %2544 = vmatpush1.bf16.msra.mxu0 %v2531_v10  ;;  %v15810_v35 = vld [vmem:[#allocation58_spill] sm:$0xff] }
 0x514   :  { %v2700_v43 = vsel %vm783_vm6, %v11521_v52, %v11537_v39  ;;  %9456 = vmatmul.mubr.msk.bf16.gmra.mrb[12].mxu1 %vm2231_vm11, %v2143_v61  ;;  %2748 = vmatprep.subr.bf16.mxu0 %v2735_v49  ;;  %v2711_v50 = vmul.f32 %v2707_v37, %v15806_v34  ;;  %v2699_v2 = vsel %vm783_vm6, %v11515_v40, %v15807_v5  ;;  %v15809_v52 = vld [vmem:[#allocation40_spill] sm:$0xff] }
 0x515   :  { %v2533_v16 = vpack.c.bf16 %v2518_v28, %v2514_v0  ;;  %v2670_v8 = vpop.permute.xlu0 %2669  ;;  %v2668_v20 = vpop.permute.xlu1 %2667  ;;  %v2534_v36 = vpack.c.bf16 %v2519_v9, %v2515_v57  ;;  %2626 = vmatprep.mubr.bf16.mxu1 %v15805_v24  ;;  %v2717_v61 = vmul.f32 %v2700_v43, %v15809_v52  ;;  %v2737_v3 = vpack.c.bf16 %v2718_v42, %v2714_v54  ;;  %v15811_v28 = vld [vmem:[#allocation59_spill] sm:$0xff]  ;;  %v2728_v0 = vld [vmem:[#allocation10 + $0x60] sm:$0xff]  ;;  %v2729_v57 = vld [vmem:[#allocation10 + $0x68] sm:$0xff] }
 0x516   :  { %v2734_v39 = vpack.c.bf16 %v2715_v1, %v2711_v50  ;;  %v2713_v4 = vmul.f32 %v2699_v2, %v15809_v52  ;;  %v2526_v5 = vpack.c.bf16 %v2524_v14, %v2523_v11  ;;  %v2878_v9 = vpack.c.bf16 %v15811_v28, %v15810_v35  ;;  %v15814_v14 = vld [vmem:[#allocation67_spill] sm:$0xff]  ;;  %v15822_v28 = vld [vmem:[#allocation69_spill] sm:$0xff] }
 0x517   :  { %2596 = vmatprep.subr.bf16.mxu1 %v2534_v36  ;;  %v2732_v2 = vpack.c.bf16 %v2729_v57, %v2728_v0  ;;  %v15824_v0 = vld [vmem:[#allocation60_spill] sm:$0xff]  ;;  %v15825_v57 = vld [vmem:[#allocation62_spill] sm:$0xff] }
 0x518   :  { %9457 = vmatmul.mubr.msk.bf16.vlgmr.msra.gmra.mrb[8].mxu0 %vm2231_vm11, %v2525_v48  ;;  %2597 = vmatpush1.bf16.msra.mxu1 %v2533_v16  ;;  %v2736_v37 = vpack.c.bf16 %v2717_v61, %v2713_v4  ;;  %v15813_v61 = vld [vmem:[#allocation66_spill] sm:$0xff] }
 0x519   :  { %2749 = vmatpush1.bf16.msra.mxu0 %v2734_v39  ;;  %v2678_v63 = vpop.permute.xlu0 %2677  ;;  %2801 = vmatprep.subr.bf16.mxu1 %v2737_v3  ;;  %v2676_v44 = vpop.permute.xlu1 %2675  ;;  %v15812_v39 = vld [vmem:[#allocation68_spill] sm:$0xff] }
 0x51a   :  { %v2706_v29 = vsel %vm783_vm6, %v2670_v8, %v2678_v63  ;;  %v2705_v40 = vsel %vm783_vm6, %v2668_v20, %v2676_v44  ;;  %2583 = vmatprep.mubr.bf16.mxu0 %v15805_v24  ;;  %v3050_v3 = vsel %vm1125_vm7, %v15813_v61, %v15812_v39 }
 0x51b   :  { %v2724_v49 = vmul.f32 %v2706_v29, %v10965_v45  ;;  %v2720_v1 = vmul.f32 %v2705_v40, %v10965_v45  ;;  %v15815_v29 = vld [vmem:[#allocation65_spill] sm:$0xff] }
 0x51c   :  { %9459 = vmatmul.mubr.msk.bf16.vlgmr.msra.gmra.mrb[8].mxu1 %vm2231_vm11, %v2525_v48  ;;  %v3049_v40 = vsel %vm1125_vm7, %v15815_v29, %v15814_v14 }
 0x51d   :  { %2802 = vmatpush1.bf16.msra.mxu1 %v2736_v37  ;;  %v2694_v27 = vpop.permute.xlu0 %2693  ;;  %v2692_v42 = vpop.permute.xlu1 %2691  ;;  %v2739_v10 = vpack.c.bf16 %v2724_v49, %v2720_v1  ;;  %2636 = vmatprep.mubr.bf16.mxu1 %v15805_v24  ;;  %v15816_v37 = vld [vmem:[#allocation57_spill] sm:$0xff]  ;;  %v15817_v49 = vld [vmem:[#allocation63_spill] sm:$0xff] }
 0x51e   :  { %v2710_v56 = vsel %vm783_vm6, %v2694_v27, %v2670_v8  ;;  %v2709_v18 = vsel %vm783_vm6, %v2692_v42, %v2668_v20  ;;  %v2877_v1 = vpack.c.bf16 %v15817_v49, %v15816_v37 }
 0x51f   :  { %v2723_v13 = vmul.f32 %v2710_v56, %v15806_v34  ;;  %v2719_v59 = vmul.f32 %v2709_v18, %v15806_v34  ;;  %2750 = vmatprep.subr.bf16.mxu0 %v2739_v10  ;;  %v2882_v56 = vpack.c.bf16 %v11397_v47, %v11395_v55  ;;  %v15820_v18 = vld [vmem:[#allocation70_spill] sm:$0xff]  ;;  %v2881_v47 = vpack.c.bf16 %v11384_v53, %v11382_v21 }
 0x520   :  { %9458 = vmatmul.mubr.msk.bf16.gmra.mrb[12].mxu0 %vm2231_vm11, %v2526_v5  ;;  %v2883_v21 = vpack.c.bf16 %v11421_v17, %v11419_v26  ;;  %v3054_v53 = vsel %vm1125_vm7, %v15820_v18, %v15813_v61  ;;  %v3053_v26 = vsel %vm1125_vm7, %v15822_v28, %v15815_v29  ;;  %v15827_v17 = vld [vmem:[#allocation43_spill] sm:$0xff]  ;;  %v4177_v34 = vld [vmem:[#allocation11 + $0x28] sm:$0xff] }
 0x521   :  { %v2738_v32 = vpack.c.bf16 %v2723_v13, %v2719_v59  ;;  %v2686_v19 = vpop.permute.xlu0 %2685  ;;  %v2684_v30 = vpop.permute.xlu1 %2683  ;;  %2780 = vmatprep.mubr.bf16.mxu0 %v15805_v24  ;;  %v15821_v13 = vld [vmem:[#allocation72_spill] sm:$0xff]  ;;  %v3061_v49 = vmul.f32 %v3053_v26, %v15827_v17  ;;  %v15834_v26 = vld [vmem:[#allocation78_spill] sm:$0xff] }
 0x522   :  { %v2698_v43 = vsel %vm783_vm6, %v2686_v19, %v2694_v27  ;;  %v2702_v48 = vsel %vm783_vm6, %v2678_v63, %v2686_v19  ;;  %v2697_v50 = vsel %vm783_vm6, %v2684_v30, %v2692_v42  ;;  %v2701_v54 = vsel %vm783_vm6, %v2676_v44, %v2684_v30  ;;  %v15819_v42 = vld [vmem:[#allocation41_spill] sm:$0xff]  ;;  %v2730_v30 = vld [vmem:[#allocation10 + $0x70] sm:$0xff] }
 0x523   :  { %v2725_v16 = vmul.f32 %v2702_v48, %v15809_v52  ;;  %v2726_v8 = vmul.f32 %v2698_v43, %v15808_v62  ;;  %v2721_v20 = vmul.f32 %v2701_v54, %v15809_v52  ;;  %v2722_v36 = vmul.f32 %v2697_v50, %v15808_v62  ;;  %2751 = vmatpush1.bf16.msra.mxu0 %v2738_v32  ;;  %v15826_v48 = vld [vmem:[#allocation42_spill] sm:$0xff] }
 0x524   :  { %9460 = vmatmul.mubr.msk.bf16.gmra.mrb[12].mxu1 %vm2231_vm11, %v2526_v5  ;;  %2891 = vmatprep.subr.bf16.mxu0 %v2878_v9  ;;  %v15818_v5 = vld [vmem:[#allocation61_spill] sm:$0xff]  ;;  %v3066_v10 = vmul.f32 %v3050_v3, %v15819_v42  ;;  %v3058_v59 = vsel %vm1125_vm7, %v15821_v13, %v15820_v18  ;;  %v3062_v35 = vmul.f32 %v3049_v40, %v15819_v42  ;;  %v15823_v9 = vld [vmem:[#allocation71_spill] sm:$0xff] }
 0x525   :  { %v2740_v4 = vpack.c.bf16 %v2725_v16, %v2721_v20  ;;  %v11934_v63 = vpop.permute.xlu0 %3644  ;;  %v11936_v44 = vpop.permute.xlu1 %3642  ;;  %v2741_v11 = vpack.c.bf16 %v2726_v8, %v2722_v36  ;;  %2833 = vmatprep.mubr.bf16.mxu1 %v15805_v24  ;;  %v2880_v27 = vpack.c.bf16 %v15818_v5, %v11255_v58  ;;  %v2731_v58 = vld [vmem:[#allocation10 + $0x78] sm:$0xff]  ;;  %v3057_v55 = vsel %vm1125_vm7, %v15823_v9, %v15822_v28 }
 0x526   :  { %v2879_v43 = vpack.c.bf16 %v15825_v57, %v15824_v0  ;;  %v3068_v50 = vmul.f32 %v3058_v59, %v15826_v48  ;;  %v3085_v54 = vpack.c.bf16 %v3066_v10, %v3062_v35  ;;  %v2884_v16 = vpack.c.bf16 %v11411_v6, %v11409_v38  ;;  %v15828_v10 = vld [vmem:[#allocation45_spill] sm:$0xff]  ;;  %v15829_v35 = vld [vmem:[#allocation76_spill] sm:$0xff] }
 0x527   :  { %2803 = vmatprep.subr.bf16.mxu1 %v2741_v11  ;;  %v2733_v8 = vpack.c.bf16 %v2731_v58, %v2730_v30  ;;  %v3064_v3 = vmul.f32 %v3057_v55, %v15826_v48  ;;  %v2872_v11 = vld [vmem:[#allocation10 + $0x88] sm:$0xff]  ;;  %v3065_v40 = vmul.f32 %v3054_v53, %v15827_v17  ;;  %v3046_v61 = vsel %vm1125_vm7, %v15812_v39, %v15821_v13  ;;  %v2873_v30 = vld [vmem:[#allocation10 + $0x90] sm:$0xff]  ;;  %v2874_v58 = vld [vmem:[#allocation10 + $0x98] sm:$0xff] }
 0x528   :  { %9461 = vmatmul.mubr.msk.bf16.vlgmr.msra.gmra.mrb[8].mxu0 %vm2231_vm11, %v2732_v2  ;;  %2804 = vmatpush1.bf16.msra.mxu1 %v2740_v4  ;;  %v2871_v4 = vld [vmem:[#allocation10 + $0x80] sm:$0xff]  ;;  %v3045_v29 = vsel %vm1125_vm7, %v15814_v14, %v15823_v9  ;;  %v15830_v14 = vld [vmem:[#allocation74_spill] sm:$0xff] }
 0x529   :  { %2892 = vmatpush1.bf16.msra.mxu0 %v2877_v1  ;;  %v11955_v32 = vpop.permute.xlu0 %3652  ;;  %2944 = vmatprep.subr.bf16.mxu1 %v2880_v27  ;;  %v3026_v19 = vpop.permute.xlu1 %3025  ;;  %v3087_v38 = vpack.c.bf16 %v3068_v50, %v3064_v3  ;;  %v2875_v37 = vpack.c.bf16 %v2872_v11, %v2871_v4  ;;  %v3084_v27 = vpack.c.bf16 %v3065_v40, %v3061_v49  ;;  %v15832_v0 = vld [vmem:[#allocation73_spill] sm:$0xff]  ;;  %v15835_v40 = vld [vmem:[#allocation80_spill] sm:$0xff] }
 0x52a   :  { %2893 = vmatprep.subr.bf16.mxu0 %v2882_v56  ;;  %2790 = vmatprep.mubr.bf16.mxu0 %v15805_v24  ;;  %v3067_v56 = vmul.f32 %v3046_v61, %v15828_v10  ;;  %v3063_v18 = vmul.f32 %v3045_v29, %v15828_v10  ;;  %v3257_v28 = vsel %vm1316_vm8, %v15830_v14, %v15829_v35 }
 0x52b   :  { %v3265_v61 = vsel %vm1316_vm8, %v15835_v40, %v15834_v26 }
 0x52c   :  { %9463 = vmatmul.mubr.msk.bf16.vlgmr.msra.gmra.mrb[8].mxu1 %vm2231_vm11, %v2732_v2  ;;  %v3086_v55 = vpack.c.bf16 %v3067_v56, %v3063_v18 }
 0x52d   :  { %2894 = vmatpush1.bf16.msra.mxu0 %v2881_v47  ;;  %2945 = vmatpush1.bf16.msra.mxu1 %v2879_v43  ;;  %v11971_v20 = vpop.permute.xlu0 %3636  ;;  %v3034_v36 = vpop.permute.xlu1 %3033  ;;  %v15831_v47 = vld [vmem:[#allocation75_spill] sm:$0xff] }
 0x52e   :  { %3098 = vmatprep.subr.bf16.mxu0 %v3085_v54  ;;  %2946 = vmatprep.subr.bf16.mxu1 %v2884_v16  ;;  %v3051_v39 = vsel %vm1125_vm7, %v3026_v19, %v3034_v36  ;;  %v3256_v57 = vsel %vm1316_vm8, %v15832_v0, %v15831_v47  ;;  %v2876_v16 = vpack.c.bf16 %v2874_v58, %v2873_v30 }
 0x52f   :  { %2843 = vmatprep.mubr.bf16.mxu1 %v15805_v24  ;;  %v3070_v43 = vmul.f32 %v3051_v39, %v15819_v42  ;;  %v15837_v39 = vld [vmem:[#allocation79_spill] sm:$0xff] }
 0x530   :  { %9462 = vmatmul.mubr.msk.bf16.gmra.mrb[12].mxu0 %vm2231_vm11, %v2733_v8 }
 0x531   :  { %2947 = vmatpush1.bf16.msra.mxu1 %v2883_v21  ;;  %v11982_v6 = vpop.permute.xlu0 %3660  ;;  %v3018_v2 = vpop.permute.xlu1 %3017  ;;  %2923 = vmatprep.mubr.bf16.mxu0 %v15805_v24 }
 0x532   :  { %3151 = vmatprep.subr.bf16.mxu1 %v3087_v38  ;;  %v3055_v54 = vsel %vm1125_vm7, %v3018_v2, %v3026_v19  ;;  %v3261_v19 = vsel %vm1316_vm8, %v15834_v26, %v15830_v14 }
 0x534   :  { %9464 = vmatmul.mubr.msk.bf16.gmra.mrb[12].mxu1 %vm2231_vm11, %v2733_v8  ;;  %v15833_v8 = vld [vmem:[#allocation44_spill] sm:$0xff] }
 0x535   :  { %v3028_v1 = vpop.permute.xlu0 %3027  ;;  %v3042_v5 = vpop.permute.xlu1 %3041  ;;  %2976 = vmatprep.mubr.bf16.mxu1 %v15805_v24  ;;  %v3273_v3 = vmul.f32 %v3257_v28, %v15833_v8  ;;  %v3269_v4 = vmul.f32 %v3256_v57, %v15833_v8  ;;  %v15838_v28 = vld [vmem:[#allocation47_spill] sm:$0xff] }
 0x536   :  { %v3047_v29 = vsel %vm1125_vm7, %v3034_v36, %v3042_v5 }
 0x537   :  { %v3292_v36 = vpack.c.bf16 %v3273_v3, %v3269_v4  ;;  %v3253_v4 = vsel %vm1316_vm8, %v15829_v35, %v15835_v40  ;;  %v15840_v40 = vld [vmem:[#allocation49_spill] sm:$0xff] }
 0x538   :  { %9465 = vmatmul.mubr.msk.bf16.vlgmr.msra.gmra.mrb[8].mxu0 %vm2231_vm11, %v2875_v37 }
 0x539   :  { %3099 = vmatpush1.bf16.msra.mxu0 %v3084_v27  ;;  %v3036_v13 = vpop.permute.xlu0 %3035  ;;  %v12006_v59 = vpop.permute.xlu1 %3232  ;;  %2933 = vmatprep.mubr.bf16.mxu0 %v15805_v24  ;;  %v15836_v27 = vld [vmem:[#allocation77_spill] sm:$0xff] }
 0x53a   :  { %v3052_v9 = vsel %vm1125_vm7, %v3028_v1, %v3036_v13  ;;  %v3260_v56 = vsel %vm1316_vm8, %v15836_v27, %v15832_v0  ;;  %v3264_v18 = vsel %vm1316_vm8, %v15837_v39, %v15836_v27 }
 0x53b   :  { %v3074_v50 = vmul.f32 %v3052_v9, %v15819_v42  ;;  %v3272_v9 = vmul.f32 %v3261_v19, %v15838_v28 }
 0x53c   :  { %9467 = vmatmul.mubr.msk.bf16.vlgmr.msra.gmra.mrb[8].mxu1 %vm2231_vm11, %v2875_v37  ;;  %v3069_v37 = vmul.f32 %v3055_v54, %v15827_v17 }
 0x53d   :  { %3152 = vmatpush1.bf16.msra.mxu1 %v3086_v55  ;;  %v3020_v21 = vpop.permute.xlu0 %3019  ;;  %v12025_v53 = vpop.permute.xlu1 %3240  ;;  %v3089_v38 = vpack.c.bf16 %v3074_v50, %v3070_v43  ;;  %2986 = vmatprep.mubr.bf16.mxu1 %v15805_v24  ;;  %v15839_v55 = vld [vmem:[#allocation46_spill] sm:$0xff]  ;;  %v3071_v50 = vmul.f32 %v3047_v29, %v15828_v10 }
 0x53e   :  { %v3056_v11 = vsel %vm1125_vm7, %v3020_v21, %v3028_v1  ;;  %v3059_v1 = vsel %vm1125_vm7, %v3042_v5, %v3018_v2  ;;  %v3078_v2 = vld [vmem:[#allocation10 + $0xa0] sm:$0xff]  ;;  %v3079_v5 = vld [vmem:[#allocation10 + $0xa8] sm:$0xff]  ;;  %v3275_v57 = vmul.f32 %v3265_v61, %v15839_v55 }
 0x53f   :  { %v3073_v49 = vmul.f32 %v3056_v11, %v15827_v17  ;;  %3100 = vmatprep.subr.bf16.mxu0 %v3089_v38  ;;  %v3072_v54 = vmul.f32 %v3059_v1, %v15826_v48  ;;  %v3271_v11 = vmul.f32 %v3264_v18, %v15839_v55  ;;  %v3258_v1 = vsel %vm1316_vm8, %v12006_v59, %v12025_v53 }
 0x540   :  { %9466 = vmatmul.mubr.msk.bf16.gmra.mrb[12].mxu0 %vm2231_vm11, %v2876_v16 }
 0x541   :  { %v3088_v30 = vpack.c.bf16 %v3073_v49, %v3069_v37  ;;  %v3044_v58 = vpop.permute.xlu0 %3043  ;;  %v12054_v14 = vpop.permute.xlu1 %3224  ;;  %3130 = vmatprep.mubr.bf16.mxu0 %v15805_v24  ;;  %v3252_v49 = vsel %vm1316_vm8, %v15831_v47, %v15837_v39  ;;  %v3294_v29 = vpack.c.bf16 %v3275_v57, %v3271_v11  ;;  %v3080_v47 = vld [vmem:[#allocation10 + $0xb0] sm:$0xff]  ;;  %v3081_v39 = vld [vmem:[#allocation10 + $0xb8] sm:$0xff]  ;;  %v15844_v57 = vld [vmem:[#allocation81_spill] sm:$0xff] }
 0x542   :  { %v3048_v0 = vsel %vm1125_vm7, %v3036_v13, %v3044_v58  ;;  %v3060_v43 = vsel %vm1125_vm7, %v3044_v58, %v3020_v21  ;;  %v3082_v13 = vpack.c.bf16 %v3079_v5, %v3078_v2  ;;  %v3268_v21 = vmul.f32 %v3260_v56, %v15838_v28  ;;  %v15842_v58 = vld [vmem:[#allocation82_spill] sm:$0xff] }
 0x543   :  { %v3075_v3 = vmul.f32 %v3048_v0, %v15828_v10  ;;  %v3076_v38 = vmul.f32 %v3060_v43, %v15826_v48  ;;  %3101 = vmatpush1.bf16.msra.mxu0 %v3088_v30  ;;  %v3270_v27 = vmul.f32 %v3252_v49, %v15840_v40  ;;  %v15841_v30 = vld [vmem:[#allocation84_spill] sm:$0xff]  ;;  %v3277_v43 = vmul.f32 %v3258_v1, %v15833_v8 }
 0x544   :  { %9468 = vmatmul.mubr.msk.bf16.gmra.mrb[12].mxu1 %vm2231_vm11, %v2876_v16  ;;  %3305 = vmatprep.subr.bf16.mxu0 %v3292_v36  ;;  %v3291_v35 = vpack.c.bf16 %v3272_v9, %v3268_v21  ;;  %v3274_v16 = vmul.f32 %v3253_v4, %v15840_v40  ;;  %v3464_v36 = vsel %vm1507_vm9, %v15842_v58, %v15841_v30  ;;  %v15843_v9 = vld [vmem:[#allocation83_spill] sm:$0xff] }
 0x545   :  { %v3090_v26 = vpack.c.bf16 %v3075_v3, %v3071_v50  ;;  %v3235_v19 = vpop.permute.xlu0 %3234  ;;  %v3249_v61 = vpop.permute.xlu1 %3248  ;;  %v3091_v37 = vpack.c.bf16 %v3076_v38, %v3072_v54  ;;  %3183 = vmatprep.mubr.bf16.mxu1 %v15805_v24  ;;  %v3463_v0 = vsel %vm1507_vm9, %v15844_v57, %v15843_v9  ;;  %v3262_v54 = vsel %vm1316_vm8, %v12054_v14, %v12006_v59  ;;  %v15845_v38 = vld [vmem:[#allocation48_spill] sm:$0xff] }
 0x546   :  { %v3293_v5 = vpack.c.bf16 %v3274_v16, %v3270_v27  ;;  %v3083_v3 = vpack.c.bf16 %v3081_v39, %v3080_v47  ;;  %v3480_v4 = vmul.f32 %v3464_v36, %v15845_v38  ;;  %v3254_v27 = vsel %vm1316_vm8, %v12025_v53, %v3249_v61  ;;  %v15848_v47 = vld [vmem:[#allocation85_spill] sm:$0xff] }
 0x547   :  { %3153 = vmatprep.subr.bf16.mxu1 %v3091_v37  ;;  %v3476_v37 = vmul.f32 %v3463_v0, %v15845_v38  ;;  %v3467_v39 = vsel %vm1507_vm9, %v15848_v47, %v15844_v57 }
 0x548   :  { %9469 = vmatmul.mubr.msk.bf16.vlgmr.msra.gmra.mrb[8].mxu0 %vm2231_vm11, %v3082_v13  ;;  %3154 = vmatpush1.bf16.msra.mxu1 %v3090_v26 }
 0x549   :  { %3306 = vmatpush1.bf16.msra.mxu0 %v3291_v35  ;;  %v3243_v56 = vpop.permute.xlu0 %3242  ;;  %3358 = vmatprep.subr.bf16.mxu1 %v3294_v29  ;;  %v12086_v18 = vpop.permute.xlu1 %3439  ;;  %v15846_v35 = vld [vmem:[#allocation86_spill] sm:$0xff]  ;;  %v3276_v29 = vmul.f32 %v3262_v54, %v15838_v28  ;;  %v3499_v53 = vpack.c.bf16 %v3480_v4, %v3476_v37 }
 0x54a   :  { %v3259_v2 = vsel %vm1316_vm8, %v3235_v19, %v3243_v56  ;;  %3140 = vmatprep.mubr.bf16.mxu0 %v15805_v24  ;;  %v3468_v59 = vsel %vm1507_vm9, %v15846_v35, %v15842_v58  ;;  %v15849_v58 = vld [vmem:[#allocation87_spill] sm:$0xff]  ;;  %v15851_v54 = vld [vmem:[#allocation50_spill] sm:$0xff] }
 0x54b   :  { %v3281_v50 = vmul.f32 %v3259_v2, %v15833_v8  ;;  %v3471_v36 = vsel %vm1507_vm9, %v15849_v58, %v15848_v47  ;;  %v3459_v47 = vsel %vm1507_vm9, %v15843_v9, %v15849_v58  ;;  %v3287_v9 = vld [vmem:[#allocation10 + $0xd0] sm:$0xff]  ;;  %v3288_v58 = vld [vmem:[#allocation10 + $0xd8] sm:$0xff] }
 0x54c   :  { %9471 = vmatmul.mubr.msk.bf16.vlgmr.msra.gmra.mrb[8].mxu1 %vm2231_vm11, %v3082_v13  ;;  %v15847_v13 = vld [vmem:[#allocation88_spill] sm:$0xff] }
 0x54d   :  { %3359 = vmatpush1.bf16.msra.mxu1 %v3293_v5  ;;  %v3227_v21 = vpop.permute.xlu0 %3226  ;;  %v12107_v11 = vpop.permute.xlu1 %3447  ;;  %v3296_v26 = vpack.c.bf16 %v3281_v50, %v3277_v43  ;;  %3193 = vmatprep.mubr.bf16.mxu1 %v15805_v24  ;;  %v3472_v16 = vsel %vm1507_vm9, %v15847_v13, %v15846_v35  ;;  %v3285_v43 = vld [vmem:[#allocation10 + $0xc0] sm:$0xff]  ;;  %v3278_v35 = vmul.f32 %v3254_v27, %v15840_v40 }
 0x54e   :  { %v3263_v49 = vsel %vm1316_vm8, %v3227_v21, %v3235_v19  ;;  %v3266_v19 = vsel %vm1316_vm8, %v3249_v61, %v12054_v14  ;;  %v3286_v14 = vld [vmem:[#allocation10 + $0xc8] sm:$0xff]  ;;  %v15850_v61 = vld [vmem:[#allocation51_spill] sm:$0xff] }
 0x54f   :  { %v3280_v1 = vmul.f32 %v3263_v49, %v15838_v28  ;;  %3307 = vmatprep.subr.bf16.mxu0 %v3296_v26  ;;  %v3479_v50 = vmul.f32 %v3468_v59, %v15850_v61  ;;  %v3482_v26 = vmul.f32 %v3472_v16, %v15851_v54  ;;  %v3460_v59 = vsel %vm1507_vm9, %v15841_v30, %v15847_v13  ;;  %v15852_v13 = vld [vmem:[#allocation53_spill] sm:$0xff] }
 0x550   :  { %9470 = vmatmul.mubr.msk.bf16.gmra.mrb[12].mxu0 %vm2231_vm11, %v3083_v3  ;;  %v3478_v16 = vmul.f32 %v3471_v36, %v15851_v54  ;;  %v3477_v36 = vmul.f32 %v3459_v47, %v15852_v13 }
 0x551   :  { %v3295_v2 = vpack.c.bf16 %v3280_v1, %v3276_v29  ;;  %v3251_v5 = vpop.permute.xlu0 %3250  ;;  %v3432_v0 = vpop.permute.xlu1 %3431  ;;  %3337 = vmatprep.mubr.bf16.mxu0 %v15805_v24  ;;  %v3279_v29 = vmul.f32 %v3266_v19, %v15839_v55 }
 0x552   :  { %v3255_v57 = vsel %vm1316_vm8, %v3243_v56, %v3251_v5  ;;  %v3267_v49 = vsel %vm1316_vm8, %v3251_v5, %v3227_v21  ;;  %v3289_v56 = vpack.c.bf16 %v3286_v14, %v3285_v43  ;;  %v3475_v21 = vmul.f32 %v3467_v39, %v15850_v61 }
 0x553   :  { %v3282_v4 = vmul.f32 %v3255_v57, %v15840_v40  ;;  %v3283_v37 = vmul.f32 %v3267_v49, %v15839_v55  ;;  %3308 = vmatpush1.bf16.msra.mxu0 %v3295_v2  ;;  %v3501_v5 = vpack.c.bf16 %v3482_v26, %v3478_v16  ;;  %v3465_v39 = vsel %vm1507_vm9, %v12086_v18, %v12107_v11  ;;  %v15853_v16 = vld [vmem:[#allocation52_spill] sm:$0xff] }
 0x554   :  { %9472 = vmatmul.mubr.msk.bf16.gmra.mrb[12].mxu1 %vm2231_vm11, %v3083_v3  ;;  %3512 = vmatprep.subr.bf16.mxu0 %v3499_v53  ;;  %v3498_v30 = vpack.c.bf16 %v3479_v50, %v3475_v21  ;;  %v3481_v3 = vmul.f32 %v3460_v59, %v15852_v13  ;;  %v3484_v26 = vmul.f32 %v3465_v39, %v15845_v38 }
 0x555   :  { %v3297_v1 = vpack.c.bf16 %v3282_v4, %v3278_v35  ;;  %v3442_v27 = vpop.permute.xlu0 %3441  ;;  %v3298_v19 = vpack.c.bf16 %v3283_v37, %v3279_v29  ;;  %3390 = vmatprep.mubr.bf16.mxu1 %v15805_v24  ;;  %v3456_v2 = vpop.permute.xlu1 %3455  ;;  %v3469_v35 = vsel %vm1507_vm9, %v3432_v0, %v12086_v18  ;;  %v3290_v29 = vpack.c.bf16 %v3288_v58, %v3287_v9 }
 0x556   :  { %v3500_v50 = vpack.c.bf16 %v3481_v3, %v3477_v36  ;;  %v3671_v4 = vsel %vm1698_vm10, %v11934_v63, %v11955_v32  ;;  %v3461_v21 = vsel %vm1507_vm9, %v12107_v11, %v3456_v2  ;;  %v3473_v47 = vsel %vm1507_vm9, %v3456_v2, %v3432_v0  ;;  %v3492_v36 = vld [vmem:[#allocation10 + $0xe0] sm:$0xff] }
 0x557   :  { %3360 = vmatprep.subr.bf16.mxu1 %v3298_v19  ;;  %v3483_v19 = vmul.f32 %v3469_v35, %v15850_v61  ;;  %v3687_v3 = vmul.f32 %v3671_v4, %v15853_v16  ;;  %v3679_v0 = vsel %vm1698_vm10, %v11982_v6, %v11971_v20  ;;  %v3485_v2 = vmul.f32 %v3461_v21, %v15852_v13 }
 0x558   :  { %9473 = vmatmul.mubr.msk.bf16.vlgmr.msra.gmra.mrb[8].mxu0 %vm2231_vm11, %v3289_v56  ;;  %3361 = vmatpush1.bf16.msra.mxu1 %v3297_v1  ;;  %v3486_v9 = vmul.f32 %v3473_v47, %v15851_v54 }
 0x559   :  { %3513 = vmatpush1.bf16.msra.mxu0 %v3498_v30  ;;  %v3450_v53 = vpop.permute.xlu0 %3449  ;;  %3565 = vmatprep.subr.bf16.mxu1 %v3501_v5 }
 0x55a   :  { %v3466_v43 = vsel %vm1507_vm9, %v3442_v27, %v3450_v53  ;;  %v3651_v14 = vpop.permute.xlu1 %3650  ;;  %3347 = vmatprep.mubr.bf16.mxu0 %v15805_v24 }
 0x55b   :  { %v3488_v57 = vmul.f32 %v3466_v43, %v15845_v38  ;;  %v3670_v49 = vsel %vm1698_vm10, %v11936_v44, %v3651_v14 }
 0x55c   :  { %9475 = vmatmul.mubr.msk.bf16.vlgmr.msra.gmra.mrb[8].mxu1 %vm2231_vm11, %v3289_v56  ;;  %v3683_v1 = vmul.f32 %v3670_v49, %v15853_v16 }
 0x55d   :  { %3566 = vmatpush1.bf16.msra.mxu1 %v3500_v50  ;;  %v3434_v37 = vpop.permute.xlu0 %3433  ;;  %v3503_v59 = vpack.c.bf16 %v3488_v57, %v3484_v26  ;;  %3400 = vmatprep.mubr.bf16.mxu1 %v15805_v24  ;;  %v15854_v26 = vld [vmem:[#allocation55_spill] sm:$0xff] }
 0x55e   :  { %v3470_v18 = vsel %vm1507_vm9, %v3434_v37, %v3442_v27  ;;  %v3635_v56 = vpop.permute.xlu1 %3634  ;;  %v3675_v27 = vsel %vm1698_vm10, %v11971_v20, %v11934_v63  ;;  %v3706_v50 = vpack.c.bf16 %v3687_v3, %v3683_v1  ;;  %v15856_v3 = vld [vmem:[#allocation56_spill] sm:$0xff] }
 0x55f   :  { %v3487_v30 = vmul.f32 %v3470_v18, %v15850_v61  ;;  %3514 = vmatprep.subr.bf16.mxu0 %v3503_v59  ;;  %v3674_v11 = vsel %vm1698_vm10, %v3635_v56, %v11936_v44  ;;  %v3493_v44 = vld [vmem:[#allocation10 + $0xe8] sm:$0xff]  ;;  %v3686_v21 = vmul.f32 %v3675_v27, %v15854_v26 }
 0x560   :  { %9474 = vmatmul.mubr.msk.bf16.gmra.mrb[12].mxu0 %vm2231_vm11, %v3290_v29  ;;  %v3682_v20 = vmul.f32 %v3674_v11, %v15854_v26  ;;  %v15855_v59 = vld [vmem:[#allocation54_spill] sm:$0xff] }
 0x561   :  { %v3502_v5 = vpack.c.bf16 %v3487_v30, %v3483_v19  ;;  %v3458_v39 = vpop.permute.xlu0 %3457  ;;  %3544 = vmatprep.mubr.bf16.mxu0 %v15805_v24  ;;  %v3689_v1 = vmul.f32 %v3679_v0, %v15855_v59 }
 0x562   :  { %v3462_v58 = vsel %vm1507_vm9, %v3450_v53, %v3458_v39  ;;  %v3474_v63 = vsel %vm1507_vm9, %v3458_v39, %v3434_v37  ;;  %v3659_v43 = vpop.permute.xlu1 %3658  ;;  %v3496_v37 = vpack.c.bf16 %v3493_v44, %v3492_v36  ;;  %v3705_v30 = vpack.c.bf16 %v3686_v21, %v3682_v20 }
 0x563   :  { %v3489_v57 = vmul.f32 %v3462_v58, %v15852_v13  ;;  %v3490_v49 = vmul.f32 %v3474_v63, %v15851_v54  ;;  %v3678_v35 = vsel %vm1698_vm10, %v3659_v43, %v3635_v56  ;;  %3515 = vmatpush1.bf16.msra.mxu0 %v3502_v5  ;;  %v3666_v4 = vsel %vm1698_vm10, %v3651_v14, %v3659_v43  ;;  %v3495_v5 = vld [vmem:[#allocation10 + $0xf8] sm:$0xff] }
 0x564   :  { %v3685_v53 = vmul.f32 %v3678_v35, %v15855_v59  ;;  %9476 = vmatmul.mubr.msk.bf16.gmra.mrb[12].mxu1 %vm2231_vm11, %v3290_v29  ;;  %3719 = vmatprep.subr.bf16.mxu0 %v3706_v50  ;;  %v3667_v14 = vsel %vm1698_vm10, %v11955_v32, %v11982_v6  ;;  %v3684_v29 = vmul.f32 %v3666_v4, %v15856_v3 }
 0x565   :  { %v3504_v18 = vpack.c.bf16 %v3489_v57, %v3485_v2  ;;  %v3649_v19 = vpop.permute.xlu0 %3648  ;;  %v3505_v47 = vpack.c.bf16 %v3490_v49, %v3486_v9  ;;  %3597 = vmatprep.mubr.bf16.mxu1 %v15805_v24  ;;  %v3688_v27 = vmul.f32 %v3667_v14, %v15856_v3  ;;  %v3494_v2 = vld [vmem:[#allocation10 + $0xf0] sm:$0xff] }
 0x566   :  { %v3647_v56 = vpop.permute.xlu1 %3646  ;;  %v3708_v11 = vpack.c.bf16 %v3689_v1, %v3685_v53  ;;  %v3497_v58 = vpack.c.bf16 %v3495_v5, %v3494_v2  ;;  %v3699_v53 = vld [vmem:[#allocation10 + $0x100] sm:$0xff]  ;;  %v3701_v5 = vld [vmem:[#allocation10 + $0x110] sm:$0xff] }
 0x567   :  { %3567 = vmatprep.subr.bf16.mxu1 %v3505_v47  ;;  %v3707_v6 = vpack.c.bf16 %v3688_v27, %v3684_v29 }
 0x568   :  { %9477 = vmatmul.mubr.msk.bf16.vlgmr.msra.gmra.mrb[8].mxu0 %vm2231_vm11, %v3496_v37  ;;  %3568 = vmatpush1.bf16.msra.mxu1 %v3504_v18 }
 0x569   :  { %3720 = vmatpush1.bf16.msra.mxu0 %v3705_v30  ;;  %v3657_v0 = vpop.permute.xlu0 %3656  ;;  %3772 = vmatprep.subr.bf16.mxu1 %v3708_v11 }
 0x56a   :  { %v3673_v39 = vsel %vm1698_vm10, %v3649_v19, %v3657_v0  ;;  %v3655_v32 = vpop.permute.xlu1 %3654  ;;  %3554 = vmatprep.mubr.bf16.mxu0 %v15805_v24 }
 0x56b   :  { %v3695_v36 = vmul.f32 %v3673_v39, %v15853_v16  ;;  %v3672_v44 = vsel %vm1698_vm10, %v3647_v56, %v3655_v32  ;;  %v3702_v39 = vld [vmem:[#allocation10 + $0x118] sm:$0xff] }
 0x56c   :  { %v3691_v9 = vmul.f32 %v3672_v44, %v15853_v16  ;;  %9479 = vmatmul.mubr.msk.bf16.vlgmr.msra.gmra.mrb[8].mxu1 %vm2231_vm11, %v3496_v37  ;;  %v3700_v37 = vld [vmem:[#allocation10 + $0x108] sm:$0xff] }
 0x56d   :  { %3773 = vmatpush1.bf16.msra.mxu1 %v3707_v6  ;;  %v3641_v63 = vpop.permute.xlu0 %3640  ;;  %3607 = vmatprep.mubr.bf16.mxu1 %v15805_v24  ;;  %v3703_v27 = vpack.c.bf16 %v3700_v37, %v3699_v53 }
 0x56e   :  { %v3677_v43 = vsel %vm1698_vm10, %v3641_v63, %v3649_v19  ;;  %v3639_v50 = vpop.permute.xlu1 %3638  ;;  %v3710_v20 = vpack.c.bf16 %v3695_v36, %v3691_v9 }
 0x56f   :  { %v3694_v57 = vmul.f32 %v3677_v43, %v15854_v26  ;;  %v3676_v49 = vsel %vm1698_vm10, %v3639_v50, %v3647_v56 }
 0x570   :  { %v3690_v35 = vmul.f32 %v3676_v49, %v15854_v26  ;;  %9478 = vmatmul.mubr.msk.bf16.gmra.mrb[12].mxu0 %vm2231_vm11, %v3497_v58  ;;  %3721 = vmatprep.subr.bf16.mxu0 %v3710_v20 }
 0x571   :  { %v3665_v4 = vpop.permute.xlu0 %3664  ;;  %3751 = vmatprep.mubr.bf16.mxu0 %v15805_v24 }
 0x572   :  { %v3709_v21 = vpack.c.bf16 %v3694_v57, %v3690_v35  ;;  %v3669_v1 = vsel %vm1698_vm10, %v3657_v0, %v3665_v4  ;;  %v3681_v18 = vsel %vm1698_vm10, %v3665_v4, %v3641_v63  ;;  %v3663_v19 = vpop.permute.xlu1 %3662 }
 0x573   :  { %v3696_v47 = vmul.f32 %v3669_v1, %v15856_v3  ;;  %v3697_v14 = vmul.f32 %v3681_v18, %v15855_v59  ;;  %v3668_v56 = vsel %vm1698_vm10, %v3655_v32, %v3663_v19  ;;  %v3680_v30 = vsel %vm1698_vm10, %v3663_v19, %v3639_v50 }
 0x574   :  { %v3692_v29 = vmul.f32 %v3668_v56, %v15856_v3  ;;  %v3693_v11 = vmul.f32 %v3680_v30, %v15855_v59  ;;  %9480 = vmatmul.mubr.msk.bf16.gmra.mrb[12].mxu1 %vm2231_vm11, %v3497_v58  ;;  %3722 = vmatpush1.bf16.msra.mxu0 %v3709_v21  ;;  %v3704_v32 = vpack.c.bf16 %v3702_v39, %v3701_v5 }
 0x575   :  { %3804 = vmatprep.mubr.bf16.mxu1 %v15805_v24 }
 0x576   :  { %v3711_v0 = vpack.c.bf16 %v3696_v47, %v3692_v29  ;;  %v3712_v2 = vpack.c.bf16 %v3697_v14, %v3693_v11 }
 0x578   :  { %9481 = vmatmul.mubr.msk.bf16.vlgmr.msra.gmra.mrb[8].mxu0 %vm2231_vm11, %v3703_v27  ;;  %3774 = vmatprep.subr.bf16.mxu1 %v3712_v2 }
 0x579   :  { %3775 = vmatpush1.bf16.msra.mxu1 %v3711_v0  ;;  %3761 = vmatprep.mubr.bf16.mxu0 %v15805_v24 }
 0x57c   :  { %9483 = vmatmul.mubr.msk.bf16.vlgmr.msra.gmra.mrb[8].mxu1 %vm2231_vm11, %v3703_v27 }
 0x57d   :  { %3814 = vmatprep.mubr.bf16.mxu1 %v15805_v24 }
 0x580   :  { %9482 = vmatmul.mubr.msk.bf16.gmra.mrb[12].mxu0 %vm2231_vm11, %v3704_v32 }
 0x581   :  { %4228 = vmatprep.mubr.bf16.mxu0 %v15805_v24 }
 0x582   :  { %v3853_v58 = vpop.permute.xlu0 %3852 }
 0x583   :  { %v3848_v6 = vpop.permute.xlu1 %3847 }
 0x584   :  { %9484 = vmatmul.mubr.msk.bf16.gmra.mrb[12].mxu1 %vm2231_vm11, %v3704_v32 }
 0x585   :  { %4281 = vmatprep.mubr.bf16.mxu1 %v15805_v24 }
 0x586   :  { %v3863_v2 = vpop.permute.xlu0 %3862 }
 0x587   :  { %v3858_v14 = vpop.permute.xlu1 %3857 }
 0x64b   :  { %v3753_v36 = vpop.f32.mrb[8].mxu0 }
 0x64c   :  { %v3865_v44 = vadd.f32 %v3848_v6, %v3753_v36  ;;  %v3755_v9 = vpop.f32.mrb[9].mxu0 }
 0x64d   :  { %v3866_v63 = vadd.f32 %v3848_v6, %v3755_v9  ;;  %v3757_v43 = vpop.f32.mrb[10].mxu0 }
 0x64e   :  { %v3869_v50 = vadd.f32 %v3853_v58, %v3757_v43  ;;  %v3759_v20 = vpop.f32.mrb[11].mxu0 }
 0x64f   :  { %v3870_v57 = vadd.f32 %v3853_v58, %v3759_v20  ;;  %v3806_v49 = vpop.f32.mrb[8].mxu1  ;;  %v3881_v35 = vadd.f32 %v3866_v63, %v3865_v44 }
 0x650   :  { %v3867_v4 = vadd.f32 %v3848_v6, %v3806_v49  ;;  %v3808_v53 = vpop.f32.mrb[9].mxu1 }
 0x651   :  { %v3868_v37 = vadd.f32 %v3848_v6, %v3808_v53  ;;  %v3810_v21 = vpop.f32.mrb[10].mxu1  ;;  %v3886_v1 = vadd.f32 %v3870_v57, %v3869_v50 }
 0x652   :  { %v3882_v18 = vadd.f32 %v3881_v35, %v3867_v4  ;;  %v3871_v19 = vadd.f32 %v3853_v58, %v3810_v21  ;;  %v3812_v47 = vpop.f32.mrb[11].mxu1 }
 0x653   :  { %v3763_v56 = vpop.f32.mrb[12].mxu0  ;;  %v3872_v30 = vadd.f32 %v3853_v58, %v3812_v47 }
 0x654   :  { %v3883_v29 = vadd.f32 %v3882_v18, %v3868_v37  ;;  %v3887_v11 = vadd.f32 %v3886_v1, %v3871_v19  ;;  %v3873_v27 = vadd.f32 %v3858_v14, %v3763_v56  ;;  %v3765_v0 = vpop.f32.mrb[13].mxu0 }
 0x655   :  { %v3874_v5 = vadd.f32 %v3858_v14, %v3765_v0  ;;  %v3767_v39 = vpop.f32.mrb[14].mxu0 }
 0x656   :  { %v3888_v32 = vadd.f32 %v3887_v11, %v3872_v30  ;;  %v3877_v36 = vadd.f32 %v3863_v2, %v3767_v39  ;;  %v3769_v9 = vpop.f32.mrb[15].mxu0  ;;  %3884 = vadd.xlane.f32.xlu1 %v3883_v29 }
 0x657   :  { %v3878_v6 = vadd.f32 %v3863_v2, %v3769_v9  ;;  %v3816_v43 = vpop.f32.mrb[12].mxu1  ;;  %v3891_v20 = vadd.f32 %v3874_v5, %v3873_v27 }
 0x658   :  { %v3875_v49 = vadd.f32 %v3858_v14, %v3816_v43  ;;  %3889 = vadd.xlane.f32.xlu0 %v3888_v32  ;;  %v3818_v35 = vpop.f32.mrb[13].mxu1 }
 0x659   :  { %v3876_v53 = vadd.f32 %v3858_v14, %v3818_v35  ;;  %v3820_v21 = vpop.f32.mrb[14].mxu1  ;;  %v3896_v58 = vadd.f32 %v3878_v6, %v3877_v36 }
 0x65a   :  { %v3892_v18 = vadd.f32 %v3891_v20, %v3875_v49  ;;  %v3879_v1 = vadd.f32 %v3863_v2, %v3820_v21  ;;  %v3822_v47 = vpop.f32.mrb[15].mxu1 }
 0x65b   :  { %v3880_v56 = vadd.f32 %v3863_v2, %v3822_v47 }
 0x65c   :  { %v3893_v3 = vadd.f32 %v3892_v18, %v3876_v53  ;;  %v3897_v0 = vadd.f32 %v3896_v58, %v3879_v1 }
 0x65e   :  { %v3898_v59 = vadd.f32 %v3897_v0, %v3880_v56  ;;  %3894 = vadd.xlane.f32.xlu0 %v3893_v3 }
 0x660   :  { %3899 = vadd.xlane.f32.xlu1 %v3898_v59 }
 0x6e3   :  { %v3885_v11 = vpop.xlane.xlu1 %3884 }
 0x6e4   :  { %v3901_v29 = vmul.f32 0.001953125, %v3885_v11 }
 0x6e5   :  { %v3890_v39 = vpop.xlane.xlu0 %3889 }
 0x6e6   :  { %v3905_v9 = vsub.f32 %v3865_v44, %v3901_v29  ;;  %v3906_v26 = vsub.f32 %v3866_v63, %v3901_v29  ;;  %v3902_v43 = vmul.f32 0.001953125, %v3890_v39  ;;  %v12273_v32 = vsub.f32 %v3867_v4, %v3901_v29 }
 0x6e7   :  { %v3908_v2 = vsub.f32 %v3868_v37, %v3901_v29 }
 0x6e8   :  { %v12275_v14 = vsub.f32 %v3869_v50, %v3902_v43  ;;  %v12277_v35 = vsub.f32 %v3870_v57, %v3902_v43  ;;  %v3921_v20 = vmul.f32 %v3905_v9, %v3905_v9  ;;  %v12279_v21 = vsub.f32 %v3871_v19, %v3902_v43 }
 0x6e9   :  { %v3922_v58 = vmul.f32 %v3906_v26, %v3906_v26  ;;  %v3923_v63 = vmul.f32 %v12273_v32, %v12273_v32  ;;  %v3912_v50 = vsub.f32 %v3872_v30, %v3902_v43  ;;  %v3924_v0 = vmul.f32 %v3908_v2, %v3908_v2 }
 0x6ea   :  { %v3925_v59 = vmul.f32 %v12275_v14, %v12275_v14  ;;  %v3926_v3 = vmul.f32 %v12277_v35, %v12277_v35  ;;  %v3927_v37 = vmul.f32 %v12279_v21, %v12279_v21 }
 0x6eb   :  { %v3895_v44 = vpop.xlane.xlu0 %3894  ;;  %v3937_v4 = vadd.f32 %v3922_v58, %v3921_v20  ;;  %v3928_v54 = vmul.f32 %v3912_v50, %v3912_v50 }
 0x6ec   :  { %v3903_v18 = vmul.f32 0.001953125, %v3895_v44  ;;  %v3942_v57 = vadd.f32 %v3926_v3, %v3925_v59 }
 0x6ed   :  { %v3900_v47 = vpop.xlane.xlu1 %3899  ;;  %v3938_v19 = vadd.f32 %v3937_v4, %v3923_v63 }
 0x6ee   :  { %v12289_v11 = vsub.f32 %v3873_v27, %v3903_v18  ;;  %v12291_v29 = vsub.f32 %v3874_v5, %v3903_v18  ;;  %v3904_v39 = vmul.f32 0.001953125, %v3900_v47  ;;  %v12293_v16 = vsub.f32 %v3875_v49, %v3903_v18 }
 0x6ef   :  { %v3939_v13 = vadd.f32 %v3938_v19, %v3924_v0  ;;  %v3943_v61 = vadd.f32 %v3942_v57, %v3927_v37  ;;  %v12303_v59 = vsub.f32 %v3876_v53, %v3903_v18 }
 0x6f0   :  { %v12295_v20 = vsub.f32 %v3877_v36, %v3904_v39  ;;  %v12297_v30 = vsub.f32 %v3878_v6, %v3904_v39  ;;  %v12299_v43 = vsub.f32 %v3879_v1, %v3904_v39  ;;  %v3929_v58 = vmul.f32 %v12289_v11, %v12289_v11 }
 0x6f1   :  { %3940 = vadd.xlane.f32.xlu0 %v3939_v13  ;;  %v3944_v27 = vadd.f32 %v3943_v61, %v3928_v54  ;;  %v3930_v5 = vmul.f32 %v12291_v29, %v12291_v29  ;;  %v12307_v49 = vsub.f32 %v3880_v56, %v3904_v39  ;;  %v3931_v1 = vmul.f32 %v12293_v16, %v12293_v16 }
 0x6f2   :  { %v3933_v36 = vmul.f32 %v12295_v20, %v12295_v20  ;;  %v3934_v6 = vmul.f32 %v12297_v30, %v12297_v30  ;;  %v3935_v61 = vmul.f32 %v12299_v43, %v12299_v43  ;;  %v3932_v13 = vmul.f32 %v12303_v59, %v12303_v59 }
 0x6f3   :  { %3945 = vadd.xlane.f32.xlu1 %v3944_v27  ;;  %v3947_v3 = vadd.f32 %v3930_v5, %v3929_v58  ;;  %v3936_v56 = vmul.f32 %v12307_v49, %v12307_v49 }
 0x6f4   :  { %v3952_v54 = vadd.f32 %v3934_v6, %v3933_v36 }
 0x6f5   :  { %v3948_v53 = vadd.f32 %v3947_v3, %v3931_v1 }
 0x6f6   :  { %v3953_v44 = vadd.f32 %v3952_v54, %v3935_v61 }
 0x6f7   :  { %v3949_v63 = vadd.f32 %v3948_v53, %v3932_v13 }
 0x6f8   :  { %v3954_v4 = vadd.f32 %v3953_v44, %v3936_v56 }
 0x6f9   :  { %3950 = vadd.xlane.f32.xlu0 %v3949_v63 }
 0x6fa   :  { %3955 = vadd.xlane.f32.xlu1 %v3954_v4 }
 0x77e   :  { %v3941_v18 = vpop.xlane.xlu0 %3940 }
 0x77f   :  { %v3957_v57 = vmul.f32 0.001953125, %v3941_v18 }
 0x780   :  { %v3946_v47 = vpop.xlane.xlu1 %3945 }
 0x781   :  { %v3961_v0 = vadd.f32 1e-05, %v3957_v57  ;;  %v3958_v19 = vmul.f32 0.001953125, %v3946_v47 }
 0x783   :  { %10129 = vrsqrt.f32 %v3961_v0  ;;  %v3962_v37 = vadd.f32 1e-05, %v3958_v19 }
 0x785   :  { %10131 = vrsqrt.f32 %v3962_v37 }
 0x787   :  { %v3956_v0 = vpop.xlane.xlu1 %3955 }
 0x788   :  { %v3960_v37 = vmul.f32 0.001953125, %v3956_v0 }
 0x78d   :  { %v10130_v39 = vpop.eup %10129 }
 0x78e   :  { %v3969_v58 = vmul.f32 %v10130_v39, %v3905_v9  ;;  %v3970_v27 = vmul.f32 %v10130_v39, %v3906_v26  ;;  %v3972_v5 = vmul.f32 %v10130_v39, %v3908_v2  ;;  %v3971_v61 = vmul.f32 %v10130_v39, %v12273_v32 }
 0x78f   :  { %v10132_v36 = vpop.eup %10131 }
 0x790   :  { %vm3985_vm12 = vcmp.ge.f32.partialorder %v3969_v58, 0.0  ;;  %v4001_v6 = vmul.f32 0.2, %v3969_v58  ;;  %vm3986_vm13 = vcmp.ge.f32.partialorder %v3970_v27, 0.0  ;;  %v4002_v1 = vmul.f32 0.2, %v3970_v27 }
 0x791   :  { %v3974_v3 = vmul.f32 %v10132_v36, %v12277_v35  ;;  %v4004_v53 = vmul.f32 0.2, %v3972_v5  ;;  %v3976_v56 = vmul.f32 %v10132_v36, %v3912_v50  ;;  %vm3988_vm14 = vcmp.ge.f32.partialorder %v3972_v5, 0.0 }
 0x792   :  { %v12323_v54 = vsel %vm3985_vm12, %v3969_v58, %v4001_v6  ;;  %v12325_v13 = vsel %vm3986_vm13, %v3970_v27, %v4002_v1  ;;  %v4003_v9 = vmul.f32 0.2, %v3971_v61  ;;  %v3975_v44 = vmul.f32 %v10132_v36, %v12279_v21 }
 0x793   :  { %15857 = vst [vmem:[#allocation64_spill] sm:$0xff] %v12323_v54  ;;  %15858 = vst [vmem:[#allocation58_spill] sm:$0xff] %v12325_v13  ;;  %4111 = vrot.lane.b32.xlu0 %v12323_v54, %s10502_s14  ;;  %4119 = vrot.lane.b32.xlu1 %v12325_v13, %s10502_s14  ;;  %vm3990_vm15 = vcmp.ge.f32.partialorder %v3974_v3, 0.0  ;;  %v4006_v26 = vmul.f32 0.2, %v3974_v3  ;;  %v12331_v2 = vsel %vm3988_vm14, %v3972_v5, %v4004_v53  ;;  %vm3987_vm0 = vcmp.ge.f32.partialorder %v3971_v61, 0.0 }
 0x794   :  { %v4008_v32 = vmul.f32 0.2, %v3976_v56  ;;  %vm3992_vm2 = vcmp.ge.f32.partialorder %v3976_v56, 0.0  ;;  %v12340_v50 = vsel %vm3987_vm0, %v3971_v61, %v4003_v9  ;;  %v4007_v4 = vmul.f32 0.2, %v3975_v44 }
 0x795   :  { %v12333_v35 = vsel %vm3990_vm15, %v3974_v3, %v4006_v26  ;;  %15860 = vst [vmem:[#allocation68_spill] sm:$0xff] %v12340_v50  ;;  %v3973_v18 = vmul.f32 %v10132_v36, %v12275_v14  ;;  %vm3991_vm4 = vcmp.ge.f32.partialorder %v3975_v44, 0.0  ;;  %v3951_v14 = vpop.xlane.xlu0 %3950  ;;  %v3964_v58 = vadd.f32 1e-05, %v3960_v37 }
 0x796   :  { %15859 = vst [vmem:[#allocation59_spill] sm:$0xff] %v12333_v35  ;;  %v12342_v63 = vsel %vm3992_vm2, %v3976_v56, %v4008_v32  ;;  %v12349_v21 = vsel %vm3991_vm4, %v3975_v44, %v4007_v4  ;;  %v3959_v19 = vmul.f32 0.001953125, %v3951_v14 }
 0x797   :  { %4135 = vrot.lane.b32.xlu1 %v12331_v2, %s10502_s14  ;;  %4121 = vrot.lane.b32.xlu0 %v12333_v35, %s10502_s14  ;;  %15861 = vst [vmem:[#allocation66_spill] sm:$0xff] %v12342_v63  ;;  %15862 = vst [vmem:[#allocation67_spill] sm:$0xff] %v12349_v21  ;;  %v4005_v57 = vmul.f32 0.2, %v3973_v18  ;;  %vm3989_vm12 = vcmp.ge.f32.partialorder %v3973_v18, 0.0 }
 0x798   :  { %v3963_v39 = vadd.f32 1e-05, %v3959_v19 }
 0x799   :  { %v12355_v47 = vsel %vm3989_vm12, %v3973_v18, %v4005_v57 }
 0x79a   :  { %15863 = vst [vmem:[#allocation65_spill] sm:$0xff] %v12355_v47  ;;  %10133 = vrsqrt.f32 %v3963_v39 }
 0x79b   :  { %4127 = vrot.lane.b32.xlu1 %v12340_v50, %s10502_s14  ;;  %4137 = vrot.lane.b32.xlu0 %v12342_v63, %s10502_s14  ;;  %10135 = vrsqrt.f32 %v3964_v58 }
 0x79f   :  { %4033 = vrot.lane.b32.xlu1 %v12323_v54, %s10504_s12  ;;  %4129 = vrot.lane.b32.xlu0 %v12349_v21, %s10502_s14 }
 0x7a3   :  { %4041 = vrot.lane.b32.xlu1 %v12325_v13, %s10504_s12  ;;  %4035 = vrot.lane.b32.xlu0 %v12355_v47, %s10504_s12 }
 0x7a4   :  { %v10134_v27 = vpop.eup %10133 }
 0x7a5   :  { %v10136_v5 = vpop.eup %10135  ;;  %v3977_v36 = vmul.f32 %v10134_v27, %v12289_v11  ;;  %v3978_v3 = vmul.f32 %v10134_v27, %v12291_v29  ;;  %v3980_v29 = vmul.f32 %v10134_v27, %v12303_v59  ;;  %v3979_v59 = vmul.f32 %v10134_v27, %v12293_v16 }
 0x7a6   :  { %v3981_v6 = vmul.f32 %v10136_v5, %v12295_v20  ;;  %v3982_v61 = vmul.f32 %v10136_v5, %v12297_v30  ;;  %v3984_v30 = vmul.f32 %v10136_v5, %v12307_v49  ;;  %v3983_v49 = vmul.f32 %v10136_v5, %v12299_v43 }
 0x7a7   :  { %4057 = vrot.lane.b32.xlu1 %v12331_v2, %s10504_s12  ;;  %4043 = vrot.lane.b32.xlu0 %v12333_v35, %s10504_s12  ;;  %v4009_v1 = vmul.f32 0.2, %v3977_v36  ;;  %vm3993_vm13 = vcmp.ge.f32.partialorder %v3977_v36, 0.0  ;;  %vm3994_vm15 = vcmp.ge.f32.partialorder %v3978_v3, 0.0  ;;  %v4010_v20 = vmul.f32 0.2, %v3978_v3 }
 0x7a8   :  { %v4013_v53 = vmul.f32 0.2, %v3981_v6  ;;  %vm3997_vm14 = vcmp.ge.f32.partialorder %v3981_v6, 0.0  ;;  %v4014_v56 = vmul.f32 0.2, %v3982_v61  ;;  %vm3998_vm0 = vcmp.ge.f32.partialorder %v3982_v61, 0.0 }
 0x7a9   :  { %v12457_v11 = vsel %vm3993_vm13, %v3977_v36, %v4009_v1  ;;  %v12471_v44 = vsel %vm3994_vm15, %v3978_v3, %v4010_v20  ;;  %v4012_v18 = vmul.f32 0.2, %v3980_v29  ;;  %v4016_v57 = vmul.f32 0.2, %v3984_v30 }
 0x7aa   :  { %v12459_v26 = vsel %vm3997_vm14, %v3981_v6, %v4013_v53  ;;  %v12473_v4 = vsel %vm3998_vm0, %v3982_v61, %v4014_v56  ;;  %vm3996_vm2 = vcmp.ge.f32.partialorder %v3980_v29, 0.0  ;;  %vm4000_vm4 = vcmp.ge.f32.partialorder %v3984_v30, 0.0 }
 0x7ab   :  { %4049 = vrot.lane.b32.xlu1 %v12340_v50, %s10504_s12  ;;  %4059 = vrot.lane.b32.xlu0 %v12342_v63, %s10504_s12  ;;  %v12485_v19 = vsel %vm3996_vm2, %v3980_v29, %v4012_v18  ;;  %v12487_v37 = vsel %vm4000_vm4, %v3984_v30, %v4016_v57  ;;  %v4011_v39 = vmul.f32 0.2, %v3979_v59  ;;  %v4015_v16 = vmul.f32 0.2, %v3983_v49 }
 0x7ac   :  { %vm3995_vm12 = vcmp.ge.f32.partialorder %v3979_v59, 0.0  ;;  %vm3999_vm13 = vcmp.ge.f32.partialorder %v3983_v49, 0.0 }
 0x7ad   :  { %v12495_v27 = vsel %vm3995_vm12, %v3979_v59, %v4011_v39  ;;  %v12497_v5 = vsel %vm3999_vm13, %v3983_v49, %v4015_v16 }
 0x7af   :  { %4414 = vrot.lane.b32.xlu1 %v12323_v54, %s10505_s6  ;;  %4051 = vrot.lane.b32.xlu0 %v12349_v21, %s10504_s12 }
 0x7b3   :  { %4422 = vrot.lane.b32.xlu1 %v12325_v13, %s10505_s6  ;;  %4416 = vrot.lane.b32.xlu0 %v12355_v47, %s10505_s6 }
 0x7b7   :  { %4438 = vrot.lane.b32.xlu1 %v12331_v2, %s10505_s6  ;;  %4424 = vrot.lane.b32.xlu0 %v12333_v35, %s10505_s6 }
 0x7bb   :  { %4430 = vrot.lane.b32.xlu1 %v12340_v50, %s10505_s6  ;;  %4440 = vrot.lane.b32.xlu0 %v12342_v63, %s10505_s6 }
 0x7bf   :  { %4621 = vrot.lane.b32.xlu1 %v12323_v54, %s10506_s2  ;;  %4432 = vrot.lane.b32.xlu0 %v12349_v21, %s10505_s6 }
 0x7c3   :  { %4629 = vrot.lane.b32.xlu1 %v12325_v13, %s10506_s2  ;;  %4623 = vrot.lane.b32.xlu0 %v12355_v47, %s10506_s2 }
 0x7c7   :  { %4645 = vrot.lane.b32.xlu1 %v12331_v2, %s10506_s2  ;;  %4631 = vrot.lane.b32.xlu0 %v12333_v35, %s10506_s2 }
 0x7cb   :  { %4637 = vrot.lane.b32.xlu1 %v12340_v50, %s10506_s2  ;;  %4647 = vrot.lane.b32.xlu0 %v12342_v63, %s10506_s2 }
 0x7cf   :  { %4979 = vrot.lane.b32.xlu1 %v12325_v13, %s10507_s18  ;;  %4639 = vrot.lane.b32.xlu0 %v12349_v21, %s10506_s2 }
 0x7d3   :  { %4987 = vrot.lane.b32.xlu1 %v12340_v50, %s10507_s18  ;;  %4981 = vrot.lane.b32.xlu0 %v12333_v35, %s10507_s18 }
 0x7d7   :  { %4971 = vrot.lane.b32.xlu1 %v12323_v54, %s10507_s18  ;;  %4989 = vrot.lane.b32.xlu0 %v12349_v21, %s10507_s18 }
 0x7db   :  { %4995 = vrot.lane.b32.xlu1 %v12331_v2, %s10507_s18  ;;  %4973 = vrot.lane.b32.xlu0 %v12355_v47, %s10507_s18 }
 0x7df   :  { %5186 = vrot.lane.b32.xlu1 %v12325_v13, %s10508_s27  ;;  %4997 = vrot.lane.b32.xlu0 %v12342_v63, %s10507_s18 }
 0x7e3   :  { %5194 = vrot.lane.b32.xlu1 %v12340_v50, %s10508_s27  ;;  %5188 = vrot.lane.b32.xlu0 %v12333_v35, %s10508_s27 }
 0x7e7   :  { %5178 = vrot.lane.b32.xlu1 %v12323_v54, %s10508_s27  ;;  %5196 = vrot.lane.b32.xlu0 %v12349_v21, %s10508_s27 }
 0x7eb   :  { %5202 = vrot.lane.b32.xlu1 %v12331_v2, %s10508_s27  ;;  %5180 = vrot.lane.b32.xlu0 %v12355_v47, %s10508_s27 }
 0x7ef   :  { %5393 = vrot.lane.b32.xlu1 %v12325_v13, %s10509_s28  ;;  %5204 = vrot.lane.b32.xlu0 %v12342_v63, %s10508_s27 }
 0x7f3   :  { %5401 = vrot.lane.b32.xlu1 %v12340_v50, %s10509_s28  ;;  %5395 = vrot.lane.b32.xlu0 %v12333_v35, %s10509_s28 }
 0x7f7   :  { %5385 = vrot.lane.b32.xlu1 %v12323_v54, %s10509_s28  ;;  %5403 = vrot.lane.b32.xlu0 %v12349_v21, %s10509_s28 }
 0x7fb   :  { %5409 = vrot.lane.b32.xlu1 %v12331_v2, %s10509_s28  ;;  %5387 = vrot.lane.b32.xlu0 %v12355_v47, %s10509_s28 }
 0x7ff   :  { %5411 = vrot.lane.b32.xlu0 %v12342_v63, %s10509_s28  ;;  %4113 = vrot.lane.b32.xlu1 %v12355_v47, %s10502_s14 }
 0x803   :  { %4115 = vrot.lane.b32.xlu1 %v12457_v11, %s10502_s14  ;;  %4117 = vrot.lane.b32.xlu0 %v12459_v26, %s10502_s14 }
 0x805   :  { %v12467_v9 = vpop.permute.xlu0 %4111  ;;  %v12469_v32 = vpop.permute.xlu1 %4119 }
 0x807   :  { %4123 = vrot.lane.b32.xlu1 %v12471_v44, %s10502_s14  ;;  %4125 = vrot.lane.b32.xlu0 %v12473_v4, %s10502_s14 }
 0x809   :  { %v12481_v14 = vpop.permute.xlu0 %4121  ;;  %v12483_v0 = vpop.permute.xlu1 %4135 }
 0x80b   :  { %4139 = vrot.lane.b32.xlu1 %v12485_v19, %s10502_s14  ;;  %4141 = vrot.lane.b32.xlu0 %v12487_v37, %s10502_s14 }
 0x80d   :  { %v12493_v43 = vpop.permute.xlu0 %4137  ;;  %v4128_v58 = vpop.permute.xlu1 %4127 }
 0x80e   :  { %v4147_v36 = vsel %vm288_vm1, %v12469_v32, %v4128_v58  ;;  %v4143_v6 = vsel %vm288_vm1, %v4128_v58, %v12483_v0 }
 0x80f   :  { %4131 = vrot.lane.b32.xlu1 %v12495_v27, %s10502_s14  ;;  %4133 = vrot.lane.b32.xlu0 %v12497_v5, %s10502_s14  ;;  %v4161_v61 = vmul.f32 %v4147_v36, %v10886_v23  ;;  %v4162_v56 = vmul.f32 %v4143_v6, %v10883_v22 }
 0x811   :  { %v4130_v1 = vpop.permute.xlu0 %4129  ;;  %v12509_v3 = vpop.permute.xlu1 %4033 }
 0x812   :  { %v4144_v53 = vsel %vm288_vm1, %v4130_v1, %v12493_v43  ;;  %v4148_v20 = vsel %vm288_vm1, %v12481_v14, %v4130_v1 }
 0x813   :  { %v4165_v29 = vmul.f32 %v4148_v20, %v10886_v23  ;;  %v4166_v30 = vmul.f32 %v4144_v53, %v10883_v22  ;;  %4037 = vrot.lane.b32.xlu1 %v12457_v11, %s10504_s12  ;;  %4039 = vrot.lane.b32.xlu0 %v12459_v26, %s10504_s12 }
 0x815   :  { %v4184_v18 = vpack.c.bf16 %v4165_v29, %v4161_v61  ;;  %v12525_v57 = vpop.permute.xlu0 %4035  ;;  %v12527_v59 = vpop.permute.xlu1 %4041  ;;  %v4185_v49 = vpack.c.bf16 %v4166_v30, %v4162_v56 }
 0x817   :  { %4045 = vrot.lane.b32.xlu1 %v12471_v44, %s10504_s12  ;;  %4047 = vrot.lane.b32.xlu0 %v12473_v4, %s10504_s12 }
 0x818   :  { %4249 = vmatprep.subr.bf16.mxu1 %v4185_v49 }
 0x819   :  { %4250 = vmatpush1.bf16.msra.mxu1 %v4184_v18  ;;  %v12533_v39 = vpop.permute.xlu0 %4043  ;;  %v12535_v16 = vpop.permute.xlu1 %4057 }
 0x81b   :  { %4061 = vrot.lane.b32.xlu1 %v12485_v19, %s10504_s12  ;;  %4063 = vrot.lane.b32.xlu0 %v12487_v37, %s10504_s12 }
 0x81d   :  { %v12541_v58 = vpop.permute.xlu0 %4059  ;;  %v12543_v36 = vpop.permute.xlu1 %4049 }
 0x81f   :  { %4053 = vrot.lane.b32.xlu1 %v12495_v27, %s10504_s12  ;;  %4055 = vrot.lane.b32.xlu0 %v12497_v5, %s10504_s12 }
 0x821   :  { %v12549_v6 = vpop.permute.xlu0 %4051  ;;  %v12551_v1 = vpop.permute.xlu1 %4414 }
 0x823   :  { %4418 = vrot.lane.b32.xlu1 %v12457_v11, %s10505_s6  ;;  %4420 = vrot.lane.b32.xlu0 %v12459_v26, %s10505_s6 }
 0x825   :  { %v12557_v61 = vpop.permute.xlu0 %4416  ;;  %v12559_v53 = vpop.permute.xlu1 %4422 }
 0x827   :  { %4426 = vrot.lane.b32.xlu1 %v12471_v44, %s10505_s6  ;;  %4428 = vrot.lane.b32.xlu0 %v12473_v4, %s10505_s6 }
 0x829   :  { %v12565_v20 = vpop.permute.xlu0 %4424  ;;  %v12567_v56 = vpop.permute.xlu1 %4438 }
 0x82b   :  { %4442 = vrot.lane.b32.xlu1 %v12485_v19, %s10505_s6  ;;  %4444 = vrot.lane.b32.xlu0 %v12487_v37, %s10505_s6 }
 0x82d   :  { %v12573_v29 = vpop.permute.xlu0 %4440  ;;  %v12575_v30 = vpop.permute.xlu1 %4430 }
 0x82f   :  { %4434 = vrot.lane.b32.xlu1 %v12495_v27, %s10505_s6  ;;  %4436 = vrot.lane.b32.xlu0 %v12497_v5, %s10505_s6 }
 0x831   :  { %v12581_v18 = vpop.permute.xlu0 %4432  ;;  %v12583_v49 = vpop.permute.xlu1 %4621 }
 0x833   :  { %4625 = vrot.lane.b32.xlu1 %v12457_v11, %s10506_s2  ;;  %4627 = vrot.lane.b32.xlu0 %v12459_v26, %s10506_s2 }
 0x835   :  { %v12589_v38 = vpop.permute.xlu0 %4623  ;;  %v12591_v40 = vpop.permute.xlu1 %4629 }
 0x837   :  { %4633 = vrot.lane.b32.xlu1 %v12471_v44, %s10506_s2  ;;  %4635 = vrot.lane.b32.xlu0 %v12473_v4, %s10506_s2 }
 0x839   :  { %v12597_v55 = vpop.permute.xlu0 %4631  ;;  %v12599_v28 = vpop.permute.xlu1 %4645 }
 0x83a   :  { %15864 = vst [vmem:[#allocation57_spill] sm:$0xff] %v12599_v28 }
 0x83b   :  { %4649 = vrot.lane.b32.xlu1 %v12485_v19, %s10506_s2  ;;  %4651 = vrot.lane.b32.xlu0 %v12487_v37, %s10506_s2 }
 0x83d   :  { %v12605_v8 = vpop.permute.xlu0 %4647  ;;  %v12607_v10 = vpop.permute.xlu1 %4637 }
 0x83e   :  { %15865 = vst [vmem:[#allocation63_spill] sm:$0xff] %v12607_v10 }
 0x83f   :  { %4641 = vrot.lane.b32.xlu1 %v12495_v27, %s10506_s2  ;;  %4643 = vrot.lane.b32.xlu0 %v12497_v5, %s10506_s2 }
 0x841   :  { %v12613_v17 = vpop.permute.xlu0 %4639  ;;  %v12615_v48 = vpop.permute.xlu1 %4979 }
 0x842   :  { %15866 = vst [vmem:[#allocation61_spill] sm:$0xff] %v12615_v48 }
 0x843   :  { %5600 = vrot.lane.b32.xlu1 %v12325_v13, %s10510_s26  ;;  %5602 = vrot.lane.b32.xlu0 %v12333_v35, %s10510_s26 }
 0x845   :  { %v12621_v42 = vpop.permute.xlu0 %4981  ;;  %v12623_v52 = vpop.permute.xlu1 %4987 }
 0x846   :  { %15867 = vst [vmem:[#allocation70_spill] sm:$0xff] %v12621_v42  ;;  %15868 = vst [vmem:[#allocation72_spill] sm:$0xff] %v12623_v52 }
 0x847   :  { %4983 = vrot.lane.b32.xlu1 %v12471_v44, %s10507_s18  ;;  %5610 = vrot.lane.b32.xlu0 %v12349_v21, %s10510_s26 }
 0x849   :  { %v12629_v62 = vpop.permute.xlu0 %4989  ;;  %v12631_v10 = vpop.permute.xlu1 %4971 }
 0x84a   :  { %15869 = vst [vmem:[#allocation69_spill] sm:$0xff] %v12629_v62  ;;  %15870 = vst [vmem:[#allocation71_spill] sm:$0xff] %v12631_v10 }
 0x84b   :  { %4991 = vrot.lane.b32.xlu1 %v12495_v27, %s10507_s18  ;;  %5594 = vrot.lane.b32.xlu0 %v12355_v47, %s10510_s26  ;;  %v15890_v47 = vld [vmem:[#allocation32_spill] sm:$0xff] }
 0x84d   :  { %v12637_v48 = vpop.permute.xlu0 %4973  ;;  %v12639_v42 = vpop.permute.xlu1 %4995 }
 0x84e   :  { %15871 = vst [vmem:[#allocation60_spill] sm:$0xff] %v12637_v48  ;;  %15872 = vst [vmem:[#allocation62_spill] sm:$0xff] %v12639_v42 }
 0x84f   :  { %4975 = vrot.lane.b32.xlu1 %v12457_v11, %s10507_s18  ;;  %5618 = vrot.lane.b32.xlu0 %v12342_v63, %s10510_s26 }
 0x851   :  { %v12645_v21 = vpop.permute.xlu0 %4997  ;;  %v12647_v52 = vpop.permute.xlu1 %5186 }
 0x852   :  { %15873 = vst [vmem:[#allocation76_spill] sm:$0xff] %v12645_v21  ;;  %15874 = vst [vmem:[#allocation74_spill] sm:$0xff] %v12647_v52 }
 0x853   :  { %4985 = vrot.lane.b32.xlu0 %v12473_v4, %s10507_s18  ;;  %4999 = vrot.lane.b32.xlu1 %v12485_v19, %s10507_s18 }
 0x855   :  { %v12653_v10 = vpop.permute.xlu0 %5188  ;;  %v12655_v48 = vpop.permute.xlu1 %5194 }
 0x856   :  { %15875 = vst [vmem:[#allocation75_spill] sm:$0xff] %v12653_v10  ;;  %15876 = vst [vmem:[#allocation73_spill] sm:$0xff] %v12655_v48 }
 0x857   :  { %4993 = vrot.lane.b32.xlu0 %v12497_v5, %s10507_s18  ;;  %5190 = vrot.lane.b32.xlu1 %v12471_v44, %s10508_s27 }
 0x859   :  { %v12661_v42 = vpop.permute.xlu0 %5196  ;;  %v12663_v21 = vpop.permute.xlu1 %5178 }
 0x85a   :  { %15877 = vst [vmem:[#allocation78_spill] sm:$0xff] %v12661_v42  ;;  %15878 = vst [vmem:[#allocation80_spill] sm:$0xff] %v12663_v21 }
 0x85b   :  { %4977 = vrot.lane.b32.xlu0 %v12459_v26, %s10507_s18  ;;  %5198 = vrot.lane.b32.xlu1 %v12495_v27, %s10508_s27 }
 0x85d   :  { %v12669_v52 = vpop.permute.xlu0 %5180  ;;  %v12671_v10 = vpop.permute.xlu1 %5202 }
 0x85e   :  { %15879 = vst [vmem:[#allocation77_spill] sm:$0xff] %v12669_v52  ;;  %15880 = vst [vmem:[#allocation79_spill] sm:$0xff] %v12671_v10 }
 0x85f   :  { %5001 = vrot.lane.b32.xlu0 %v12487_v37, %s10507_s18  ;;  %5182 = vrot.lane.b32.xlu1 %v12457_v11, %s10508_s27 }
 0x861   :  { %v12677_v48 = vpop.permute.xlu0 %5204  ;;  %v12679_v42 = vpop.permute.xlu1 %5393 }
 0x862   :  { %15881 = vst [vmem:[#allocation84_spill] sm:$0xff] %v12677_v48  ;;  %15882 = vst [vmem:[#allocation82_spill] sm:$0xff] %v12679_v42 }
 0x863   :  { %5192 = vrot.lane.b32.xlu0 %v12473_v4, %s10508_s27  ;;  %5206 = vrot.lane.b32.xlu1 %v12485_v19, %s10508_s27 }
 0x865   :  { %v12685_v21 = vpop.permute.xlu0 %5395  ;;  %v12687_v52 = vpop.permute.xlu1 %5401 }
 0x866   :  { %15883 = vst [vmem:[#allocation83_spill] sm:$0xff] %v12685_v21  ;;  %15884 = vst [vmem:[#allocation81_spill] sm:$0xff] %v12687_v52  ;;  %v4155_v52 = vsel %vm288_vm1, %v12483_v0, %v12467_v9 }
 0x867   :  { %5200 = vrot.lane.b32.xlu0 %v12497_v5, %s10508_s27  ;;  %5397 = vrot.lane.b32.xlu1 %v12471_v44, %s10509_s28 }
 0x869   :  { %v12693_v10 = vpop.permute.xlu0 %5403  ;;  %v12695_v48 = vpop.permute.xlu1 %5385 }
 0x86a   :  { %15885 = vst [vmem:[#allocation86_spill] sm:$0xff] %v12693_v10  ;;  %15886 = vst [vmem:[#allocation88_spill] sm:$0xff] %v12695_v48  ;;  %v4151_v48 = vsel %vm288_vm1, %v12467_v9, %v12469_v32  ;;  %v4159_v32 = vmul.f32 %v4155_v52, %v10870_v12  ;;  %v4074_v52 = vsel %vm239_vm3, %v12525_v57, %v12533_v39 }
 0x86b   :  { %5184 = vrot.lane.b32.xlu0 %v12459_v26, %s10508_s27  ;;  %5405 = vrot.lane.b32.xlu1 %v12495_v27, %s10509_s28  ;;  %v4160_v62 = vmul.f32 %v4151_v48, %v15890_v47 }
 0x86d   :  { %v12701_v42 = vpop.permute.xlu0 %5387  ;;  %v12703_v21 = vpop.permute.xlu1 %5409 }
 0x86e   :  { %15887 = vst [vmem:[#allocation85_spill] sm:$0xff] %v12701_v42  ;;  %15888 = vst [vmem:[#allocation87_spill] sm:$0xff] %v12703_v21 }
 0x86f   :  { %5208 = vrot.lane.b32.xlu0 %v12487_v37, %s10508_s27  ;;  %5389 = vrot.lane.b32.xlu1 %v12457_v11, %s10509_s28 }
 0x871   :  { %v12717_v10 = vpop.permute.xlu0 %5411  ;;  %v4114_v42 = vpop.permute.xlu1 %4113 }
 0x872   :  { %15889 = vst [vmem:[#allocation89_spill] sm:$0xff] %v12717_v10  ;;  %v4152_v21 = vsel %vm288_vm1, %v4114_v42, %v12481_v14  ;;  %v4156_v63 = vsel %vm288_vm1, %v12493_v43, %v4114_v42 }
 0x873   :  { %v4163_v35 = vmul.f32 %v4156_v63, %v10870_v12  ;;  %v4164_v13 = vmul.f32 %v4152_v21, %v15890_v47  ;;  %5399 = vrot.lane.b32.xlu0 %v12473_v4, %s10509_s28  ;;  %5413 = vrot.lane.b32.xlu1 %v12485_v19, %s10509_s28  ;;  %v4086_v21 = vmul.f32 %v4074_v52, %v10899_v33 }
 0x875   :  { %v4182_v9 = vpack.c.bf16 %v4163_v35, %v4159_v32  ;;  %v4118_v14 = vpop.permute.xlu0 %4117  ;;  %v4116_v0 = vpop.permute.xlu1 %4115  ;;  %v4183_v10 = vpack.c.bf16 %v4164_v13, %v4160_v62 }
 0x877   :  { %5407 = vrot.lane.b32.xlu0 %v12497_v5, %s10509_s28  ;;  %4196 = vmatprep.subr.bf16.mxu0 %v4183_v10  ;;  %v4073_v10 = vsel %vm239_vm3, %v12509_v3, %v12527_v59 }
 0x878   :  { %5608 = vrot.lane.b32.xlu1 %v12340_v50, %s10510_s26  ;;  %4197 = vmatpush1.bf16.msra.mxu0 %v4182_v9  ;;  %v4176_v50 = vld [vmem:[#allocation11 + $0x20] sm:$0xff]  ;;  %v4082_v28 = vmul.f32 %v4073_v10, %v10899_v33  ;;  %v4077_v10 = vsel %vm239_vm3, %v12535_v16, %v12509_v3 }
 0x879   :  { %v4126_v42 = vpop.permute.xlu0 %4125  ;;  %v4124_v48 = vpop.permute.xlu1 %4123 }
 0x87a   :  { %v4154_v35 = vsel %vm288_vm1, %v4118_v14, %v4126_v42  ;;  %v4153_v62 = vsel %vm288_vm1, %v4116_v0, %v4124_v48 }
 0x87b   :  { %v4172_v13 = vmul.f32 %v4154_v35, %v15890_v47  ;;  %v4168_v63 = vmul.f32 %v4153_v62, %v15890_v47  ;;  %5391 = vrot.lane.b32.xlu0 %v12459_v26, %s10509_s28  ;;  %v4078_v35 = vsel %vm239_vm3, %v12541_v58, %v12525_v57  ;;  %v4104_v57 = vpack.c.bf16 %v4086_v21, %v4082_v28 }
 0x87c   :  { %5592 = vrot.lane.b32.xlu1 %v12323_v54, %s10510_s26 }
 0x87d   :  { %v4142_v43 = vpop.permute.xlu0 %4141  ;;  %v4140_v32 = vpop.permute.xlu1 %4139  ;;  %v4187_v9 = vpack.c.bf16 %v4172_v13, %v4168_v63  ;;  %v4065_v13 = vsel %vm239_vm3, %v12543_v36, %v12535_v16  ;;  %v4066_v63 = vsel %vm239_vm3, %v12549_v6, %v12541_v58  ;;  %v4070_v58 = vsel %vm239_vm3, %v12533_v39, %v12549_v6 }
 0x87e   :  { %v4158_v62 = vsel %vm288_vm1, %v4142_v43, %v4118_v14  ;;  %v4157_v52 = vsel %vm288_vm1, %v4140_v32, %v4116_v0  ;;  %v4180_v14 = vpack.c.bf16 %v4177_v34, %v4176_v50  ;;  %v4085_v0 = vmul.f32 %v4078_v35, %v10905_v41 }
 0x87f   :  { %v4171_v47 = vmul.f32 %v4158_v62, %v10870_v12  ;;  %v4167_v54 = vmul.f32 %v4157_v52, %v10870_v12  ;;  %5415 = vrot.lane.b32.xlu0 %v12487_v37, %s10509_s28  ;;  %4198 = vmatprep.subr.bf16.mxu0 %v4187_v9  ;;  %v4084_v39 = vmul.f32 %v4065_v13, %v10916_v51 }
 0x880   :  { %5616 = vrot.lane.b32.xlu1 %v12331_v2, %s10510_s26 }
 0x881   :  { %v4186_v9 = vpack.c.bf16 %v4171_v47, %v4167_v54  ;;  %v4134_v62 = vpop.permute.xlu0 %4133  ;;  %v4132_v3 = vpop.permute.xlu1 %4131 }
 0x882   :  { %v4146_v52 = vsel %vm288_vm1, %v4134_v62, %v4142_v43  ;;  %v4150_v34 = vsel %vm288_vm1, %v4126_v42, %v4134_v62  ;;  %v4145_v28 = vsel %vm288_vm1, %v4132_v3, %v4140_v32  ;;  %v4149_v50 = vsel %vm288_vm1, %v4124_v48, %v4132_v3 }
 0x883   :  { %v4173_v16 = vmul.f32 %v4150_v34, %v10886_v23  ;;  %v4174_v21 = vmul.f32 %v4146_v52, %v10883_v22  ;;  %v4169_v54 = vmul.f32 %v4149_v50, %v10886_v23  ;;  %v4170_v47 = vmul.f32 %v4145_v28, %v10883_v22  ;;  %5606 = vrot.lane.b32.xlu0 %v12473_v4, %s10510_s26 }
 0x884   :  { %v4088_v42 = vmul.f32 %v4066_v63, %v10916_v51  ;;  %5604 = vrot.lane.b32.xlu1 %v12471_v44, %s10510_s26  ;;  %4199 = vmatpush1.bf16.msra.mxu0 %v4186_v9  ;;  %v4081_v48 = vmul.f32 %v4077_v10, %v10905_v41  ;;  %v4069_v3 = vsel %vm239_vm3, %v12527_v59, %v12543_v36  ;;  %v4179_v9 = vld [vmem:[#allocation11 + $0x38] sm:$0xff] }
 0x885   :  { %v4188_v43 = vpack.c.bf16 %v4173_v16, %v4169_v54  ;;  %4308 = vmatprep.subr.bf16.mxu0 %v4104_v57  ;;  %v4040_v32 = vpop.permute.xlu0 %4039  ;;  %v4038_v35 = vpop.permute.xlu1 %4037  ;;  %v4189_v62 = vpack.c.bf16 %v4174_v21, %v4170_v47  ;;  %v4087_v63 = vmul.f32 %v4070_v58, %v10911_v46  ;;  %v4178_v57 = vld [vmem:[#allocation11 + $0x30] sm:$0xff]  ;;  %v4083_v52 = vmul.f32 %v4069_v3, %v10911_v46  ;;  %v4097_v21 = vld [vmem:[#allocation11] sm:$0xff]  ;;  %v4098_v54 = vld [vmem:[#allocation11 + $0x8] sm:$0xff] }
 0x886   :  { %v4103_v6 = vpack.c.bf16 %v4085_v0, %v4081_v48  ;;  %v4106_v10 = vpack.c.bf16 %v4088_v42, %v4084_v39  ;;  %v4181_v16 = vpack.c.bf16 %v4179_v9, %v4178_v57  ;;  %v4454_v47 = vsel %vm592_vm5, %v12551_v1, %v12559_v53 }
 0x887   :  { %9485 = vmatmul.mubr.msk.bf16.vlgmr.msra.gmra.mrb[16].mxu0 %vm2231_vm11, %v4180_v14  ;;  %5614 = vrot.lane.b32.xlu0 %v12497_v5, %s10510_s26  ;;  %v4105_v34 = vpack.c.bf16 %v4087_v63, %v4083_v52  ;;  %v4455_v58 = vsel %vm592_vm5, %v12557_v61, %v12565_v20  ;;  %v12852_v63 = vpack.c.bf16 %v4098_v54, %v4097_v21 }
 0x888   :  { %5612 = vrot.lane.b32.xlu1 %v12495_v27, %s10510_s26  ;;  %4251 = vmatprep.subr.bf16.mxu1 %v4189_v62  ;;  %v4446_v9 = vsel %vm592_vm5, %v12575_v30, %v12567_v56  ;;  %v4447_v52 = vsel %vm592_vm5, %v12581_v18, %v12573_v29 }
 0x889   :  { %4309 = vmatpush1.bf16.msra.mxu0 %v4103_v6  ;;  %4252 = vmatpush1.bf16.msra.mxu1 %v4188_v43  ;;  %v4048_v59 = vpop.permute.xlu0 %4047  ;;  %v4046_v36 = vpop.permute.xlu1 %4045 }
 0x88a   :  { %v4076_v0 = vsel %vm239_vm3, %v4040_v32, %v4048_v59  ;;  %4361 = vmatprep.subr.bf16.mxu1 %v4106_v10  ;;  %v4075_v13 = vsel %vm239_vm3, %v4038_v35, %v4046_v36  ;;  %4238 = vmatprep.mubr.bf16.mxu0 %v15805_v24  ;;  %v4463_v10 = vmul.f32 %v4454_v47, %v10928_v60 }
 0x88b   :  { %v4094_v28 = vmul.f32 %v4076_v0, %v10899_v33  ;;  %v4090_v50 = vmul.f32 %v4075_v13, %v10899_v33  ;;  %5598 = vrot.lane.b32.xlu0 %v12459_v26, %s10510_s26 }
 0x88c   :  { %5596 = vrot.lane.b32.xlu1 %v12457_v11, %s10510_s26  ;;  %9487 = vmatmul.mubr.msk.bf16.vlgmr.msra.gmra.mrb[16].mxu1 %vm2231_vm11, %v4180_v14  ;;  %v4459_v14 = vsel %vm592_vm5, %v12573_v29, %v12557_v61  ;;  %v4467_v61 = vmul.f32 %v4455_v58, %v10928_v60 }
 0x88d   :  { %4362 = vmatpush1.bf16.msra.mxu1 %v4105_v34  ;;  %v4064_v42 = vpop.permute.xlu0 %4063  ;;  %v4062_v48 = vpop.permute.xlu1 %4061  ;;  %v4108_v43 = vpack.c.bf16 %v4094_v28, %v4090_v50  ;;  %4291 = vmatprep.mubr.bf16.mxu1 %v15805_v24  ;;  %v4466_v57 = vmul.f32 %v4459_v14, %v10936_v15  ;;  %v5799_v34 = vld [vmem:[#allocation19] sm:$0xff] }
 0x88e   :  { %v4080_v62 = vsel %vm239_vm3, %v4064_v42, %v4040_v32  ;;  %v4079_v3 = vsel %vm239_vm3, %v4062_v48, %v4038_v35  ;;  %v4458_v32 = vsel %vm592_vm5, %v12567_v56, %v12551_v1  ;;  %v5800_v35 = vld [vmem:[#allocation19 + $0x8] sm:$0xff] }
 0x88f   :  { %v4093_v39 = vmul.f32 %v4080_v62, %v10905_v41  ;;  %v4089_v6 = vmul.f32 %v4079_v3, %v10905_v41  ;;  %9486 = vmatmul.mubr.msk.bf16.gmra.mrb[20].mxu0 %vm2231_vm11, %v4181_v16  ;;  %5622 = vrot.lane.b32.xlu0 %v12487_v37, %s10510_s26 }
 0x890   :  { %5620 = vrot.lane.b32.xlu1 %v12485_v19, %s10510_s26  ;;  %4310 = vmatprep.subr.bf16.mxu0 %v4108_v43  ;;  %v4462_v43 = vmul.f32 %v4458_v32, %v10936_v15 }
 0x891   :  { %v4107_v0 = vpack.c.bf16 %v4093_v39, %v4089_v6  ;;  %v4056_v13 = vpop.permute.xlu0 %4055  ;;  %v4054_v1 = vpop.permute.xlu1 %4053  ;;  %4340 = vmatprep.mubr.bf16.mxu0 %v15805_v24  ;;  %v5801_v39 = vld [vmem:[#allocation19 + $0x10] sm:$0xff] }
 0x892   :  { %v4068_v28 = vsel %vm239_vm3, %v4056_v13, %v4064_v42  ;;  %v4072_v50 = vsel %vm239_vm3, %v4048_v59, %v4056_v13  ;;  %v4067_v56 = vsel %vm239_vm3, %v4054_v1, %v4062_v48  ;;  %v4071_v21 = vsel %vm239_vm3, %v4046_v36, %v4054_v1  ;;  %v5802_v48 = vld [vmem:[#allocation19 + $0x18] sm:$0xff] }
 0x893   :  { %v4095_v29 = vmul.f32 %v4072_v50, %v10911_v46  ;;  %v4096_v54 = vmul.f32 %v4068_v28, %v10916_v51  ;;  %v4091_v47 = vmul.f32 %v4071_v21, %v10911_v46  ;;  %v4092_v58 = vmul.f32 %v4067_v56, %v10916_v51  ;;  %5810 = vperm.xlu0 %10115, %v5800_v35  }
 0x894   :  { %v4451_v59 = vsel %vm592_vm5, %v12565_v20, %v12581_v18  ;;  %v4469_v42 = vmul.f32 %v4447_v52, %v10950_v31  ;;  %5805 = vperm.xlu1 %10116, %v5799_v34   ;;  %9488 = vmatmul.mubr.msk.bf16.gmra.mrb[20].mxu1 %vm2231_vm11, %v4181_v16  ;;  %v4486_v36 = vpack.c.bf16 %v4467_v61, %v4463_v10 }
 0x895   :  { %v4109_v14 = vpack.c.bf16 %v4095_v29, %v4091_v47  ;;  %4311 = vmatpush1.bf16.msra.mxu0 %v4107_v0  ;;  %v4421_v62 = vpop.permute.xlu0 %4420  ;;  %v4419_v3 = vpop.permute.xlu1 %4418  ;;  %v4110_v6 = vpack.c.bf16 %v4096_v54, %v4092_v58  ;;  %4393 = vmatprep.mubr.bf16.mxu1 %v15805_v24  ;;  %v4450_v20 = vsel %vm592_vm5, %v12559_v53, %v12575_v30 }
 0x896   :  { %v4465_v18 = vmul.f32 %v4446_v9, %v10950_v31  ;;  %4499 = vmatprep.subr.bf16.mxu0 %v4486_v36  ;;  %v4485_v16 = vpack.c.bf16 %v4466_v57, %v4462_v43  ;;  %v4468_v10 = vmul.f32 %v4451_v59, %v10944_v25  ;;  %v4464_v32 = vmul.f32 %v4450_v20, %v10944_v25  ;;  %v4099_v57 = vld [vmem:[#allocation11 + $0x10] sm:$0xff]  ;;  %v4100_v9 = vld [vmem:[#allocation11 + $0x18] sm:$0xff]  ;;  %v15891_v43 = vld [vmem:[#allocation57_spill] sm:$0xff] }
 0x897   :  { %5820 = vperm.xlu0 %10115, %v5802_v48   ;;  %4363 = vmatprep.subr.bf16.mxu1 %v4110_v6  ;;  %v4662_v53 = vsel %vm783_vm6, %v12589_v38, %v12597_v55  ;;  %v4661_v52 = vsel %vm783_vm6, %v12583_v49, %v12591_v40  ;;  %v4102_v56 = vpack.c.bf16 %v4100_v9, %v4099_v57  ;;  %v15894_v6 = vld [vmem:[#allocation38_spill] sm:$0xff] }
 0x898   :  { %9489 = vmatmul.mubr.msk.bf16.vlgmr.msra.gmra.mrb[16].mxu0 %vm2231_vm11, %v12852_v63  ;;  %5815 = vperm.xlu1 %10116, %v5801_v39   ;;  %v4488_v61 = vpack.c.bf16 %v4469_v42, %v4465_v18  ;;  %v4487_v1 = vpack.c.bf16 %v4468_v10, %v4464_v32  ;;  %v4674_v50 = vmul.f32 %v4662_v53, %v10965_v45  ;;  %v4480_v32 = vld [vmem:[#allocation11 + $0x48] sm:$0xff] }
 0x899   :  { %4500 = vmatpush1.bf16.msra.mxu0 %v4485_v16  ;;  %4364 = vmatpush1.bf16.msra.mxu1 %v4109_v14  ;;  %v4429_v30 = vpop.permute.xlu0 %4428  ;;  %v4427_v35 = vpop.permute.xlu1 %4426  ;;  %v4670_v21 = vmul.f32 %v4661_v52, %v10965_v45  ;;  %v4666_v58 = vsel %vm783_vm6, %v12605_v8, %v12589_v38  ;;  %v4654_v59 = vsel %vm783_vm6, %v12613_v17, %v12605_v8  ;;  %v15892_v8 = vld [vmem:[#allocation39_spill] sm:$0xff] }
 0x89a   :  { %v4457_v0 = vsel %vm592_vm5, %v4421_v62, %v4429_v30  ;;  %4552 = vmatprep.subr.bf16.mxu1 %v4488_v61  ;;  %v4456_v13 = vsel %vm592_vm5, %v4419_v3, %v4427_v35  ;;  %4350 = vmatprep.mubr.bf16.mxu0 %v15805_v24  ;;  %v4665_v38 = vsel %vm783_vm6, %v15891_v43, %v12583_v49  ;;  %v4479_v61 = vld [vmem:[#allocation11 + $0x40] sm:$0xff] }
 0x89b   :  { %v4475_v34 = vmul.f32 %v4457_v0, %v10928_v60  ;;  %v4471_v28 = vmul.f32 %v4456_v13, %v10928_v60  ;;  %v4693_v14 = vpack.c.bf16 %v4674_v50, %v4670_v21  ;;  %v4673_v39 = vmul.f32 %v4666_v58, %v15892_v8 }
 0x89c   :  { %9491 = vmatmul.mubr.msk.bf16.vlgmr.msra.gmra.mrb[16].mxu1 %vm2231_vm11, %v12852_v63  ;;  %v4676_v20 = vmul.f32 %v4654_v59, %v15894_v6 }
 0x89d   :  { %4553 = vmatpush1.bf16.msra.mxu1 %v4487_v1  ;;  %v4445_v29 = vpop.permute.xlu0 %4444  ;;  %v4443_v54 = vpop.permute.xlu1 %4442  ;;  %v4490_v47 = vpack.c.bf16 %v4475_v34, %v4471_v28  ;;  %4403 = vmatprep.mubr.bf16.mxu1 %v15805_v24  ;;  %v4483_v34 = vpack.c.bf16 %v4480_v32, %v4479_v61 }
 0x89e   :  { %v4461_v63 = vsel %vm592_vm5, %v4445_v29, %v4421_v62  ;;  %v4460_v42 = vsel %vm592_vm5, %v4443_v54, %v4419_v3  ;;  %v15893_v62 = vld [vmem:[#allocation63_spill] sm:$0xff] }
 0x89f   :  { %v4474_v36 = vmul.f32 %v4461_v63, %v10936_v15  ;;  %v4470_v48 = vmul.f32 %v4460_v42, %v10936_v15  ;;  %4501 = vmatprep.subr.bf16.mxu0 %v4490_v47  ;;  %v4653_v3 = vsel %vm783_vm6, %v15893_v62, %v15891_v43  ;;  %v4657_v47 = vsel %vm783_vm6, %v12591_v40, %v15893_v62 }
 0x8a0   :  { %9490 = vmatmul.mubr.msk.bf16.gmra.mrb[20].mxu0 %vm2231_vm11, %v4102_v56  ;;  %v4672_v28 = vmul.f32 %v4653_v3, %v15894_v6 }
 0x8a1   :  { %v4489_v18 = vpack.c.bf16 %v4474_v36, %v4470_v48  ;;  %v4437_v16 = vpop.permute.xlu0 %4436  ;;  %v4435_v10 = vpop.permute.xlu1 %4434  ;;  %4531 = vmatprep.mubr.bf16.mxu0 %v15805_v24  ;;  %v4481_v36 = vld [vmem:[#allocation11 + $0x50] sm:$0xff]  ;;  %v4482_v48 = vld [vmem:[#allocation11 + $0x58] sm:$0xff] }
 0x8a2   :  { %v4449_v49 = vsel %vm592_vm5, %v4437_v16, %v4445_v29  ;;  %v4453_v53 = vsel %vm592_vm5, %v4429_v30, %v4437_v16  ;;  %v4448_v57 = vsel %vm592_vm5, %v4435_v10, %v4443_v54  ;;  %v4452_v9 = vsel %vm592_vm5, %v4427_v35, %v4435_v10 }
 0x8a3   :  { %v4476_v52 = vmul.f32 %v4453_v53, %v10944_v25  ;;  %v4477_v0 = vmul.f32 %v4449_v49, %v10950_v31  ;;  %v4472_v13 = vmul.f32 %v4452_v9, %v10944_v25  ;;  %v4473_v1 = vmul.f32 %v4448_v57, %v10950_v31  ;;  %4502 = vmatpush1.bf16.msra.mxu0 %v4489_v18  ;;  %v15896_v9 = vld [vmem:[#allocation58_spill] sm:$0xff] }
 0x8a4   :  { %v4658_v30 = vsel %vm783_vm6, %v12597_v55, %v12613_v17  ;;  %9492 = vmatmul.mubr.msk.bf16.gmra.mrb[20].mxu1 %vm2231_vm11, %v4102_v56  ;;  %4706 = vmatprep.subr.bf16.mxu0 %v4693_v14  ;;  %v4669_v35 = vmul.f32 %v4665_v38, %v15892_v8  ;;  %v15895_v55 = vld [vmem:[#allocation40_spill] sm:$0xff]  ;;  %v4695_v58 = vpack.c.bf16 %v4676_v20, %v4672_v28 }
 0x8a5   :  { %v4491_v50 = vpack.c.bf16 %v4476_v52, %v4472_v13  ;;  %v4628_v21 = vpop.permute.xlu0 %4627  ;;  %v4626_v29 = vpop.permute.xlu1 %4625  ;;  %v4492_v54 = vpack.c.bf16 %v4477_v0, %v4473_v1  ;;  %4584 = vmatprep.mubr.bf16.mxu1 %v15805_v24  ;;  %v4675_v56 = vmul.f32 %v4658_v30, %v15895_v55  ;;  %v4671_v59 = vmul.f32 %v4657_v47, %v15895_v55  ;;  %v15897_v52 = vld [vmem:[#allocation59_spill] sm:$0xff]  ;;  %v4686_v13 = vld [vmem:[#allocation11 + $0x60] sm:$0xff]  ;;  %v4687_v1 = vld [vmem:[#allocation11 + $0x68] sm:$0xff] }
 0x8a6   :  { %v4692_v17 = vpack.c.bf16 %v4673_v39, %v4669_v35  ;;  %v4484_v62 = vpack.c.bf16 %v4482_v48, %v4481_v36  ;;  %v4836_v0 = vpack.c.bf16 %v15897_v52, %v15896_v9  ;;  %v4690_v47 = vpack.c.bf16 %v4687_v1, %v4686_v13  ;;  %v15900_v48 = vld [vmem:[#allocation72_spill] sm:$0xff]  ;;  %v15908_v52 = vld [vmem:[#allocation71_spill] sm:$0xff] }
 0x8a7   :  { %4554 = vmatprep.subr.bf16.mxu1 %v4492_v54  ;;  %v4694_v38 = vpack.c.bf16 %v4675_v56, %v4671_v59  ;;  %v15899_v56 = vld [vmem:[#allocation70_spill] sm:$0xff]  ;;  %v15910_v13 = vld [vmem:[#allocation68_spill] sm:$0xff]  ;;  %v15911_v1 = vld [vmem:[#allocation67_spill] sm:$0xff] }
 0x8a8   :  { %9493 = vmatmul.mubr.msk.bf16.vlgmr.msra.gmra.mrb[16].mxu0 %vm2231_vm11, %v4483_v34  ;;  %4555 = vmatpush1.bf16.msra.mxu1 %v4491_v50 }
 0x8a9   :  { %4707 = vmatpush1.bf16.msra.mxu0 %v4692_v17  ;;  %v4636_v63 = vpop.permute.xlu0 %4635  ;;  %4759 = vmatprep.subr.bf16.mxu1 %v4695_v58  ;;  %v4634_v42 = vpop.permute.xlu1 %4633  ;;  %v15898_v17 = vld [vmem:[#allocation69_spill] sm:$0xff] }
 0x8aa   :  { %v4664_v43 = vsel %vm783_vm6, %v4628_v21, %v4636_v63  ;;  %v4663_v40 = vsel %vm783_vm6, %v4626_v29, %v4634_v42  ;;  %4541 = vmatprep.mubr.bf16.mxu0 %v15805_v24  ;;  %v5008_v58 = vsel %vm1125_vm7, %v15899_v56, %v15898_v17 }
 0x8ab   :  { %v4682_v14 = vmul.f32 %v4664_v43, %v10965_v45  ;;  %v4678_v39 = vmul.f32 %v4663_v40, %v10965_v45  ;;  %v15901_v43 = vld [vmem:[#allocation61_spill] sm:$0xff] }
 0x8ac   :  { %9495 = vmatmul.mubr.msk.bf16.vlgmr.msra.gmra.mrb[16].mxu1 %vm2231_vm11, %v4483_v34  ;;  %v5007_v40 = vsel %vm1125_vm7, %v15901_v43, %v15900_v48 }
 0x8ad   :  { %4760 = vmatpush1.bf16.msra.mxu1 %v4694_v38  ;;  %v4652_v3 = vpop.permute.xlu0 %4651  ;;  %v4650_v20 = vpop.permute.xlu1 %4649  ;;  %v4697_v18 = vpack.c.bf16 %v4682_v14, %v4678_v39  ;;  %4594 = vmatprep.mubr.bf16.mxu1 %v15805_v24  ;;  %v15902_v38 = vld [vmem:[#allocation64_spill] sm:$0xff]  ;;  %v15903_v14 = vld [vmem:[#allocation65_spill] sm:$0xff] }
 0x8ae   :  { %v4668_v16 = vsel %vm783_vm6, %v4652_v3, %v4628_v21  ;;  %v4667_v10 = vsel %vm783_vm6, %v4650_v20, %v4626_v29  ;;  %v4835_v39 = vpack.c.bf16 %v15903_v14, %v15902_v38 }
 0x8af   :  { %v4681_v61 = vmul.f32 %v4668_v16, %v15892_v8  ;;  %v4677_v32 = vmul.f32 %v4667_v10, %v15892_v8  ;;  %4708 = vmatprep.subr.bf16.mxu0 %v4697_v18  ;;  %v4840_v16 = vpack.c.bf16 %v12473_v4, %v12471_v44  ;;  %v15906_v10 = vld [vmem:[#allocation60_spill] sm:$0xff]  ;;  %v4839_v4 = vpack.c.bf16 %v12459_v26, %v12457_v11  ;;  %v6135_v8 = vld [vmem:[#allocation13 + $0x28] sm:$0xff] }
 0x8b0   :  { %9494 = vmatmul.mubr.msk.bf16.gmra.mrb[20].mxu0 %vm2231_vm11, %v4484_v62  ;;  %v4841_v11 = vpack.c.bf16 %v12497_v5, %v12495_v27  ;;  %v5012_v26 = vsel %vm1125_vm7, %v15906_v10, %v15899_v56  ;;  %v5011_v27 = vsel %vm1125_vm7, %v15908_v52, %v15901_v43  ;;  %v15913_v5 = vld [vmem:[#allocation43_spill] sm:$0xff] }
 0x8b1   :  { %v4696_v49 = vpack.c.bf16 %v4681_v61, %v4677_v32  ;;  %v4644_v53 = vpop.permute.xlu0 %4643  ;;  %v4642_v57 = vpop.permute.xlu1 %4641  ;;  %4738 = vmatprep.mubr.bf16.mxu0 %v15805_v24  ;;  %v15907_v61 = vld [vmem:[#allocation76_spill] sm:$0xff]  ;;  %v5019_v14 = vmul.f32 %v5011_v27, %v15913_v5  ;;  %v15920_v27 = vld [vmem:[#allocation77_spill] sm:$0xff] }
 0x8b2   :  { %v4656_v30 = vsel %vm783_vm6, %v4644_v53, %v4652_v3  ;;  %v4660_v34 = vsel %vm783_vm6, %v4636_v63, %v4644_v53  ;;  %v4655_v35 = vsel %vm783_vm6, %v4642_v57, %v4650_v20  ;;  %v4659_v28 = vsel %vm783_vm6, %v4634_v42, %v4642_v57  ;;  %v15905_v20 = vld [vmem:[#allocation41_spill] sm:$0xff]  ;;  %v4688_v57 = vld [vmem:[#allocation11 + $0x70] sm:$0xff] }
 0x8b3   :  { %v4683_v50 = vmul.f32 %v4660_v34, %v15895_v55  ;;  %v4684_v21 = vmul.f32 %v4656_v30, %v15894_v6  ;;  %v4679_v29 = vmul.f32 %v4659_v28, %v15895_v55  ;;  %v4680_v54 = vmul.f32 %v4655_v35, %v15894_v6  ;;  %4709 = vmatpush1.bf16.msra.mxu0 %v4696_v49  ;;  %v15912_v34 = vld [vmem:[#allocation42_spill] sm:$0xff] }
 0x8b4   :  { %9496 = vmatmul.mubr.msk.bf16.gmra.mrb[20].mxu1 %vm2231_vm11, %v4484_v62  ;;  %4849 = vmatprep.subr.bf16.mxu0 %v4836_v0  ;;  %v15904_v62 = vld [vmem:[#allocation66_spill] sm:$0xff]  ;;  %v5024_v18 = vmul.f32 %v5008_v58, %v15905_v20  ;;  %v5016_v32 = vsel %vm1125_vm7, %v15907_v61, %v15906_v10  ;;  %v5020_v9 = vmul.f32 %v5007_v40, %v15905_v20 }
 0x8b5   :  { %v4698_v59 = vpack.c.bf16 %v4683_v50, %v4679_v29  ;;  %v13010_v63 = vpop.permute.xlu0 %5602  ;;  %v13012_v42 = vpop.permute.xlu1 %5600  ;;  %v4699_v36 = vpack.c.bf16 %v4684_v21, %v4680_v54  ;;  %4791 = vmatprep.mubr.bf16.mxu1 %v15805_v24  ;;  %v4838_v3 = vpack.c.bf16 %v15904_v62, %v12331_v2  ;;  %v4689_v2 = vld [vmem:[#allocation11 + $0x78] sm:$0xff]  ;;  %v15909_v0 = vld [vmem:[#allocation62_spill] sm:$0xff]  ;;  %v4837_v30 = vpack.c.bf16 %v15911_v1, %v15910_v13 }
 0x8b6   :  { %v5015_v44 = vsel %vm1125_vm7, %v15909_v0, %v15908_v52  ;;  %v5026_v35 = vmul.f32 %v5016_v32, %v15912_v34  ;;  %v5043_v28 = vpack.c.bf16 %v5024_v18, %v5020_v9  ;;  %v4842_v50 = vpack.c.bf16 %v12487_v37, %v12485_v19  ;;  %v15914_v18 = vld [vmem:[#allocation45_spill] sm:$0xff]  ;;  %v15915_v9 = vld [vmem:[#allocation78_spill] sm:$0xff] }
 0x8b7   :  { %4761 = vmatprep.subr.bf16.mxu1 %v4699_v36  ;;  %v4691_v21 = vpack.c.bf16 %v4689_v2, %v4688_v57  ;;  %v5022_v58 = vmul.f32 %v5015_v44, %v15912_v34  ;;  %v4830_v36 = vld [vmem:[#allocation11 + $0x88] sm:$0xff]  ;;  %v5023_v40 = vmul.f32 %v5012_v26, %v15913_v5  ;;  %v5004_v56 = vsel %vm1125_vm7, %v15898_v17, %v15907_v61  ;;  %v4831_v57 = vld [vmem:[#allocation11 + $0x90] sm:$0xff]  ;;  %v4832_v2 = vld [vmem:[#allocation11 + $0x98] sm:$0xff] }
 0x8b8   :  { %9497 = vmatmul.mubr.msk.bf16.vlgmr.msra.gmra.mrb[16].mxu0 %vm2231_vm11, %v4690_v47  ;;  %4762 = vmatpush1.bf16.msra.mxu1 %v4698_v59  ;;  %v4829_v59 = vld [vmem:[#allocation11 + $0x80] sm:$0xff]  ;;  %v5003_v43 = vsel %vm1125_vm7, %v15900_v48, %v15909_v0  ;;  %v15916_v48 = vld [vmem:[#allocation75_spill] sm:$0xff]  ;;  %v15918_v13 = vld [vmem:[#allocation74_spill] sm:$0xff] }
 0x8b9   :  { %4850 = vmatpush1.bf16.msra.mxu0 %v4835_v39  ;;  %v13031_v49 = vpop.permute.xlu0 %5610  ;;  %4902 = vmatprep.subr.bf16.mxu1 %v4838_v3  ;;  %v4984_v53 = vpop.permute.xlu1 %4983  ;;  %v5045_v19 = vpack.c.bf16 %v5026_v35, %v5022_v58  ;;  %v4833_v38 = vpack.c.bf16 %v4830_v36, %v4829_v59  ;;  %v5042_v3 = vpack.c.bf16 %v5023_v40, %v5019_v14  ;;  %v15921_v40 = vld [vmem:[#allocation84_spill] sm:$0xff] }
 0x8ba   :  { %4851 = vmatprep.subr.bf16.mxu0 %v4840_v16  ;;  %4748 = vmatprep.mubr.bf16.mxu0 %v15805_v24  ;;  %v5025_v16 = vmul.f32 %v5004_v56, %v15914_v18  ;;  %v5021_v10 = vmul.f32 %v5003_v43, %v15914_v18  ;;  %v5215_v52 = vsel %vm1316_vm8, %v15916_v48, %v15915_v9 }
 0x8bb   :  { %v5223_v56 = vsel %vm1316_vm8, %v15921_v40, %v15920_v27 }
 0x8bc   :  { %9499 = vmatmul.mubr.msk.bf16.vlgmr.msra.gmra.mrb[16].mxu1 %vm2231_vm11, %v4690_v47  ;;  %v5044_v44 = vpack.c.bf16 %v5025_v16, %v5021_v10 }
 0x8bd   :  { %4852 = vmatpush1.bf16.msra.mxu0 %v4839_v4  ;;  %4903 = vmatpush1.bf16.msra.mxu1 %v4837_v30  ;;  %v13047_v29 = vpop.permute.xlu0 %5594  ;;  %v4992_v54 = vpop.permute.xlu1 %4991  ;;  %v15917_v4 = vld [vmem:[#allocation73_spill] sm:$0xff] }
 0x8be   :  { %5056 = vmatprep.subr.bf16.mxu0 %v5043_v28  ;;  %4904 = vmatprep.subr.bf16.mxu1 %v4842_v50  ;;  %v5009_v17 = vsel %vm1125_vm7, %v4984_v53, %v4992_v54  ;;  %v5214_v1 = vsel %vm1316_vm8, %v15918_v13, %v15917_v4  ;;  %v4834_v50 = vpack.c.bf16 %v4832_v2, %v4831_v57 }
 0x8bf   :  { %4801 = vmatprep.mubr.bf16.mxu1 %v15805_v24  ;;  %v5028_v30 = vmul.f32 %v5009_v17, %v15905_v20  ;;  %v15923_v17 = vld [vmem:[#allocation79_spill] sm:$0xff] }
 0x8c0   :  { %9498 = vmatmul.mubr.msk.bf16.gmra.mrb[20].mxu0 %vm2231_vm11, %v4691_v21 }
 0x8c1   :  { %4905 = vmatpush1.bf16.msra.mxu1 %v4841_v11  ;;  %v13058_v37 = vpop.permute.xlu0 %5618  ;;  %v4976_v47 = vpop.permute.xlu1 %4975  ;;  %4881 = vmatprep.mubr.bf16.mxu0 %v15805_v24 }
 0x8c2   :  { %5109 = vmatprep.subr.bf16.mxu1 %v5045_v19  ;;  %v5013_v28 = vsel %vm1125_vm7, %v4976_v47, %v4984_v53  ;;  %v5219_v53 = vsel %vm1316_vm8, %v15920_v27, %v15916_v48 }
 0x8c4   :  { %9500 = vmatmul.mubr.msk.bf16.gmra.mrb[20].mxu1 %vm2231_vm11, %v4691_v21  ;;  %v15919_v21 = vld [vmem:[#allocation44_spill] sm:$0xff] }
 0x8c5   :  { %v4986_v39 = vpop.permute.xlu0 %4985  ;;  %v5000_v62 = vpop.permute.xlu1 %4999  ;;  %4934 = vmatprep.mubr.bf16.mxu1 %v15805_v24  ;;  %v5231_v58 = vmul.f32 %v5215_v52, %v15919_v21  ;;  %v5227_v59 = vmul.f32 %v5214_v1, %v15919_v21  ;;  %v15924_v52 = vld [vmem:[#allocation47_spill] sm:$0xff] }
 0x8c6   :  { %v5005_v43 = vsel %vm1125_vm7, %v4992_v54, %v5000_v62 }
 0x8c7   :  { %v5250_v54 = vpack.c.bf16 %v5231_v58, %v5227_v59  ;;  %v5211_v59 = vsel %vm1316_vm8, %v15915_v9, %v15921_v40  ;;  %v15926_v40 = vld [vmem:[#allocation49_spill] sm:$0xff] }
 0x8c8   :  { %9501 = vmatmul.mubr.msk.bf16.vlgmr.msra.gmra.mrb[16].mxu0 %vm2231_vm11, %v4833_v38 }
 0x8c9   :  { %5057 = vmatpush1.bf16.msra.mxu0 %v5042_v3  ;;  %v4994_v61 = vpop.permute.xlu0 %4993  ;;  %v13082_v32 = vpop.permute.xlu1 %5190  ;;  %4891 = vmatprep.mubr.bf16.mxu0 %v15805_v24  ;;  %v15922_v3 = vld [vmem:[#allocation80_spill] sm:$0xff] }
 0x8ca   :  { %v5010_v0 = vsel %vm1125_vm7, %v4986_v39, %v4994_v61  ;;  %v5218_v16 = vsel %vm1316_vm8, %v15922_v3, %v15918_v13  ;;  %v5222_v10 = vsel %vm1316_vm8, %v15923_v17, %v15922_v3 }
 0x8cb   :  { %v5032_v35 = vmul.f32 %v5010_v0, %v15905_v20  ;;  %v5230_v0 = vmul.f32 %v5219_v53, %v15924_v52 }
 0x8cc   :  { %9503 = vmatmul.mubr.msk.bf16.vlgmr.msra.gmra.mrb[16].mxu1 %vm2231_vm11, %v4833_v38  ;;  %v5027_v38 = vmul.f32 %v5013_v28, %v15913_v5 }
 0x8cd   :  { %5110 = vmatpush1.bf16.msra.mxu1 %v5044_v44  ;;  %v4978_v11 = vpop.permute.xlu0 %4977  ;;  %v13101_v26 = vpop.permute.xlu1 %5198  ;;  %v5047_v19 = vpack.c.bf16 %v5032_v35, %v5028_v30  ;;  %4944 = vmatprep.mubr.bf16.mxu1 %v15805_v24  ;;  %v15925_v44 = vld [vmem:[#allocation46_spill] sm:$0xff]  ;;  %v5029_v35 = vmul.f32 %v5005_v43, %v15914_v18 }
 0x8ce   :  { %v5014_v36 = vsel %vm1125_vm7, %v4978_v11, %v4986_v39  ;;  %v5017_v39 = vsel %vm1125_vm7, %v5000_v62, %v4976_v47  ;;  %v5036_v47 = vld [vmem:[#allocation11 + $0xa0] sm:$0xff]  ;;  %v5037_v62 = vld [vmem:[#allocation11 + $0xa8] sm:$0xff]  ;;  %v5233_v1 = vmul.f32 %v5223_v56, %v15925_v44 }
 0x8cf   :  { %v5031_v14 = vmul.f32 %v5014_v36, %v15913_v5  ;;  %5058 = vmatprep.subr.bf16.mxu0 %v5047_v19  ;;  %v5030_v28 = vmul.f32 %v5017_v39, %v15912_v34  ;;  %v5229_v36 = vmul.f32 %v5222_v10, %v15925_v44  ;;  %v5216_v39 = vsel %vm1316_vm8, %v13082_v32, %v13101_v26 }
 0x8d0   :  { %9502 = vmatmul.mubr.msk.bf16.gmra.mrb[20].mxu0 %vm2231_vm11, %v4834_v50 }
 0x8d1   :  { %v5046_v57 = vpack.c.bf16 %v5031_v14, %v5027_v38  ;;  %v5002_v2 = vpop.permute.xlu0 %5001  ;;  %v13130_v48 = vpop.permute.xlu1 %5182  ;;  %5088 = vmatprep.mubr.bf16.mxu0 %v15805_v24  ;;  %v5210_v14 = vsel %vm1316_vm8, %v15917_v4, %v15923_v17  ;;  %v5252_v43 = vpack.c.bf16 %v5233_v1, %v5229_v36  ;;  %v5038_v4 = vld [vmem:[#allocation11 + $0xb0] sm:$0xff]  ;;  %v5039_v17 = vld [vmem:[#allocation11 + $0xb8] sm:$0xff]  ;;  %v15930_v1 = vld [vmem:[#allocation82_spill] sm:$0xff] }
 0x8d2   :  { %v5006_v13 = vsel %vm1125_vm7, %v4994_v61, %v5002_v2  ;;  %v5018_v30 = vsel %vm1125_vm7, %v5002_v2, %v4978_v11  ;;  %v5040_v61 = vpack.c.bf16 %v5037_v62, %v5036_v47  ;;  %v5226_v11 = vmul.f32 %v5218_v16, %v15924_v52  ;;  %v15928_v2 = vld [vmem:[#allocation83_spill] sm:$0xff] }
 0x8d3   :  { %v5033_v58 = vmul.f32 %v5006_v13, %v15914_v18  ;;  %v5034_v19 = vmul.f32 %v5018_v30, %v15912_v34  ;;  %5059 = vmatpush1.bf16.msra.mxu0 %v5046_v57  ;;  %v5228_v3 = vmul.f32 %v5210_v14, %v15926_v40  ;;  %v15927_v57 = vld [vmem:[#allocation86_spill] sm:$0xff]  ;;  %v5235_v30 = vmul.f32 %v5216_v39, %v15919_v21 }
 0x8d4   :  { %9504 = vmatmul.mubr.msk.bf16.gmra.mrb[20].mxu1 %vm2231_vm11, %v4834_v50  ;;  %5263 = vmatprep.subr.bf16.mxu0 %v5250_v54  ;;  %v5249_v9 = vpack.c.bf16 %v5230_v0, %v5226_v11  ;;  %v5232_v50 = vmul.f32 %v5211_v59, %v15926_v40  ;;  %v5422_v54 = vsel %vm1507_vm9, %v15928_v2, %v15927_v57  ;;  %v15929_v0 = vld [vmem:[#allocation81_spill] sm:$0xff] }
 0x8d5   :  { %v5048_v27 = vpack.c.bf16 %v5033_v58, %v5029_v35  ;;  %v5193_v53 = vpop.permute.xlu0 %5192  ;;  %v5207_v56 = vpop.permute.xlu1 %5206  ;;  %v5049_v38 = vpack.c.bf16 %v5034_v19, %v5030_v28  ;;  %5141 = vmatprep.mubr.bf16.mxu1 %v15805_v24  ;;  %v5421_v13 = vsel %vm1507_vm9, %v15930_v1, %v15929_v0  ;;  %v5220_v28 = vsel %vm1316_vm8, %v13130_v48, %v13082_v32  ;;  %v15931_v19 = vld [vmem:[#allocation48_spill] sm:$0xff] }
 0x8d6   :  { %v5251_v62 = vpack.c.bf16 %v5232_v50, %v5228_v3  ;;  %v5041_v58 = vpack.c.bf16 %v5039_v17, %v5038_v4  ;;  %v5438_v59 = vmul.f32 %v5422_v54, %v15931_v19  ;;  %v5212_v3 = vsel %vm1316_vm8, %v13101_v26, %v5207_v56  ;;  %v15934_v4 = vld [vmem:[#allocation88_spill] sm:$0xff] }
 0x8d7   :  { %5111 = vmatprep.subr.bf16.mxu1 %v5049_v38  ;;  %v5434_v38 = vmul.f32 %v5421_v13, %v15931_v19  ;;  %v5425_v17 = vsel %vm1507_vm9, %v15934_v4, %v15930_v1 }
 0x8d8   :  { %9505 = vmatmul.mubr.msk.bf16.vlgmr.msra.gmra.mrb[16].mxu0 %vm2231_vm11, %v5040_v61  ;;  %5112 = vmatpush1.bf16.msra.mxu1 %v5048_v27 }
 0x8d9   :  { %5264 = vmatpush1.bf16.msra.mxu0 %v5249_v9  ;;  %v5201_v16 = vpop.permute.xlu0 %5200  ;;  %5316 = vmatprep.subr.bf16.mxu1 %v5252_v43  ;;  %v13162_v10 = vpop.permute.xlu1 %5397  ;;  %v15932_v9 = vld [vmem:[#allocation85_spill] sm:$0xff]  ;;  %v5234_v43 = vmul.f32 %v5220_v28, %v15924_v52  ;;  %v5457_v26 = vpack.c.bf16 %v5438_v59, %v5434_v38  ;;  %v15937_v28 = vld [vmem:[#allocation50_spill] sm:$0xff] }
 0x8da   :  { %v5217_v47 = vsel %vm1316_vm8, %v5193_v53, %v5201_v16  ;;  %5098 = vmatprep.mubr.bf16.mxu0 %v15805_v24  ;;  %v5426_v32 = vsel %vm1507_vm9, %v15932_v9, %v15928_v2  ;;  %v15935_v2 = vld [vmem:[#allocation87_spill] sm:$0xff] }
 0x8db   :  { %v5239_v35 = vmul.f32 %v5217_v47, %v15919_v21  ;;  %v5429_v54 = vsel %vm1507_vm9, %v15935_v2, %v15934_v4  ;;  %v5417_v4 = vsel %vm1507_vm9, %v15929_v0, %v15935_v2  ;;  %v5245_v0 = vld [vmem:[#allocation11 + $0xd0] sm:$0xff]  ;;  %v5246_v2 = vld [vmem:[#allocation11 + $0xd8] sm:$0xff] }
 0x8dc   :  { %9507 = vmatmul.mubr.msk.bf16.vlgmr.msra.gmra.mrb[16].mxu1 %vm2231_vm11, %v5040_v61  ;;  %v15933_v61 = vld [vmem:[#allocation89_spill] sm:$0xff] }
 0x8dd   :  { %5317 = vmatpush1.bf16.msra.mxu1 %v5251_v62  ;;  %v5185_v11 = vpop.permute.xlu0 %5184  ;;  %v13183_v36 = vpop.permute.xlu1 %5405  ;;  %v5254_v27 = vpack.c.bf16 %v5239_v35, %v5235_v30  ;;  %5151 = vmatprep.mubr.bf16.mxu1 %v15805_v24  ;;  %v5430_v50 = vsel %vm1507_vm9, %v15933_v61, %v15932_v9  ;;  %v5243_v30 = vld [vmem:[#allocation11 + $0xc0] sm:$0xff]  ;;  %v5236_v9 = vmul.f32 %v5212_v3, %v15926_v40 }
 0x8de   :  { %v5221_v14 = vsel %vm1316_vm8, %v5185_v11, %v5193_v53  ;;  %v5224_v53 = vsel %vm1316_vm8, %v5207_v56, %v13130_v48  ;;  %v5244_v48 = vld [vmem:[#allocation11 + $0xc8] sm:$0xff]  ;;  %v15936_v56 = vld [vmem:[#allocation51_spill] sm:$0xff] }
 0x8df   :  { %v5238_v39 = vmul.f32 %v5221_v14, %v15924_v52  ;;  %5265 = vmatprep.subr.bf16.mxu0 %v5254_v27  ;;  %v5437_v35 = vmul.f32 %v5426_v32, %v15936_v56  ;;  %v5440_v27 = vmul.f32 %v5430_v50, %v15937_v28  ;;  %v5418_v32 = vsel %vm1507_vm9, %v15927_v57, %v15933_v61  ;;  %v15938_v61 = vld [vmem:[#allocation53_spill] sm:$0xff] }
 0x8e0   :  { %9506 = vmatmul.mubr.msk.bf16.gmra.mrb[20].mxu0 %vm2231_vm11, %v5041_v58  ;;  %v5436_v50 = vmul.f32 %v5429_v54, %v15937_v28  ;;  %v5435_v54 = vmul.f32 %v5417_v4, %v15938_v61 }
 0x8e1   :  { %v5253_v47 = vpack.c.bf16 %v5238_v39, %v5234_v43  ;;  %v5209_v62 = vpop.permute.xlu0 %5208  ;;  %v5390_v13 = vpop.permute.xlu1 %5389  ;;  %5295 = vmatprep.mubr.bf16.mxu0 %v15805_v24  ;;  %v5237_v43 = vmul.f32 %v5224_v53, %v15925_v44 }
 0x8e2   :  { %v5213_v1 = vsel %vm1316_vm8, %v5201_v16, %v5209_v62  ;;  %v5225_v14 = vsel %vm1316_vm8, %v5209_v62, %v5185_v11  ;;  %v5247_v16 = vpack.c.bf16 %v5244_v48, %v5243_v30  ;;  %v5433_v11 = vmul.f32 %v5425_v17, %v15936_v56 }
 0x8e3   :  { %v5240_v59 = vmul.f32 %v5213_v1, %v15926_v40  ;;  %v5241_v38 = vmul.f32 %v5225_v14, %v15925_v44  ;;  %5266 = vmatpush1.bf16.msra.mxu0 %v5253_v47  ;;  %v5459_v62 = vpack.c.bf16 %v5440_v27, %v5436_v50  ;;  %v5423_v17 = vsel %vm1507_vm9, %v13162_v10, %v13183_v36  ;;  %v15939_v50 = vld [vmem:[#allocation52_spill] sm:$0xff] }
 0x8e4   :  { %9508 = vmatmul.mubr.msk.bf16.gmra.mrb[20].mxu1 %vm2231_vm11, %v5041_v58  ;;  %5470 = vmatprep.subr.bf16.mxu0 %v5457_v26  ;;  %v5456_v57 = vpack.c.bf16 %v5437_v35, %v5433_v11  ;;  %v5439_v58 = vmul.f32 %v5418_v32, %v15938_v61  ;;  %v5442_v27 = vmul.f32 %v5423_v17, %v15931_v19 }
 0x8e5   :  { %v5255_v39 = vpack.c.bf16 %v5240_v59, %v5236_v9  ;;  %v5400_v3 = vpop.permute.xlu0 %5399  ;;  %v5256_v53 = vpack.c.bf16 %v5241_v38, %v5237_v43  ;;  %5348 = vmatprep.mubr.bf16.mxu1 %v15805_v24  ;;  %v5414_v47 = vpop.permute.xlu1 %5413  ;;  %v5427_v9 = vsel %vm1507_vm9, %v5390_v13, %v13162_v10  ;;  %v5248_v43 = vpack.c.bf16 %v5246_v2, %v5245_v0 }
 0x8e6   :  { %v5458_v35 = vpack.c.bf16 %v5439_v58, %v5435_v54  ;;  %v5629_v59 = vsel %vm1698_vm10, %v13010_v63, %v13031_v49  ;;  %v5419_v11 = vsel %vm1507_vm9, %v13183_v36, %v5414_v47  ;;  %v5431_v4 = vsel %vm1507_vm9, %v5414_v47, %v5390_v13  ;;  %v5450_v54 = vld [vmem:[#allocation11 + $0xe0] sm:$0xff] }
 0x8e7   :  { %5318 = vmatprep.subr.bf16.mxu1 %v5256_v53  ;;  %v5441_v53 = vmul.f32 %v5427_v9, %v15936_v56  ;;  %v5645_v58 = vmul.f32 %v5629_v59, %v15939_v50  ;;  %v5637_v13 = vsel %vm1698_vm10, %v13058_v37, %v13047_v29  ;;  %v5443_v47 = vmul.f32 %v5419_v11, %v15938_v61 }
 0x8e8   :  { %9509 = vmatmul.mubr.msk.bf16.vlgmr.msra.gmra.mrb[16].mxu0 %vm2231_vm11, %v5247_v16  ;;  %5319 = vmatpush1.bf16.msra.mxu1 %v5255_v39  ;;  %v5444_v0 = vmul.f32 %v5431_v4, %v15937_v28 }
 0x8e9   :  { %5471 = vmatpush1.bf16.msra.mxu0 %v5456_v57  ;;  %v5408_v26 = vpop.permute.xlu0 %5407  ;;  %5523 = vmatprep.subr.bf16.mxu1 %v5459_v62 }
 0x8ea   :  { %v5424_v30 = vsel %vm1507_vm9, %v5400_v3, %v5408_v26  ;;  %v5609_v48 = vpop.permute.xlu1 %5608  ;;  %5305 = vmatprep.mubr.bf16.mxu0 %v15805_v24 }
 0x8eb   :  { %v5446_v1 = vmul.f32 %v5424_v30, %v15931_v19  ;;  %v5628_v14 = vsel %vm1698_vm10, %v13012_v42, %v5609_v48 }
 0x8ec   :  { %9511 = vmatmul.mubr.msk.bf16.vlgmr.msra.gmra.mrb[16].mxu1 %vm2231_vm11, %v5247_v16  ;;  %v5641_v39 = vmul.f32 %v5628_v14, %v15939_v50 }
 0x8ed   :  { %5524 = vmatpush1.bf16.msra.mxu1 %v5458_v35  ;;  %v5392_v38 = vpop.permute.xlu0 %5391  ;;  %v5461_v32 = vpack.c.bf16 %v5446_v1, %v5442_v27  ;;  %5358 = vmatprep.mubr.bf16.mxu1 %v15805_v24  ;;  %v15940_v27 = vld [vmem:[#allocation55_spill] sm:$0xff] }
 0x8ee   :  { %v5428_v10 = vsel %vm1507_vm9, %v5392_v38, %v5400_v3  ;;  %v5593_v16 = vpop.permute.xlu1 %5592  ;;  %v5633_v3 = vsel %vm1698_vm10, %v13047_v29, %v13010_v63  ;;  %v5664_v35 = vpack.c.bf16 %v5645_v58, %v5641_v39  ;;  %v15942_v58 = vld [vmem:[#allocation56_spill] sm:$0xff] }
 0x8ef   :  { %v5445_v57 = vmul.f32 %v5428_v10, %v15936_v56  ;;  %5472 = vmatprep.subr.bf16.mxu0 %v5461_v32  ;;  %v5632_v36 = vsel %vm1698_vm10, %v5593_v16, %v13012_v42  ;;  %v5451_v42 = vld [vmem:[#allocation11 + $0xe8] sm:$0xff]  ;;  %v5644_v11 = vmul.f32 %v5633_v3, %v15940_v27 }
 0x8f0   :  { %9510 = vmatmul.mubr.msk.bf16.gmra.mrb[20].mxu0 %vm2231_vm11, %v5248_v43  ;;  %v5640_v29 = vmul.f32 %v5632_v36, %v15940_v27  ;;  %v15941_v32 = vld [vmem:[#allocation54_spill] sm:$0xff] }
 0x8f1   :  { %v5460_v62 = vpack.c.bf16 %v5445_v57, %v5441_v53  ;;  %v5416_v17 = vpop.permute.xlu0 %5415  ;;  %5502 = vmatprep.mubr.bf16.mxu0 %v15805_v24  ;;  %v5647_v39 = vmul.f32 %v5637_v13, %v15941_v32 }
 0x8f2   :  { %v5420_v2 = vsel %vm1507_vm9, %v5408_v26, %v5416_v17  ;;  %v5432_v63 = vsel %vm1507_vm9, %v5416_v17, %v5392_v38  ;;  %v5617_v30 = vpop.permute.xlu1 %5616  ;;  %v5454_v38 = vpack.c.bf16 %v5451_v42, %v5450_v54  ;;  %v5663_v57 = vpack.c.bf16 %v5644_v11, %v5640_v29 }
 0x8f3   :  { %v5447_v1 = vmul.f32 %v5420_v2, %v15938_v61  ;;  %v5448_v14 = vmul.f32 %v5432_v63, %v15937_v28  ;;  %v5636_v9 = vsel %vm1698_vm10, %v5617_v30, %v5593_v16  ;;  %5473 = vmatpush1.bf16.msra.mxu0 %v5460_v62  ;;  %v5624_v59 = vsel %vm1698_vm10, %v5609_v48, %v5617_v30  ;;  %v5453_v62 = vld [vmem:[#allocation11 + $0xf8] sm:$0xff] }
 0x8f4   :  { %v5643_v26 = vmul.f32 %v5636_v9, %v15941_v32  ;;  %9512 = vmatmul.mubr.msk.bf16.gmra.mrb[20].mxu1 %vm2231_vm11, %v5248_v43  ;;  %5677 = vmatprep.subr.bf16.mxu0 %v5664_v35  ;;  %v5625_v48 = vsel %vm1698_vm10, %v13031_v49, %v13058_v37  ;;  %v5642_v43 = vmul.f32 %v5624_v59, %v15942_v58 }
 0x8f5   :  { %v5462_v10 = vpack.c.bf16 %v5447_v1, %v5443_v47  ;;  %v5607_v53 = vpop.permute.xlu0 %5606  ;;  %v5463_v4 = vpack.c.bf16 %v5448_v14, %v5444_v0  ;;  %5555 = vmatprep.mubr.bf16.mxu1 %v15805_v24  ;;  %v5646_v3 = vmul.f32 %v5625_v48, %v15942_v58  ;;  %v5452_v47 = vld [vmem:[#allocation11 + $0xf0] sm:$0xff] }
 0x8f6   :  { %v5605_v16 = vpop.permute.xlu1 %5604  ;;  %v5666_v36 = vpack.c.bf16 %v5647_v39, %v5643_v26  ;;  %v5455_v2 = vpack.c.bf16 %v5453_v62, %v5452_v47  ;;  %v5657_v26 = vld [vmem:[#allocation11 + $0x100] sm:$0xff]  ;;  %v5659_v62 = vld [vmem:[#allocation11 + $0x110] sm:$0xff] }
 0x8f7   :  { %5525 = vmatprep.subr.bf16.mxu1 %v5463_v4  ;;  %v5665_v37 = vpack.c.bf16 %v5646_v3, %v5642_v43 }
 0x8f8   :  { %9513 = vmatmul.mubr.msk.bf16.vlgmr.msra.gmra.mrb[16].mxu0 %vm2231_vm11, %v5454_v38  ;;  %5526 = vmatpush1.bf16.msra.mxu1 %v5462_v10 }
 0x8f9   :  { %5678 = vmatpush1.bf16.msra.mxu0 %v5663_v57  ;;  %v5615_v13 = vpop.permute.xlu0 %5614  ;;  %5730 = vmatprep.subr.bf16.mxu1 %v5666_v36 }
 0x8fa   :  { %v5631_v17 = vsel %vm1698_vm10, %v5607_v53, %v5615_v13  ;;  %v5613_v49 = vpop.permute.xlu1 %5612  ;;  %5512 = vmatprep.mubr.bf16.mxu0 %v15805_v24 }
 0x8fb   :  { %v5653_v54 = vmul.f32 %v5631_v17, %v15939_v50  ;;  %v5630_v42 = vsel %vm1698_vm10, %v5605_v16, %v5613_v49  ;;  %v5660_v17 = vld [vmem:[#allocation11 + $0x118] sm:$0xff] }
 0x8fc   :  { %v5649_v0 = vmul.f32 %v5630_v42, %v15939_v50  ;;  %9515 = vmatmul.mubr.msk.bf16.vlgmr.msra.gmra.mrb[16].mxu1 %vm2231_vm11, %v5454_v38  ;;  %v5658_v38 = vld [vmem:[#allocation11 + $0x108] sm:$0xff] }
 0x8fd   :  { %5731 = vmatpush1.bf16.msra.mxu1 %v5665_v37  ;;  %v5599_v63 = vpop.permute.xlu0 %5598  ;;  %5565 = vmatprep.mubr.bf16.mxu1 %v15805_v24  ;;  %v5661_v3 = vpack.c.bf16 %v5658_v38, %v5657_v26 }
 0x8fe   :  { %v5635_v30 = vsel %vm1698_vm10, %v5599_v63, %v5607_v53  ;;  %v5597_v35 = vpop.permute.xlu1 %5596  ;;  %v5668_v29 = vpack.c.bf16 %v5653_v54, %v5649_v0 }
 0x8ff   :  { %v5652_v1 = vmul.f32 %v5635_v30, %v15940_v27  ;;  %v5634_v14 = vsel %vm1698_vm10, %v5597_v35, %v5605_v16 }
 0x900   :  { %v5648_v9 = vmul.f32 %v5634_v14, %v15940_v27  ;;  %9514 = vmatmul.mubr.msk.bf16.gmra.mrb[20].mxu0 %vm2231_vm11, %v5455_v2  ;;  %5679 = vmatprep.subr.bf16.mxu0 %v5668_v29 }
 0x901   :  { %v5623_v59 = vpop.permute.xlu0 %5622  ;;  %5709 = vmatprep.mubr.bf16.mxu0 %v15805_v24 }
 0x902   :  { %v5667_v11 = vpack.c.bf16 %v5652_v1, %v5648_v9  ;;  %v5627_v39 = vsel %vm1698_vm10, %v5615_v13, %v5623_v59  ;;  %v5639_v10 = vsel %vm1698_vm10, %v5623_v59, %v5599_v63  ;;  %v5621_v53 = vpop.permute.xlu1 %5620 }
 0x903   :  { %v5654_v4 = vmul.f32 %v5627_v39, %v15942_v58  ;;  %v5655_v48 = vmul.f32 %v5639_v10, %v15941_v32  ;;  %v5626_v16 = vsel %vm1698_vm10, %v5613_v49, %v5621_v53  ;;  %v5638_v57 = vsel %vm1698_vm10, %v5621_v53, %v5597_v35 }
 0x904   :  { %v5650_v43 = vmul.f32 %v5626_v16, %v15942_v58  ;;  %v5651_v36 = vmul.f32 %v5638_v57, %v15941_v32  ;;  %9516 = vmatmul.mubr.msk.bf16.gmra.mrb[20].mxu1 %vm2231_vm11, %v5455_v2  ;;  %5680 = vmatpush1.bf16.msra.mxu0 %v5667_v11  ;;  %v5662_v49 = vpack.c.bf16 %v5660_v17, %v5659_v62 }
 0x905   :  { %5762 = vmatprep.mubr.bf16.mxu1 %v15805_v24 }
 0x906   :  { %v5669_v13 = vpack.c.bf16 %v5654_v4, %v5650_v43  ;;  %v5670_v47 = vpack.c.bf16 %v5655_v48, %v5651_v36 }
 0x908   :  { %9517 = vmatmul.mubr.msk.bf16.vlgmr.msra.gmra.mrb[16].mxu0 %vm2231_vm11, %v5661_v3  ;;  %5732 = vmatprep.subr.bf16.mxu1 %v5670_v47 }
 0x909   :  { %5733 = vmatpush1.bf16.msra.mxu1 %v5669_v13  ;;  %5719 = vmatprep.mubr.bf16.mxu0 %v15805_v24 }
 0x90c   :  { %9519 = vmatmul.mubr.msk.bf16.vlgmr.msra.gmra.mrb[16].mxu1 %vm2231_vm11, %v5661_v3 }
 0x90d   :  { %5772 = vmatprep.mubr.bf16.mxu1 %v15805_v24 }
 0x910   :  { %9518 = vmatmul.mubr.msk.bf16.gmra.mrb[20].mxu0 %vm2231_vm11, %v5662_v49 }
 0x911   :  { %6186 = vmatprep.mubr.bf16.mxu0 %v15805_v24 }
 0x912   :  { %v5811_v2 = vpop.permute.xlu0 %5810 }
 0x913   :  { %v5806_v37 = vpop.permute.xlu1 %5805 }
 0x914   :  { %9520 = vmatmul.mubr.msk.bf16.gmra.mrb[20].mxu1 %vm2231_vm11, %v5662_v49 }
 0x915   :  { %6239 = vmatprep.mubr.bf16.mxu1 %v15805_v24 }
 0x916   :  { %v5821_v47 = vpop.permute.xlu0 %5820 }
 0x917   :  { %v5816_v48 = vpop.permute.xlu1 %5815 }
 0x9db   :  { %v5711_v54 = vpop.f32.mrb[16].mxu0 }
 0x9dc   :  { %v5823_v42 = vadd.f32 %v5806_v37, %v5711_v54  ;;  %v5713_v0 = vpop.f32.mrb[17].mxu0 }
 0x9dd   :  { %v5824_v63 = vadd.f32 %v5806_v37, %v5713_v0  ;;  %v5715_v30 = vpop.f32.mrb[18].mxu0 }
 0x9de   :  { %v5827_v35 = vadd.f32 %v5811_v2, %v5715_v30  ;;  %v5717_v29 = vpop.f32.mrb[19].mxu0 }
 0x9df   :  { %v5828_v1 = vadd.f32 %v5811_v2, %v5717_v29  ;;  %v5764_v14 = vpop.f32.mrb[16].mxu1  ;;  %v5839_v9 = vadd.f32 %v5824_v63, %v5823_v42 }
 0x9e0   :  { %v5825_v59 = vadd.f32 %v5806_v37, %v5764_v14  ;;  %v5766_v26 = vpop.f32.mrb[17].mxu1 }
 0x9e1   :  { %v5826_v38 = vadd.f32 %v5806_v37, %v5766_v26  ;;  %v5768_v11 = vpop.f32.mrb[18].mxu1  ;;  %v5844_v39 = vadd.f32 %v5828_v1, %v5827_v35 }
 0x9e2   :  { %v5840_v10 = vadd.f32 %v5839_v9, %v5825_v59  ;;  %v5829_v53 = vadd.f32 %v5811_v2, %v5768_v11  ;;  %v5770_v4 = vpop.f32.mrb[19].mxu1 }
 0x9e3   :  { %v5721_v16 = vpop.f32.mrb[20].mxu0  ;;  %v5830_v57 = vadd.f32 %v5811_v2, %v5770_v4 }
 0x9e4   :  { %v5841_v43 = vadd.f32 %v5840_v10, %v5826_v38  ;;  %v5845_v36 = vadd.f32 %v5844_v39, %v5829_v53  ;;  %v5831_v3 = vadd.f32 %v5816_v48, %v5721_v16  ;;  %v5723_v13 = vpop.f32.mrb[21].mxu0 }
 0x9e5   :  { %v5832_v62 = vadd.f32 %v5816_v48, %v5723_v13  ;;  %v5725_v17 = vpop.f32.mrb[22].mxu0 }
 0x9e6   :  { %v5846_v49 = vadd.f32 %v5845_v36, %v5830_v57  ;;  %v5835_v54 = vadd.f32 %v5821_v47, %v5725_v17  ;;  %v5727_v0 = vpop.f32.mrb[23].mxu0  ;;  %5842 = vadd.xlane.f32.xlu1 %v5841_v43 }
 0x9e7   :  { %v5836_v37 = vadd.f32 %v5821_v47, %v5727_v0  ;;  %v5774_v30 = vpop.f32.mrb[20].mxu1  ;;  %v5849_v29 = vadd.f32 %v5832_v62, %v5831_v3 }
 0x9e8   :  { %v5833_v14 = vadd.f32 %v5816_v48, %v5774_v30  ;;  %5847 = vadd.xlane.f32.xlu0 %v5846_v49  ;;  %v5776_v9 = vpop.f32.mrb[21].mxu1 }
 0x9e9   :  { %v5834_v26 = vadd.f32 %v5816_v48, %v5776_v9  ;;  %v5778_v11 = vpop.f32.mrb[22].mxu1  ;;  %v5854_v2 = vadd.f32 %v5836_v37, %v5835_v54 }
 0x9ea   :  { %v5850_v10 = vadd.f32 %v5849_v29, %v5833_v14  ;;  %v5837_v39 = vadd.f32 %v5821_v47, %v5778_v11  ;;  %v5780_v4 = vpop.f32.mrb[23].mxu1 }
 0x9eb   :  { %v5838_v16 = vadd.f32 %v5821_v47, %v5780_v4 }
 0x9ec   :  { %v5851_v58 = vadd.f32 %v5850_v10, %v5834_v26  ;;  %v5855_v13 = vadd.f32 %v5854_v2, %v5837_v39 }
 0x9ee   :  { %v5856_v32 = vadd.f32 %v5855_v13, %v5838_v16  ;;  %5852 = vadd.xlane.f32.xlu0 %v5851_v58 }
 0x9f0   :  { %5857 = vadd.xlane.f32.xlu1 %v5856_v32 }
 0xa73   :  { %v5843_v36 = vpop.xlane.xlu1 %5842 }
 0xa74   :  { %v5859_v43 = vmul.f32 0.001953125, %v5843_v36 }
 0xa75   :  { %v5848_v17 = vpop.xlane.xlu0 %5847 }
 0xa76   :  { %v5863_v0 = vsub.f32 %v5823_v42, %v5859_v43  ;;  %v5864_v27 = vsub.f32 %v5824_v63, %v5859_v43  ;;  %v5860_v30 = vmul.f32 0.001953125, %v5848_v17  ;;  %v13349_v49 = vsub.f32 %v5825_v59, %v5859_v43 }
 0xa77   :  { %v5866_v47 = vsub.f32 %v5826_v38, %v5859_v43 }
 0xa78   :  { %v13351_v48 = vsub.f32 %v5827_v35, %v5860_v30  ;;  %v13353_v9 = vsub.f32 %v5828_v1, %v5860_v30  ;;  %v5879_v29 = vmul.f32 %v5863_v0, %v5863_v0  ;;  %v13355_v11 = vsub.f32 %v5829_v53, %v5860_v30 }
 0xa79   :  { %v5880_v2 = vmul.f32 %v5864_v27, %v5864_v27  ;;  %v5881_v63 = vmul.f32 %v13349_v49, %v13349_v49  ;;  %v5870_v35 = vsub.f32 %v5830_v57, %v5860_v30  ;;  %v5882_v13 = vmul.f32 %v5866_v47, %v5866_v47 }
 0xa7a   :  { %v5883_v32 = vmul.f32 %v13351_v48, %v13351_v48  ;;  %v5884_v58 = vmul.f32 %v13353_v9, %v13353_v9  ;;  %v5885_v38 = vmul.f32 %v13355_v11, %v13355_v11 }
 0xa7b   :  { %v5853_v42 = vpop.xlane.xlu0 %5852  ;;  %v5895_v59 = vadd.f32 %v5880_v2, %v5879_v29  ;;  %v5886_v28 = vmul.f32 %v5870_v35, %v5870_v35 }
 0xa7c   :  { %v5861_v10 = vmul.f32 0.001953125, %v5853_v42  ;;  %v5900_v1 = vadd.f32 %v5884_v58, %v5883_v32 }
 0xa7d   :  { %v5858_v4 = vpop.xlane.xlu1 %5857  ;;  %v5896_v53 = vadd.f32 %v5895_v59, %v5881_v63 }
 0xa7e   :  { %v13365_v36 = vsub.f32 %v5831_v3, %v5861_v10  ;;  %v13367_v43 = vsub.f32 %v5832_v62, %v5861_v10  ;;  %v5862_v17 = vmul.f32 0.001953125, %v5858_v4  ;;  %v13369_v50 = vsub.f32 %v5833_v14, %v5861_v10 }
 0xa7f   :  { %v5897_v61 = vadd.f32 %v5896_v53, %v5882_v13  ;;  %v5901_v56 = vadd.f32 %v5900_v1, %v5885_v38  ;;  %v13379_v32 = vsub.f32 %v5834_v26, %v5861_v10 }
 0xa80   :  { %v13371_v29 = vsub.f32 %v5835_v54, %v5862_v17  ;;  %v13373_v57 = vsub.f32 %v5836_v37, %v5862_v17  ;;  %v13375_v30 = vsub.f32 %v5837_v39, %v5862_v17  ;;  %v5887_v2 = vmul.f32 %v13365_v36, %v13365_v36 }
 0xa81   :  { %5898 = vadd.xlane.f32.xlu0 %v5897_v61  ;;  %v5902_v3 = vadd.f32 %v5901_v56, %v5886_v28  ;;  %v5888_v62 = vmul.f32 %v13367_v43, %v13367_v43  ;;  %v13383_v14 = vsub.f32 %v5838_v16, %v5862_v17  ;;  %v5889_v39 = vmul.f32 %v13369_v50, %v13369_v50 }
 0xa82   :  { %v5891_v54 = vmul.f32 %v13371_v29, %v13371_v29  ;;  %v5892_v37 = vmul.f32 %v13373_v57, %v13373_v57  ;;  %v5893_v56 = vmul.f32 %v13375_v30, %v13375_v30  ;;  %v5890_v61 = vmul.f32 %v13379_v32, %v13379_v32 }
 0xa83   :  { %5903 = vadd.xlane.f32.xlu1 %v5902_v3  ;;  %v5905_v58 = vadd.f32 %v5888_v62, %v5887_v2  ;;  %v5894_v16 = vmul.f32 %v13383_v14, %v13383_v14 }
 0xa84   :  { %v5910_v28 = vadd.f32 %v5892_v37, %v5891_v54 }
 0xa85   :  { %v5906_v26 = vadd.f32 %v5905_v58, %v5889_v39 }
 0xa86   :  { %v5911_v42 = vadd.f32 %v5910_v28, %v5893_v56 }
 0xa87   :  { %v5907_v63 = vadd.f32 %v5906_v26, %v5890_v61 }
 0xa88   :  { %v5912_v59 = vadd.f32 %v5911_v42, %v5894_v16 }
 0xa89   :  { %5908 = vadd.xlane.f32.xlu0 %v5907_v63 }
 0xa8a   :  { %5913 = vadd.xlane.f32.xlu1 %v5912_v59 }
 0xb0e   :  { %v5899_v10 = vpop.xlane.xlu0 %5898 }
 0xb0f   :  { %v5915_v1 = vmul.f32 0.001953125, %v5899_v10 }
 0xb10   :  { %v5904_v4 = vpop.xlane.xlu1 %5903 }
 0xb11   :  { %v5919_v13 = vadd.f32 1e-05, %v5915_v1  ;;  %v5916_v53 = vmul.f32 0.001953125, %v5904_v4 }
 0xb13   :  { %10137 = vrsqrt.f32 %v5919_v13  ;;  %v5920_v38 = vadd.f32 1e-05, %v5916_v53 }
 0xb15   :  { %10139 = vrsqrt.f32 %v5920_v38 }
 0xb17   :  { %v5914_v13 = vpop.xlane.xlu1 %5913 }
 0xb18   :  { %v5918_v38 = vmul.f32 0.001953125, %v5914_v13 }
 0xb1d   :  { %v10138_v17 = vpop.eup %10137 }
 0xb1e   :  { %v5927_v2 = vmul.f32 %v10138_v17, %v5863_v0  ;;  %v5928_v3 = vmul.f32 %v10138_v17, %v5864_v27  ;;  %v5930_v62 = vmul.f32 %v10138_v17, %v5866_v47  ;;  %v5929_v56 = vmul.f32 %v10138_v17, %v13349_v49 }
 0xb1f   :  { %v10140_v54 = vpop.eup %10139 }
 0xb20   :  { %vm5943_vm14 = vcmp.ge.f32.partialorder %v5927_v2, 0.0  ;;  %v5959_v37 = vmul.f32 0.2, %v5927_v2  ;;  %vm5944_vm15 = vcmp.ge.f32.partialorder %v5928_v3, 0.0  ;;  %v5960_v39 = vmul.f32 0.2, %v5928_v3 }
 0xb21   :  { %v5932_v58 = vmul.f32 %v10140_v54, %v13353_v9  ;;  %v5962_v26 = vmul.f32 0.2, %v5930_v62  ;;  %v5934_v16 = vmul.f32 %v10140_v54, %v5870_v35  ;;  %vm5946_vm0 = vcmp.ge.f32.partialorder %v5930_v62, 0.0 }
 0xb22   :  { %v13399_v28 = vsel %vm5943_vm14, %v5927_v2, %v5959_v37  ;;  %v13401_v61 = vsel %vm5944_vm15, %v5928_v3, %v5960_v39  ;;  %v5961_v0 = vmul.f32 0.2, %v5929_v56  ;;  %v5933_v42 = vmul.f32 %v10140_v54, %v13355_v11 }
 0xb23   :  { %15943 = vst [vmem:[#allocation57_spill] sm:$0xff] %v13399_v28  ;;  %15944 = vst [vmem:[#allocation63_spill] sm:$0xff] %v13401_v61  ;;  %6069 = vrot.lane.b32.xlu0 %v13399_v28, %s10502_s14  ;;  %6077 = vrot.lane.b32.xlu1 %v13401_v61, %s10502_s14  ;;  %vm5948_vm2 = vcmp.ge.f32.partialorder %v5932_v58, 0.0  ;;  %v5964_v27 = vmul.f32 0.2, %v5932_v58  ;;  %v13407_v47 = vsel %vm5946_vm0, %v5930_v62, %v5962_v26  ;;  %vm5945_vm4 = vcmp.ge.f32.partialorder %v5929_v56, 0.0 }
 0xb24   :  { %v5966_v49 = vmul.f32 0.2, %v5934_v16  ;;  %vm5950_vm12 = vcmp.ge.f32.partialorder %v5934_v16, 0.0  ;;  %v13416_v35 = vsel %vm5945_vm4, %v5929_v56, %v5961_v0  ;;  %v5965_v59 = vmul.f32 0.2, %v5933_v42 }
 0xb25   :  { %v13409_v9 = vsel %vm5948_vm2, %v5932_v58, %v5964_v27  ;;  %15946 = vst [vmem:[#allocation59_spill] sm:$0xff] %v13416_v35  ;;  %v5931_v10 = vmul.f32 %v10140_v54, %v13351_v48  ;;  %vm5949_vm13 = vcmp.ge.f32.partialorder %v5933_v42, 0.0  ;;  %v5909_v48 = vpop.xlane.xlu0 %5908  ;;  %v5922_v2 = vadd.f32 1e-05, %v5918_v38 }
 0xb26   :  { %15945 = vst [vmem:[#allocation58_spill] sm:$0xff] %v13409_v9  ;;  %v13418_v63 = vsel %vm5950_vm12, %v5934_v16, %v5966_v49  ;;  %v13425_v11 = vsel %vm5949_vm13, %v5933_v42, %v5965_v59  ;;  %v5917_v53 = vmul.f32 0.001953125, %v5909_v48 }
 0xb27   :  { %6093 = vrot.lane.b32.xlu1 %v13407_v47, %s10502_s14  ;;  %6079 = vrot.lane.b32.xlu0 %v13409_v9, %s10502_s14  ;;  %15947 = vst [vmem:[#allocation69_spill] sm:$0xff] %v13418_v63  ;;  %15948 = vst [vmem:[#allocation70_spill] sm:$0xff] %v13425_v11  ;;  %v5963_v1 = vmul.f32 0.2, %v5931_v10  ;;  %vm5947_vm14 = vcmp.ge.f32.partialorder %v5931_v10, 0.0 }
 0xb28   :  { %v5921_v17 = vadd.f32 1e-05, %v5917_v53 }
 0xb29   :  { %v13431_v4 = vsel %vm5947_vm14, %v5931_v10, %v5963_v1 }
 0xb2a   :  { %15949 = vst [vmem:[#allocation72_spill] sm:$0xff] %v13431_v4  ;;  %10141 = vrsqrt.f32 %v5921_v17 }
 0xb2b   :  { %6085 = vrot.lane.b32.xlu1 %v13416_v35, %s10502_s14  ;;  %6095 = vrot.lane.b32.xlu0 %v13418_v63, %s10502_s14  ;;  %10143 = vrsqrt.f32 %v5922_v2 }
 0xb2f   :  { %5991 = vrot.lane.b32.xlu1 %v13399_v28, %s10504_s12  ;;  %6087 = vrot.lane.b32.xlu0 %v13425_v11, %s10502_s14 }
 0xb33   :  { %5999 = vrot.lane.b32.xlu1 %v13401_v61, %s10504_s12  ;;  %5993 = vrot.lane.b32.xlu0 %v13431_v4, %s10504_s12 }
 0xb34   :  { %v10142_v3 = vpop.eup %10141 }
 0xb35   :  { %v10144_v62 = vpop.eup %10143  ;;  %v5935_v54 = vmul.f32 %v10142_v3, %v13365_v36  ;;  %v5936_v58 = vmul.f32 %v10142_v3, %v13367_v43  ;;  %v5938_v43 = vmul.f32 %v10142_v3, %v13379_v32  ;;  %v5937_v32 = vmul.f32 %v10142_v3, %v13369_v50 }
 0xb36   :  { %v5939_v37 = vmul.f32 %v10144_v62, %v13371_v29  ;;  %v5940_v56 = vmul.f32 %v10144_v62, %v13373_v57  ;;  %v5942_v57 = vmul.f32 %v10144_v62, %v13383_v14  ;;  %v5941_v14 = vmul.f32 %v10144_v62, %v13375_v30 }
 0xb37   :  { %6015 = vrot.lane.b32.xlu1 %v13407_v47, %s10504_s12  ;;  %6001 = vrot.lane.b32.xlu0 %v13409_v9, %s10504_s12  ;;  %v5967_v39 = vmul.f32 0.2, %v5935_v54  ;;  %vm5951_vm15 = vcmp.ge.f32.partialorder %v5935_v54, 0.0  ;;  %vm5952_vm2 = vcmp.ge.f32.partialorder %v5936_v58, 0.0  ;;  %v5968_v29 = vmul.f32 0.2, %v5936_v58 }
 0xb38   :  { %v5971_v26 = vmul.f32 0.2, %v5939_v37  ;;  %vm5955_vm0 = vcmp.ge.f32.partialorder %v5939_v37, 0.0  ;;  %v5972_v16 = vmul.f32 0.2, %v5940_v56  ;;  %vm5956_vm4 = vcmp.ge.f32.partialorder %v5940_v56, 0.0 }
 0xb39   :  { %v13533_v36 = vsel %vm5951_vm15, %v5935_v54, %v5967_v39  ;;  %v13547_v42 = vsel %vm5952_vm2, %v5936_v58, %v5968_v29  ;;  %v5970_v10 = vmul.f32 0.2, %v5938_v43  ;;  %v5974_v1 = vmul.f32 0.2, %v5942_v57 }
 0xb3a   :  { %v13535_v27 = vsel %vm5955_vm0, %v5939_v37, %v5971_v26  ;;  %v13549_v59 = vsel %vm5956_vm4, %v5940_v56, %v5972_v16  ;;  %vm5954_vm12 = vcmp.ge.f32.partialorder %v5938_v43, 0.0  ;;  %vm5958_vm13 = vcmp.ge.f32.partialorder %v5942_v57, 0.0 }
 0xb3b   :  { %6007 = vrot.lane.b32.xlu1 %v13416_v35, %s10504_s12  ;;  %6017 = vrot.lane.b32.xlu0 %v13418_v63, %s10504_s12  ;;  %v13561_v53 = vsel %vm5954_vm12, %v5938_v43, %v5970_v10  ;;  %v13563_v38 = vsel %vm5958_vm13, %v5942_v57, %v5974_v1  ;;  %v5969_v17 = vmul.f32 0.2, %v5937_v32  ;;  %v5973_v50 = vmul.f32 0.2, %v5941_v14 }
 0xb3c   :  { %vm5953_vm14 = vcmp.ge.f32.partialorder %v5937_v32, 0.0  ;;  %vm5957_vm15 = vcmp.ge.f32.partialorder %v5941_v14, 0.0 }
 0xb3d   :  { %v13571_v3 = vsel %vm5953_vm14, %v5937_v32, %v5969_v17  ;;  %v13573_v62 = vsel %vm5957_vm15, %v5941_v14, %v5973_v50 }
 0xb3f   :  { %6372 = vrot.lane.b32.xlu1 %v13399_v28, %s10505_s6  ;;  %6009 = vrot.lane.b32.xlu0 %v13425_v11, %s10504_s12 }
 0xb43   :  { %6380 = vrot.lane.b32.xlu1 %v13401_v61, %s10505_s6  ;;  %6374 = vrot.lane.b32.xlu0 %v13431_v4, %s10505_s6 }
 0xb47   :  { %6396 = vrot.lane.b32.xlu1 %v13407_v47, %s10505_s6  ;;  %6382 = vrot.lane.b32.xlu0 %v13409_v9, %s10505_s6 }
 0xb4b   :  { %6388 = vrot.lane.b32.xlu1 %v13416_v35, %s10505_s6  ;;  %6398 = vrot.lane.b32.xlu0 %v13418_v63, %s10505_s6 }
 0xb4f   :  { %6579 = vrot.lane.b32.xlu1 %v13399_v28, %s10506_s2  ;;  %6390 = vrot.lane.b32.xlu0 %v13425_v11, %s10505_s6 }
 0xb53   :  { %6587 = vrot.lane.b32.xlu1 %v13401_v61, %s10506_s2  ;;  %6581 = vrot.lane.b32.xlu0 %v13431_v4, %s10506_s2 }
 0xb57   :  { %6603 = vrot.lane.b32.xlu1 %v13407_v47, %s10506_s2  ;;  %6589 = vrot.lane.b32.xlu0 %v13409_v9, %s10506_s2 }
 0xb5b   :  { %6595 = vrot.lane.b32.xlu1 %v13416_v35, %s10506_s2  ;;  %6605 = vrot.lane.b32.xlu0 %v13418_v63, %s10506_s2 }
 0xb5f   :  { %6937 = vrot.lane.b32.xlu1 %v13401_v61, %s10507_s18  ;;  %6597 = vrot.lane.b32.xlu0 %v13425_v11, %s10506_s2 }
 0xb63   :  { %6945 = vrot.lane.b32.xlu1 %v13416_v35, %s10507_s18  ;;  %6939 = vrot.lane.b32.xlu0 %v13409_v9, %s10507_s18 }
 0xb67   :  { %6929 = vrot.lane.b32.xlu1 %v13399_v28, %s10507_s18  ;;  %6947 = vrot.lane.b32.xlu0 %v13425_v11, %s10507_s18 }
 0xb6b   :  { %6953 = vrot.lane.b32.xlu1 %v13407_v47, %s10507_s18  ;;  %6931 = vrot.lane.b32.xlu0 %v13431_v4, %s10507_s18 }
 0xb6f   :  { %7144 = vrot.lane.b32.xlu1 %v13401_v61, %s10508_s27  ;;  %6955 = vrot.lane.b32.xlu0 %v13418_v63, %s10507_s18 }
 0xb73   :  { %7152 = vrot.lane.b32.xlu1 %v13416_v35, %s10508_s27  ;;  %7146 = vrot.lane.b32.xlu0 %v13409_v9, %s10508_s27 }
 0xb77   :  { %7136 = vrot.lane.b32.xlu1 %v13399_v28, %s10508_s27  ;;  %7154 = vrot.lane.b32.xlu0 %v13425_v11, %s10508_s27 }
 0xb7b   :  { %7160 = vrot.lane.b32.xlu1 %v13407_v47, %s10508_s27  ;;  %7138 = vrot.lane.b32.xlu0 %v13431_v4, %s10508_s27 }
 0xb7f   :  { %7351 = vrot.lane.b32.xlu1 %v13401_v61, %s10509_s28  ;;  %7162 = vrot.lane.b32.xlu0 %v13418_v63, %s10508_s27 }
 0xb83   :  { %7359 = vrot.lane.b32.xlu1 %v13416_v35, %s10509_s28  ;;  %7353 = vrot.lane.b32.xlu0 %v13409_v9, %s10509_s28 }
 0xb87   :  { %7343 = vrot.lane.b32.xlu1 %v13399_v28, %s10509_s28  ;;  %7361 = vrot.lane.b32.xlu0 %v13425_v11, %s10509_s28 }
 0xb8b   :  { %7367 = vrot.lane.b32.xlu1 %v13407_v47, %s10509_s28  ;;  %7345 = vrot.lane.b32.xlu0 %v13431_v4, %s10509_s28 }
 0xb8f   :  { %7369 = vrot.lane.b32.xlu0 %v13418_v63, %s10509_s28  ;;  %6071 = vrot.lane.b32.xlu1 %v13431_v4, %s10502_s14 }
 0xb93   :  { %6073 = vrot.lane.b32.xlu1 %v13533_v36, %s10502_s14  ;;  %6075 = vrot.lane.b32.xlu0 %v13535_v27, %s10502_s14 }
 0xb95   :  { %v13543_v0 = vpop.permute.xlu0 %6069  ;;  %v13545_v49 = vpop.permute.xlu1 %6077 }
 0xb97   :  { %6081 = vrot.lane.b32.xlu1 %v13547_v42, %s10502_s14  ;;  %6083 = vrot.lane.b32.xlu0 %v13549_v59, %s10502_s14 }
 0xb99   :  { %v13557_v48 = vpop.permute.xlu0 %6079  ;;  %v13559_v13 = vpop.permute.xlu1 %6093 }
 0xb9b   :  { %6097 = vrot.lane.b32.xlu1 %v13561_v53, %s10502_s14  ;;  %6099 = vrot.lane.b32.xlu0 %v13563_v38, %s10502_s14 }
 0xb9d   :  { %v13569_v30 = vpop.permute.xlu0 %6095  ;;  %v6086_v2 = vpop.permute.xlu1 %6085 }
 0xb9e   :  { %v6105_v54 = vsel %vm288_vm1, %v13545_v49, %v6086_v2  ;;  %v6101_v37 = vsel %vm288_vm1, %v6086_v2, %v13559_v13 }
 0xb9f   :  { %6089 = vrot.lane.b32.xlu1 %v13571_v3, %s10502_s14  ;;  %6091 = vrot.lane.b32.xlu0 %v13573_v62, %s10502_s14  ;;  %v6119_v56 = vmul.f32 %v6105_v54, %v10886_v23  ;;  %v6120_v16 = vmul.f32 %v6101_v37, %v10883_v22 }
 0xba1   :  { %v6088_v39 = vpop.permute.xlu0 %6087  ;;  %v13585_v58 = vpop.permute.xlu1 %5991 }
 0xba2   :  { %v6102_v26 = vsel %vm288_vm1, %v6088_v39, %v13569_v30  ;;  %v6106_v29 = vsel %vm288_vm1, %v13557_v48, %v6088_v39 }
 0xba3   :  { %v6123_v43 = vmul.f32 %v6106_v29, %v10886_v23  ;;  %v6124_v57 = vmul.f32 %v6102_v26, %v10883_v22  ;;  %5995 = vrot.lane.b32.xlu1 %v13533_v36, %s10504_s12  ;;  %5997 = vrot.lane.b32.xlu0 %v13535_v27, %s10504_s12 }
 0xba5   :  { %v6142_v10 = vpack.c.bf16 %v6123_v43, %v6119_v56  ;;  %v13601_v1 = vpop.permute.xlu0 %5993  ;;  %v13603_v32 = vpop.permute.xlu1 %5999  ;;  %v6143_v14 = vpack.c.bf16 %v6124_v57, %v6120_v16 }
 0xba7   :  { %6003 = vrot.lane.b32.xlu1 %v13547_v42, %s10504_s12  ;;  %6005 = vrot.lane.b32.xlu0 %v13549_v59, %s10504_s12 }
 0xba8   :  { %6207 = vmatprep.subr.bf16.mxu1 %v6143_v14 }
 0xba9   :  { %6208 = vmatpush1.bf16.msra.mxu1 %v6142_v10  ;;  %v13609_v17 = vpop.permute.xlu0 %6001  ;;  %v13611_v50 = vpop.permute.xlu1 %6015 }
 0xbab   :  { %6019 = vrot.lane.b32.xlu1 %v13561_v53, %s10504_s12  ;;  %6021 = vrot.lane.b32.xlu0 %v13563_v38, %s10504_s12 }
 0xbad   :  { %v13617_v2 = vpop.permute.xlu0 %6017  ;;  %v13619_v54 = vpop.permute.xlu1 %6007 }
 0xbaf   :  { %6011 = vrot.lane.b32.xlu1 %v13571_v3, %s10504_s12  ;;  %6013 = vrot.lane.b32.xlu0 %v13573_v62, %s10504_s12 }
 0xbb1   :  { %v13625_v37 = vpop.permute.xlu0 %6009  ;;  %v13627_v39 = vpop.permute.xlu1 %6372 }
 0xbb3   :  { %6376 = vrot.lane.b32.xlu1 %v13533_v36, %s10505_s6  ;;  %6378 = vrot.lane.b32.xlu0 %v13535_v27, %s10505_s6 }
 0xbb5   :  { %v13633_v56 = vpop.permute.xlu0 %6374  ;;  %v13635_v26 = vpop.permute.xlu1 %6380 }
 0xbb7   :  { %6384 = vrot.lane.b32.xlu1 %v13547_v42, %s10505_s6  ;;  %6386 = vrot.lane.b32.xlu0 %v13549_v59, %s10505_s6 }
 0xbb9   :  { %v13641_v29 = vpop.permute.xlu0 %6382  ;;  %v13643_v16 = vpop.permute.xlu1 %6396 }
 0xbbb   :  { %6400 = vrot.lane.b32.xlu1 %v13561_v53, %s10505_s6  ;;  %6402 = vrot.lane.b32.xlu0 %v13563_v38, %s10505_s6 }
 0xbbd   :  { %v13649_v43 = vpop.permute.xlu0 %6398  ;;  %v13651_v57 = vpop.permute.xlu1 %6388 }
 0xbbf   :  { %6392 = vrot.lane.b32.xlu1 %v13571_v3, %s10505_s6  ;;  %6394 = vrot.lane.b32.xlu0 %v13573_v62, %s10505_s6 }
 0xbc1   :  { %v13657_v10 = vpop.permute.xlu0 %6390  ;;  %v13659_v14 = vpop.permute.xlu1 %6579 }
 0xbc3   :  { %6583 = vrot.lane.b32.xlu1 %v13533_v36, %s10506_s2  ;;  %6585 = vrot.lane.b32.xlu0 %v13535_v27, %s10506_s2 }
 0xbc5   :  { %v13665_v19 = vpop.permute.xlu0 %6581  ;;  %v13667_v40 = vpop.permute.xlu1 %6587 }
 0xbc7   :  { %6591 = vrot.lane.b32.xlu1 %v13547_v42, %s10506_s2  ;;  %6593 = vrot.lane.b32.xlu0 %v13549_v59, %s10506_s2 }
 0xbc9   :  { %v13673_v44 = vpop.permute.xlu0 %6589  ;;  %v13675_v52 = vpop.permute.xlu1 %6603 }
 0xbca   :  { %15950 = vst [vmem:[#allocation61_spill] sm:$0xff] %v13675_v52 }
 0xbcb   :  { %6607 = vrot.lane.b32.xlu1 %v13561_v53, %s10506_s2  ;;  %6609 = vrot.lane.b32.xlu0 %v13563_v38, %s10506_s2 }
 0xbcd   :  { %v13681_v21 = vpop.permute.xlu0 %6605  ;;  %v13683_v18 = vpop.permute.xlu1 %6595 }
 0xbce   :  { %15951 = vst [vmem:[#allocation64_spill] sm:$0xff] %v13683_v18 }
 0xbcf   :  { %6599 = vrot.lane.b32.xlu1 %v13571_v3, %s10506_s2  ;;  %6601 = vrot.lane.b32.xlu0 %v13573_v62, %s10506_s2 }
 0xbd1   :  { %v13689_v5 = vpop.permute.xlu0 %6597  ;;  %v13691_v34 = vpop.permute.xlu1 %6937 }
 0xbd2   :  { %15952 = vst [vmem:[#allocation65_spill] sm:$0xff] %v13691_v34 }
 0xbd3   :  { %7558 = vrot.lane.b32.xlu1 %v13401_v61, %s10510_s26  ;;  %7560 = vrot.lane.b32.xlu0 %v13409_v9, %s10510_s26 }
 0xbd5   :  { %v13697_v20 = vpop.permute.xlu0 %6939  ;;  %v13699_v55 = vpop.permute.xlu1 %6945 }
 0xbd6   :  { %15953 = vst [vmem:[#allocation66_spill] sm:$0xff] %v13697_v20  ;;  %15954 = vst [vmem:[#allocation60_spill] sm:$0xff] %v13699_v55 }
 0xbd7   :  { %6941 = vrot.lane.b32.xlu1 %v13547_v42, %s10507_s18  ;;  %7568 = vrot.lane.b32.xlu0 %v13425_v11, %s10510_s26 }
 0xbd9   :  { %v13705_v6 = vpop.permute.xlu0 %6947  ;;  %v13707_v18 = vpop.permute.xlu1 %6929 }
 0xbda   :  { %15955 = vst [vmem:[#allocation76_spill] sm:$0xff] %v13705_v6  ;;  %15956 = vst [vmem:[#allocation71_spill] sm:$0xff] %v13707_v18 }
 0xbdb   :  { %6949 = vrot.lane.b32.xlu1 %v13571_v3, %s10507_s18  ;;  %7552 = vrot.lane.b32.xlu0 %v13431_v4, %s10510_s26  ;;  %v15976_v4 = vld [vmem:[#allocation32_spill] sm:$0xff] }
 0xbdd   :  { %v13713_v34 = vpop.permute.xlu0 %6931  ;;  %v13715_v20 = vpop.permute.xlu1 %6953 }
 0xbde   :  { %15957 = vst [vmem:[#allocation62_spill] sm:$0xff] %v13713_v34  ;;  %15958 = vst [vmem:[#allocation68_spill] sm:$0xff] %v13715_v20 }
 0xbdf   :  { %6933 = vrot.lane.b32.xlu1 %v13533_v36, %s10507_s18  ;;  %7576 = vrot.lane.b32.xlu0 %v13418_v63, %s10510_s26 }
 0xbe1   :  { %v13721_v11 = vpop.permute.xlu0 %6955  ;;  %v13723_v55 = vpop.permute.xlu1 %7144 }
 0xbe2   :  { %15959 = vst [vmem:[#allocation67_spill] sm:$0xff] %v13721_v11  ;;  %15960 = vst [vmem:[#allocation78_spill] sm:$0xff] %v13723_v55 }
 0xbe3   :  { %6943 = vrot.lane.b32.xlu0 %v13549_v59, %s10507_s18  ;;  %6957 = vrot.lane.b32.xlu1 %v13561_v53, %s10507_s18 }
 0xbe5   :  { %v13729_v18 = vpop.permute.xlu0 %7146  ;;  %v13731_v34 = vpop.permute.xlu1 %7152 }
 0xbe6   :  { %15961 = vst [vmem:[#allocation75_spill] sm:$0xff] %v13729_v18  ;;  %15962 = vst [vmem:[#allocation73_spill] sm:$0xff] %v13731_v34 }
 0xbe7   :  { %6951 = vrot.lane.b32.xlu0 %v13573_v62, %s10507_s18  ;;  %7148 = vrot.lane.b32.xlu1 %v13547_v42, %s10508_s27 }
 0xbe9   :  { %v13737_v20 = vpop.permute.xlu0 %7154  ;;  %v13739_v11 = vpop.permute.xlu1 %7136 }
 0xbea   :  { %15963 = vst [vmem:[#allocation74_spill] sm:$0xff] %v13737_v20  ;;  %15964 = vst [vmem:[#allocation77_spill] sm:$0xff] %v13739_v11 }
 0xbeb   :  { %6935 = vrot.lane.b32.xlu0 %v13535_v27, %s10507_s18  ;;  %7156 = vrot.lane.b32.xlu1 %v13571_v3, %s10508_s27 }
 0xbed   :  { %v13745_v55 = vpop.permute.xlu0 %7138  ;;  %v13747_v18 = vpop.permute.xlu1 %7160 }
 0xbee   :  { %15965 = vst [vmem:[#allocation84_spill] sm:$0xff] %v13745_v55  ;;  %15966 = vst [vmem:[#allocation80_spill] sm:$0xff] %v13747_v18 }
 0xbef   :  { %6959 = vrot.lane.b32.xlu0 %v13563_v38, %s10507_s18  ;;  %7140 = vrot.lane.b32.xlu1 %v13533_v36, %s10508_s27 }
 0xbf1   :  { %v13753_v34 = vpop.permute.xlu0 %7162  ;;  %v13755_v20 = vpop.permute.xlu1 %7351 }
 0xbf2   :  { %15967 = vst [vmem:[#allocation79_spill] sm:$0xff] %v13753_v34  ;;  %15968 = vst [vmem:[#allocation86_spill] sm:$0xff] %v13755_v20 }
 0xbf3   :  { %7150 = vrot.lane.b32.xlu0 %v13549_v59, %s10508_s27  ;;  %7164 = vrot.lane.b32.xlu1 %v13561_v53, %s10508_s27 }
 0xbf5   :  { %v13761_v11 = vpop.permute.xlu0 %7353  ;;  %v13763_v55 = vpop.permute.xlu1 %7359 }
 0xbf6   :  { %15969 = vst [vmem:[#allocation83_spill] sm:$0xff] %v13761_v11  ;;  %15970 = vst [vmem:[#allocation81_spill] sm:$0xff] %v13763_v55  ;;  %v6113_v55 = vsel %vm288_vm1, %v13559_v13, %v13543_v0 }
 0xbf7   :  { %7158 = vrot.lane.b32.xlu0 %v13573_v62, %s10508_s27  ;;  %7355 = vrot.lane.b32.xlu1 %v13547_v42, %s10509_s28 }
 0xbf9   :  { %v13769_v18 = vpop.permute.xlu0 %7361  ;;  %v13771_v34 = vpop.permute.xlu1 %7343 }
 0xbfa   :  { %15971 = vst [vmem:[#allocation82_spill] sm:$0xff] %v13769_v18  ;;  %15972 = vst [vmem:[#allocation85_spill] sm:$0xff] %v13771_v34  ;;  %v6109_v34 = vsel %vm288_vm1, %v13543_v0, %v13545_v49  ;;  %v6117_v49 = vmul.f32 %v6113_v55, %v10870_v12  ;;  %v6032_v55 = vsel %vm239_vm3, %v13601_v1, %v13609_v17 }
 0xbfb   :  { %7142 = vrot.lane.b32.xlu0 %v13535_v27, %s10508_s27  ;;  %7363 = vrot.lane.b32.xlu1 %v13571_v3, %s10509_s28  ;;  %v6118_v6 = vmul.f32 %v6109_v34, %v15976_v4 }
 0xbfd   :  { %v13777_v20 = vpop.permute.xlu0 %7345  ;;  %v13779_v11 = vpop.permute.xlu1 %7367 }
 0xbfe   :  { %15973 = vst [vmem:[#allocation89_spill] sm:$0xff] %v13777_v20  ;;  %15974 = vst [vmem:[#allocation88_spill] sm:$0xff] %v13779_v11 }
 0xbff   :  { %7166 = vrot.lane.b32.xlu0 %v13563_v38, %s10508_s27  ;;  %7347 = vrot.lane.b32.xlu1 %v13533_v36, %s10509_s28 }
 0xc01   :  { %v13793_v18 = vpop.permute.xlu0 %7369  ;;  %v6072_v20 = vpop.permute.xlu1 %6071 }
 0xc02   :  { %15975 = vst [vmem:[#allocation87_spill] sm:$0xff] %v13793_v18  ;;  %v6110_v11 = vsel %vm288_vm1, %v6072_v20, %v13557_v48  ;;  %v6114_v63 = vsel %vm288_vm1, %v13569_v30, %v6072_v20 }
 0xc03   :  { %v6121_v9 = vmul.f32 %v6114_v63, %v10870_v12  ;;  %v6122_v61 = vmul.f32 %v6110_v11, %v15976_v4  ;;  %7357 = vrot.lane.b32.xlu0 %v13549_v59, %s10509_s28  ;;  %7371 = vrot.lane.b32.xlu1 %v13561_v53, %s10509_s28  ;;  %v6044_v11 = vmul.f32 %v6032_v55, %v10899_v33 }
 0xc05   :  { %v6140_v0 = vpack.c.bf16 %v6121_v9, %v6117_v49  ;;  %v6076_v48 = vpop.permute.xlu0 %6075  ;;  %v6074_v13 = vpop.permute.xlu1 %6073  ;;  %v6141_v18 = vpack.c.bf16 %v6122_v61, %v6118_v6 }
 0xc07   :  { %7365 = vrot.lane.b32.xlu0 %v13573_v62, %s10509_s28  ;;  %6154 = vmatprep.subr.bf16.mxu0 %v6141_v18  ;;  %v6031_v18 = vsel %vm239_vm3, %v13585_v58, %v13603_v32 }
 0xc08   :  { %7566 = vrot.lane.b32.xlu1 %v13416_v35, %s10510_s26  ;;  %6155 = vmatpush1.bf16.msra.mxu0 %v6140_v0  ;;  %v6134_v35 = vld [vmem:[#allocation13 + $0x20] sm:$0xff]  ;;  %v6040_v52 = vmul.f32 %v6031_v18, %v10899_v33  ;;  %v6035_v18 = vsel %vm239_vm3, %v13611_v50, %v13585_v58 }
 0xc09   :  { %v6084_v20 = vpop.permute.xlu0 %6083  ;;  %v6082_v34 = vpop.permute.xlu1 %6081 }
 0xc0a   :  { %v6112_v9 = vsel %vm288_vm1, %v6076_v48, %v6084_v20  ;;  %v6111_v6 = vsel %vm288_vm1, %v6074_v13, %v6082_v34 }
 0xc0b   :  { %v6130_v61 = vmul.f32 %v6112_v9, %v15976_v4  ;;  %v6126_v63 = vmul.f32 %v6111_v6, %v15976_v4  ;;  %7349 = vrot.lane.b32.xlu0 %v13535_v27, %s10509_s28  ;;  %v6036_v9 = vsel %vm239_vm3, %v13617_v2, %v13601_v1  ;;  %v6062_v1 = vpack.c.bf16 %v6044_v11, %v6040_v52 }
 0xc0c   :  { %7550 = vrot.lane.b32.xlu1 %v13399_v28, %s10510_s26 }
 0xc0d   :  { %v6100_v30 = vpop.permute.xlu0 %6099  ;;  %v6098_v49 = vpop.permute.xlu1 %6097  ;;  %v6145_v0 = vpack.c.bf16 %v6130_v61, %v6126_v63  ;;  %v6023_v61 = vsel %vm239_vm3, %v13619_v54, %v13611_v50  ;;  %v6024_v63 = vsel %vm239_vm3, %v13625_v37, %v13617_v2  ;;  %v6028_v2 = vsel %vm239_vm3, %v13609_v17, %v13625_v37 }
 0xc0e   :  { %v6116_v6 = vsel %vm288_vm1, %v6100_v30, %v6076_v48  ;;  %v6115_v55 = vsel %vm288_vm1, %v6098_v49, %v6074_v13  ;;  %v6138_v48 = vpack.c.bf16 %v6135_v8, %v6134_v35  ;;  %v6043_v13 = vmul.f32 %v6036_v9, %v10905_v41 }
 0xc0f   :  { %v6129_v4 = vmul.f32 %v6116_v6, %v10870_v12  ;;  %v6125_v28 = vmul.f32 %v6115_v55, %v10870_v12  ;;  %7373 = vrot.lane.b32.xlu0 %v13563_v38, %s10509_s28  ;;  %6156 = vmatprep.subr.bf16.mxu0 %v6145_v0  ;;  %v6042_v17 = vmul.f32 %v6023_v61, %v10916_v51 }
 0xc10   :  { %7574 = vrot.lane.b32.xlu1 %v13407_v47, %s10510_s26 }
 0xc11   :  { %v6144_v0 = vpack.c.bf16 %v6129_v4, %v6125_v28  ;;  %v6092_v6 = vpop.permute.xlu0 %6091  ;;  %v6090_v58 = vpop.permute.xlu1 %6089 }
 0xc12   :  { %v6104_v55 = vsel %vm288_vm1, %v6092_v6, %v6100_v30  ;;  %v6108_v8 = vsel %vm288_vm1, %v6084_v20, %v6092_v6  ;;  %v6103_v52 = vsel %vm288_vm1, %v6090_v58, %v6098_v49  ;;  %v6107_v35 = vsel %vm288_vm1, %v6082_v34, %v6090_v58 }
 0xc13   :  { %v6131_v50 = vmul.f32 %v6108_v8, %v10886_v23  ;;  %v6132_v11 = vmul.f32 %v6104_v55, %v10883_v22  ;;  %v6127_v28 = vmul.f32 %v6107_v35, %v10886_v23  ;;  %v6128_v4 = vmul.f32 %v6103_v52, %v10883_v22  ;;  %7564 = vrot.lane.b32.xlu0 %v13549_v59, %s10510_s26 }
 0xc14   :  { %v6046_v20 = vmul.f32 %v6024_v63, %v10916_v51  ;;  %7562 = vrot.lane.b32.xlu1 %v13547_v42, %s10510_s26  ;;  %6157 = vmatpush1.bf16.msra.mxu0 %v6144_v0  ;;  %v6039_v34 = vmul.f32 %v6035_v18, %v10905_v41  ;;  %v6027_v58 = vsel %vm239_vm3, %v13603_v32, %v13619_v54  ;;  %v6137_v0 = vld [vmem:[#allocation13 + $0x38] sm:$0xff] }
 0xc15   :  { %v6146_v30 = vpack.c.bf16 %v6131_v50, %v6127_v28  ;;  %6266 = vmatprep.subr.bf16.mxu0 %v6062_v1  ;;  %v5998_v49 = vpop.permute.xlu0 %5997  ;;  %v5996_v9 = vpop.permute.xlu1 %5995  ;;  %v6147_v6 = vpack.c.bf16 %v6132_v11, %v6128_v4  ;;  %v6045_v63 = vmul.f32 %v6028_v2, %v10911_v46  ;;  %v6136_v1 = vld [vmem:[#allocation13 + $0x30] sm:$0xff]  ;;  %v6041_v55 = vmul.f32 %v6027_v58, %v10911_v46  ;;  %v6055_v11 = vld [vmem:[#allocation13] sm:$0xff]  ;;  %v6056_v28 = vld [vmem:[#allocation13 + $0x8] sm:$0xff] }
 0xc16   :  { %v6061_v37 = vpack.c.bf16 %v6043_v13, %v6039_v34  ;;  %v6064_v18 = vpack.c.bf16 %v6046_v20, %v6042_v17  ;;  %v6139_v50 = vpack.c.bf16 %v6137_v0, %v6136_v1  ;;  %v6412_v4 = vsel %vm592_vm5, %v13627_v39, %v13635_v26 }
 0xc17   :  { %9521 = vmatmul.mubr.msk.bf16.vlgmr.msra.gmra.mrb[24].mxu0 %vm2231_vm11, %v6138_v48  ;;  %7572 = vrot.lane.b32.xlu0 %v13573_v62, %s10510_s26  ;;  %v6063_v8 = vpack.c.bf16 %v6045_v63, %v6041_v55  ;;  %v6413_v2 = vsel %vm592_vm5, %v13633_v56, %v13641_v29  ;;  %v13928_v63 = vpack.c.bf16 %v6056_v28, %v6055_v11 }
 0xc18   :  { %7570 = vrot.lane.b32.xlu1 %v13571_v3, %s10510_s26  ;;  %6209 = vmatprep.subr.bf16.mxu1 %v6147_v6  ;;  %v6404_v0 = vsel %vm592_vm5, %v13651_v57, %v13643_v16  ;;  %v6405_v55 = vsel %vm592_vm5, %v13657_v10, %v13649_v43 }
 0xc19   :  { %6267 = vmatpush1.bf16.msra.mxu0 %v6061_v37  ;;  %6210 = vmatpush1.bf16.msra.mxu1 %v6146_v30  ;;  %v6006_v32 = vpop.permute.xlu0 %6005  ;;  %v6004_v54 = vpop.permute.xlu1 %6003 }
 0xc1a   :  { %v6034_v13 = vsel %vm239_vm3, %v5998_v49, %v6006_v32  ;;  %6319 = vmatprep.subr.bf16.mxu1 %v6064_v18  ;;  %v6033_v61 = vsel %vm239_vm3, %v5996_v9, %v6004_v54  ;;  %6196 = vmatprep.mubr.bf16.mxu0 %v15805_v24  ;;  %v6421_v18 = vmul.f32 %v6412_v4, %v10928_v60 }
 0xc1b   :  { %v6052_v52 = vmul.f32 %v6034_v13, %v10899_v33  ;;  %v6048_v35 = vmul.f32 %v6033_v61, %v10899_v33  ;;  %7556 = vrot.lane.b32.xlu0 %v13535_v27, %s10510_s26 }
 0xc1c   :  { %7554 = vrot.lane.b32.xlu1 %v13533_v36, %s10510_s26  ;;  %9523 = vmatmul.mubr.msk.bf16.vlgmr.msra.gmra.mrb[24].mxu1 %vm2231_vm11, %v6138_v48  ;;  %v6417_v48 = vsel %vm592_vm5, %v13649_v43, %v13633_v56  ;;  %v6425_v56 = vmul.f32 %v6413_v2, %v10928_v60 }
 0xc1d   :  { %6320 = vmatpush1.bf16.msra.mxu1 %v6063_v8  ;;  %v6022_v20 = vpop.permute.xlu0 %6021  ;;  %v6020_v34 = vpop.permute.xlu1 %6019  ;;  %v6066_v30 = vpack.c.bf16 %v6052_v52, %v6048_v35  ;;  %6249 = vmatprep.mubr.bf16.mxu1 %v15805_v24  ;;  %v6424_v1 = vmul.f32 %v6417_v48, %v10936_v15  ;;  %v7757_v8 = vld [vmem:[#allocation20] sm:$0xff] }
 0xc1e   :  { %v6038_v6 = vsel %vm239_vm3, %v6022_v20, %v5998_v49  ;;  %v6037_v58 = vsel %vm239_vm3, %v6020_v34, %v5996_v9  ;;  %v6416_v49 = vsel %vm592_vm5, %v13643_v16, %v13627_v39  ;;  %v7758_v9 = vld [vmem:[#allocation20 + $0x8] sm:$0xff] }
 0xc1f   :  { %v6051_v17 = vmul.f32 %v6038_v6, %v10905_v41  ;;  %v6047_v37 = vmul.f32 %v6037_v58, %v10905_v41  ;;  %9522 = vmatmul.mubr.msk.bf16.gmra.mrb[28].mxu0 %vm2231_vm11, %v6139_v50  ;;  %7580 = vrot.lane.b32.xlu0 %v13563_v38, %s10510_s26 }
 0xc20   :  { %7578 = vrot.lane.b32.xlu1 %v13561_v53, %s10510_s26  ;;  %6268 = vmatprep.subr.bf16.mxu0 %v6066_v30  ;;  %v6420_v30 = vmul.f32 %v6416_v49, %v10936_v15 }
 0xc21   :  { %v6065_v13 = vpack.c.bf16 %v6051_v17, %v6047_v37  ;;  %v6014_v61 = vpop.permute.xlu0 %6013  ;;  %v6012_v39 = vpop.permute.xlu1 %6011  ;;  %6298 = vmatprep.mubr.bf16.mxu0 %v15805_v24  ;;  %v7759_v17 = vld [vmem:[#allocation20 + $0x10] sm:$0xff] }
 0xc22   :  { %v6026_v52 = vsel %vm239_vm3, %v6014_v61, %v6022_v20  ;;  %v6030_v35 = vsel %vm239_vm3, %v6006_v32, %v6014_v61  ;;  %v6025_v16 = vsel %vm239_vm3, %v6012_v39, %v6020_v34  ;;  %v6029_v11 = vsel %vm239_vm3, %v6004_v54, %v6012_v39  ;;  %v7760_v34 = vld [vmem:[#allocation20 + $0x18] sm:$0xff] }
 0xc23   :  { %v6053_v43 = vmul.f32 %v6030_v35, %v10911_v46  ;;  %v6054_v28 = vmul.f32 %v6026_v52, %v10916_v51  ;;  %v6049_v4 = vmul.f32 %v6029_v11, %v10911_v46  ;;  %v6050_v2 = vmul.f32 %v6025_v16, %v10916_v51  ;;  %7768 = vperm.xlu0 %10115, %v7758_v9  }
 0xc24   :  { %v6409_v32 = vsel %vm592_vm5, %v13641_v29, %v13657_v10  ;;  %v6427_v20 = vmul.f32 %v6405_v55, %v10950_v31  ;;  %7763 = vperm.xlu1 %10116, %v7757_v8   ;;  %9524 = vmatmul.mubr.msk.bf16.gmra.mrb[28].mxu1 %vm2231_vm11, %v6139_v50  ;;  %v6444_v54 = vpack.c.bf16 %v6425_v56, %v6421_v18 }
 0xc25   :  { %v6067_v48 = vpack.c.bf16 %v6053_v43, %v6049_v4  ;;  %6269 = vmatpush1.bf16.msra.mxu0 %v6065_v13  ;;  %v6379_v6 = vpop.permute.xlu0 %6378  ;;  %v6377_v58 = vpop.permute.xlu1 %6376  ;;  %v6068_v37 = vpack.c.bf16 %v6054_v28, %v6050_v2  ;;  %6351 = vmatprep.mubr.bf16.mxu1 %v15805_v24  ;;  %v6408_v29 = vsel %vm592_vm5, %v13635_v26, %v13651_v57 }
 0xc26   :  { %v6423_v10 = vmul.f32 %v6404_v0, %v10950_v31  ;;  %6457 = vmatprep.subr.bf16.mxu0 %v6444_v54  ;;  %v6443_v50 = vpack.c.bf16 %v6424_v1, %v6420_v30  ;;  %v6426_v18 = vmul.f32 %v6409_v32, %v10944_v25  ;;  %v6422_v49 = vmul.f32 %v6408_v29, %v10944_v25  ;;  %v6057_v1 = vld [vmem:[#allocation13 + $0x10] sm:$0xff]  ;;  %v6058_v0 = vld [vmem:[#allocation13 + $0x18] sm:$0xff]  ;;  %v15977_v30 = vld [vmem:[#allocation61_spill] sm:$0xff] }
 0xc27   :  { %7778 = vperm.xlu0 %10115, %v7760_v34   ;;  %6321 = vmatprep.subr.bf16.mxu1 %v6068_v37  ;;  %v6620_v26 = vsel %vm783_vm6, %v13665_v19, %v13673_v44  ;;  %v6619_v55 = vsel %vm783_vm6, %v13659_v14, %v13667_v40  ;;  %v6060_v16 = vpack.c.bf16 %v6058_v0, %v6057_v1  ;;  %v15980_v37 = vld [vmem:[#allocation38_spill] sm:$0xff] }
 0xc28   :  { %9525 = vmatmul.mubr.msk.bf16.vlgmr.msra.gmra.mrb[24].mxu0 %vm2231_vm11, %v13928_v63  ;;  %7773 = vperm.xlu1 %10116, %v7759_v17   ;;  %v6446_v56 = vpack.c.bf16 %v6427_v20, %v6423_v10  ;;  %v6445_v39 = vpack.c.bf16 %v6426_v18, %v6422_v49  ;;  %v6632_v35 = vmul.f32 %v6620_v26, %v10965_v45  ;;  %v6438_v49 = vld [vmem:[#allocation13 + $0x48] sm:$0xff] }
 0xc29   :  { %6458 = vmatpush1.bf16.msra.mxu0 %v6443_v50  ;;  %6322 = vmatpush1.bf16.msra.mxu1 %v6067_v48  ;;  %v6387_v57 = vpop.permute.xlu0 %6386  ;;  %v6385_v9 = vpop.permute.xlu1 %6384  ;;  %v6628_v11 = vmul.f32 %v6619_v55, %v10965_v45  ;;  %v6624_v2 = vsel %vm783_vm6, %v13681_v21, %v13665_v19  ;;  %v6612_v32 = vsel %vm783_vm6, %v13689_v5, %v13681_v21  ;;  %v15978_v21 = vld [vmem:[#allocation39_spill] sm:$0xff] }
 0xc2a   :  { %v6415_v13 = vsel %vm592_vm5, %v6379_v6, %v6387_v57  ;;  %6510 = vmatprep.subr.bf16.mxu1 %v6446_v56  ;;  %v6414_v61 = vsel %vm592_vm5, %v6377_v58, %v6385_v9  ;;  %6308 = vmatprep.mubr.bf16.mxu0 %v15805_v24  ;;  %v6623_v19 = vsel %vm783_vm6, %v15977_v30, %v13659_v14  ;;  %v6437_v56 = vld [vmem:[#allocation13 + $0x40] sm:$0xff] }
 0xc2b   :  { %v6433_v8 = vmul.f32 %v6415_v13, %v10928_v60  ;;  %v6429_v52 = vmul.f32 %v6414_v61, %v10928_v60  ;;  %v6651_v48 = vpack.c.bf16 %v6632_v35, %v6628_v11  ;;  %v6631_v17 = vmul.f32 %v6624_v2, %v15978_v21 }
 0xc2c   :  { %9527 = vmatmul.mubr.msk.bf16.vlgmr.msra.gmra.mrb[24].mxu1 %vm2231_vm11, %v13928_v63  ;;  %v6634_v29 = vmul.f32 %v6612_v32, %v15980_v37 }
 0xc2d   :  { %6511 = vmatpush1.bf16.msra.mxu1 %v6445_v39  ;;  %v6403_v43 = vpop.permute.xlu0 %6402  ;;  %v6401_v28 = vpop.permute.xlu1 %6400  ;;  %v6448_v4 = vpack.c.bf16 %v6433_v8, %v6429_v52  ;;  %6361 = vmatprep.mubr.bf16.mxu1 %v15805_v24  ;;  %v6441_v8 = vpack.c.bf16 %v6438_v49, %v6437_v56 }
 0xc2e   :  { %v6419_v63 = vsel %vm592_vm5, %v6403_v43, %v6379_v6  ;;  %v6418_v20 = vsel %vm592_vm5, %v6401_v28, %v6377_v58  ;;  %v15979_v6 = vld [vmem:[#allocation64_spill] sm:$0xff] }
 0xc2f   :  { %v6432_v54 = vmul.f32 %v6419_v63, %v10936_v15  ;;  %v6428_v34 = vmul.f32 %v6418_v20, %v10936_v15  ;;  %6459 = vmatprep.subr.bf16.mxu0 %v6448_v4  ;;  %v6611_v58 = vsel %vm783_vm6, %v15979_v6, %v15977_v30  ;;  %v6615_v4 = vsel %vm783_vm6, %v13667_v40, %v15979_v6 }
 0xc30   :  { %9526 = vmatmul.mubr.msk.bf16.gmra.mrb[28].mxu0 %vm2231_vm11, %v6060_v16  ;;  %v6630_v52 = vmul.f32 %v6611_v58, %v15980_v37 }
 0xc31   :  { %v6447_v10 = vpack.c.bf16 %v6432_v54, %v6428_v34  ;;  %v6395_v50 = vpop.permute.xlu0 %6394  ;;  %v6393_v18 = vpop.permute.xlu1 %6392  ;;  %6489 = vmatprep.mubr.bf16.mxu0 %v15805_v24  ;;  %v6439_v54 = vld [vmem:[#allocation13 + $0x50] sm:$0xff]  ;;  %v6440_v34 = vld [vmem:[#allocation13 + $0x58] sm:$0xff] }
 0xc32   :  { %v6407_v14 = vsel %vm592_vm5, %v6395_v50, %v6403_v43  ;;  %v6411_v26 = vsel %vm592_vm5, %v6387_v57, %v6395_v50  ;;  %v6406_v1 = vsel %vm592_vm5, %v6393_v18, %v6401_v28  ;;  %v6410_v0 = vsel %vm592_vm5, %v6385_v9, %v6393_v18 }
 0xc33   :  { %v6434_v55 = vmul.f32 %v6411_v26, %v10944_v25  ;;  %v6435_v13 = vmul.f32 %v6407_v14, %v10950_v31  ;;  %v6430_v61 = vmul.f32 %v6410_v0, %v10944_v25  ;;  %v6431_v39 = vmul.f32 %v6406_v1, %v10950_v31  ;;  %6460 = vmatpush1.bf16.msra.mxu0 %v6447_v10  ;;  %v15982_v0 = vld [vmem:[#allocation63_spill] sm:$0xff] }
 0xc34   :  { %v6616_v57 = vsel %vm783_vm6, %v13673_v44, %v13689_v5  ;;  %9528 = vmatmul.mubr.msk.bf16.gmra.mrb[28].mxu1 %vm2231_vm11, %v6060_v16  ;;  %6664 = vmatprep.subr.bf16.mxu0 %v6651_v48  ;;  %v6627_v9 = vmul.f32 %v6623_v19, %v15978_v21  ;;  %v15981_v44 = vld [vmem:[#allocation40_spill] sm:$0xff]  ;;  %v6653_v2 = vpack.c.bf16 %v6634_v29, %v6630_v52 }
 0xc35   :  { %v6449_v35 = vpack.c.bf16 %v6434_v55, %v6430_v61  ;;  %v6586_v11 = vpop.permute.xlu0 %6585  ;;  %v6584_v43 = vpop.permute.xlu1 %6583  ;;  %v6450_v28 = vpack.c.bf16 %v6435_v13, %v6431_v39  ;;  %6542 = vmatprep.mubr.bf16.mxu1 %v15805_v24  ;;  %v6633_v16 = vmul.f32 %v6616_v57, %v15981_v44  ;;  %v6629_v32 = vmul.f32 %v6615_v4, %v15981_v44  ;;  %v15983_v55 = vld [vmem:[#allocation58_spill] sm:$0xff]  ;;  %v6644_v61 = vld [vmem:[#allocation13 + $0x60] sm:$0xff] }
 0xc36   :  { %v6650_v5 = vpack.c.bf16 %v6631_v17, %v6627_v9  ;;  %v6442_v6 = vpack.c.bf16 %v6440_v34, %v6439_v54  ;;  %v6794_v13 = vpack.c.bf16 %v15983_v55, %v15982_v0  ;;  %v6645_v39 = vld [vmem:[#allocation13 + $0x68] sm:$0xff]  ;;  %v15986_v34 = vld [vmem:[#allocation60_spill] sm:$0xff]  ;;  %v15994_v55 = vld [vmem:[#allocation71_spill] sm:$0xff] }
 0xc37   :  { %6512 = vmatprep.subr.bf16.mxu1 %v6450_v28  ;;  %v6652_v19 = vpack.c.bf16 %v6633_v16, %v6629_v32  ;;  %v6648_v4 = vpack.c.bf16 %v6645_v39, %v6644_v61  ;;  %v15985_v16 = vld [vmem:[#allocation66_spill] sm:$0xff]  ;;  %v15996_v61 = vld [vmem:[#allocation59_spill] sm:$0xff] }
 0xc38   :  { %9529 = vmatmul.mubr.msk.bf16.vlgmr.msra.gmra.mrb[24].mxu0 %vm2231_vm11, %v6441_v8  ;;  %6513 = vmatpush1.bf16.msra.mxu1 %v6449_v35  ;;  %v15997_v39 = vld [vmem:[#allocation70_spill] sm:$0xff] }
 0xc39   :  { %6665 = vmatpush1.bf16.msra.mxu0 %v6650_v5  ;;  %v6594_v63 = vpop.permute.xlu0 %6593  ;;  %6717 = vmatprep.subr.bf16.mxu1 %v6653_v2  ;;  %v6592_v20 = vpop.permute.xlu1 %6591  ;;  %v15984_v5 = vld [vmem:[#allocation76_spill] sm:$0xff] }
 0xc3a   :  { %v6622_v30 = vsel %vm783_vm6, %v6586_v11, %v6594_v63  ;;  %v6621_v40 = vsel %vm783_vm6, %v6584_v43, %v6592_v20  ;;  %6499 = vmatprep.mubr.bf16.mxu0 %v15805_v24  ;;  %v6966_v2 = vsel %vm1125_vm7, %v15985_v16, %v15984_v5 }
 0xc3b   :  { %v6640_v48 = vmul.f32 %v6622_v30, %v10965_v45  ;;  %v6636_v17 = vmul.f32 %v6621_v40, %v10965_v45  ;;  %v15987_v30 = vld [vmem:[#allocation65_spill] sm:$0xff] }
 0xc3c   :  { %9531 = vmatmul.mubr.msk.bf16.vlgmr.msra.gmra.mrb[24].mxu1 %vm2231_vm11, %v6441_v8  ;;  %v6965_v40 = vsel %vm1125_vm7, %v15987_v30, %v15986_v34 }
 0xc3d   :  { %6718 = vmatpush1.bf16.msra.mxu1 %v6652_v19  ;;  %v6610_v58 = vpop.permute.xlu0 %6609  ;;  %v6608_v29 = vpop.permute.xlu1 %6607  ;;  %v6655_v10 = vpack.c.bf16 %v6640_v48, %v6636_v17  ;;  %6552 = vmatprep.mubr.bf16.mxu1 %v15805_v24  ;;  %v15988_v19 = vld [vmem:[#allocation57_spill] sm:$0xff]  ;;  %v15989_v48 = vld [vmem:[#allocation72_spill] sm:$0xff] }
 0xc3e   :  { %v6626_v50 = vsel %vm783_vm6, %v6610_v58, %v6586_v11  ;;  %v6625_v18 = vsel %vm783_vm6, %v6608_v29, %v6584_v43  ;;  %v6793_v17 = vpack.c.bf16 %v15989_v48, %v15988_v19 }
 0xc3f   :  { %v6639_v56 = vmul.f32 %v6626_v50, %v15978_v21  ;;  %v6635_v49 = vmul.f32 %v6625_v18, %v15978_v21  ;;  %6666 = vmatprep.subr.bf16.mxu0 %v6655_v10  ;;  %v6798_v50 = vpack.c.bf16 %v13549_v59, %v13547_v42  ;;  %v15992_v18 = vld [vmem:[#allocation62_spill] sm:$0xff]  ;;  %v6797_v59 = vpack.c.bf16 %v13535_v27, %v13533_v36 }
 0xc40   :  { %9530 = vmatmul.mubr.msk.bf16.gmra.mrb[28].mxu0 %vm2231_vm11, %v6442_v6  ;;  %v6799_v36 = vpack.c.bf16 %v13573_v62, %v13571_v3  ;;  %v6970_v27 = vsel %vm1125_vm7, %v15992_v18, %v15985_v16  ;;  %v6969_v3 = vsel %vm1125_vm7, %v15994_v55, %v15987_v30  ;;  %v15999_v62 = vld [vmem:[#allocation43_spill] sm:$0xff] }
 0xc41   :  { %v6654_v14 = vpack.c.bf16 %v6639_v56, %v6635_v49  ;;  %v6602_v26 = vpop.permute.xlu0 %6601  ;;  %v6600_v1 = vpop.permute.xlu1 %6599  ;;  %6696 = vmatprep.mubr.bf16.mxu0 %v15805_v24  ;;  %v15993_v56 = vld [vmem:[#allocation67_spill] sm:$0xff]  ;;  %v6977_v48 = vmul.f32 %v6969_v3, %v15999_v62  ;;  %v16006_v3 = vld [vmem:[#allocation84_spill] sm:$0xff] }
 0xc42   :  { %v6614_v57 = vsel %vm783_vm6, %v6602_v26, %v6610_v58  ;;  %v6618_v8 = vsel %vm783_vm6, %v6594_v63, %v6602_v26  ;;  %v6613_v9 = vsel %vm783_vm6, %v6600_v1, %v6608_v29  ;;  %v6617_v52 = vsel %vm783_vm6, %v6592_v20, %v6600_v1  ;;  %v15991_v29 = vld [vmem:[#allocation41_spill] sm:$0xff]  ;;  %v6646_v1 = vld [vmem:[#allocation13 + $0x70] sm:$0xff] }
 0xc43   :  { %v6641_v35 = vmul.f32 %v6618_v8, %v15981_v44  ;;  %v6642_v11 = vmul.f32 %v6614_v57, %v15980_v37  ;;  %v6637_v43 = vmul.f32 %v6617_v52, %v15981_v44  ;;  %v6638_v28 = vmul.f32 %v6613_v9, %v15980_v37  ;;  %6667 = vmatpush1.bf16.msra.mxu0 %v6654_v14  ;;  %v15998_v8 = vld [vmem:[#allocation42_spill] sm:$0xff] }
 0xc44   :  { %9532 = vmatmul.mubr.msk.bf16.gmra.mrb[28].mxu1 %vm2231_vm11, %v6442_v6  ;;  %6807 = vmatprep.subr.bf16.mxu0 %v6794_v13  ;;  %v15990_v6 = vld [vmem:[#allocation69_spill] sm:$0xff]  ;;  %v6982_v10 = vmul.f32 %v6966_v2, %v15991_v29  ;;  %v6974_v49 = vsel %vm1125_vm7, %v15993_v56, %v15992_v18  ;;  %v6978_v0 = vmul.f32 %v6965_v40, %v15991_v29  ;;  %v15995_v13 = vld [vmem:[#allocation68_spill] sm:$0xff] }
 0xc45   :  { %v6656_v32 = vpack.c.bf16 %v6641_v35, %v6637_v43  ;;  %v14086_v63 = vpop.permute.xlu0 %7560  ;;  %v14088_v20 = vpop.permute.xlu1 %7558  ;;  %v6657_v54 = vpack.c.bf16 %v6642_v11, %v6638_v28  ;;  %6749 = vmatprep.mubr.bf16.mxu1 %v15805_v24  ;;  %v6796_v58 = vpack.c.bf16 %v15990_v6, %v13407_v47  ;;  %v6647_v47 = vld [vmem:[#allocation13 + $0x78] sm:$0xff]  ;;  %v6973_v42 = vsel %vm1125_vm7, %v15995_v13, %v15994_v55 }
 0xc46   :  { %v6795_v57 = vpack.c.bf16 %v15997_v39, %v15996_v61  ;;  %v6984_v9 = vmul.f32 %v6974_v49, %v15998_v8  ;;  %v7001_v52 = vpack.c.bf16 %v6982_v10, %v6978_v0  ;;  %v6800_v35 = vpack.c.bf16 %v13563_v38, %v13561_v53  ;;  %v16000_v10 = vld [vmem:[#allocation45_spill] sm:$0xff]  ;;  %v16001_v0 = vld [vmem:[#allocation74_spill] sm:$0xff] }
 0xc47   :  { %6719 = vmatprep.subr.bf16.mxu1 %v6657_v54  ;;  %v6649_v11 = vpack.c.bf16 %v6647_v47, %v6646_v1  ;;  %v6980_v2 = vmul.f32 %v6973_v42, %v15998_v8  ;;  %v6788_v54 = vld [vmem:[#allocation13 + $0x88] sm:$0xff]  ;;  %v6981_v40 = vmul.f32 %v6970_v27, %v15999_v62  ;;  %v6962_v16 = vsel %vm1125_vm7, %v15984_v5, %v15993_v56  ;;  %v6789_v1 = vld [vmem:[#allocation13 + $0x90] sm:$0xff]  ;;  %v6790_v47 = vld [vmem:[#allocation13 + $0x98] sm:$0xff] }
 0xc48   :  { %9533 = vmatmul.mubr.msk.bf16.vlgmr.msra.gmra.mrb[24].mxu0 %vm2231_vm11, %v6648_v4  ;;  %6720 = vmatpush1.bf16.msra.mxu1 %v6656_v32  ;;  %v6787_v32 = vld [vmem:[#allocation13 + $0x80] sm:$0xff]  ;;  %v6961_v30 = vsel %vm1125_vm7, %v15986_v34, %v15995_v13  ;;  %v16002_v34 = vld [vmem:[#allocation75_spill] sm:$0xff]  ;;  %v16004_v61 = vld [vmem:[#allocation78_spill] sm:$0xff] }
 0xc49   :  { %6808 = vmatpush1.bf16.msra.mxu0 %v6793_v17  ;;  %v14107_v14 = vpop.permute.xlu0 %7568  ;;  %6860 = vmatprep.subr.bf16.mxu1 %v6796_v58  ;;  %v6942_v26 = vpop.permute.xlu1 %6941  ;;  %v7003_v53 = vpack.c.bf16 %v6984_v9, %v6980_v2  ;;  %v6791_v19 = vpack.c.bf16 %v6788_v54, %v6787_v32  ;;  %v7000_v58 = vpack.c.bf16 %v6981_v40, %v6977_v48  ;;  %v16007_v40 = vld [vmem:[#allocation79_spill] sm:$0xff] }
 0xc4a   :  { %6809 = vmatprep.subr.bf16.mxu0 %v6798_v50  ;;  %6706 = vmatprep.mubr.bf16.mxu0 %v15805_v24  ;;  %v6983_v50 = vmul.f32 %v6962_v16, %v16000_v10  ;;  %v6979_v18 = vmul.f32 %v6961_v30, %v16000_v10  ;;  %v7173_v55 = vsel %vm1316_vm8, %v16002_v34, %v16001_v0 }
 0xc4b   :  { %v7181_v16 = vsel %vm1316_vm8, %v16007_v40, %v16006_v3 }
 0xc4c   :  { %9535 = vmatmul.mubr.msk.bf16.vlgmr.msra.gmra.mrb[24].mxu1 %vm2231_vm11, %v6648_v4  ;;  %v7002_v42 = vpack.c.bf16 %v6983_v50, %v6979_v18 }
 0xc4d   :  { %6810 = vmatpush1.bf16.msra.mxu0 %v6797_v59  ;;  %6861 = vmatpush1.bf16.msra.mxu1 %v6795_v57  ;;  %v14123_v43 = vpop.permute.xlu0 %7552  ;;  %v6950_v28 = vpop.permute.xlu1 %6949  ;;  %v16003_v59 = vld [vmem:[#allocation73_spill] sm:$0xff] }
 0xc4e   :  { %7014 = vmatprep.subr.bf16.mxu0 %v7001_v52  ;;  %6862 = vmatprep.subr.bf16.mxu1 %v6800_v35  ;;  %v6967_v5 = vsel %vm1125_vm7, %v6942_v26, %v6950_v28  ;;  %v7172_v39 = vsel %vm1316_vm8, %v16004_v61, %v16003_v59  ;;  %v6792_v35 = vpack.c.bf16 %v6790_v47, %v6789_v1 }
 0xc4f   :  { %6759 = vmatprep.mubr.bf16.mxu1 %v15805_v24  ;;  %v6986_v57 = vmul.f32 %v6967_v5, %v15991_v29  ;;  %v16009_v5 = vld [vmem:[#allocation80_spill] sm:$0xff] }
 0xc50   :  { %9534 = vmatmul.mubr.msk.bf16.gmra.mrb[28].mxu0 %vm2231_vm11, %v6649_v11 }
 0xc51   :  { %6863 = vmatpush1.bf16.msra.mxu1 %v6799_v36  ;;  %v14134_v38 = vpop.permute.xlu0 %7576  ;;  %v6934_v4 = vpop.permute.xlu1 %6933  ;;  %6839 = vmatprep.mubr.bf16.mxu0 %v15805_v24 }
 0xc52   :  { %7067 = vmatprep.subr.bf16.mxu1 %v7003_v53  ;;  %v6971_v52 = vsel %vm1125_vm7, %v6934_v4, %v6942_v26  ;;  %v7177_v26 = vsel %vm1316_vm8, %v16006_v3, %v16002_v34 }
 0xc54   :  { %9536 = vmatmul.mubr.msk.bf16.gmra.mrb[28].mxu1 %vm2231_vm11, %v6649_v11  ;;  %v16005_v11 = vld [vmem:[#allocation44_spill] sm:$0xff] }
 0xc55   :  { %v6944_v17 = vpop.permute.xlu0 %6943  ;;  %v6958_v6 = vpop.permute.xlu1 %6957  ;;  %6892 = vmatprep.mubr.bf16.mxu1 %v15805_v24  ;;  %v7189_v2 = vmul.f32 %v7173_v55, %v16005_v11  ;;  %v7185_v32 = vmul.f32 %v7172_v39, %v16005_v11  ;;  %v16010_v55 = vld [vmem:[#allocation47_spill] sm:$0xff] }
 0xc56   :  { %v6963_v30 = vsel %vm1125_vm7, %v6950_v28, %v6958_v6 }
 0xc57   :  { %v7208_v28 = vpack.c.bf16 %v7189_v2, %v7185_v32  ;;  %v7169_v32 = vsel %vm1316_vm8, %v16001_v0, %v16007_v40  ;;  %v16012_v40 = vld [vmem:[#allocation49_spill] sm:$0xff] }
 0xc58   :  { %9537 = vmatmul.mubr.msk.bf16.vlgmr.msra.gmra.mrb[24].mxu0 %vm2231_vm11, %v6791_v19 }
 0xc59   :  { %7015 = vmatpush1.bf16.msra.mxu0 %v7000_v58  ;;  %v6952_v56 = vpop.permute.xlu0 %6951  ;;  %v14158_v49 = vpop.permute.xlu1 %7148  ;;  %6849 = vmatprep.mubr.bf16.mxu0 %v15805_v24  ;;  %v16008_v58 = vld [vmem:[#allocation77_spill] sm:$0xff] }
 0xc5a   :  { %v6968_v13 = vsel %vm1125_vm7, %v6944_v17, %v6952_v56  ;;  %v7176_v50 = vsel %vm1316_vm8, %v16008_v58, %v16004_v61  ;;  %v7180_v18 = vsel %vm1316_vm8, %v16009_v5, %v16008_v58 }
 0xc5b   :  { %v6990_v9 = vmul.f32 %v6968_v13, %v15991_v29  ;;  %v7188_v13 = vmul.f32 %v7177_v26, %v16010_v55 }
 0xc5c   :  { %9539 = vmatmul.mubr.msk.bf16.vlgmr.msra.gmra.mrb[24].mxu1 %vm2231_vm11, %v6791_v19  ;;  %v6985_v19 = vmul.f32 %v6971_v52, %v15999_v62 }
 0xc5d   :  { %7068 = vmatpush1.bf16.msra.mxu1 %v7002_v42  ;;  %v6936_v36 = vpop.permute.xlu0 %6935  ;;  %v14177_v27 = vpop.permute.xlu1 %7156  ;;  %v7005_v53 = vpack.c.bf16 %v6990_v9, %v6986_v57  ;;  %6902 = vmatprep.mubr.bf16.mxu1 %v15805_v24  ;;  %v16011_v42 = vld [vmem:[#allocation46_spill] sm:$0xff]  ;;  %v6987_v9 = vmul.f32 %v6963_v30, %v16000_v10 }
 0xc5e   :  { %v6972_v54 = vsel %vm1125_vm7, %v6936_v36, %v6944_v17  ;;  %v6975_v17 = vsel %vm1125_vm7, %v6958_v6, %v6934_v4  ;;  %v6994_v4 = vld [vmem:[#allocation13 + $0xa0] sm:$0xff]  ;;  %v6995_v6 = vld [vmem:[#allocation13 + $0xa8] sm:$0xff]  ;;  %v7191_v39 = vmul.f32 %v7181_v16, %v16011_v42 }
 0xc5f   :  { %v6989_v48 = vmul.f32 %v6972_v54, %v15999_v62  ;;  %7016 = vmatprep.subr.bf16.mxu0 %v7005_v53  ;;  %v6988_v52 = vmul.f32 %v6975_v17, %v15998_v8  ;;  %v7187_v54 = vmul.f32 %v7180_v18, %v16011_v42  ;;  %v7174_v17 = vsel %vm1316_vm8, %v14158_v49, %v14177_v27 }
 0xc60   :  { %9538 = vmatmul.mubr.msk.bf16.gmra.mrb[28].mxu0 %vm2231_vm11, %v6792_v35 }
 0xc61   :  { %v7004_v1 = vpack.c.bf16 %v6989_v48, %v6985_v19  ;;  %v6960_v47 = vpop.permute.xlu0 %6959  ;;  %v14206_v34 = vpop.permute.xlu1 %7140  ;;  %7046 = vmatprep.mubr.bf16.mxu0 %v15805_v24  ;;  %v7168_v48 = vsel %vm1316_vm8, %v16003_v59, %v16009_v5  ;;  %v7210_v30 = vpack.c.bf16 %v7191_v39, %v7187_v54  ;;  %v6996_v59 = vld [vmem:[#allocation13 + $0xb0] sm:$0xff]  ;;  %v6997_v5 = vld [vmem:[#allocation13 + $0xb8] sm:$0xff]  ;;  %v16016_v39 = vld [vmem:[#allocation86_spill] sm:$0xff] }
 0xc62   :  { %v6964_v61 = vsel %vm1125_vm7, %v6952_v56, %v6960_v47  ;;  %v6976_v57 = vsel %vm1125_vm7, %v6960_v47, %v6936_v36  ;;  %v6998_v56 = vpack.c.bf16 %v6995_v6, %v6994_v4  ;;  %v7184_v36 = vmul.f32 %v7176_v50, %v16010_v55  ;;  %v16014_v47 = vld [vmem:[#allocation83_spill] sm:$0xff] }
 0xc63   :  { %v6991_v2 = vmul.f32 %v6964_v61, %v16000_v10  ;;  %v6992_v53 = vmul.f32 %v6976_v57, %v15998_v8  ;;  %7017 = vmatpush1.bf16.msra.mxu0 %v7004_v1  ;;  %v7186_v58 = vmul.f32 %v7168_v48, %v16012_v40  ;;  %v16013_v1 = vld [vmem:[#allocation82_spill] sm:$0xff]  ;;  %v7193_v57 = vmul.f32 %v7174_v17, %v16005_v11 }
 0xc64   :  { %9540 = vmatmul.mubr.msk.bf16.gmra.mrb[28].mxu1 %vm2231_vm11, %v6792_v35  ;;  %7221 = vmatprep.subr.bf16.mxu0 %v7208_v28  ;;  %v7207_v0 = vpack.c.bf16 %v7188_v13, %v7184_v36  ;;  %v7190_v35 = vmul.f32 %v7169_v32, %v16012_v40  ;;  %v7380_v28 = vsel %vm1507_vm9, %v16014_v47, %v16013_v1  ;;  %v16015_v13 = vld [vmem:[#allocation81_spill] sm:$0xff] }
 0xc65   :  { %v7006_v3 = vpack.c.bf16 %v6991_v2, %v6987_v9  ;;  %v7151_v26 = vpop.permute.xlu0 %7150  ;;  %v7165_v16 = vpop.permute.xlu1 %7164  ;;  %v7007_v19 = vpack.c.bf16 %v6992_v53, %v6988_v52  ;;  %7099 = vmatprep.mubr.bf16.mxu1 %v15805_v24  ;;  %v7379_v61 = vsel %vm1507_vm9, %v16016_v39, %v16015_v13  ;;  %v7178_v52 = vsel %vm1316_vm8, %v14206_v34, %v14158_v49  ;;  %v16017_v53 = vld [vmem:[#allocation48_spill] sm:$0xff] }
 0xc66   :  { %v7209_v6 = vpack.c.bf16 %v7190_v35, %v7186_v58  ;;  %v6999_v2 = vpack.c.bf16 %v6997_v5, %v6996_v59  ;;  %v7396_v32 = vmul.f32 %v7380_v28, %v16017_v53  ;;  %v7170_v58 = vsel %vm1316_vm8, %v14177_v27, %v7165_v16  ;;  %v16020_v59 = vld [vmem:[#allocation85_spill] sm:$0xff] }
 0xc67   :  { %7069 = vmatprep.subr.bf16.mxu1 %v7007_v19  ;;  %v7392_v19 = vmul.f32 %v7379_v61, %v16017_v53  ;;  %v7383_v5 = vsel %vm1507_vm9, %v16020_v59, %v16016_v39 }
 0xc68   :  { %9541 = vmatmul.mubr.msk.bf16.vlgmr.msra.gmra.mrb[24].mxu0 %vm2231_vm11, %v6998_v56  ;;  %7070 = vmatpush1.bf16.msra.mxu1 %v7006_v3 }
 0xc69   :  { %7222 = vmatpush1.bf16.msra.mxu0 %v7207_v0  ;;  %v7159_v50 = vpop.permute.xlu0 %7158  ;;  %7274 = vmatprep.subr.bf16.mxu1 %v7210_v30  ;;  %v14238_v18 = vpop.permute.xlu1 %7355  ;;  %v16018_v0 = vld [vmem:[#allocation89_spill] sm:$0xff]  ;;  %v7192_v30 = vmul.f32 %v7178_v52, %v16010_v55  ;;  %v7415_v27 = vpack.c.bf16 %v7396_v32, %v7392_v19  ;;  %v16023_v52 = vld [vmem:[#allocation50_spill] sm:$0xff] }
 0xc6a   :  { %v7175_v4 = vsel %vm1316_vm8, %v7151_v26, %v7159_v50  ;;  %7056 = vmatprep.mubr.bf16.mxu0 %v15805_v24  ;;  %v7384_v49 = vsel %vm1507_vm9, %v16018_v0, %v16014_v47  ;;  %v16021_v47 = vld [vmem:[#allocation88_spill] sm:$0xff] }
 0xc6b   :  { %v7197_v9 = vmul.f32 %v7175_v4, %v16005_v11  ;;  %v7387_v28 = vsel %vm1507_vm9, %v16021_v47, %v16020_v59  ;;  %v7375_v59 = vsel %vm1507_vm9, %v16015_v13, %v16021_v47  ;;  %v7203_v13 = vld [vmem:[#allocation13 + $0xd0] sm:$0xff]  ;;  %v7204_v47 = vld [vmem:[#allocation13 + $0xd8] sm:$0xff] }
 0xc6c   :  { %9543 = vmatmul.mubr.msk.bf16.vlgmr.msra.gmra.mrb[24].mxu1 %vm2231_vm11, %v6998_v56  ;;  %v16019_v56 = vld [vmem:[#allocation87_spill] sm:$0xff] }
 0xc6d   :  { %7275 = vmatpush1.bf16.msra.mxu1 %v7209_v6  ;;  %v7143_v36 = vpop.permute.xlu0 %7142  ;;  %v14259_v54 = vpop.permute.xlu1 %7363  ;;  %v7212_v3 = vpack.c.bf16 %v7197_v9, %v7193_v57  ;;  %7109 = vmatprep.mubr.bf16.mxu1 %v15805_v24  ;;  %v7388_v35 = vsel %vm1507_vm9, %v16019_v56, %v16018_v0  ;;  %v7201_v57 = vld [vmem:[#allocation13 + $0xc0] sm:$0xff]  ;;  %v7194_v0 = vmul.f32 %v7170_v58, %v16012_v40 }
 0xc6e   :  { %v7179_v48 = vsel %vm1316_vm8, %v7143_v36, %v7151_v26  ;;  %v7182_v26 = vsel %vm1316_vm8, %v7165_v16, %v14206_v34  ;;  %v7202_v34 = vld [vmem:[#allocation13 + $0xc8] sm:$0xff]  ;;  %v16022_v16 = vld [vmem:[#allocation51_spill] sm:$0xff] }
 0xc6f   :  { %v7196_v17 = vmul.f32 %v7179_v48, %v16010_v55  ;;  %7223 = vmatprep.subr.bf16.mxu0 %v7212_v3  ;;  %v7395_v9 = vmul.f32 %v7384_v49, %v16022_v16  ;;  %v7398_v3 = vmul.f32 %v7388_v35, %v16023_v52  ;;  %v7376_v49 = vsel %vm1507_vm9, %v16013_v1, %v16019_v56  ;;  %v16024_v56 = vld [vmem:[#allocation53_spill] sm:$0xff] }
 0xc70   :  { %9542 = vmatmul.mubr.msk.bf16.gmra.mrb[28].mxu0 %vm2231_vm11, %v6999_v2  ;;  %v7394_v35 = vmul.f32 %v7387_v28, %v16023_v52  ;;  %v7393_v28 = vmul.f32 %v7375_v59, %v16024_v56 }
 0xc71   :  { %v7211_v4 = vpack.c.bf16 %v7196_v17, %v7192_v30  ;;  %v7167_v6 = vpop.permute.xlu0 %7166  ;;  %v7348_v61 = vpop.permute.xlu1 %7347  ;;  %7253 = vmatprep.mubr.bf16.mxu0 %v15805_v24  ;;  %v7195_v30 = vmul.f32 %v7182_v26, %v16011_v42 }
 0xc72   :  { %v7171_v39 = vsel %vm1316_vm8, %v7159_v50, %v7167_v6  ;;  %v7183_v48 = vsel %vm1316_vm8, %v7167_v6, %v7143_v36  ;;  %v7205_v50 = vpack.c.bf16 %v7202_v34, %v7201_v57  ;;  %v7391_v36 = vmul.f32 %v7383_v5, %v16022_v16 }
 0xc73   :  { %v7198_v32 = vmul.f32 %v7171_v39, %v16012_v40  ;;  %v7199_v19 = vmul.f32 %v7183_v48, %v16011_v42  ;;  %7224 = vmatpush1.bf16.msra.mxu0 %v7211_v4  ;;  %v7417_v6 = vpack.c.bf16 %v7398_v3, %v7394_v35  ;;  %v7381_v5 = vsel %vm1507_vm9, %v14238_v18, %v14259_v54  ;;  %v16025_v35 = vld [vmem:[#allocation52_spill] sm:$0xff] }
 0xc74   :  { %9544 = vmatmul.mubr.msk.bf16.gmra.mrb[28].mxu1 %vm2231_vm11, %v6999_v2  ;;  %7428 = vmatprep.subr.bf16.mxu0 %v7415_v27  ;;  %v7414_v1 = vpack.c.bf16 %v7395_v9, %v7391_v36  ;;  %v7397_v2 = vmul.f32 %v7376_v49, %v16024_v56  ;;  %v7400_v3 = vmul.f32 %v7381_v5, %v16017_v53 }
 0xc75   :  { %v7213_v17 = vpack.c.bf16 %v7198_v32, %v7194_v0  ;;  %v7358_v58 = vpop.permute.xlu0 %7357  ;;  %v7214_v26 = vpack.c.bf16 %v7199_v19, %v7195_v30  ;;  %7306 = vmatprep.mubr.bf16.mxu1 %v15805_v24  ;;  %v7372_v4 = vpop.permute.xlu1 %7371  ;;  %v7385_v0 = vsel %vm1507_vm9, %v7348_v61, %v14238_v18  ;;  %v7206_v30 = vpack.c.bf16 %v7204_v47, %v7203_v13 }
 0xc76   :  { %v7416_v9 = vpack.c.bf16 %v7397_v2, %v7393_v28  ;;  %v7587_v32 = vsel %vm1698_vm10, %v14086_v63, %v14107_v14  ;;  %v7377_v36 = vsel %vm1507_vm9, %v14259_v54, %v7372_v4  ;;  %v7389_v59 = vsel %vm1507_vm9, %v7372_v4, %v7348_v61  ;;  %v7408_v28 = vld [vmem:[#allocation13 + $0xe0] sm:$0xff] }
 0xc77   :  { %7276 = vmatprep.subr.bf16.mxu1 %v7214_v26  ;;  %v7399_v26 = vmul.f32 %v7385_v0, %v16022_v16  ;;  %v7603_v2 = vmul.f32 %v7587_v32, %v16025_v35  ;;  %v7595_v61 = vsel %vm1698_vm10, %v14134_v38, %v14123_v43  ;;  %v7401_v4 = vmul.f32 %v7377_v36, %v16024_v56 }
 0xc78   :  { %9545 = vmatmul.mubr.msk.bf16.vlgmr.msra.gmra.mrb[24].mxu0 %vm2231_vm11, %v7205_v50  ;;  %7277 = vmatpush1.bf16.msra.mxu1 %v7213_v17  ;;  %v7402_v13 = vmul.f32 %v7389_v59, %v16023_v52 }
 0xc79   :  { %7429 = vmatpush1.bf16.msra.mxu0 %v7414_v1  ;;  %v7366_v27 = vpop.permute.xlu0 %7365  ;;  %7481 = vmatprep.subr.bf16.mxu1 %v7417_v6 }
 0xc7a   :  { %v7382_v57 = vsel %vm1507_vm9, %v7358_v58, %v7366_v27  ;;  %v7567_v34 = vpop.permute.xlu1 %7566  ;;  %7263 = vmatprep.mubr.bf16.mxu0 %v15805_v24 }
 0xc7b   :  { %v7404_v39 = vmul.f32 %v7382_v57, %v16017_v53  ;;  %v7586_v48 = vsel %vm1698_vm10, %v14088_v20, %v7567_v34 }
 0xc7c   :  { %9547 = vmatmul.mubr.msk.bf16.vlgmr.msra.gmra.mrb[24].mxu1 %vm2231_vm11, %v7205_v50  ;;  %v7599_v17 = vmul.f32 %v7586_v48, %v16025_v35 }
 0xc7d   :  { %7482 = vmatpush1.bf16.msra.mxu1 %v7416_v9  ;;  %v7350_v19 = vpop.permute.xlu0 %7349  ;;  %v7419_v49 = vpack.c.bf16 %v7404_v39, %v7400_v3  ;;  %7316 = vmatprep.mubr.bf16.mxu1 %v15805_v24  ;;  %v16026_v3 = vld [vmem:[#allocation55_spill] sm:$0xff] }
 0xc7e   :  { %v7386_v18 = vsel %vm1507_vm9, %v7350_v19, %v7358_v58  ;;  %v7551_v50 = vpop.permute.xlu1 %7550  ;;  %v7591_v58 = vsel %vm1698_vm10, %v14123_v43, %v14086_v63  ;;  %v7622_v9 = vpack.c.bf16 %v7603_v2, %v7599_v17  ;;  %v16028_v2 = vld [vmem:[#allocation56_spill] sm:$0xff] }
 0xc7f   :  { %v7403_v1 = vmul.f32 %v7386_v18, %v16022_v16  ;;  %7430 = vmatprep.subr.bf16.mxu0 %v7419_v49  ;;  %v7590_v54 = vsel %vm1698_vm10, %v7551_v50, %v14088_v20  ;;  %v7409_v20 = vld [vmem:[#allocation13 + $0xe8] sm:$0xff]  ;;  %v7602_v36 = vmul.f32 %v7591_v58, %v16026_v3 }
 0xc80   :  { %9546 = vmatmul.mubr.msk.bf16.gmra.mrb[28].mxu0 %vm2231_vm11, %v7206_v30  ;;  %v7598_v43 = vmul.f32 %v7590_v54, %v16026_v3  ;;  %v16027_v49 = vld [vmem:[#allocation54_spill] sm:$0xff] }
 0xc81   :  { %v7418_v6 = vpack.c.bf16 %v7403_v1, %v7399_v26  ;;  %v7374_v5 = vpop.permute.xlu0 %7373  ;;  %7460 = vmatprep.mubr.bf16.mxu0 %v15805_v24  ;;  %v7605_v17 = vmul.f32 %v7595_v61, %v16027_v49 }
 0xc82   :  { %v7378_v47 = vsel %vm1507_vm9, %v7366_v27, %v7374_v5  ;;  %v7390_v63 = vsel %vm1507_vm9, %v7374_v5, %v7350_v19  ;;  %v7575_v57 = vpop.permute.xlu1 %7574  ;;  %v7412_v19 = vpack.c.bf16 %v7409_v20, %v7408_v28  ;;  %v7621_v1 = vpack.c.bf16 %v7602_v36, %v7598_v43 }
 0xc83   :  { %v7405_v39 = vmul.f32 %v7378_v47, %v16024_v56  ;;  %v7406_v48 = vmul.f32 %v7390_v63, %v16023_v52  ;;  %v7594_v0 = vsel %vm1698_vm10, %v7575_v57, %v7551_v50  ;;  %7431 = vmatpush1.bf16.msra.mxu0 %v7418_v6  ;;  %v7582_v32 = vsel %vm1698_vm10, %v7567_v34, %v7575_v57  ;;  %v7411_v6 = vld [vmem:[#allocation13 + $0xf8] sm:$0xff] }
 0xc84   :  { %v7601_v27 = vmul.f32 %v7594_v0, %v16027_v49  ;;  %9548 = vmatmul.mubr.msk.bf16.gmra.mrb[28].mxu1 %vm2231_vm11, %v7206_v30  ;;  %7635 = vmatprep.subr.bf16.mxu0 %v7622_v9  ;;  %v7583_v34 = vsel %vm1698_vm10, %v14107_v14, %v14134_v38  ;;  %v7600_v30 = vmul.f32 %v7582_v32, %v16028_v2 }
 0xc85   :  { %v7420_v18 = vpack.c.bf16 %v7405_v39, %v7401_v4  ;;  %v7565_v26 = vpop.permute.xlu0 %7564  ;;  %v7421_v59 = vpack.c.bf16 %v7406_v48, %v7402_v13  ;;  %7513 = vmatprep.mubr.bf16.mxu1 %v15805_v24  ;;  %v7604_v58 = vmul.f32 %v7583_v34, %v16028_v2  ;;  %v7410_v4 = vld [vmem:[#allocation13 + $0xf0] sm:$0xff] }
 0xc86   :  { %v7563_v50 = vpop.permute.xlu1 %7562  ;;  %v7624_v54 = vpack.c.bf16 %v7605_v17, %v7601_v27  ;;  %v7413_v47 = vpack.c.bf16 %v7411_v6, %v7410_v4  ;;  %v7615_v27 = vld [vmem:[#allocation13 + $0x100] sm:$0xff]  ;;  %v7617_v6 = vld [vmem:[#allocation13 + $0x110] sm:$0xff] }
 0xc87   :  { %7483 = vmatprep.subr.bf16.mxu1 %v7421_v59  ;;  %v7623_v38 = vpack.c.bf16 %v7604_v58, %v7600_v30 }
 0xc88   :  { %9549 = vmatmul.mubr.msk.bf16.vlgmr.msra.gmra.mrb[24].mxu0 %vm2231_vm11, %v7412_v19  ;;  %7484 = vmatpush1.bf16.msra.mxu1 %v7420_v18 }
 0xc89   :  { %7636 = vmatpush1.bf16.msra.mxu0 %v7621_v1  ;;  %v7573_v61 = vpop.permute.xlu0 %7572  ;;  %7688 = vmatprep.subr.bf16.mxu1 %v7624_v54 }
 0xc8a   :  { %v7589_v5 = vsel %vm1698_vm10, %v7565_v26, %v7573_v61  ;;  %v7571_v14 = vpop.permute.xlu1 %7570  ;;  %7470 = vmatprep.mubr.bf16.mxu0 %v15805_v24 }
 0xc8b   :  { %v7611_v28 = vmul.f32 %v7589_v5, %v16025_v35  ;;  %v7588_v20 = vsel %vm1698_vm10, %v7563_v50, %v7571_v14  ;;  %v7618_v5 = vld [vmem:[#allocation13 + $0x118] sm:$0xff] }
 0xc8c   :  { %v7607_v13 = vmul.f32 %v7588_v20, %v16025_v35  ;;  %9551 = vmatmul.mubr.msk.bf16.vlgmr.msra.gmra.mrb[24].mxu1 %vm2231_vm11, %v7412_v19  ;;  %v7616_v19 = vld [vmem:[#allocation13 + $0x108] sm:$0xff] }
 0xc8d   :  { %7689 = vmatpush1.bf16.msra.mxu1 %v7623_v38  ;;  %v7557_v63 = vpop.permute.xlu0 %7556  ;;  %7523 = vmatprep.mubr.bf16.mxu1 %v15805_v24  ;;  %v7619_v58 = vpack.c.bf16 %v7616_v19, %v7615_v27 }
 0xc8e   :  { %v7593_v57 = vsel %vm1698_vm10, %v7557_v63, %v7565_v26  ;;  %v7555_v9 = vpop.permute.xlu1 %7554  ;;  %v7626_v43 = vpack.c.bf16 %v7611_v28, %v7607_v13 }
 0xc8f   :  { %v7610_v39 = vmul.f32 %v7593_v57, %v16026_v3  ;;  %v7592_v48 = vsel %vm1698_vm10, %v7555_v9, %v7563_v50 }
 0xc90   :  { %v7606_v0 = vmul.f32 %v7592_v48, %v16026_v3  ;;  %9550 = vmatmul.mubr.msk.bf16.gmra.mrb[28].mxu0 %vm2231_vm11, %v7413_v47  ;;  %7637 = vmatprep.subr.bf16.mxu0 %v7626_v43 }
 0xc91   :  { %v7581_v32 = vpop.permute.xlu0 %7580  ;;  %7667 = vmatprep.mubr.bf16.mxu0 %v15805_v24 }
 0xc92   :  { %v7625_v36 = vpack.c.bf16 %v7610_v39, %v7606_v0  ;;  %v7585_v17 = vsel %vm1698_vm10, %v7573_v61, %v7581_v32  ;;  %v7597_v18 = vsel %vm1698_vm10, %v7581_v32, %v7557_v63  ;;  %v7579_v26 = vpop.permute.xlu1 %7578 }
 0xc93   :  { %v7612_v59 = vmul.f32 %v7585_v17, %v16028_v2  ;;  %v7613_v34 = vmul.f32 %v7597_v18, %v16027_v49  ;;  %v7584_v50 = vsel %vm1698_vm10, %v7571_v14, %v7579_v26  ;;  %v7596_v1 = vsel %vm1698_vm10, %v7579_v26, %v7555_v9 }
 0xc94   :  { %v7608_v30 = vmul.f32 %v7584_v50, %v16028_v2  ;;  %v7609_v54 = vmul.f32 %v7596_v1, %v16027_v49  ;;  %9552 = vmatmul.mubr.msk.bf16.gmra.mrb[28].mxu1 %vm2231_vm11, %v7413_v47  ;;  %7638 = vmatpush1.bf16.msra.mxu0 %v7625_v36  ;;  %v7620_v14 = vpack.c.bf16 %v7618_v5, %v7617_v6 }
 0xc95   :  { %7720 = vmatprep.mubr.bf16.mxu1 %v15805_v24 }
 0xc96   :  { %v7627_v61 = vpack.c.bf16 %v7612_v59, %v7608_v30  ;;  %v7628_v4 = vpack.c.bf16 %v7613_v34, %v7609_v54 }
 0xc98   :  { %9553 = vmatmul.mubr.msk.bf16.vlgmr.msra.gmra.mrb[24].mxu0 %vm2231_vm11, %v7619_v58  ;;  %7690 = vmatprep.subr.bf16.mxu1 %v7628_v4 }
 0xc99   :  { %7691 = vmatpush1.bf16.msra.mxu1 %v7627_v61  ;;  %7677 = vmatprep.mubr.bf16.mxu0 %v15805_v24 }
 0xc9c   :  { %9555 = vmatmul.mubr.msk.bf16.vlgmr.msra.gmra.mrb[24].mxu1 %vm2231_vm11, %v7619_v58 }
 0xc9d   :  { %7730 = vmatprep.mubr.bf16.mxu1 %v15805_v24 }
 0xca0   :  { %9554 = vmatmul.mubr.msk.bf16.gmra.mrb[28].mxu0 %vm2231_vm11, %v7620_v14 }
 0xca1   :  { %8133 = vmatprep.mubr.bf16.mxu0 %v15805_v24 }
 0xca2   :  { %v7769_v47 = vpop.permute.xlu0 %7768 }
 0xca3   :  { %v7764_v38 = vpop.permute.xlu1 %7763 }
 0xca4   :  { %9556 = vmatmul.mubr.msk.bf16.gmra.mrb[28].mxu1 %vm2231_vm11, %v7620_v14 }
 0xca5   :  { %8174 = vmatprep.mubr.bf16.mxu1 %v15805_v24 }
 0xca6   :  { %v7779_v4 = vpop.permute.xlu0 %7778 }
 0xca7   :  { %v7774_v34 = vpop.permute.xlu1 %7773 }
 0xd6b   :  { %v7669_v28 = vpop.f32.mrb[24].mxu0 }
 0xd6c   :  { %v7781_v20 = vadd.f32 %v7764_v38, %v7669_v28  ;;  %v7671_v13 = vpop.f32.mrb[25].mxu0 }
 0xd6d   :  { %v7782_v63 = vadd.f32 %v7764_v38, %v7671_v13  ;;  %v7673_v57 = vpop.f32.mrb[26].mxu0 }
 0xd6e   :  { %v7785_v9 = vadd.f32 %v7769_v47, %v7673_v57  ;;  %v7675_v43 = vpop.f32.mrb[27].mxu0 }
 0xd6f   :  { %v7786_v39 = vadd.f32 %v7769_v47, %v7675_v43  ;;  %v7722_v48 = vpop.f32.mrb[24].mxu1  ;;  %v7797_v0 = vadd.f32 %v7782_v63, %v7781_v20 }
 0xd70   :  { %v7783_v32 = vadd.f32 %v7764_v38, %v7722_v48  ;;  %v7724_v27 = vpop.f32.mrb[25].mxu1 }
 0xd71   :  { %v7784_v19 = vadd.f32 %v7764_v38, %v7724_v27  ;;  %v7726_v36 = vpop.f32.mrb[26].mxu1  ;;  %v7802_v17 = vadd.f32 %v7786_v39, %v7785_v9 }
 0xd72   :  { %v7798_v18 = vadd.f32 %v7797_v0, %v7783_v32  ;;  %v7787_v26 = vadd.f32 %v7769_v47, %v7726_v36  ;;  %v7728_v59 = vpop.f32.mrb[27].mxu1 }
 0xd73   :  { %v7679_v50 = vpop.f32.mrb[28].mxu0  ;;  %v7788_v1 = vadd.f32 %v7769_v47, %v7728_v59 }
 0xd74   :  { %v7799_v30 = vadd.f32 %v7798_v18, %v7784_v19  ;;  %v7803_v54 = vadd.f32 %v7802_v17, %v7787_v26  ;;  %v7789_v58 = vadd.f32 %v7774_v34, %v7679_v50  ;;  %v7681_v61 = vpop.f32.mrb[29].mxu0 }
 0xd75   :  { %v7790_v6 = vadd.f32 %v7774_v34, %v7681_v61  ;;  %v7683_v5 = vpop.f32.mrb[30].mxu0 }
 0xd76   :  { %v7804_v14 = vadd.f32 %v7803_v54, %v7788_v1  ;;  %v7793_v28 = vadd.f32 %v7779_v4, %v7683_v5  ;;  %v7685_v13 = vpop.f32.mrb[31].mxu0  ;;  %7800 = vadd.xlane.f32.xlu1 %v7799_v30 }
 0xd77   :  { %v7794_v38 = vadd.f32 %v7779_v4, %v7685_v13  ;;  %v7732_v57 = vpop.f32.mrb[28].mxu1  ;;  %v7807_v43 = vadd.f32 %v7790_v6, %v7789_v58 }
 0xd78   :  { %v7791_v48 = vadd.f32 %v7774_v34, %v7732_v57  ;;  %7805 = vadd.xlane.f32.xlu0 %v7804_v14  ;;  %v7734_v0 = vpop.f32.mrb[29].mxu1 }
 0xd79   :  { %v7792_v27 = vadd.f32 %v7774_v34, %v7734_v0  ;;  %v7736_v36 = vpop.f32.mrb[30].mxu1  ;;  %v7812_v47 = vadd.f32 %v7794_v38, %v7793_v28 }
 0xd7a   :  { %v7808_v18 = vadd.f32 %v7807_v43, %v7791_v48  ;;  %v7795_v17 = vadd.f32 %v7779_v4, %v7736_v36  ;;  %v7738_v59 = vpop.f32.mrb[31].mxu1 }
 0xd7b   :  { %v7796_v50 = vadd.f32 %v7779_v4, %v7738_v59 }
 0xd7c   :  { %v7809_v44 = vadd.f32 %v7808_v18, %v7792_v27  ;;  %v7813_v61 = vadd.f32 %v7812_v47, %v7795_v17 }
 0xd7e   :  { %v7814_v21 = vadd.f32 %v7813_v61, %v7796_v50  ;;  %7810 = vadd.xlane.f32.xlu0 %v7809_v44 }
 0xd80   :  { %7815 = vadd.xlane.f32.xlu1 %v7814_v21 }
 0xe03   :  { %v7801_v54 = vpop.xlane.xlu1 %7800 }
 0xe04   :  { %v7817_v30 = vmul.f32 0.001953125, %v7801_v54 }
 0xe05   :  { %v7806_v5 = vpop.xlane.xlu0 %7805 }
 0xe06   :  { %v7821_v13 = vsub.f32 %v7781_v20, %v7817_v30  ;;  %v7822_v37 = vsub.f32 %v7782_v63, %v7817_v30  ;;  %v7818_v57 = vmul.f32 0.001953125, %v7806_v5  ;;  %v7823_v14 = vsub.f32 %v7783_v32, %v7817_v30 }
 0xe07   :  { %v14431_v4 = vsub.f32 %v7784_v19, %v7817_v30 }
 0xe08   :  { %v14425_v45 = vsub.f32 %v7785_v9, %v7818_v57  ;;  %v14427_v34 = vsub.f32 %v7786_v39, %v7818_v57  ;;  %v7837_v43 = vmul.f32 %v7821_v13, %v7821_v13  ;;  %v14429_v0 = vsub.f32 %v7787_v26, %v7818_v57 }
 0xe09   :  { %v7838_v36 = vmul.f32 %v7822_v37, %v7822_v37  ;;  %v7839_v63 = vmul.f32 %v7823_v14, %v7823_v14  ;;  %v14437_v32 = vsub.f32 %v7788_v1, %v7818_v57  ;;  %v7840_v26 = vmul.f32 %v14431_v4, %v14431_v4 }
 0xe0a   :  { %v7841_v21 = vmul.f32 %v14425_v45, %v14425_v45  ;;  %v7842_v44 = vmul.f32 %v14427_v34, %v14427_v34  ;;  %v7843_v59 = vmul.f32 %v14429_v0, %v14429_v0 }
 0xe0b   :  { %v7811_v20 = vpop.xlane.xlu0 %7810  ;;  %v7853_v47 = vadd.f32 %v7838_v36, %v7837_v43  ;;  %v7844_v1 = vmul.f32 %v14437_v32, %v14437_v32 }
 0xe0c   :  { %v7819_v9 = vmul.f32 0.001953125, %v7811_v20  ;;  %v7858_v39 = vadd.f32 %v7842_v44, %v7841_v21 }
 0xe0d   :  { %v7816_v18 = vpop.xlane.xlu1 %7815  ;;  %v7854_v19 = vadd.f32 %v7853_v47, %v7839_v63 }
 0xe0e   :  { %v14443_v61 = vsub.f32 %v7789_v58, %v7819_v9  ;;  %v14445_v54 = vsub.f32 %v7790_v6, %v7819_v9  ;;  %v7820_v30 = vmul.f32 0.001953125, %v7816_v18  ;;  %v14447_v5 = vsub.f32 %v7791_v48, %v7819_v9 }
 0xe0f   :  { %v7855_v43 = vadd.f32 %v7854_v19, %v7840_v26  ;;  %v7859_v57 = vadd.f32 %v7858_v39, %v7843_v59  ;;  %v14459_v20 = vsub.f32 %v7792_v27, %v7819_v9 }
 0xe10   :  { %v14451_v36 = vsub.f32 %v7793_v28, %v7820_v30  ;;  %v14453_v21 = vsub.f32 %v7794_v38, %v7820_v30  ;;  %v14455_v44 = vsub.f32 %v7795_v17, %v7820_v30  ;;  %v7845_v58 = vmul.f32 %v14443_v61, %v14443_v61 }
 0xe11   :  { %7856 = vadd.xlane.f32.xlu0 %v7855_v43  ;;  %v7860_v6 = vadd.f32 %v7859_v57, %v7844_v1  ;;  %v7846_v48 = vmul.f32 %v14445_v54, %v14445_v54  ;;  %v14463_v63 = vsub.f32 %v7796_v50, %v7820_v30  ;;  %v7847_v17 = vmul.f32 %v14447_v5, %v14447_v5 }
 0xe12   :  { %v7849_v28 = vmul.f32 %v14451_v36, %v14451_v36  ;;  %v7850_v38 = vmul.f32 %v14453_v21, %v14453_v21  ;;  %v7851_v27 = vmul.f32 %v14455_v44, %v14455_v44  ;;  %v7848_v39 = vmul.f32 %v14459_v20, %v14459_v20 }
 0xe13   :  { %7861 = vadd.xlane.f32.xlu1 %v7860_v6  ;;  %v7863_v47 = vadd.f32 %v7846_v48, %v7845_v58  ;;  %v7852_v18 = vmul.f32 %v14463_v63, %v14463_v63 }
 0xe14   :  { %v7868_v9 = vadd.f32 %v7850_v38, %v7849_v28 }
 0xe15   :  { %v7864_v50 = vadd.f32 %v7863_v47, %v7847_v17 }
 0xe16   :  { %v7869_v26 = vadd.f32 %v7868_v9, %v7851_v27 }
 0xe17   :  { %v7865_v19 = vadd.f32 %v7864_v50, %v7848_v39 }
 0xe18   :  { %v7870_v59 = vadd.f32 %v7869_v26, %v7852_v18 }
 0xe19   :  { %7866 = vadd.xlane.f32.xlu0 %v7865_v19 }
 0xe1a   :  { %7871 = vadd.xlane.f32.xlu1 %v7870_v59 }
 0xe9e   :  { %v7857_v30 = vpop.xlane.xlu0 %7856 }
 0xe9f   :  { %v7873_v43 = vmul.f32 0.001953125, %v7857_v30 }
 0xea0   :  { %v7862_v1 = vpop.xlane.xlu1 %7861 }
 0xea1   :  { %v7877_v57 = vadd.f32 1e-05, %v7873_v43  ;;  %v7874_v58 = vmul.f32 0.001953125, %v7862_v1 }
 0xea3   :  { %10145 = vrsqrt.f32 %v7877_v57  ;;  %v7878_v6 = vadd.f32 1e-05, %v7874_v58 }
 0xea5   :  { %10147 = vrsqrt.f32 %v7878_v6 }
 0xea7   :  { %v7872_v58 = vpop.xlane.xlu1 %7871 }
 0xead   :  { %v10146_v48 = vpop.eup %10145 }
 0xeae   :  { %v7885_v28 = vmul.f32 %v10146_v48, %v7821_v13  ;;  %v7886_v38 = vmul.f32 %v10146_v48, %v7822_v37  ;;  %v7887_v17 = vmul.f32 %v10146_v48, %v7823_v14  ;;  %v7888_v39 = vmul.f32 %v10146_v48, %v14431_v4 }
 0xeaf   :  { %v10148_v47 = vpop.eup %10147  ;;  %v7876_v48 = vmul.f32 0.001953125, %v7872_v58 }
 0xeb0   :  { %vm7901_vm0 = vcmp.ge.f32.partialorder %v7885_v28, 0.0  ;;  %v7917_v25 = vmul.f32 0.2, %v7885_v28  ;;  %vm7902_vm2 = vcmp.ge.f32.partialorder %v7886_v38, 0.0  ;;  %v7918_v27 = vmul.f32 0.2, %v7886_v38 }
 0xeb1   :  { %v7890_v9 = vmul.f32 %v10148_v47, %v14427_v34  ;;  %v7919_v26 = vmul.f32 0.2, %v7887_v17  ;;  %v7891_v19 = vmul.f32 %v10148_v47, %v14429_v0  ;;  %vm7903_vm4 = vcmp.ge.f32.partialorder %v7887_v17, 0.0 }
 0xeb2   :  { %v14479_v50 = vsel %vm7901_vm0, %v7885_v28, %v7917_v25  ;;  %v14481_v18 = vsel %vm7902_vm2, %v7886_v38, %v7918_v27  ;;  %v7920_v13 = vmul.f32 0.2, %v7888_v39  ;;  %v7892_v4 = vmul.f32 %v10148_v47, %v14437_v32 }
 0xeb3   :  { %16029 = vst [vmem:[#allocation61_spill] sm:$0xff] %v14479_v50  ;;  %16030 = vst [vmem:[#allocation64_spill] sm:$0xff] %v14481_v18  ;;  %8023 = vrot.lane.b32.xlu0 %v14479_v50, %s10502_s14  ;;  %8031 = vrot.lane.b32.xlu1 %v14481_v18, %s10502_s14  ;;  %vm7906_vm12 = vcmp.ge.f32.partialorder %v7890_v9, 0.0  ;;  %v7922_v37 = vmul.f32 0.2, %v7890_v9  ;;  %v14488_v14 = vsel %vm7903_vm4, %v7887_v17, %v7919_v26  ;;  %vm7904_vm13 = vcmp.ge.f32.partialorder %v7888_v39, 0.0 }
 0xeb4   :  { %16031 = vst [vmem:[#allocation63_spill] sm:$0xff] %v14488_v14  ;;  %v7923_v25 = vmul.f32 0.2, %v7891_v19  ;;  %vm7907_vm14 = vcmp.ge.f32.partialorder %v7891_v19, 0.0  ;;  %v14497_v0 = vsel %vm7904_vm13, %v7888_v39, %v7920_v13  ;;  %v7924_v30 = vmul.f32 0.2, %v7892_v4 }
 0xeb5   :  { %v14490_v34 = vsel %vm7906_vm12, %v7890_v9, %v7922_v37  ;;  %16033 = vst [vmem:[#allocation76_spill] sm:$0xff] %v14497_v0  ;;  %v7889_v43 = vmul.f32 %v10148_v47, %v14425_v45  ;;  %vm7908_vm15 = vcmp.ge.f32.partialorder %v7892_v4, 0.0  ;;  %v7867_v45 = vpop.xlane.xlu0 %7866  ;;  %v7880_v38 = vadd.f32 1e-05, %v7876_v48 }
 0xeb6   :  { %16032 = vst [vmem:[#allocation58_spill] sm:$0xff] %v14490_v34  ;;  %v14499_v59 = vsel %vm7907_vm14, %v7891_v19, %v7923_v25  ;;  %v14506_v32 = vsel %vm7908_vm15, %v7892_v4, %v7924_v30  ;;  %v7875_v6 = vmul.f32 0.001953125, %v7867_v45 }
 0xeb7   :  { %8039 = vrot.lane.b32.xlu1 %v14488_v14, %s10502_s14  ;;  %8033 = vrot.lane.b32.xlu0 %v14490_v34, %s10502_s14  ;;  %16034 = vst [vmem:[#allocation66_spill] sm:$0xff] %v14499_v59  ;;  %16035 = vst [vmem:[#allocation60_spill] sm:$0xff] %v14506_v32  ;;  %v7921_v1 = vmul.f32 0.2, %v7889_v43  ;;  %vm7905_vm0 = vcmp.ge.f32.partialorder %v7889_v43, 0.0 }
 0xeb8   :  { %v7879_v28 = vadd.f32 1e-05, %v7875_v6 }
 0xeb9   :  { %v14512_v57 = vsel %vm7905_vm0, %v7889_v43, %v7921_v1 }
 0xeba   :  { %16036 = vst [vmem:[#allocation65_spill] sm:$0xff] %v14512_v57  ;;  %10149 = vrsqrt.f32 %v7879_v28 }
 0xebb   :  { %8047 = vrot.lane.b32.xlu1 %v14497_v0, %s10502_s14  ;;  %8041 = vrot.lane.b32.xlu0 %v14499_v59, %s10502_s14  ;;  %10151 = vrsqrt.f32 %v7880_v38 }
 0xebf   :  { %7949 = vrot.lane.b32.xlu1 %v14479_v50, %s10504_s12  ;;  %8049 = vrot.lane.b32.xlu0 %v14506_v32, %s10502_s14 }
 0xec3   :  { %7957 = vrot.lane.b32.xlu1 %v14481_v18, %s10504_s12  ;;  %7951 = vrot.lane.b32.xlu0 %v14512_v57, %s10504_s12 }
 0xec4   :  { %v10150_v27 = vpop.eup %10149 }
 0xec5   :  { %v10152_v9 = vpop.eup %10151  ;;  %v7893_v19 = vmul.f32 %v10150_v27, %v14443_v61  ;;  %v7894_v13 = vmul.f32 %v10150_v27, %v14445_v54  ;;  %v7895_v48 = vmul.f32 %v10150_v27, %v14447_v5 }
 0xec6   :  { %v7897_v37 = vmul.f32 %v10152_v9, %v14451_v36  ;;  %v7898_v43 = vmul.f32 %v10152_v9, %v14453_v21 }
 0xec7   :  { %7965 = vrot.lane.b32.xlu1 %v14488_v14, %s10504_s12  ;;  %7959 = vrot.lane.b32.xlu0 %v14490_v34, %s10504_s12  ;;  %v7925_v30 = vmul.f32 0.2, %v7893_v19  ;;  %vm7909_vm2 = vcmp.ge.f32.partialorder %v7893_v19, 0.0  ;;  %vm7910_vm12 = vcmp.ge.f32.partialorder %v7894_v13, 0.0  ;;  %v7926_v36 = vmul.f32 0.2, %v7894_v13 }
 0xec8   :  { %v7929_v1 = vmul.f32 0.2, %v7897_v37  ;;  %vm7913_vm4 = vcmp.ge.f32.partialorder %v7897_v37, 0.0  ;;  %vm7914_vm13 = vcmp.ge.f32.partialorder %v7898_v43, 0.0  ;;  %v7930_v6 = vmul.f32 0.2, %v7898_v43 }
 0xec9   :  { %v14648_v58 = vsel %vm7909_vm2, %v7893_v19, %v7925_v30  ;;  %vm7911_vm14 = vcmp.ge.f32.partialorder %v7895_v48, 0.0 }
 0xecb   :  { %7973 = vrot.lane.b32.xlu1 %v14497_v0, %s10504_s12  ;;  %7967 = vrot.lane.b32.xlu0 %v14499_v59, %s10504_s12 }
 0xecf   :  { %8268 = vrot.lane.b32.xlu1 %v14479_v50, %s10505_s6  ;;  %7975 = vrot.lane.b32.xlu0 %v14506_v32, %s10504_s12 }
 0xed3   :  { %8276 = vrot.lane.b32.xlu1 %v14481_v18, %s10505_s6  ;;  %8270 = vrot.lane.b32.xlu0 %v14512_v57, %s10505_s6 }
 0xed7   :  { %8284 = vrot.lane.b32.xlu1 %v14488_v14, %s10505_s6  ;;  %8278 = vrot.lane.b32.xlu0 %v14490_v34, %s10505_s6 }
 0xedb   :  { %8292 = vrot.lane.b32.xlu1 %v14497_v0, %s10505_s6  ;;  %8286 = vrot.lane.b32.xlu0 %v14499_v59, %s10505_s6 }
 0xedf   :  { %8432 = vrot.lane.b32.xlu1 %v14479_v50, %s10506_s2  ;;  %8294 = vrot.lane.b32.xlu0 %v14506_v32, %s10505_s6 }
 0xee3   :  { %8440 = vrot.lane.b32.xlu1 %v14481_v18, %s10506_s2  ;;  %8434 = vrot.lane.b32.xlu0 %v14512_v57, %s10506_s2 }
 0xee7   :  { %8448 = vrot.lane.b32.xlu1 %v14488_v14, %s10506_s2  ;;  %8442 = vrot.lane.b32.xlu0 %v14490_v34, %s10506_s2 }
 0xeeb   :  { %8456 = vrot.lane.b32.xlu1 %v14497_v0, %s10506_s2  ;;  %8450 = vrot.lane.b32.xlu0 %v14499_v59, %s10506_s2 }
 0xeef   :  { %8696 = vrot.lane.b32.xlu1 %v14479_v50, %s10507_s18  ;;  %8458 = vrot.lane.b32.xlu0 %v14506_v32, %s10506_s2 }
 0xef3   :  { %8704 = vrot.lane.b32.xlu1 %v14481_v18, %s10507_s18  ;;  %8698 = vrot.lane.b32.xlu0 %v14512_v57, %s10507_s18 }
 0xef7   :  { %8712 = vrot.lane.b32.xlu1 %v14488_v14, %s10507_s18  ;;  %8706 = vrot.lane.b32.xlu0 %v14490_v34, %s10507_s18 }
 0xefb   :  { %8720 = vrot.lane.b32.xlu1 %v14497_v0, %s10507_s18  ;;  %8714 = vrot.lane.b32.xlu0 %v14499_v59, %s10507_s18 }
 0xeff   :  { %8860 = vrot.lane.b32.xlu1 %v14479_v50, %s10508_s27  ;;  %8722 = vrot.lane.b32.xlu0 %v14506_v32, %s10507_s18 }
 0xf03   :  { %8868 = vrot.lane.b32.xlu1 %v14481_v18, %s10508_s27  ;;  %8862 = vrot.lane.b32.xlu0 %v14512_v57, %s10508_s27 }
 0xf07   :  { %8876 = vrot.lane.b32.xlu1 %v14488_v14, %s10508_s27  ;;  %8870 = vrot.lane.b32.xlu0 %v14490_v34, %s10508_s27 }
 0xf0b   :  { %8884 = vrot.lane.b32.xlu1 %v14497_v0, %s10508_s27  ;;  %8878 = vrot.lane.b32.xlu0 %v14499_v59, %s10508_s27 }
 0xf0f   :  { %9024 = vrot.lane.b32.xlu1 %v14479_v50, %s10509_s28  ;;  %8886 = vrot.lane.b32.xlu0 %v14506_v32, %s10508_s27 }
 0xf13   :  { %9032 = vrot.lane.b32.xlu1 %v14481_v18, %s10509_s28  ;;  %9026 = vrot.lane.b32.xlu0 %v14512_v57, %s10509_s28 }
 0xf17   :  { %9040 = vrot.lane.b32.xlu1 %v14488_v14, %s10509_s28  ;;  %9034 = vrot.lane.b32.xlu0 %v14490_v34, %s10509_s28 }
 0xf1b   :  { %9048 = vrot.lane.b32.xlu1 %v14497_v0, %s10509_s28  ;;  %9042 = vrot.lane.b32.xlu0 %v14499_v59, %s10509_s28 }
 0xf1f   :  { %9188 = vrot.lane.b32.xlu1 %v14479_v50, %s10510_s26  ;;  %9050 = vrot.lane.b32.xlu0 %v14506_v32, %s10509_s28  ;;  %v7900_v50 = vmul.f32 %v10152_v9, %v14463_v63 }
 0xf21   :  { %vm7916_vm2 = vcmp.ge.f32.partialorder %v7900_v50, 0.0 }
 0xf23   :  { %9196 = vrot.lane.b32.xlu1 %v14481_v18, %s10510_s26  ;;  %9190 = vrot.lane.b32.xlu0 %v14512_v57, %s10510_s26 }
 0xf25   :  { %v14614_v17 = vpop.permute.xlu0 %8023  ;;  %v14616_v47 = vpop.permute.xlu1 %8031 }
 0xf27   :  { %9204 = vrot.lane.b32.xlu1 %v14488_v14, %s10510_s26  ;;  %9198 = vrot.lane.b32.xlu0 %v14490_v34, %s10510_s26  ;;  %v7899_v14 = vmul.f32 %v10152_v9, %v14455_v44  ;;  %v14673_v44 = vsel %vm7910_vm12, %v7894_v13, %v7926_v36 }
 0xf29   :  { %v14622_v39 = vpop.permute.xlu0 %8033  ;;  %v8040_v26 = vpop.permute.xlu1 %8039  ;;  %vm7915_vm15 = vcmp.ge.f32.partialorder %v7899_v14, 0.0 }
 0xf2a   :  { %v8059_v28 = vsel %vm288_vm1, %v14616_v47, %v8040_v26 }
 0xf2b   :  { %9212 = vrot.lane.b32.xlu1 %v14497_v0, %s10510_s26  ;;  %9206 = vrot.lane.b32.xlu0 %v14499_v59, %s10510_s26  ;;  %v14657_v59 = vsel %vm7913_vm4, %v7897_v37, %v7929_v1  ;;  %v8073_v5 = vmul.f32 %v8059_v28, %v10886_v23 }
 0xf2d   :  { %v8042_v25 = vpop.permute.xlu0 %8041  ;;  %v14631_v4 = vpop.permute.xlu1 %8047 }
 0xf2e   :  { %v8060_v61 = vsel %vm288_vm1, %v14622_v39, %v8042_v25  ;;  %v8055_v54 = vsel %vm288_vm1, %v8040_v26, %v14631_v4 }
 0xf2f   :  { %9214 = vrot.lane.b32.xlu0 %v14506_v32, %s10510_s26  ;;  %8025 = vrot.lane.b32.xlu1 %v14512_v57, %s10502_s14  ;;  %v8077_v57 = vmul.f32 %v8060_v61, %v10886_v23  ;;  %v8074_v19 = vmul.f32 %v8055_v54, %v10883_v22  ;;  %v7927_v61 = vmul.f32 0.2, %v7895_v48  ;;  %v7931_v54 = vmul.f32 0.2, %v7899_v14 }
 0xf31   :  { %v14644_v21 = vpop.permute.xlu0 %8049  ;;  %v14646_v45 = vpop.permute.xlu1 %7949  ;;  %v8092_v32 = vpack.c.bf16 %v8077_v57, %v8073_v5  ;;  %v14688_v36 = vsel %vm7911_vm14, %v7895_v48, %v7927_v61  ;;  %v7932_v57 = vmul.f32 0.2, %v7900_v50 }
 0xf32   :  { %v8056_v38 = vsel %vm288_vm1, %v8042_v25, %v14644_v21  ;;  %v14676_v25 = vsel %vm7914_vm13, %v7898_v43, %v7930_v6 }
 0xf33   :  { %v8078_v30 = vmul.f32 %v8056_v38, %v10883_v22  ;;  %8027 = vrot.lane.b32.xlu1 %v14648_v58, %s10502_s14  ;;  %8029 = vrot.lane.b32.xlu0 %v14657_v59, %s10502_s14  ;;  %v7896_v38 = vmul.f32 %v10150_v27, %v14459_v20  ;;  %v14690_v20 = vsel %vm7915_vm15, %v7899_v14, %v7931_v54 }
 0xf34   :  { %v14702_v6 = vsel %vm7916_vm2, %v7900_v50, %v7932_v57 }
 0xf35   :  { %v14668_v26 = vpop.permute.xlu0 %7951  ;;  %v14670_v37 = vpop.permute.xlu1 %7957  ;;  %v8093_v1 = vpack.c.bf16 %v8078_v30, %v8074_v19  ;;  %v7928_v63 = vmul.f32 0.2, %v7896_v38  ;;  %vm7912_vm0 = vcmp.ge.f32.partialorder %v7896_v38, 0.0 }
 0xf37   :  { %8035 = vrot.lane.b32.xlu1 %v14673_v44, %s10502_s14  ;;  %8037 = vrot.lane.b32.xlu0 %v14676_v25, %s10502_s14  ;;  %v14700_v9 = vsel %vm7912_vm0, %v7896_v38, %v7928_v63 }
 0xf38   :  { %8142 = vmatprep.subr.bf16.mxu1 %v8093_v1 }
 0xf39   :  { %8143 = vmatpush1.bf16.msra.mxu1 %v8092_v32  ;;  %v14684_v13 = vpop.permute.xlu0 %7959  ;;  %v14686_v43 = vpop.permute.xlu1 %7965 }
 0xf3b   :  { %8043 = vrot.lane.b32.xlu1 %v14688_v36, %s10502_s14  ;;  %8045 = vrot.lane.b32.xlu0 %v14690_v20, %s10502_s14 }
 0xf3d   :  { %v14696_v27 = vpop.permute.xlu0 %7967  ;;  %v14698_v32 = vpop.permute.xlu1 %7973 }
 0xf3f   :  { %8051 = vrot.lane.b32.xlu1 %v14700_v9, %s10502_s14  ;;  %8053 = vrot.lane.b32.xlu0 %v14702_v6, %s10502_s14 }
 0xf41   :  { %v14708_v14 = vpop.permute.xlu0 %7975  ;;  %v14710_v48 = vpop.permute.xlu1 %8268 }
 0xf42   :  { %16037 = vst [vmem:[#allocation57_spill] sm:$0xff] %v14710_v48 }
 0xf43   :  { %7953 = vrot.lane.b32.xlu1 %v14648_v58, %s10504_s12  ;;  %7955 = vrot.lane.b32.xlu0 %v14657_v59, %s10504_s12 }
 0xf45   :  { %v14716_v28 = vpop.permute.xlu0 %8270  ;;  %v14718_v50 = vpop.permute.xlu1 %8276 }
 0xf46   :  { %16038 = vst [vmem:[#allocation72_spill] sm:$0xff] %v14718_v50 }
 0xf47   :  { %7961 = vrot.lane.b32.xlu1 %v14673_v44, %s10504_s12  ;;  %7963 = vrot.lane.b32.xlu0 %v14676_v25, %s10504_s12 }
 0xf49   :  { %v14724_v19 = vpop.permute.xlu0 %8278  ;;  %v14726_v30 = vpop.permute.xlu1 %8284 }
 0xf4a   :  { %16039 = vst [vmem:[#allocation69_spill] sm:$0xff] %v14726_v30 }
 0xf4b   :  { %7969 = vrot.lane.b32.xlu1 %v14688_v36, %s10504_s12  ;;  %7971 = vrot.lane.b32.xlu0 %v14690_v20, %s10504_s12 }
 0xf4d   :  { %v14732_v5 = vpop.permute.xlu0 %8286  ;;  %v14734_v1 = vpop.permute.xlu1 %8292 }
 0xf4e   :  { %16040 = vst [vmem:[#allocation62_spill] sm:$0xff] %v14734_v1 }
 0xf4f   :  { %7977 = vrot.lane.b32.xlu1 %v14700_v9, %s10504_s12  ;;  %7979 = vrot.lane.b32.xlu0 %v14702_v6, %s10504_s12 }
 0xf51   :  { %v14740_v61 = vpop.permute.xlu0 %8294  ;;  %v14742_v54 = vpop.permute.xlu1 %8432 }
 0xf52   :  { %16041 = vst [vmem:[#allocation67_spill] sm:$0xff] %v14742_v54 }
 0xf53   :  { %8272 = vrot.lane.b32.xlu1 %v14648_v58, %s10505_s6  ;;  %8274 = vrot.lane.b32.xlu0 %v14657_v59, %s10505_s6 }
 0xf55   :  { %v14748_v38 = vpop.permute.xlu0 %8434  ;;  %v14750_v63 = vpop.permute.xlu1 %8440 }
 0xf56   :  { %16042 = vst [vmem:[#allocation71_spill] sm:$0xff] %v14748_v38  ;;  %16043 = vst [vmem:[#allocation68_spill] sm:$0xff] %v14750_v63 }
 0xf57   :  { %8280 = vrot.lane.b32.xlu1 %v14673_v44, %s10505_s6  ;;  %8282 = vrot.lane.b32.xlu0 %v14676_v25, %s10505_s6 }
 0xf59   :  { %v14756_v57 = vpop.permute.xlu0 %8442  ;;  %v14758_v0 = vpop.permute.xlu1 %8448 }
 0xf5a   :  { %16044 = vst [vmem:[#allocation59_spill] sm:$0xff] %v14756_v57  ;;  %16045 = vst [vmem:[#allocation70_spill] sm:$0xff] %v14758_v0 }
 0xf5b   :  { %8288 = vrot.lane.b32.xlu1 %v14688_v36, %s10505_s6  ;;  %8290 = vrot.lane.b32.xlu0 %v14690_v20, %s10505_s6 }
 0xf5d   :  { %v14764_v34 = vpop.permute.xlu0 %8450  ;;  %v14766_v18 = vpop.permute.xlu1 %8456 }
 0xf5e   :  { %16046 = vst [vmem:[#allocation74_spill] sm:$0xff] %v14764_v34  ;;  %16047 = vst [vmem:[#allocation75_spill] sm:$0xff] %v14766_v18 }
 0xf5f   :  { %8296 = vrot.lane.b32.xlu1 %v14700_v9, %s10505_s6  ;;  %8298 = vrot.lane.b32.xlu0 %v14702_v6, %s10505_s6 }
 0xf61   :  { %v14772_v54 = vpop.permute.xlu0 %8458  ;;  %v8697_v63 = vpop.permute.xlu1 %8696 }
 0xf62   :  { %16048 = vst [vmem:[#allocation73_spill] sm:$0xff] %v14772_v54 }
 0xf63   :  { %8436 = vrot.lane.b32.xlu1 %v14648_v58, %s10506_s2  ;;  %8438 = vrot.lane.b32.xlu0 %v14657_v59, %s10506_s2 }
 0xf65   :  { %v8699_v0 = vpop.permute.xlu0 %8698  ;;  %v8705_v38 = vpop.permute.xlu1 %8704 }
 0xf66   :  { %v8736_v18 = vsel %vm1125_vm7, %v8697_v63, %v8705_v38 }
 0xf67   :  { %8444 = vrot.lane.b32.xlu1 %v14673_v44, %s10506_s2  ;;  %8446 = vrot.lane.b32.xlu0 %v14676_v25, %s10506_s2  ;;  %v14789_v31 = vmul.f32 %v8736_v18, %v15999_v62 }
 0xf69   :  { %v8707_v34 = vpop.permute.xlu0 %8706  ;;  %v8713_v54 = vpop.permute.xlu1 %8712  ;;  %16049 = vst [vmem:[#allocation78_spill] sm:$0xff] %v14789_v31 }
 0xf6a   :  { %v8737_v57 = vsel %vm1125_vm7, %v8699_v0, %v8707_v34  ;;  %v8732_v15 = vsel %vm1125_vm7, %v8705_v38, %v8713_v54 }
 0xf6b   :  { %v14792_v30 = vmul.f32 %v8737_v57, %v15999_v62  ;;  %8452 = vrot.lane.b32.xlu1 %v14688_v36, %s10506_s2  ;;  %8454 = vrot.lane.b32.xlu0 %v14690_v20, %s10506_s2  ;;  %v14805_v57 = vmul.f32 %v8732_v15, %v15991_v29 }
 0xf6d   :  { %16050 = vst [vmem:[#allocation84_spill] sm:$0xff] %v14792_v30  ;;  %v8715_v60 = vpop.permute.xlu0 %8714  ;;  %v8721_v48 = vpop.permute.xlu1 %8720 }
 0xf6e   :  { %v8733_v38 = vsel %vm1125_vm7, %v8707_v34, %v8715_v60  ;;  %v8728_v18 = vsel %vm1125_vm7, %v8713_v54, %v8721_v48  ;;  %v8740_v1 = vsel %vm1125_vm7, %v8721_v48, %v8697_v63 }
 0xf6f   :  { %v14808_v62 = vmul.f32 %v8733_v38, %v15991_v29  ;;  %8460 = vrot.lane.b32.xlu1 %v14700_v9, %s10506_s2  ;;  %8462 = vrot.lane.b32.xlu0 %v14702_v6, %s10506_s2  ;;  %v14819_v15 = vmul.f32 %v8728_v18, %v16000_v10  ;;  %v14826_v29 = vmul.f32 %v8740_v1, %v15998_v8 }
 0xf71   :  { %v8723_v31 = vpop.permute.xlu0 %8722  ;;  %v8861_v34 = vpop.permute.xlu1 %8860  ;;  %16051 = vst [vmem:[#allocation79_spill] sm:$0xff] %v14819_v15 }
 0xf72   :  { %v8729_v38 = vsel %vm1125_vm7, %v8715_v60, %v8723_v31  ;;  %v8741_v30 = vsel %vm1125_vm7, %v8723_v31, %v8699_v0 }
 0xf73   :  { %v14829_v50 = vmul.f32 %v8729_v38, %v16000_v10  ;;  %v14832_v48 = vmul.f32 %v8741_v30, %v15998_v8  ;;  %8702 = vrot.lane.b32.xlu0 %v14657_v59, %s10507_s18  ;;  %8700 = vrot.lane.b32.xlu1 %v14648_v58, %s10507_s18 }
 0xf75   :  { %16052 = vst [vmem:[#allocation77_spill] sm:$0xff] %v14829_v50  ;;  %v8863_v63 = vpop.permute.xlu0 %8862  ;;  %v8869_v31 = vpop.permute.xlu1 %8868 }
 0xf76   :  { %v8900_v1 = vsel %vm1316_vm8, %v8861_v34, %v8869_v31 }
 0xf77   :  { %8710 = vrot.lane.b32.xlu0 %v14676_v25, %s10507_s18  ;;  %8708 = vrot.lane.b32.xlu1 %v14673_v44, %s10507_s18  ;;  %v14853_v54 = vmul.f32 %v8900_v1, %v16010_v55 }
 0xf79   :  { %v8871_v30 = vpop.permute.xlu0 %8870  ;;  %v8877_v18 = vpop.permute.xlu1 %8876  ;;  %16053 = vst [vmem:[#allocation80_spill] sm:$0xff] %v14853_v54 }
 0xf7a   :  { %v8901_v38 = vsel %vm1316_vm8, %v8863_v63, %v8871_v30  ;;  %v8896_v60 = vsel %vm1316_vm8, %v8869_v31, %v8877_v18 }
 0xf7b   :  { %v14856_v0 = vmul.f32 %v8901_v38, %v16010_v55  ;;  %8718 = vrot.lane.b32.xlu0 %v14690_v20, %s10507_s18  ;;  %8716 = vrot.lane.b32.xlu1 %v14688_v36, %s10507_s18  ;;  %v14871_v55 = vmul.f32 %v8896_v60, %v16005_v11 }
 0xf7d   :  { %16054 = vst [vmem:[#allocation82_spill] sm:$0xff] %v14856_v0  ;;  %v8879_v50 = vpop.permute.xlu0 %8878  ;;  %v8885_v8 = vpop.permute.xlu1 %8884 }
 0xf7e   :  { %v8897_v31 = vsel %vm1316_vm8, %v8871_v30, %v8879_v50  ;;  %v8892_v1 = vsel %vm1316_vm8, %v8877_v18, %v8885_v8  ;;  %v8904_v38 = vsel %vm1316_vm8, %v8885_v8, %v8861_v34 }
 0xf7f   :  { %v14874_v10 = vmul.f32 %v8897_v31, %v16005_v11  ;;  %8726 = vrot.lane.b32.xlu0 %v14702_v6, %s10507_s18  ;;  %8724 = vrot.lane.b32.xlu1 %v14700_v9, %s10507_s18  ;;  %v14883_v54 = vmul.f32 %v8892_v1, %v16012_v40  ;;  %v14890_v60 = vmul.f32 %v8904_v38, %v16011_v42 }
 0xf81   :  { %v8887_v15 = vpop.permute.xlu0 %8886  ;;  %v9025_v30 = vpop.permute.xlu1 %9024  ;;  %16055 = vst [vmem:[#allocation83_spill] sm:$0xff] %v14883_v54 }
 0xf82   :  { %v8893_v8 = vsel %vm1316_vm8, %v8879_v50, %v8887_v15  ;;  %v8905_v34 = vsel %vm1316_vm8, %v8887_v15, %v8863_v63 }
 0xf83   :  { %v14893_v31 = vmul.f32 %v8893_v8, %v16012_v40  ;;  %v14896_v11 = vmul.f32 %v8905_v34, %v16011_v42  ;;  %8866 = vrot.lane.b32.xlu0 %v14657_v59, %s10508_s27  ;;  %8864 = vrot.lane.b32.xlu1 %v14648_v58, %s10508_s27 }
 0xf85   :  { %16056 = vst [vmem:[#allocation81_spill] sm:$0xff] %v14893_v31  ;;  %v9027_v1 = vpop.permute.xlu0 %9026  ;;  %v9033_v15 = vpop.permute.xlu1 %9032 }
 0xf86   :  { %v9064_v38 = vsel %vm1507_vm9, %v9025_v30, %v9033_v15 }
 0xf87   :  { %8874 = vrot.lane.b32.xlu0 %v14676_v25, %s10508_s27  ;;  %8872 = vrot.lane.b32.xlu1 %v14673_v44, %s10508_s27  ;;  %v14917_v42 = vmul.f32 %v9064_v38, %v16022_v16 }
 0xf89   :  { %v9035_v8 = vpop.permute.xlu0 %9034  ;;  %v9041_v34 = vpop.permute.xlu1 %9040  ;;  %16057 = vst [vmem:[#allocation86_spill] sm:$0xff] %v14917_v42 }
 0xf8a   :  { %v9065_v18 = vsel %vm1507_vm9, %v9027_v1, %v9035_v8  ;;  %v9060_v50 = vsel %vm1507_vm9, %v9033_v15, %v9041_v34 }
 0xf8b   :  { %v14920_v63 = vmul.f32 %v9065_v18, %v16022_v16  ;;  %8882 = vrot.lane.b32.xlu0 %v14690_v20, %s10508_s27  ;;  %8880 = vrot.lane.b32.xlu1 %v14688_v36, %s10508_s27  ;;  %v14935_v16 = vmul.f32 %v9060_v50, %v16017_v53 }
 0xf8d   :  { %v9043_v54 = vpop.permute.xlu0 %9042  ;;  %v9049_v31 = vpop.permute.xlu1 %9048 }
 0xf8e   :  { %v9061_v15 = vsel %vm1507_vm9, %v9035_v8, %v9043_v54  ;;  %v9056_v38 = vsel %vm1507_vm9, %v9041_v34, %v9049_v31  ;;  %v9068_v18 = vsel %vm1507_vm9, %v9049_v31, %v9025_v30 }
 0xf8f   :  { %v14938_v0 = vmul.f32 %v9061_v15, %v16017_v53  ;;  %8890 = vrot.lane.b32.xlu0 %v14702_v6, %s10508_s27  ;;  %8888 = vrot.lane.b32.xlu1 %v14700_v9, %s10508_s27  ;;  %v14947_v42 = vmul.f32 %v9056_v38, %v16024_v56  ;;  %v14954_v50 = vmul.f32 %v9068_v18, %v16023_v52 }
 0xf91   :  { %v9051_v40 = vpop.permute.xlu0 %9050  ;;  %v9189_v8 = vpop.permute.xlu1 %9188  ;;  %16058 = vst [vmem:[#allocation89_spill] sm:$0xff] %v14947_v42  ;;  %16059 = vst [vmem:[#allocation87_spill] sm:$0xff] %v14954_v50 }
 0xf92   :  { %v9057_v30 = vsel %vm1507_vm9, %v9043_v54, %v9051_v40  ;;  %v9069_v31 = vsel %vm1507_vm9, %v9051_v40, %v9027_v1 }
 0xf93   :  { %v14957_v15 = vmul.f32 %v9057_v30, %v16024_v56  ;;  %v14960_v53 = vmul.f32 %v9069_v31, %v16023_v52  ;;  %9030 = vrot.lane.b32.xlu0 %v14657_v59, %s10509_s28  ;;  %9028 = vrot.lane.b32.xlu1 %v14648_v58, %s10509_s28  ;;  %v8063_v56 = vsel %vm288_vm1, %v14614_v17, %v14616_v47 }
 0xf95   :  { %16060 = vst [vmem:[#allocation85_spill] sm:$0xff] %v14957_v15  ;;  %v9191_v38 = vpop.permute.xlu0 %9190  ;;  %v9197_v40 = vpop.permute.xlu1 %9196 }
 0xf96   :  { %v9228_v18 = vsel %vm1698_vm10, %v9189_v8, %v9197_v40 }
 0xf97   :  { %9038 = vrot.lane.b32.xlu0 %v14676_v25, %s10509_s28  ;;  %9036 = vrot.lane.b32.xlu1 %v14673_v44, %s10509_s28  ;;  %v14981_v52 = vmul.f32 %v9228_v18, %v16026_v3 }
 0xf99   :  { %v9199_v30 = vpop.permute.xlu0 %9198  ;;  %v9205_v31 = vpop.permute.xlu1 %9204  ;;  %16061 = vst [vmem:[#allocation88_spill] sm:$0xff] %v14981_v52 }
 0xf9a   :  { %v9229_v34 = vsel %vm1698_vm10, %v9191_v38, %v9199_v30  ;;  %v9224_v54 = vsel %vm1698_vm10, %v9197_v40, %v9205_v31 }
 0xf9b   :  { %v14984_v1 = vmul.f32 %v9229_v34, %v16026_v3  ;;  %9046 = vrot.lane.b32.xlu0 %v14690_v20, %s10509_s28  ;;  %9044 = vrot.lane.b32.xlu1 %v14688_v36, %s10509_s28  ;;  %v8067_v34 = vsel %vm288_vm1, %v14631_v4, %v14614_v17  ;;  %v15007_v47 = vmul.f32 %v9224_v54, %v16025_v35  ;;  %v16062_v17 = vld [vmem:[#allocation32_spill] sm:$0xff] }
 0xf9c   :  { %v8072_v4 = vmul.f32 %v8063_v56, %v16062_v17 }
 0xf9d   :  { %v9207_v42 = vpop.permute.xlu0 %9206  ;;  %v9213_v18 = vpop.permute.xlu1 %9212 }
 0xf9e   :  { %v9225_v3 = vsel %vm1698_vm10, %v9199_v30, %v9207_v42  ;;  %v9220_v15 = vsel %vm1698_vm10, %v9205_v31, %v9213_v18  ;;  %v9232_v50 = vsel %vm1698_vm10, %v9213_v18, %v9189_v8  ;;  %v8071_v30 = vmul.f32 %v8067_v34, %v10870_v12 }
 0xf9f   :  { %v15010_v40 = vmul.f32 %v9225_v3, %v16025_v35  ;;  %9054 = vrot.lane.b32.xlu0 %v14702_v6, %s10509_s28  ;;  %9052 = vrot.lane.b32.xlu1 %v14700_v9, %s10509_s28  ;;  %v15019_v31 = vmul.f32 %v9220_v15, %v16028_v2  ;;  %v15022_v8 = vmul.f32 %v9232_v50, %v16027_v49 }
 0xfa1   :  { %16063 = vst [vmem:[#allocation32_spill] sm:$0xff] %v15019_v31  ;;  %16064 = vst [vmem:[#allocation90_spill] sm:$0xff] %v15022_v8  ;;  %v9215_v54 = vpop.permute.xlu0 %9214  ;;  %v8026_v18 = vpop.permute.xlu1 %8025 }
 0xfa2   :  { %v9221_v35 = vsel %vm1698_vm10, %v9207_v42, %v9215_v54  ;;  %v9233_v52 = vsel %vm1698_vm10, %v9215_v54, %v9191_v38  ;;  %v8064_v56 = vsel %vm288_vm1, %v8026_v18, %v14622_v39  ;;  %v8068_v50 = vsel %vm288_vm1, %v14644_v21, %v8026_v18 }
 0xfa3   :  { %v15037_v15 = vmul.f32 %v9221_v35, %v16028_v2  ;;  %v15040_v34 = vmul.f32 %v9233_v52, %v16027_v49  ;;  %v8075_v3 = vmul.f32 %v8068_v50, %v10870_v12  ;;  %v8076_v42 = vmul.f32 %v8064_v56, %v16062_v17  ;;  %9194 = vrot.lane.b32.xlu0 %v14657_v59, %s10510_s26  ;;  %v9352_v2 = vld [vmem:[#allocation22] sm:$0x7] }
 0xfa4   :  { %9192 = vrot.lane.b32.xlu1 %v14648_v58, %s10510_s26  ;;  %v7986_v52 = vsel %vm239_vm3, %v14684_v13, %v14696_v27 }
 0xfa5   :  { %16065 = vst [vmem:[#allocation91_spill] sm:$0xff] %v15037_v15  ;;  %v8090_v21 = vpack.c.bf16 %v8075_v3, %v8071_v30  ;;  %v8030_v38 = vpop.permute.xlu0 %8029  ;;  %v8028_v35 = vpop.permute.xlu1 %8027  ;;  %v8091_v54 = vpack.c.bf16 %v8076_v42, %v8072_v4  ;;  %v7990_v42 = vsel %vm239_vm3, %v14668_v26, %v14684_v13 }
 0xfa7   :  { %9202 = vrot.lane.b32.xlu0 %v14676_v25, %s10510_s26  ;;  %8101 = vmatprep.subr.bf16.mxu0 %v8091_v54 }
 0xfa8   :  { %9200 = vrot.lane.b32.xlu1 %v14673_v44, %s10510_s26  ;;  %8102 = vmatpush1.bf16.msra.mxu0 %v8090_v21 }
 0xfa9   :  { %v8038_v18 = vpop.permute.xlu0 %8037  ;;  %v8036_v56 = vpop.permute.xlu1 %8035 }
 0xfaa   :  { %v8066_v50 = vsel %vm288_vm1, %v8030_v38, %v8038_v18  ;;  %v8065_v30 = vsel %vm288_vm1, %v8028_v35, %v8036_v56 }
 0xfab   :  { %v8084_v4 = vmul.f32 %v8066_v50, %v16062_v17  ;;  %v8080_v3 = vmul.f32 %v8065_v30, %v16062_v17  ;;  %9210 = vrot.lane.b32.xlu0 %v14690_v20, %s10510_s26  ;;  %v7982_v50 = vsel %vm239_vm3, %v14696_v27, %v14708_v14 }
 0xfac   :  { %9208 = vrot.lane.b32.xlu1 %v14688_v36, %s10510_s26 }
 0xfad   :  { %v8046_v21 = vpop.permute.xlu0 %8045  ;;  %v8044_v54 = vpop.permute.xlu1 %8043  ;;  %v8095_v39 = vpack.c.bf16 %v8084_v4, %v8080_v3  ;;  %v7989_v4 = vsel %vm239_vm3, %v14646_v45, %v14670_v37  ;;  %v8002_v3 = vmul.f32 %v7990_v42, %v10899_v33 }
 0xfae   :  { %v8062_v17 = vsel %vm288_vm1, %v8038_v18, %v8046_v21  ;;  %v8061_v30 = vsel %vm288_vm1, %v8036_v56, %v8044_v54  ;;  %v7981_v18 = vsel %vm239_vm3, %v14686_v43, %v14698_v32  ;;  %v8004_v56 = vmul.f32 %v7982_v50, %v10916_v51 }
 0xfaf   :  { %9218 = vrot.lane.b32.xlu0 %v14702_v6, %s10510_s26  ;;  %8103 = vmatprep.subr.bf16.mxu0 %v8095_v39  ;;  %v7994_v39 = vsel %vm239_vm3, %v14708_v14, %v14668_v26  ;;  %v8085_v42 = vmul.f32 %v8062_v17, %v10886_v23  ;;  %v8081_v49 = vmul.f32 %v8061_v30, %v10886_v23  ;;  %v8088_v30 = vld [vmem:[#allocation14 + $0x4] sm:$0x7] }
 0xfb0   :  { %9216 = vrot.lane.b32.xlu1 %v14700_v9, %s10510_s26 }
 0xfb1   :  { %v8054_v13 = vpop.permute.xlu0 %8053  ;;  %v8052_v27 = vpop.permute.xlu1 %8051 }
 0xfb2   :  { %v8058_v31 = vsel %vm288_vm1, %v8046_v21, %v8054_v13  ;;  %v8070_v15 = vsel %vm288_vm1, %v8054_v13, %v8030_v38  ;;  %v8057_v8 = vsel %vm288_vm1, %v8044_v54, %v8052_v27  ;;  %v8069_v26 = vsel %vm288_vm1, %v8052_v27, %v8028_v35 }
 0xfb3   :  { %v8083_v14 = vmul.f32 %v8070_v15, %v10870_v12  ;;  %v8086_v50 = vmul.f32 %v8058_v31, %v10883_v22  ;;  %v8079_v23 = vmul.f32 %v8069_v26, %v10870_v12  ;;  %v8082_v17 = vmul.f32 %v8057_v8, %v10883_v22 }
 0xfb4   :  { %v7998_v21 = vmul.f32 %v7989_v4, %v10899_v33  ;;  %v7985_v38 = vsel %vm239_vm3, %v14670_v37, %v14686_v43  ;;  %v7993_v35 = vsel %vm239_vm3, %v14698_v32, %v14646_v45  ;;  %9355 = vperm.xlu1 %10116, %v9352_v2   ;;  %v8000_v31 = vmul.f32 %v7981_v18, %v10916_v51 }
 0xfb5   :  { %v8001_v12 = vmul.f32 %v7994_v39, %v10905_v41  ;;  %v8094_v15 = vpack.c.bf16 %v8083_v14, %v8079_v23  ;;  %v7956_v22 = vpop.permute.xlu0 %7955  ;;  %v7954_v8 = vpop.permute.xlu1 %7953  ;;  %v8097_v54 = vpack.c.bf16 %v8086_v50, %v8082_v17  ;;  %v8003_v4 = vmul.f32 %v7986_v52, %v10911_v46 }
 0xfb6   :  { %v8096_v13 = vpack.c.bf16 %v8085_v42, %v8081_v49  ;;  %v8016_v27 = vpack.c.bf16 %v8002_v3, %v7998_v21  ;;  %v8089_v26 = vpack.c.bf16 %v8088_v30, %v8088_v30  ;;  %v7997_v37 = vmul.f32 %v7993_v35, %v10905_v41  ;;  %v16066_v21 = vld [vmem:[#allocation72_spill] sm:$0xff] }
 0xfb7   :  { %8104 = vmatpush1.bf16.msra.mxu0 %v8094_v15  ;;  %8144 = vmatprep.subr.bf16.mxu1 %v8097_v54  ;;  %v8018_v43 = vpack.c.bf16 %v8004_v56, %v8000_v31  ;;  %v7999_v2 = vmul.f32 %v7985_v38, %v10911_v46  ;;  %v8309_v42 = vsel %vm592_vm5, %v14716_v28, %v14724_v19  ;;  %v16067_v38 = vld [vmem:[#allocation57_spill] sm:$0xff]  ;;  %v16069_v54 = vld [vmem:[#allocation62_spill] sm:$0xff] }
 0xfb8   :  { %8145 = vmatpush1.bf16.msra.mxu1 %v8096_v13  ;;  %8186 = vmatprep.subr.bf16.mxu0 %v8016_v27  ;;  %v8015_v45 = vpack.c.bf16 %v8001_v12, %v7997_v37  ;;  %v8308_v35 = vsel %vm592_vm5, %v16067_v38, %v16066_v21  ;;  %v16068_v31 = vld [vmem:[#allocation33_spill] sm:$0xff]  ;;  %v8305_v15 = vsel %vm592_vm5, %v14724_v19, %v14732_v5 }
 0xfb9   :  { %v7964_v32 = vpop.permute.xlu0 %7963  ;;  %8227 = vmatprep.subr.bf16.mxu1 %v8018_v43  ;;  %v7962_v18 = vpop.permute.xlu1 %7961  ;;  %v8017_v39 = vpack.c.bf16 %v8003_v4, %v7999_v2  ;;  %v8321_v12 = vmul.f32 %v8309_v42, %v16068_v31  ;;  %v16070_v4 = vld [vmem:[#allocation69_spill] sm:$0xff]  ;;  %v8313_v27 = vsel %vm592_vm5, %v14740_v61, %v14716_v28  ;;  %v16072_v42 = vld [vmem:[#allocation34_spill] sm:$0xff] }
 0xfba   :  { %v7992_v52 = vsel %vm239_vm3, %v7956_v22, %v7964_v32  ;;  %v7991_v49 = vsel %vm239_vm3, %v7954_v8, %v7962_v18  ;;  %9557 = vmatmul.mubr.msk.bf16.vlgmr.msra.gmra.mrb[32].mxu0 %vm2231_vm11, %v8089_v26  ;;  %v8300_v13 = vsel %vm592_vm5, %v16070_v4, %v16069_v54 }
 0xfbb   :  { %v8010_v3 = vmul.f32 %v7992_v52, %v10899_v33  ;;  %v8006_v56 = vmul.f32 %v7991_v49, %v10899_v33  ;;  %8187 = vmatpush1.bf16.msra.mxu0 %v8015_v45  ;;  %9558 = vmatmul.mubr.msk.bf16.vlgmr.msra.gmra.mrb[32].mxu1 %vm2231_vm11, %v8089_v26  ;;  %v8301_v33 = vsel %vm592_vm5, %v14732_v5, %v14740_v61  ;;  %v16071_v26 = vld [vmem:[#allocation36_spill] sm:$0xff]  ;;  %v8013_v49 = vld [vmem:[#allocation14] sm:$0x7] }
 0xfbc   :  { %8228 = vmatpush1.bf16.msra.mxu1 %v8017_v39  ;;  %8218 = vmatprep.mubr.bf16.mxu0 %v15805_v24  ;;  %v8323_v37 = vmul.f32 %v8301_v33, %v16071_v26  ;;  %v16073_v33 = vld [vmem:[#allocation35_spill] sm:$0xff] }
 0xfbd   :  { %v7972_v14 = vpop.permute.xlu0 %7971  ;;  %v7970_v50 = vpop.permute.xlu1 %7969  ;;  %v8020_v23 = vpack.c.bf16 %v8010_v3, %v8006_v56  ;;  %8259 = vmatprep.mubr.bf16.mxu1 %v15805_v24  ;;  %v8317_v3 = vmul.f32 %v8308_v35, %v16068_v31  ;;  %v8319_v56 = vmul.f32 %v8300_v13, %v16071_v26 }
 0xfbe   :  { %v7988_v17 = vsel %vm239_vm3, %v7964_v32, %v7972_v14  ;;  %v7987_v30 = vsel %vm239_vm3, %v7962_v18, %v7970_v50 }
 0xfbf   :  { %8188 = vmatprep.subr.bf16.mxu0 %v8020_v23  ;;  %v8011_v43 = vmul.f32 %v7988_v17, %v10911_v46  ;;  %v8007_v2 = vmul.f32 %v7987_v30, %v10911_v46  ;;  %v8322_v17 = vmul.f32 %v8305_v15, %v16073_v33  ;;  %v8336_v35 = vpack.c.bf16 %v8321_v12, %v8317_v3  ;;  %v16078_v3 = vld [vmem:[#allocation68_spill] sm:$0xff] }
 0xfc1   :  { %v7980_v45 = vpop.permute.xlu0 %7979  ;;  %v7978_v32 = vpop.permute.xlu1 %7977  ;;  %v8021_v30 = vpack.c.bf16 %v8011_v43, %v8007_v2  ;;  %v16074_v2 = vld [vmem:[#allocation59_spill] sm:$0xff] }
 0xfc2   :  { %v7984_v19 = vsel %vm239_vm3, %v7972_v14, %v7980_v45  ;;  %v7996_v5 = vsel %vm239_vm3, %v7980_v45, %v7956_v22  ;;  %v7983_v18 = vsel %vm239_vm3, %v7970_v50, %v7978_v32  ;;  %v7995_v28 = vsel %vm239_vm3, %v7978_v32, %v7954_v8 }
 0xfc3   :  { %v8009_v61 = vmul.f32 %v7996_v5, %v10905_v41  ;;  %v8012_v39 = vmul.f32 %v7984_v19, %v10916_v51  ;;  %v8005_v46 = vmul.f32 %v7995_v28, %v10905_v41  ;;  %v8008_v52 = vmul.f32 %v7983_v18, %v10916_v51  ;;  %v16075_v19 = vld [vmem:[#allocation71_spill] sm:$0xff] }
 0xfc4   :  { %v8304_v22 = vsel %vm592_vm5, %v16066_v21, %v16070_v4  ;;  %v8312_v8 = vsel %vm592_vm5, %v16069_v54, %v16067_v38  ;;  %v8320_v14 = vmul.f32 %v8313_v27, %v16072_v42  ;;  %v8014_v45 = vpack.c.bf16 %v8013_v49, %v8013_v49 }
 0xfc5   :  { %v8019_v41 = vpack.c.bf16 %v8009_v61, %v8005_v46  ;;  %v8275_v50 = vpop.permute.xlu0 %8274  ;;  %v8273_v51 = vpop.permute.xlu1 %8272  ;;  %v8022_v23 = vpack.c.bf16 %v8012_v39, %v8008_v52  ;;  %v8316_v21 = vmul.f32 %v8312_v8, %v16072_v42  ;;  %v8338_v4 = vpack.c.bf16 %v8323_v37, %v8319_v56  ;;  %v16076_v39 = vld [vmem:[#allocation73_spill] sm:$0xff]  ;;  %v16077_v46 = vld [vmem:[#allocation74_spill] sm:$0xff] }
 0xfc6   :  { %v8318_v38 = vmul.f32 %v8304_v22, %v16073_v33  ;;  %v8473_v5 = vsel %vm783_vm6, %v16075_v19, %v16074_v2  ;;  %v16079_v22 = vld [vmem:[#allocation67_spill] sm:$0xff]  ;;  %v16080_v56 = vld [vmem:[#allocation37_spill] sm:$0xff] }
 0xfc7   :  { %8189 = vmatpush1.bf16.msra.mxu0 %v8019_v41  ;;  %8229 = vmatprep.subr.bf16.mxu1 %v8022_v23  ;;  %v8335_v54 = vpack.c.bf16 %v8320_v14, %v8316_v21  ;;  %v8472_v8 = vsel %vm783_vm6, %v16079_v22, %v16078_v3  ;;  %v8485_v14 = vmul.f32 %v8473_v5, %v16080_v56  ;;  %v16081_v23 = vld [vmem:[#allocation75_spill] sm:$0xff] }
 0xfc8   :  { %8230 = vmatpush1.bf16.msra.mxu1 %v8021_v30  ;;  %8346 = vmatprep.subr.bf16.mxu0 %v8336_v35  ;;  %v8337_v32 = vpack.c.bf16 %v8322_v17, %v8318_v38  ;;  %v8469_v41 = vsel %vm783_vm6, %v16074_v2, %v16077_v46  ;;  %v16082_v17 = vld [vmem:[#allocation70_spill] sm:$0xff]  ;;  %v8477_v35 = vsel %vm783_vm6, %v16076_v39, %v16075_v19 }
 0xfc9   :  { %v8283_v13 = vpop.permute.xlu0 %8282  ;;  %8387 = vmatprep.subr.bf16.mxu1 %v8338_v4  ;;  %v8281_v27 = vpop.permute.xlu1 %8280  ;;  %v8464_v30 = vsel %vm783_vm6, %v16082_v17, %v16081_v23  ;;  %v8333_v19 = vld [vmem:[#allocation14 + $0x8] sm:$0x7]  ;;  %v8481_v5 = vmul.f32 %v8472_v8, %v16080_v56 }
 0xfca   :  { %v8311_v15 = vsel %vm592_vm5, %v8275_v50, %v8283_v13  ;;  %v8310_v12 = vsel %vm592_vm5, %v8273_v51, %v8281_v27  ;;  %9559 = vmatmul.mubr.msk.bf16.vlgmr.msra.gmra.mrb[36].mxu0 %vm2231_vm11, %v8014_v45 }
 0xfcb   :  { %v8329_v43 = vmul.f32 %v8311_v15, %v16068_v31  ;;  %v8325_v37 = vmul.f32 %v8310_v12, %v16068_v31  ;;  %8347 = vmatpush1.bf16.msra.mxu0 %v8335_v54  ;;  %9560 = vmatmul.mubr.msk.bf16.vlgmr.msra.gmra.mrb[36].mxu1 %vm2231_vm11, %v8014_v45  ;;  %v8465_v31 = vsel %vm783_vm6, %v16077_v46, %v16076_v39  ;;  %v16083_v45 = vld [vmem:[#allocation38_spill] sm:$0xff] }
 0xfcc   :  { %8388 = vmatpush1.bf16.msra.mxu1 %v8337_v32  ;;  %8378 = vmatprep.mubr.bf16.mxu0 %v15805_v24  ;;  %v8487_v21 = vmul.f32 %v8465_v31, %v16083_v45  ;;  %v16085_v31 = vld [vmem:[#allocation40_spill] sm:$0xff]  ;;  %v8500_v8 = vpack.c.bf16 %v8485_v14, %v8481_v5 }
 0xfcd   :  { %v8291_v18 = vpop.permute.xlu0 %8290  ;;  %v8289_v28 = vpop.permute.xlu1 %8288  ;;  %v8340_v61 = vpack.c.bf16 %v8329_v43, %v8325_v37  ;;  %8419 = vmatprep.mubr.bf16.mxu1 %v15805_v24 }
 0xfce   :  { %v8307_v52 = vsel %vm592_vm5, %v8283_v13, %v8291_v18  ;;  %v8306_v49 = vsel %vm592_vm5, %v8281_v27, %v8289_v28 }
 0xfcf   :  { %8348 = vmatprep.subr.bf16.mxu0 %v8340_v61  ;;  %v8330_v4 = vmul.f32 %v8307_v52, %v16073_v33  ;;  %v8326_v38 = vmul.f32 %v8306_v49, %v16073_v33  ;;  %v8486_v52 = vmul.f32 %v8469_v41, %v16085_v31 }
 0xfd1   :  { %v8299_v54 = vpop.permute.xlu0 %8298  ;;  %v8297_v13 = vpop.permute.xlu1 %8296  ;;  %v8341_v49 = vpack.c.bf16 %v8330_v4, %v8326_v38 }
 0xfd2   :  { %v8303_v27 = vsel %vm592_vm5, %v8291_v18, %v8299_v54  ;;  %v8315_v32 = vsel %vm592_vm5, %v8299_v54, %v8275_v50  ;;  %v8302_v15 = vsel %vm592_vm5, %v8289_v28, %v8297_v13  ;;  %v8314_v12 = vsel %vm592_vm5, %v8297_v13, %v8273_v51  ;;  %v16084_v28 = vld [vmem:[#allocation39_spill] sm:$0xff] }
 0xfd3   :  { %v8328_v43 = vmul.f32 %v8315_v32, %v16072_v42  ;;  %v8331_v37 = vmul.f32 %v8303_v27, %v16071_v26  ;;  %v8324_v33 = vmul.f32 %v8314_v12, %v16072_v42  ;;  %v8327_v2 = vmul.f32 %v8302_v15, %v16071_v26 }
 0xfd4   :  { %v8468_v50 = vsel %vm783_vm6, %v16078_v3, %v16082_v17  ;;  %v8476_v51 = vsel %vm783_vm6, %v16081_v23, %v16079_v22  ;;  %v8483_v18 = vmul.f32 %v8464_v30, %v16083_v45  ;;  %v8484_v61 = vmul.f32 %v8477_v35, %v16084_v28 }
 0xfd5   :  { %v8339_v42 = vpack.c.bf16 %v8328_v43, %v8324_v33  ;;  %v8439_v39 = vpop.permute.xlu0 %8438  ;;  %v8437_v26 = vpop.permute.xlu1 %8436  ;;  %v8342_v46 = vpack.c.bf16 %v8331_v37, %v8327_v2  ;;  %v8334_v54 = vpack.c.bf16 %v8333_v19, %v8333_v19  ;;  %v8480_v3 = vmul.f32 %v8476_v51, %v16084_v28 }
 0xfd6   :  { %v8502_v17 = vpack.c.bf16 %v8487_v21, %v8483_v18  ;;  %v8482_v22 = vmul.f32 %v8468_v50, %v16085_v31 }
 0xfd7   :  { %8349 = vmatpush1.bf16.msra.mxu0 %v8339_v42  ;;  %8389 = vmatprep.subr.bf16.mxu1 %v8342_v46  ;;  %v8499_v23 = vpack.c.bf16 %v8484_v61, %v8480_v3  ;;  %v8497_v46 = vld [vmem:[#allocation14 + $0xc] sm:$0x7] }
 0xfd8   :  { %8390 = vmatpush1.bf16.msra.mxu1 %v8341_v49  ;;  %8510 = vmatprep.subr.bf16.mxu0 %v8500_v8  ;;  %v8501_v13 = vpack.c.bf16 %v8486_v52, %v8482_v22  ;;  %v16087_v3 = vld [vmem:[#allocation58_spill] sm:$0xff]  ;;  %v8498_v22 = vpack.c.bf16 %v8497_v46, %v8497_v46  ;;  %v16098_v46 = vld [vmem:[#allocation45_spill] sm:$0xff] }
 0xfd9   :  { %v8447_v30 = vpop.permute.xlu0 %8446  ;;  %8551 = vmatprep.subr.bf16.mxu1 %v8502_v17  ;;  %v8445_v35 = vpop.permute.xlu1 %8444 }
 0xfda   :  { %v8475_v41 = vsel %vm783_vm6, %v8439_v39, %v8447_v30  ;;  %v8474_v14 = vsel %vm783_vm6, %v8437_v26, %v8445_v35  ;;  %9561 = vmatmul.mubr.msk.bf16.vlgmr.msra.gmra.mrb[40].mxu0 %vm2231_vm11, %v8334_v54 }
 0xfdb   :  { %v8493_v4 = vmul.f32 %v8475_v41, %v16080_v56  ;;  %v8489_v21 = vmul.f32 %v8474_v14, %v16080_v56  ;;  %8511 = vmatpush1.bf16.msra.mxu0 %v8499_v23  ;;  %9562 = vmatmul.mubr.msk.bf16.vlgmr.msra.gmra.mrb[40].mxu1 %vm2231_vm11, %v8334_v54  ;;  %v16086_v54 = vld [vmem:[#allocation64_spill] sm:$0xff]  ;;  %v8604_v14 = vpack.c.bf16 %v14676_v25, %v14673_v44 }
 0xfdc   :  { %8552 = vmatpush1.bf16.msra.mxu1 %v8501_v13  ;;  %8542 = vmatprep.mubr.bf16.mxu0 %v15805_v24  ;;  %v8600_v17 = vpack.c.bf16 %v16087_v3, %v16086_v54  ;;  %v16089_v23 = vld [vmem:[#allocation60_spill] sm:$0xff]  ;;  %v16091_v13 = vld [vmem:[#allocation65_spill] sm:$0xff]  ;;  %v8605_v44 = vpack.c.bf16 %v14690_v20, %v14688_v36  ;;  %v16095_v20 = vpack.c.bf16 %v14808_v62, %v14805_v57 }
 0xfdd   :  { %v8455_v38 = vpop.permute.xlu0 %8454  ;;  %v8453_v27 = vpop.permute.xlu1 %8452  ;;  %v8504_v32 = vpack.c.bf16 %v8493_v4, %v8489_v21  ;;  %8583 = vmatprep.mubr.bf16.mxu1 %v15805_v24  ;;  %v16092_v4 = vld [vmem:[#allocation63_spill] sm:$0xff]  ;;  %v16093_v21 = vld [vmem:[#allocation66_spill] sm:$0xff]  ;;  %v16100_v54 = vld [vmem:[#allocation84_spill] sm:$0xff] }
 0xfde   :  { %v8471_v15 = vsel %vm783_vm6, %v8447_v30, %v8455_v38  ;;  %v8470_v12 = vsel %vm783_vm6, %v8445_v35, %v8453_v27  ;;  %v16090_v35 = vld [vmem:[#allocation61_spill] sm:$0xff] }
 0xfdf   :  { %8512 = vmatprep.subr.bf16.mxu0 %v8504_v32  ;;  %v8494_v56 = vmul.f32 %v8471_v15, %v16085_v31  ;;  %v8490_v43 = vmul.f32 %v8470_v12, %v16085_v31  ;;  %v8599_v41 = vpack.c.bf16 %v16091_v13, %v16090_v35  ;;  %v8606_v32 = vpack.c.bf16 %v14702_v6, %v14700_v9 }
 0xfe1   :  { %v8463_v37 = vpop.permute.xlu0 %8462  ;;  %v8461_v33 = vpop.permute.xlu1 %8460 }
 0xfe2   :  { %v8467_v2 = vsel %vm783_vm6, %v8455_v38, %v8463_v37  ;;  %v8479_v19 = vsel %vm783_vm6, %v8463_v37, %v8439_v39  ;;  %v8466_v5 = vsel %vm783_vm6, %v8453_v27, %v8461_v33  ;;  %v8478_v50 = vsel %vm783_vm6, %v8461_v33, %v8437_v26  ;;  %v16088_v26 = vld [vmem:[#allocation76_spill] sm:$0xff]  ;;  %v8597_v27 = vld [vmem:[#allocation14 + $0x10] sm:$0x7] }
 0xfe3   :  { %v8492_v51 = vmul.f32 %v8479_v19, %v16084_v28  ;;  %v8495_v18 = vmul.f32 %v8467_v2, %v16083_v45  ;;  %v8488_v61 = vmul.f32 %v8478_v50, %v16084_v28  ;;  %v8491_v42 = vmul.f32 %v8466_v5, %v16083_v45  ;;  %v16096_v33 = vld [vmem:[#allocation43_spill] sm:$0xff] }
 0xfe4   :  { %v8505_v39 = vpack.c.bf16 %v8494_v56, %v8490_v43  ;;  %v8602_v30 = vpack.c.bf16 %v16089_v23, %v16088_v26  ;;  %v8601_v38 = vpack.c.bf16 %v16093_v21, %v16092_v4  ;;  %v8603_v56 = vpack.c.bf16 %v14657_v59, %v14648_v58  ;;  %v16094_v59 = vld [vmem:[#allocation41_spill] sm:$0xff] }
 0xfe5   :  { %v8503_v31 = vpack.c.bf16 %v8492_v51, %v8488_v61  ;;  %v8703_v52 = vpop.permute.xlu0 %8702  ;;  %v8701_v49 = vpop.permute.xlu1 %8700  ;;  %v8506_v8 = vpack.c.bf16 %v8495_v18, %v8491_v42  ;;  %v8598_v25 = vpack.c.bf16 %v8597_v27, %v8597_v27  ;;  %v16097_v50 = vpack.c.bf16 %v14832_v48, %v14826_v29  ;;  %v16099_v29 = vld [vmem:[#allocation42_spill] sm:$0xff] }
 0xfe6   :  { %v16107_v4 = vpack.c.bf16 %v14896_v11, %v14890_v60  ;;  %v16114_v11 = vld [vmem:[#allocation47_spill] sm:$0xff] }
 0xfe7   :  { %8513 = vmatpush1.bf16.msra.mxu0 %v8503_v31  ;;  %8553 = vmatprep.subr.bf16.mxu1 %v8506_v8 }
 0xfe8   :  { %8554 = vmatpush1.bf16.msra.mxu1 %v8505_v39  ;;  %8610 = vmatprep.subr.bf16.mxu0 %v8600_v17  ;;  %v16103_v17 = vld [vmem:[#allocation77_spill] sm:$0xff] }
 0xfe9   :  { %v8711_v28 = vpop.permute.xlu0 %8710  ;;  %8651 = vmatprep.subr.bf16.mxu1 %v8602_v30  ;;  %v8709_v45 = vpop.permute.xlu1 %8708 }
 0xfea   :  { %9563 = vmatmul.mubr.msk.bf16.vlgmr.msra.gmra.mrb[44].mxu0 %vm2231_vm11, %v8498_v22  ;;  %v8739_v43 = vsel %vm1125_vm7, %v8703_v52, %v8711_v28  ;;  %v8738_v9 = vsel %vm1125_vm7, %v8701_v49, %v8709_v45 }
 0xfeb   :  { %9564 = vmatmul.mubr.msk.bf16.vlgmr.msra.gmra.mrb[44].mxu1 %vm2231_vm11, %v8498_v22  ;;  %8611 = vmatpush1.bf16.msra.mxu0 %v8599_v41  ;;  %v8756_v2 = vmul.f32 %v8739_v43, %v16096_v33  ;;  %v8752_v19 = vmul.f32 %v8738_v9, %v16096_v33  ;;  %v16104_v22 = vld [vmem:[#allocation79_spill] sm:$0xff]  ;;  %v16106_v41 = vpack.c.bf16 %v14874_v10, %v14871_v55  ;;  %v16111_v55 = vld [vmem:[#allocation81_spill] sm:$0xff] }
 0xfec   :  { %8612 = vmatprep.subr.bf16.mxu0 %v8604_v14  ;;  %8652 = vmatpush1.bf16.msra.mxu1 %v8601_v38  ;;  %v16105_v26 = vpack.c.bf16 %v16103_v17, %v16104_v22 }
 0xfed   :  { %v8719_v15 = vpop.permute.xlu0 %8718  ;;  %8653 = vmatprep.subr.bf16.mxu1 %v8606_v32  ;;  %v8717_v12 = vpop.permute.xlu1 %8716  ;;  %8642 = vmatprep.mubr.bf16.mxu0 %v15805_v24  ;;  %v8767_v35 = vpack.c.bf16 %v8756_v2, %v8752_v19  ;;  %v16108_v32 = vld [vmem:[#allocation82_spill] sm:$0xff] }
 0xfee   :  { %v8735_v6 = vsel %vm1125_vm7, %v8711_v28, %v8719_v15  ;;  %v8734_v37 = vsel %vm1125_vm7, %v8709_v45, %v8717_v12  ;;  %8683 = vmatprep.mubr.bf16.mxu1 %v15805_v24 }
 0xfef   :  { %v8757_v58 = vmul.f32 %v8735_v6, %v16094_v59  ;;  %v8753_v36 = vmul.f32 %v8734_v37, %v16094_v59  ;;  %8613 = vmatpush1.bf16.msra.mxu0 %v8603_v56  ;;  %v8925_v37 = vld [vmem:[#allocation14 + $0x18] sm:$0x7] }
 0xff0   :  { %8654 = vmatpush1.bf16.msra.mxu1 %v8605_v44  ;;  %8774 = vmatprep.subr.bf16.mxu0 %v16095_v20  ;;  %v16115_v59 = vld [vmem:[#allocation44_spill] sm:$0xff] }
 0xff1   :  { %v8727_v5 = vpop.permute.xlu0 %8726  ;;  %8815 = vmatprep.subr.bf16.mxu1 %v16097_v50  ;;  %v8725_v51 = vpop.permute.xlu1 %8724  ;;  %v8768_v18 = vpack.c.bf16 %v8757_v58, %v8753_v36 }
 0xff2   :  { %v8731_v61 = vsel %vm1125_vm7, %v8719_v15, %v8727_v5  ;;  %v8743_v42 = vsel %vm1125_vm7, %v8727_v5, %v8703_v52  ;;  %v8730_v62 = vsel %vm1125_vm7, %v8717_v12, %v8725_v51  ;;  %v8742_v57 = vsel %vm1125_vm7, %v8725_v51, %v8701_v49  ;;  %9565 = vmatmul.mubr.msk.bf16.vlgmr.msra.gmra.mrb[48].mxu0 %vm2231_vm11, %v8598_v25  ;;  %v16101_v52 = vld [vmem:[#allocation78_spill] sm:$0xff]  ;;  %v8761_v49 = vld [vmem:[#allocation14 + $0x14] sm:$0x7]  ;;  %v16109_v15 = vld [vmem:[#allocation80_spill] sm:$0xff] }
 0xff3   :  { %v8758_v31 = vmul.f32 %v8731_v61, %v16098_v46  ;;  %v8759_v48 = vmul.f32 %v8743_v42, %v16099_v29  ;;  %v8754_v8 = vmul.f32 %v8730_v62, %v16098_v46  ;;  %v8755_v39 = vmul.f32 %v8742_v57, %v16099_v29  ;;  %9566 = vmatmul.mubr.msk.bf16.vlgmr.msra.gmra.mrb[48].mxu1 %vm2231_vm11, %v8598_v25  ;;  %v16112_v12 = vld [vmem:[#allocation83_spill] sm:$0xff]  ;;  %v16116_v42 = vld [vmem:[#allocation49_spill] sm:$0xff]  ;;  %v16117_v57 = vld [vmem:[#allocation46_spill] sm:$0xff] }
 0xff4   :  { %v16102_v3 = vpack.c.bf16 %v16100_v54, %v16101_v52  ;;  %8816 = vmatpush1.bf16.msra.mxu1 %v16105_v26  ;;  %8806 = vmatprep.mubr.bf16.mxu0 %v15805_v24  ;;  %v8762_v13 = vpack.c.bf16 %v8761_v49, %v8761_v49  ;;  %v16110_v10 = vpack.c.bf16 %v16108_v32, %v16109_v15  ;;  %v16121_v26 = vld [vmem:[#allocation87_spill] sm:$0xff] }
 0xff5   :  { %v8769_v23 = vpack.c.bf16 %v8758_v31, %v8754_v8  ;;  %v8867_v30 = vpop.permute.xlu0 %8866  ;;  %v8865_v28 = vpop.permute.xlu1 %8864  ;;  %v8770_v45 = vpack.c.bf16 %v8759_v48, %v8755_v39  ;;  %8847 = vmatprep.mubr.bf16.mxu1 %v15805_v24  ;;  %v16113_v56 = vpack.c.bf16 %v16111_v55, %v16112_v12  ;;  %v8926_v5 = vpack.c.bf16 %v8925_v37, %v8925_v37 }
 0xff6   :  { %8775 = vmatpush1.bf16.msra.mxu0 %v16102_v3  ;;  %v16118_v39 = vpack.c.bf16 %v14938_v0, %v14935_v16  ;;  %v16119_v3 = vld [vmem:[#allocation86_spill] sm:$0xff]  ;;  %v16122_v49 = vpack.c.bf16 %v14960_v53, %v16121_v26 }
 0xff7   :  { %8776 = vmatprep.subr.bf16.mxu0 %v8768_v18  ;;  %8817 = vmatprep.subr.bf16.mxu1 %v8770_v45  ;;  %v16120_v17 = vpack.c.bf16 %v14920_v63, %v16119_v3  ;;  %v16126_v45 = vld [vmem:[#allocation51_spill] sm:$0xff] }
 0xff8   :  { %8818 = vmatpush1.bf16.msra.mxu1 %v8769_v23 }
 0xff9   :  { %v8875_v14 = vpop.permute.xlu0 %8874  ;;  %8979 = vmatprep.subr.bf16.mxu1 %v16107_v4  ;;  %v8873_v21 = vpop.permute.xlu1 %8872 }
 0xffa   :  { %8777 = vmatpush1.bf16.msra.mxu0 %v8767_v35  ;;  %v8903_v38 = vsel %vm1316_vm8, %v8867_v30, %v8875_v14  ;;  %v8902_v27 = vsel %vm1316_vm8, %v8865_v28, %v8873_v21 }
 0xffb   :  { %8938 = vmatprep.subr.bf16.mxu0 %v16106_v41  ;;  %9568 = vmatmul.mubr.msk.bf16.vlgmr.msra.gmra.mrb[52].mxu1 %vm2231_vm11, %v8762_v13  ;;  %v8920_v60 = vmul.f32 %v8903_v38, %v16114_v11  ;;  %v8916_v44 = vmul.f32 %v8902_v27, %v16114_v11  ;;  %v16127_v38 = vld [vmem:[#allocation48_spill] sm:$0xff] }
 0xffc   :  { %8980 = vmatpush1.bf16.msra.mxu1 %v16113_v56  ;;  %9011 = vmatprep.mubr.bf16.mxu1 %v15805_v24 }
 0xffd   :  { %9567 = vmatmul.mubr.msk.bf16.vlgmr.msra.gmra.mrb[52].mxu0 %vm2231_vm11, %v8762_v13  ;;  %v8883_v25 = vpop.permute.xlu0 %8882  ;;  %v8881_v43 = vpop.permute.xlu1 %8880  ;;  %v8931_v20 = vpack.c.bf16 %v8920_v60, %v8916_v44 }
 0xffe   :  { %8939 = vmatpush1.bf16.msra.mxu0 %v16110_v10  ;;  %8970 = vmatprep.mubr.bf16.mxu0 %v15805_v24  ;;  %v8899_v9 = vsel %vm1316_vm8, %v8875_v14, %v8883_v25  ;;  %v8898_v6 = vsel %vm1316_vm8, %v8873_v21, %v8881_v43  ;;  %v9089_v21 = vld [vmem:[#allocation14 + $0x1c] sm:$0x7] }
 0xfff   :  { %v8921_v58 = vmul.f32 %v8899_v9, %v16115_v59  ;;  %v8917_v36 = vmul.f32 %v8898_v6, %v16115_v59  ;;  %v9090_v56 = vpack.c.bf16 %v9089_v21, %v9089_v21  ;;  %v16129_v6 = vld [vmem:[#allocation50_spill] sm:$0xff] }
0x1001   :  { %v8891_v33 = vpop.permute.xlu0 %8890  ;;  %v8889_v2 = vpop.permute.xlu1 %8888  ;;  %v8932_v19 = vpack.c.bf16 %v8921_v58, %v8917_v36 }
0x1002   :  { %v8895_v50 = vsel %vm1316_vm8, %v8883_v25, %v8891_v33  ;;  %v8907_v51 = vsel %vm1316_vm8, %v8891_v33, %v8867_v30  ;;  %v8894_v18 = vsel %vm1316_vm8, %v8881_v43, %v8889_v2  ;;  %v8906_v61 = vsel %vm1316_vm8, %v8889_v2, %v8865_v28  ;;  %v16123_v30 = vld [vmem:[#allocation85_spill] sm:$0xff] }
0x1003   :  { %v8922_v62 = vmul.f32 %v8895_v50, %v16116_v42  ;;  %v8923_v46 = vmul.f32 %v8907_v51, %v16117_v57  ;;  %v8918_v31 = vmul.f32 %v8894_v18, %v16116_v42  ;;  %v8919_v29 = vmul.f32 %v8906_v61, %v16117_v57  ;;  %8940 = vmatprep.subr.bf16.mxu0 %v8932_v19  ;;  %v16124_v28 = vld [vmem:[#allocation89_spill] sm:$0xff]  ;;  %v16133_v18 = vld [vmem:[#allocation90_spill] sm:$0xff]  ;;  %v16136_v57 = vld [vmem:[#allocation32_spill] sm:$0xff] }
0x1004   :  { %8941 = vmatpush1.bf16.msra.mxu0 %v8931_v20  ;;  %v16125_v63 = vpack.c.bf16 %v16123_v30, %v16124_v28  ;;  %v16128_v43 = vld [vmem:[#allocation53_spill] sm:$0xff]  ;;  %v16130_v33 = vpack.c.bf16 %v15010_v40, %v15007_v47  ;;  %v16134_v61 = vpack.c.bf16 %v15040_v34, %v16133_v18  ;;  %v16138_v34 = vld [vmem:[#allocation55_spill] sm:$0xff]  ;;  %v16141_v28 = vld [vmem:[#allocation54_spill] sm:$0xff] }
0x1005   :  { %v8933_v48 = vpack.c.bf16 %v8922_v62, %v8918_v31  ;;  %v9031_v8 = vpop.permute.xlu0 %9030  ;;  %9102 = vmatprep.subr.bf16.mxu0 %v16118_v39  ;;  %v9029_v54 = vpop.permute.xlu1 %9028  ;;  %v8934_v52 = vpack.c.bf16 %v8923_v46, %v8919_v29  ;;  %v16135_v62 = vld [vmem:[#allocation91_spill] sm:$0xff]  ;;  %v16139_v39 = vld [vmem:[#allocation52_spill] sm:$0xff] }
0x1007   :  { %9569 = vmatmul.mubr.msk.bf16.vlgmr.msra.gmra.mrb[56].mxu0 %vm2231_vm11, %v8926_v5  ;;  %8981 = vmatprep.subr.bf16.mxu1 %v8934_v52 }
0x1008   :  { %8982 = vmatpush1.bf16.msra.mxu1 %v8933_v48  ;;  %9103 = vmatpush1.bf16.msra.mxu0 %v16120_v17 }
0x1009   :  { %v9039_v22 = vpop.permute.xlu0 %9038  ;;  %9143 = vmatprep.subr.bf16.mxu1 %v16122_v49  ;;  %v9037_v23 = vpop.permute.xlu1 %9036  ;;  %9134 = vmatprep.mubr.bf16.mxu0 %v15805_v24 }
0x100a   :  { %v9067_v16 = vsel %vm1507_vm9, %v9031_v8, %v9039_v22  ;;  %v9066_v0 = vsel %vm1507_vm9, %v9029_v54, %v9037_v23 }
0x100b   :  { %9570 = vmatmul.mubr.msk.bf16.vlgmr.msra.gmra.mrb[56].mxu1 %vm2231_vm11, %v8926_v5  ;;  %v9084_v53 = vmul.f32 %v9067_v16, %v16126_v45  ;;  %v9080_v35 = vmul.f32 %v9066_v0, %v16126_v45  ;;  %v16131_v5 = vld [vmem:[#allocation88_spill] sm:$0xff] }
0x100c   :  { %9144 = vmatpush1.bf16.msra.mxu1 %v16125_v63  ;;  %9175 = vmatprep.mubr.bf16.mxu1 %v15805_v24  ;;  %v16132_v50 = vpack.c.bf16 %v14984_v1, %v16131_v5  ;;  %v16137_v1 = vpack.c.bf16 %v16135_v62, %v16136_v57  ;;  %v16140_v0 = vld [vmem:[#allocation56_spill] sm:$0xff] }
0x100d   :  { %v9047_v13 = vpop.permute.xlu0 %9046  ;;  %v9045_v41 = vpop.permute.xlu1 %9044  ;;  %v9095_v15 = vpack.c.bf16 %v9084_v53, %v9080_v35 }
0x100e   :  { %v9063_v14 = vsel %vm1507_vm9, %v9039_v22, %v9047_v13  ;;  %v9062_v4 = vsel %vm1507_vm9, %v9037_v23, %v9045_v41  ;;  %v9253_v22 = vld [vmem:[#allocation14 + $0x20] sm:$0x7] }
0x100f   :  { %v9085_v27 = vmul.f32 %v9063_v14, %v16127_v38  ;;  %v9081_v32 = vmul.f32 %v9062_v4, %v16127_v38 }
0x1011   :  { %v9055_v10 = vpop.permute.xlu0 %9054  ;;  %v9053_v55 = vpop.permute.xlu1 %9052  ;;  %v9096_v12 = vpack.c.bf16 %v9085_v27, %v9081_v32 }
0x1012   :  { %v9059_v11 = vsel %vm1507_vm9, %v9047_v13, %v9055_v10  ;;  %v9071_v60 = vsel %vm1507_vm9, %v9055_v10, %v9031_v8  ;;  %v9058_v44 = vsel %vm1507_vm9, %v9045_v41, %v9053_v55  ;;  %v9070_v25 = vsel %vm1507_vm9, %v9053_v55, %v9029_v54 }
0x1013   :  { %v9086_v9 = vmul.f32 %v9059_v11, %v16128_v43  ;;  %v9087_v37 = vmul.f32 %v9071_v60, %v16129_v6  ;;  %v9082_v59 = vmul.f32 %v9058_v44, %v16128_v43  ;;  %v9083_v58 = vmul.f32 %v9070_v25, %v16129_v6  ;;  %9104 = vmatprep.subr.bf16.mxu0 %v9096_v12 }
0x1014   :  { %9105 = vmatpush1.bf16.msra.mxu0 %v9095_v15  ;;  %v9254_v41 = vpack.c.bf16 %v9253_v22, %v9253_v22 }
0x1015   :  { %v9097_v36 = vpack.c.bf16 %v9086_v9, %v9082_v59  ;;  %v9195_v20 = vpop.permute.xlu0 %9194  ;;  %9266 = vmatprep.subr.bf16.mxu0 %v16130_v33  ;;  %v9098_v2 = vpack.c.bf16 %v9087_v37, %v9083_v58 }
0x1016   :  { %v9193_v19 = vpop.permute.xlu1 %9192 }
0x1017   :  { %9571 = vmatmul.mubr.msk.bf16.vlgmr.msra.gmra.mrb[60].mxu0 %vm2231_vm11, %v9090_v56  ;;  %9145 = vmatprep.subr.bf16.mxu1 %v9098_v2 }
0x1018   :  { %9146 = vmatpush1.bf16.msra.mxu1 %v9097_v36  ;;  %9267 = vmatpush1.bf16.msra.mxu0 %v16132_v50 }
0x1019   :  { %v9203_v51 = vpop.permute.xlu0 %9202  ;;  %9307 = vmatprep.subr.bf16.mxu1 %v16134_v61  ;;  %9298 = vmatprep.mubr.bf16.mxu0 %v15805_v24 }
0x101a   :  { %v9201_v42 = vpop.permute.xlu1 %9200  ;;  %v9231_v40 = vsel %vm1698_vm10, %v9195_v20, %v9203_v51 }
0x101b   :  { %v9230_v47 = vsel %vm1698_vm10, %v9193_v19, %v9201_v42  ;;  %9572 = vmatmul.mubr.msk.bf16.vlgmr.msra.gmra.mrb[60].mxu1 %vm2231_vm11, %v9090_v56  ;;  %v9248_v31 = vmul.f32 %v9231_v40, %v16138_v34 }
0x101c   :  { %9308 = vmatpush1.bf16.msra.mxu1 %v16137_v1  ;;  %9339 = vmatprep.mubr.bf16.mxu1 %v15805_v24  ;;  %v9244_v29 = vmul.f32 %v9230_v47, %v16138_v34 }
0x101d   :  { %v9211_v46 = vpop.permute.xlu0 %9210 }
0x101e   :  { %v9227_v48 = vsel %vm1698_vm10, %v9203_v51, %v9211_v46  ;;  %v9209_v8 = vpop.permute.xlu1 %9208  ;;  %v9259_v26 = vpack.c.bf16 %v9248_v31, %v9244_v29 }
0x101f   :  { %v9249_v54 = vmul.f32 %v9227_v48, %v16139_v39  ;;  %v9226_v52 = vsel %vm1698_vm10, %v9201_v42, %v9209_v8 }
0x1020   :  { %v9245_v3 = vmul.f32 %v9226_v52, %v16139_v39 }
0x1021   :  { %v9219_v17 = vpop.permute.xlu0 %9218 }
0x1022   :  { %v9223_v24 = vsel %vm1698_vm10, %v9211_v46, %v9219_v17  ;;  %v9235_v49 = vsel %vm1698_vm10, %v9219_v17, %v9195_v20  ;;  %v9217_v23 = vpop.permute.xlu1 %9216  ;;  %v9260_v16 = vpack.c.bf16 %v9249_v54, %v9245_v3 }
0x1023   :  { %v9250_v30 = vmul.f32 %v9223_v24, %v16140_v0  ;;  %v9251_v63 = vmul.f32 %v9235_v49, %v16141_v28  ;;  %v9222_v45 = vsel %vm1698_vm10, %v9209_v8, %v9217_v23  ;;  %v9234_v53 = vsel %vm1698_vm10, %v9217_v23, %v9193_v19 }
0x1024   :  { %v9246_v35 = vmul.f32 %v9222_v45, %v16140_v0  ;;  %v9247_v13 = vmul.f32 %v9234_v53, %v16141_v28  ;;  %9268 = vmatprep.subr.bf16.mxu0 %v9260_v16 }
0x1025   :  { %9269 = vmatpush1.bf16.msra.mxu0 %v9259_v26 }
0x1026   :  { %v9261_v14 = vpack.c.bf16 %v9250_v30, %v9246_v35  ;;  %v9262_v4 = vpack.c.bf16 %v9251_v63, %v9247_v13 }
0x1028   :  { %9573 = vmatmul.mubr.msk.bf16.vlgmr.msra.gmra.mrb[64].mxu0 %vm2231_vm11, %v9254_v41  ;;  %9309 = vmatprep.subr.bf16.mxu1 %v9262_v4 }
0x1029   :  { %9310 = vmatpush1.bf16.msra.mxu1 %v9261_v14 }
0x102c   :  { %9574 = vmatmul.mubr.msk.bf16.vlgmr.msra.gmra.mrb[64].mxu1 %vm2231_vm11, %v9254_v41 }
0x108d   :  { %v8135_v21 = vpop.f32.mrb[32].mxu0 }
0x108e   :  { %v8176_v38 = vpop.f32.mrb[32].mxu1  ;;  %v8137_v27 = vpop.f32.mrb[33].mxu0 }
0x108f   :  { %v8178_v7 = vpop.f32.mrb[33].mxu1  ;;  %v8139_v32 = vpop.f32.mrb[34].mxu0 }
0x1090   :  { %v8180_v15 = vpop.f32.mrb[34].mxu1  ;;  %v8140_v10 = vpop.f32.mrb[35].mxu0 }
0x1091   :  { %v8181_v55 = vpop.f32.mrb[35].mxu1 }
0x109d   :  { %v8220_v12 = vpop.f32.mrb[36].mxu0 }
0x109e   :  { %v8221_v56 = vadd.f32 %v8220_v12, %v8135_v21  ;;  %v8261_v11 = vpop.f32.mrb[36].mxu1  ;;  %v8222_v60 = vpop.f32.mrb[37].mxu0 }
0x109f   :  { %v8262_v44 = vadd.f32 %v8261_v11, %v8176_v38  ;;  %v8223_v25 = vadd.f32 %v8222_v60, %v8137_v27  ;;  %v8263_v43 = vpop.f32.mrb[37].mxu1  ;;  %v8224_v9 = vpop.f32.mrb[38].mxu0 }
0x10a0   :  { %v8264_v6 = vadd.f32 %v8263_v43, %v8178_v7  ;;  %v8265_v37 = vpop.f32.mrb[38].mxu1  ;;  %v8225_v59 = vpop.f32.mrb[39].mxu0 }
0x10a1   :  { %v8266_v58 = vpop.f32.mrb[39].mxu1 }
0x10ad   :  { %v8380_v36 = vpop.f32.mrb[40].mxu0 }
0x10ae   :  { %v8428_v20 = vadd.f32 %v8380_v36, %v8221_v56  ;;  %v8421_v33 = vpop.f32.mrb[40].mxu1  ;;  %v8382_v2 = vpop.f32.mrb[41].mxu0 }
0x10af   :  { %v8430_v19 = vadd.f32 %v8421_v33, %v8262_v44  ;;  %v8429_v5 = vadd.f32 %v8382_v2, %v8223_v25  ;;  %v8423_v50 = vpop.f32.mrb[41].mxu1  ;;  %v8384_v51 = vpop.f32.mrb[42].mxu0 }
0x10b0   :  { %v8431_v18 = vadd.f32 %v8423_v50, %v8264_v6  ;;  %v8425_v61 = vpop.f32.mrb[42].mxu1  ;;  %v8385_v42 = vpop.f32.mrb[43].mxu0 }
0x10b1   :  { %v8426_v40 = vpop.f32.mrb[43].mxu1 }
0x10b2   :  { %v9356_v40 = vpop.permute.xlu1 %9355 }
0x10bd   :  { %v8544_v47 = vpop.f32.mrb[44].mxu0 }
0x10be   :  { %v8592_v62 = vadd.f32 %v8544_v47, %v8428_v20  ;;  %v8585_v57 = vpop.f32.mrb[44].mxu1  ;;  %v8546_v1 = vpop.f32.mrb[45].mxu0 }
0x10bf   :  { %v8594_v46 = vadd.f32 %v8585_v57, %v8430_v19  ;;  %v8593_v34 = vadd.f32 %v8546_v1, %v8429_v5  ;;  %v8587_v31 = vpop.f32.mrb[45].mxu1  ;;  %v8548_v29 = vpop.f32.mrb[46].mxu0 }
0x10c0   :  { %v8595_v48 = vadd.f32 %v8587_v31, %v8431_v18  ;;  %v8589_v8 = vpop.f32.mrb[46].mxu1  ;;  %v8549_v39 = vpop.f32.mrb[47].mxu0 }
0x10c1   :  { %v8590_v54 = vpop.f32.mrb[47].mxu1 }
0x10c5   :  { %v8644_v52 = vpop.f32.mrb[48].mxu0 }
0x10c6   :  { %v8692_v3 = vadd.f32 %v8644_v52, %v8592_v62  ;;  %v8685_v17 = vpop.f32.mrb[48].mxu1  ;;  %v8646_v22 = vpop.f32.mrb[49].mxu0 }
0x10c7   :  { %v8694_v26 = vadd.f32 %v8685_v17, %v8594_v46  ;;  %v8693_v24 = vadd.f32 %v8646_v22, %v8593_v34  ;;  %v8687_v49 = vpop.f32.mrb[49].mxu1  ;;  %v8648_v23 = vpop.f32.mrb[50].mxu0  ;;  %v9378_v22 = vld [vmem:[#allocation5 + $0x8] sm:$0x77] }
0x10c8   :  { %v8695_v16 = vadd.f32 %v8687_v49, %v8595_v48  ;;  %v8649_v0 = vpop.f32.mrb[51].mxu0  ;;  %v8689_v30 = vpop.f32.mrb[50].mxu1 }
0x10c9   :  { %v8690_v28 = vpop.f32.mrb[51].mxu1 }
0x10ce   :  { %v8849_v45 = vpop.f32.mrb[52].mxu1 }
0x10cf   :  { %v8858_v13 = vadd.f32 %v8849_v45, %v8694_v26  ;;  %v8851_v41 = vpop.f32.mrb[53].mxu1 }
0x10d0   :  { %v8808_v63 = vpop.f32.mrb[52].mxu0  ;;  %v8859_v4 = vadd.f32 %v8851_v41, %v8695_v16  ;;  %v8853_v38 = vpop.f32.mrb[54].mxu1  ;;  %v9380_v16 = vcombine.high %v9378_v22, %v9378_v22 }
0x10d1   :  { %v8856_v53 = vadd.f32 %v8808_v63, %v8692_v3  ;;  %v8810_v35 = vpop.f32.mrb[53].mxu0  ;;  %v8854_v7 = vpop.f32.mrb[55].mxu1  ;;  %v9366_v3 = vld [vmem:[#allocation5] sm:$0x77] }
0x10d2   :  { %v8857_v14 = vadd.f32 %v8810_v35, %v8693_v24  ;;  %v8812_v21 = vpop.f32.mrb[54].mxu0  ;;  %v9368_v17 = vcombine.high %v9366_v3, %v9366_v3 }
0x10d3   :  { %v8813_v27 = vpop.f32.mrb[55].mxu0 }
0x10da   :  { %v8972_v32 = vpop.f32.mrb[56].mxu0 }
0x10db   :  { %v9020_v15 = vadd.f32 %v8972_v32, %v8856_v53  ;;  %v8974_v10 = vpop.f32.mrb[57].mxu0 }
0x10dc   :  { %v9021_v55 = vadd.f32 %v8974_v10, %v8857_v14  ;;  %v8976_v12 = vpop.f32.mrb[58].mxu0 }
0x10dd   :  { %v8977_v56 = vpop.f32.mrb[59].mxu0 }
0x10de   :  { %v9013_v11 = vpop.f32.mrb[56].mxu1 }
0x10df   :  { %v9022_v60 = vadd.f32 %v9013_v11, %v8858_v13  ;;  %v9015_v44 = vpop.f32.mrb[57].mxu1 }
0x10e0   :  { %v9023_v25 = vadd.f32 %v9015_v44, %v8859_v4  ;;  %v9017_v43 = vpop.f32.mrb[58].mxu1 }
0x10e1   :  { %v9018_v9 = vpop.f32.mrb[59].mxu1 }
0x10ea   :  { %v9136_v6 = vpop.f32.mrb[60].mxu0 }
0x10eb   :  { %v9184_v37 = vadd.f32 %v9136_v6, %v9020_v15  ;;  %v9138_v59 = vpop.f32.mrb[61].mxu0 }
0x10ec   :  { %v9185_v58 = vadd.f32 %v9138_v59, %v9021_v55  ;;  %v9140_v36 = vpop.f32.mrb[62].mxu0 }
0x10ed   :  { %v9141_v20 = vpop.f32.mrb[63].mxu0 }
0x10ee   :  { %v9177_v33 = vpop.f32.mrb[60].mxu1 }
0x10ef   :  { %v9186_v2 = vadd.f32 %v9177_v33, %v9022_v60  ;;  %v9179_v19 = vpop.f32.mrb[61].mxu1 }
0x10f0   :  { %v9187_v5 = vadd.f32 %v9179_v19, %v9023_v25  ;;  %v9181_v50 = vpop.f32.mrb[62].mxu1 }
0x10f1   :  { %v9182_v51 = vpop.f32.mrb[63].mxu1 }
0x10fb   :  { %v9300_v18 = vpop.f32.mrb[64].mxu0 }
0x10fc   :  { %v9348_v61 = vadd.f32 %v9300_v18, %v9184_v37  ;;  %v9302_v42 = vpop.f32.mrb[65].mxu0 }
0x10fd   :  { %v9349_v47 = vadd.f32 %v9302_v42, %v9185_v58  ;;  %v9304_v62 = vpop.f32.mrb[66].mxu0 }
0x10fe   :  { %v9358_v57 = vadd.f32 %v9356_v40, %v9348_v61  ;;  %v9305_v1 = vpop.f32.mrb[67].mxu0 }
0x10ff   :  { %v9359_v46 = vadd.f32 %v9356_v40, %v9349_v47  ;;  %v9341_v34 = vpop.f32.mrb[64].mxu1 }
0x1100   :  { %10153 = vtanh.f32 %v9358_v57  ;;  %v9350_v31 = vadd.f32 %v9341_v34, %v9186_v2  ;;  %v9343_v29 = vpop.f32.mrb[65].mxu1 }
0x1101   :  { %10155 = vtanh.f32 %v9359_v46  ;;  %v9351_v48 = vadd.f32 %v9343_v29, %v9187_v5  ;;  %v9345_v8 = vpop.f32.mrb[66].mxu1 }
0x1102   :  { %v9360_v39 = vadd.f32 %v9356_v40, %v9350_v31  ;;  %v9346_v54 = vpop.f32.mrb[67].mxu1 }
0x1103   :  { %v9361_v52 = vadd.f32 %v9356_v40, %v9351_v48 }
0x1104   :  { %10157 = vtanh.f32 %v9360_v39 }
0x1105   :  { %10159 = vtanh.f32 %v9361_v52 }
0x110a   :  { %v10154_v26 = vpop.eup %10153 }
0x110b   :  { %v10156_v24 = vpop.eup %10155  ;;  %v9370_v49 = vadd.f32 %v10154_v26, %v9366_v3 }
0x110c   :  { %v9371_v23 = vadd.f32 %v10156_v24, %v9368_v17 }
0x110e   :  { %v10158_v0 = vpop.eup %10157  ;;  %v9374_v30 = vcombine.low %v9370_v49, %v9371_v23 }
0x110f   :  { %v10160_v28 = vpop.eup %10159  ;;  %v9382_v63 = vadd.f32 %v10158_v0, %v9378_v22 }
0x1110   :  { %9376 = vst [vmem:[#allocation23] sm:$0x77] %v9374_v30  ;;  %v9383_v45 = vadd.f32 %v10160_v28, %v9380_v16 }
0x1112   :  { %v9386_v53 = vcombine.low %v9382_v63, %v9383_v45 }
0x1114   :  { %9389 = vst [vmem:[#allocation23 + $0x8] sm:$0x77] %v9386_v53 }
0x1115   :  { %10458 = shalt.err (!%p10455_p10)
}
0x1116   :  { %s10459_s0 = scalar_lea.hbm %s15502_s13, 256 }
0x1117   :  { %p10460_p11 = scmp.ne.s32.totalorder %s15502_s13, %s10459_s0  ;;  %p10463_p12 = scmp.lt.u32.totalorder %s10459_s0, %s15502_s13 }
0x1119   :  { %p10465_p13 = pnand %p10463_p12, %p10460_p11 }
0x111b   :  { %10468 = shalt.err (!%p10465_p13)
}
0x111c   :  { %9401 = dma.vmem_to_hbm [thread:$0]  %s9396_s17, 256, %s15502_s13, [#allocation4], %s10487_s20, %s10487_s20, %s10488_s21  }
0x111d   :  { %10483 = dma.done.wait [#allocation4], 256  }
0x111e   :  { %10484 = vsyncadd [#allocation4], 4294967040 }
0x111f   :  { %9405 = vsyncpa [#allocation3], 1 }
0x1120   :  { %9406 = vsyncpa [#allocation6], 1 }
0x1121   :  { %9407 = vsyncpa [#allocation9], 1 }
0x1122   :  { %9408 = vsyncpa [#allocation12], 1 }
0x1123   :  { %9409 = vsyncpa [#allocation15], 1 }
0x1124   :  { %9410 = vsyncpa [#allocation18], 1 }
0x1125   :  { %9411 = vsyncpa [#allocation21], 1 }
0x1126   :  { %9412 = vsyncpa [#allocation4], 1 }

</bundles_post_ra>
